<compile_context>
chip_gen: v7x
topology: tpu7x:2x2x1
jax: 0.10.0
libtpu: 0.0.40
codegen_flags: <defaults>
</compile_context>

<pallas_src>
import functools

import numpy as np
import jax
import jax.numpy as jnp
from jax.experimental import pallas as pl
from jax.experimental.pallas import tpu as pltpu


def _banded_weights(w, W):
    """Turn HWIO conv weights (3, 3, Cin, Cout) into 3 banded matrices.

    Returns A of shape (3, (W+2)*Cin, W*Cout) with
      A[kh, j*Cin + ci, w*Cout + co] = w[kh, j - w, ci, co]  if 0 <= j - w <= 2
                                       else 0,
    so that for the zero-padded row-slab
      S_kh[b*H + h, j*Cin + ci] = x_pad[b, h + kh, j, ci]
    we get  sum_kh (S_kh @ A[kh]) == conv3x3(x, w)  directly in the
    (B*H, W*Cout) channel-minor layout.
    """
    _, _, cin, cout = w.shape
    wp = W + 2
    j = np.arange(wp)[:, None]
    wc = np.arange(W)[None, :]
    onehot = np.stack([(j == wc + kw) for kw in range(3)], axis=0)  # (3, Wp, W)
    onehot = jnp.asarray(onehot.astype(np.float32), dtype=w.dtype)
    a = jnp.einsum("kjw,hkio->hjiwo", onehot, w)          # (3, Wp, Cin, W, Cout)
    return a.reshape(3, wp * cin, W * cout)


def _conv_relu_pool(pad_ref, act, a_ref, b_ref, *, B, H, W, Cin, Cout, mxu_dtype):
    """conv3x3(+bias) + ReLU + maxpool2x2 for B images, fully in VMEM/vregs.

    pad_ref: (B, H+2, (W+2)*Cin) VMEM scratch (zero-padded activation).
    act:     (B, H, W*Cin) activation value (channel-minor lanes).
    a_ref:   (3, (W+2)*Cin, W*Cout) banded weights (one matrix per kernel row).
    b_ref:   (1, W*Cout) bias, pre-tiled across W.
    Returns pooled activation (B, H//2, (W//2)*Cout), channel-minor lanes.
    """
    Hp, Wp = H + 2, W + 2
    Ho, Wo = H // 2, W // 2
    f32 = jnp.float32

    # Zero only the one-pixel border; the interior is fully overwritten below.
    zrow = jnp.zeros((B, 1, Wp * Cin), f32)
    pad_ref[:, 0:1, :] = zrow
    pad_ref[:, Hp - 1:Hp, :] = zrow
    zcol = jnp.zeros((B, Hp, Cin), f32)
    pad_ref[:, :, 0:Cin] = zcol
    pad_ref[:, :, (W + 1) * Cin:(W + 2) * Cin] = zcol
    pad_ref[:, 1:H + 1, Cin:(W + 1) * Cin] = act

    # Conv: one matmul per kernel row kh.  The (B*H, Wp*Cin) row-slab times the
    # banded (Wp*Cin, W*Cout) weights lands directly in (B*H, W*Cout) layout.
    acc = None
    for kh in range(3):
        slab = pad_ref[:, kh:kh + H, :].reshape(B * H, Wp * Cin)
        part = jnp.dot(slab.astype(mxu_dtype), a_ref[kh].astype(mxu_dtype),
                       preferred_element_type=f32)
        acc = part if acc is None else acc + part
    z = jnp.maximum(acc + b_ref[...], 0.0)                  # bias + ReLU, once

    # 2x2 max-pool.  Lanes are (w, c): pool W pairs on the lane axis, then pool
    # H pairs on the (b, h) row axis.
    zw = z.reshape(B * H, Wo, 2 * Cout)
    zw = jnp.maximum(zw[:, :, :Cout], zw[:, :, Cout:])      # pool along W
    zh = zw.reshape(B * Ho, 2, Wo * Cout)
    zh = jnp.maximum(zh[:, 0, :], zh[:, 1, :])              # pool along H
    return zh.reshape(B, Ho, Wo * Cout)


def cnn_encoder(x_nchw, params, *, batch_block=8, mxu_dtype=jnp.float32):
    """Pallas implementation of CNN_Encoder.forward.  x_nchw: (N, 1, H, W)."""
    (w1, b1), (w2, b2), (w3, b3) = params
    N, cin0, H, W = x_nchw.shape
    assert cin0 == 1, "CNN_Encoder expects a single input channel"
    assert H % 8 == 0 and W % 8 == 0, "H, W must be divisible by 8 (3x 2x2 pools)"
    B = min(batch_block, N)
    assert N % B == 0, "batch must be divisible by the batch block"
    c1, c2, c3 = w1.shape[-1], w2.shape[-1], w3.shape[-1]
    H1, W1 = H, W
    H2, W2 = H1 // 2, W1 // 2
    H3, W3 = H2 // 2, W2 // 2
    Ho, Wo = H3 // 2, W3 // 2

    x = x_nchw.reshape(N, H, W)                        # drop the size-1 channel dim
    a1 = _banded_weights(w1, W1)                       # (3, (W1+2)*1,  W1*c1)
    a2 = _banded_weights(w2, W2)                       # (3, (W2+2)*c1, W2*c2)
    a3 = _banded_weights(w3, W3)                       # (3, (W3+2)*c2, W3*c3)
    b1t = jnp.tile(b1.reshape(1, c1), (1, W1))         # (1, W1*c1)
    b2t = jnp.tile(b2.reshape(1, c2), (1, W2))
    b3t = jnp.tile(b3.reshape(1, c3), (1, W3))

    def kernel(x_ref, a1_ref, a2_ref, a3_ref, b1_ref, b2_ref, b3_ref,
               o_ref, pad1, pad2, pad3):
        stage = functools.partial(_conv_relu_pool, B=B, mxu_dtype=mxu_dtype)
        h1 = stage(pad1, x_ref[...], a1_ref, b1_ref, H=H1, W=W1, Cin=1, Cout=c1)
        h2 = stage(pad2, h1, a2_ref, b2_ref, H=H2, W=W2, Cin=c1, Cout=c2)
        h3 = stage(pad3, h2, a3_ref, b3_ref, H=H3, W=W3, Cin=c2, Cout=c3)
        o_ref[...] = h3.astype(o_ref.dtype)             # lane-dense store

    out_flat = pl.pallas_call(
        kernel,
        out_shape=jax.ShapeDtypeStruct((N, Ho, Wo * c3), x.dtype),
        grid_spec=pltpu.PrefetchScalarGridSpec(
            num_scalar_prefetch=0,
            grid=(N // B,),
            in_specs=[
                pl.BlockSpec((B, H1, W1), lambda n: (n, 0, 0)),
                pl.BlockSpec(a1.shape, lambda n: (0, 0, 0)),
                pl.BlockSpec(a2.shape, lambda n: (0, 0, 0)),
                pl.BlockSpec(a3.shape, lambda n: (0, 0, 0)),
                pl.BlockSpec((1, W1 * c1), lambda n: (0, 0)),
                pl.BlockSpec((1, W2 * c2), lambda n: (0, 0)),
                pl.BlockSpec((1, W3 * c3), lambda n: (0, 0)),
            ],
            out_specs=pl.BlockSpec((B, Ho, Wo * c3), lambda n: (n, 0, 0)),
            scratch_shapes=[
                pltpu.VMEM((B, H1 + 2, (W1 + 2) * 1), jnp.float32),   # padded stage-1 act
                pltpu.VMEM((B, H2 + 2, (W2 + 2) * c1), jnp.float32),  # padded stage-2 act
                pltpu.VMEM((B, H3 + 2, (W3 + 2) * c2), jnp.float32),  # padded stage-3 act
            ],
        ),
        compiler_params=pltpu.CompilerParams(
            dimension_semantics=("parallel",)),
    )(x, a1, a2, a3, b1t, b2t, b3t)

    out = out_flat.reshape(N, Ho, Wo, c3)               # (N, Ho, Wo, 64)
    return jnp.transpose(out, (0, 3, 1, 2))             # back to NCHW


def cnn_encoder_reference(x_nchw, params):
    """Plain-JAX reference (lax conv + reduce_window) for correctness check."""
    x = jnp.transpose(x_nchw, (0, 2, 3, 1))
    for w, b in params:
        y = jax.lax.conv_general_dilated(
            x, w, window_strides=(1, 1), padding=((1, 1), (1, 1)),
            dimension_numbers=("NHWC", "HWIO", "NHWC"))
        y = jnp.maximum(y + b, 0.0)
        y = jax.lax.reduce_window(y, -jnp.inf, jax.lax.max,
                                  (1, 2, 2, 1), (1, 2, 2, 1), "VALID")
        x = y
    return jnp.transpose(x, (0, 3, 1, 2))


def init_params(key):
    """Deterministic init matching nn.Conv2d shapes: (1->16), (16->32), (32->64)."""
    dims = [(1, 16), (16, 32), (32, 64)]
    params = []
    for cin, cout in dims:
        key, kw, kb = jax.random.split(key, 3)
        bound = 1.0 / np.sqrt(cin * 3 * 3)
        w = jax.random.uniform(kw, (3, 3, cin, cout), jnp.float32, -bound, bound)
        b = jax.random.uniform(kb, (cout,), jnp.float32, -bound, bound)
        params.append((w, b))
    return params


if __name__ == "__main__":
    key = jax.random.PRNGKey(0)
    key, kx = jax.random.split(key)
    # batch=8, 1 input channel, 16x16 spatial; batch_block=4 -> grid=(2,) so
    # batching and multi-step (dual-TensorCore on v7x) paths are exercised.
    N, H, W = 8, 16, 16
    x = jax.random.normal(kx, (N, 1, H, W), dtype=jnp.float32)
    params = init_params(key)

    fwd = jax.jit(functools.partial(cnn_encoder, batch_block=4))
    out = jax.block_until_ready(fwd(x, params))
    assert out.shape == (N, 64, H // 8, W // 8), out.shape

    ref = jax.block_until_ready(cnn_encoder_reference(x, params))
    if not np.allclose(np.asarray(out), np.asarray(ref), rtol=1e-4, atol=1e-4):
        err = float(np.max(np.abs(np.asarray(out) - np.asarray(ref))))
        raise AssertionError(f"Pallas output does not match reference (max abs err {err})")

    print("KERNEL_OK")
</pallas_src>

<mosaic_0001>
module attributes {stable_mosaic.version = 11 : i64} {
  func.func @kernel(%arg0: i32, %arg1: memref<4x16x16xf32, #tpu.memory_space<vmem>>, %arg2: memref<3x18x256xf32, #tpu.memory_space<vmem>>, %arg3: memref<3x160x256xf32, #tpu.memory_space<vmem>>, %arg4: memref<3x192x256xf32, #tpu.memory_space<vmem>>, %arg5: memref<1x256xf32, #tpu.memory_space<vmem>>, %arg6: memref<1x256xf32, #tpu.memory_space<vmem>>, %arg7: memref<1x256xf32, #tpu.memory_space<vmem>>, %arg8: memref<4x2x128xf32, #tpu.memory_space<vmem>>, %arg9: memref<4x18x18xf32, #tpu.memory_space<vmem>>, %arg10: memref<4x10x160xf32, #tpu.memory_space<vmem>>, %arg11: memref<4x6x192xf32, #tpu.memory_space<vmem>>) attributes {dimension_semantics = [#tpu.dimension_semantics<parallel>], iteration_bounds = array<i64: 2>, scalar_prefetch = 0 : i64, scratch_operands = 3 : i64, tpu.core_type = #tpu.core_type<tc>, window_params = [{transform_indices = @transform_0, window_bounds = array<i64: 4, 16, 16>}, {pipeline_mode = #tpu.pipeline_mode<synchronous>, transform_indices = @transform_1, window_bounds = array<i64: 3, 18, 256>}, {pipeline_mode = #tpu.pipeline_mode<synchronous>, transform_indices = @transform_2, window_bounds = array<i64: 3, 160, 256>}, {pipeline_mode = #tpu.pipeline_mode<synchronous>, transform_indices = @transform_3, window_bounds = array<i64: 3, 192, 256>}, {pipeline_mode = #tpu.pipeline_mode<synchronous>, transform_indices = @transform_4, window_bounds = array<i64: 1, 256>}, {pipeline_mode = #tpu.pipeline_mode<synchronous>, transform_indices = @transform_5, window_bounds = array<i64: 1, 256>}, {pipeline_mode = #tpu.pipeline_mode<synchronous>, transform_indices = @transform_6, window_bounds = array<i64: 1, 256>}, {transform_indices = @transform_7, window_bounds = array<i64: 4, 2, 128>}]} {
    %c0 = arith.constant 0 : index
    %c0_0 = arith.constant 0 : index
    %c0_1 = arith.constant 0 : index
    %0 = vector.load %arg1[%c0, %c0_0, %c0_1] : memref<4x16x16xf32, #tpu.memory_space<vmem>>, vector<4x16x16xf32>
    %cst = arith.constant 0.000000e+00 : f32
    %1 = vector.broadcast %cst : f32 to vector<4x1x18xf32>
    %c0_2 = arith.constant 0 : index
    %c0_3 = arith.constant 0 : index
    %c0_4 = arith.constant 0 : index
    %2 = vector.load %arg9[%c0_2, %c0_3, %c0_4] : memref<4x18x18xf32, #tpu.memory_space<vmem>>, vector<4x1x18xf32>
    tpu.vector_store %arg9[%c0_2, %c0_3, %c0_4], %1 {strides = array<i32>} : memref<4x18x18xf32, #tpu.memory_space<vmem>>, vector<4x1x18xf32>,
    %c0_5 = arith.constant 0 : index
    %c17 = arith.constant 17 : index
    %c0_6 = arith.constant 0 : index
    %3 = vector.load %arg9[%c0_5, %c17, %c0_6] : memref<4x18x18xf32, #tpu.memory_space<vmem>>, vector<4x1x18xf32>
    tpu.vector_store %arg9[%c0_5, %c17, %c0_6], %1 {strides = array<i32>} : memref<4x18x18xf32, #tpu.memory_space<vmem>>, vector<4x1x18xf32>,
    %cst_7 = arith.constant 0.000000e+00 : f32
    %4 = vector.broadcast %cst_7 : f32 to vector<4x18x1xf32>
    %c0_8 = arith.constant 0 : index
    %c0_9 = arith.constant 0 : index
    %c0_10 = arith.constant 0 : index
    %5 = vector.load %arg9[%c0_8, %c0_9, %c0_10] : memref<4x18x18xf32, #tpu.memory_space<vmem>>, vector<4x18x1xf32>
    tpu.vector_store %arg9[%c0_8, %c0_9, %c0_10], %4 {strides = array<i32>} : memref<4x18x18xf32, #tpu.memory_space<vmem>>, vector<4x18x1xf32>,
    %c0_11 = arith.constant 0 : index
    %c0_12 = arith.constant 0 : index
    %c17_13 = arith.constant 17 : index
    %6 = vector.load %arg9[%c0_11, %c0_12, %c17_13] : memref<4x18x18xf32, #tpu.memory_space<vmem>>, vector<4x18x1xf32>
    tpu.vector_store %arg9[%c0_11, %c0_12, %c17_13], %4 {strides = array<i32>} : memref<4x18x18xf32, #tpu.memory_space<vmem>>, vector<4x18x1xf32>,
    %c0_14 = arith.constant 0 : index
    %c1 = arith.constant 1 : index
    %c1_15 = arith.constant 1 : index
    %7 = vector.load %arg9[%c0_14, %c1, %c1_15] : memref<4x18x18xf32, #tpu.memory_space<vmem>>, vector<4x16x16xf32>
    tpu.vector_store %arg9[%c0_14, %c1, %c1_15], %0 {strides = array<i32>} : memref<4x18x18xf32, #tpu.memory_space<vmem>>, vector<4x16x16xf32>,
    %c0_16 = arith.constant 0 : index
    %c0_17 = arith.constant 0 : index
    %c0_18 = arith.constant 0 : index
    %8 = vector.load %arg9[%c0_16, %c0_17, %c0_18] : memref<4x18x18xf32, #tpu.memory_space<vmem>>, vector<4x16x18xf32>
    %9 = vector.shape_cast %8 : vector<4x16x18xf32> to vector<64x18xf32>
    %c0_19 = arith.constant 0 : index
    %c0_20 = arith.constant 0 : index
    %c0_21 = arith.constant 0 : index
    %10 = vector.load %arg2[%c0_19, %c0_20, %c0_21] : memref<3x18x256xf32, #tpu.memory_space<vmem>>, vector<1x18x256xf32>
    %11 = vector.shape_cast %10 : vector<1x18x256xf32> to vector<18x256xf32>
    %cst_22 = arith.constant dense<0.000000e+00> : vector<64x256xf32>
    %12 = tpu.matmul %9, %11, %cst_22 {dimension_numbers = #tpu.dot_dimension_numbers<[1], [0], [0], [1], [0, 0, 1, 1], [], []>} : vector<64x18xf32>, vector<18x256xf32>, vector<64x256xf32> -> vector<64x256xf32>
    %c0_23 = arith.constant 0 : index
    %c1_24 = arith.constant 1 : index
    %c0_25 = arith.constant 0 : index
    %13 = vector.load %arg9[%c0_23, %c1_24, %c0_25] : memref<4x18x18xf32, #tpu.memory_space<vmem>>, vector<4x16x18xf32>
    %14 = vector.shape_cast %13 : vector<4x16x18xf32> to vector<64x18xf32>
    %c1_26 = arith.constant 1 : index
    %c0_27 = arith.constant 0 : index
    %c0_28 = arith.constant 0 : index
    %15 = vector.load %arg2[%c1_26, %c0_27, %c0_28] : memref<3x18x256xf32, #tpu.memory_space<vmem>>, vector<1x18x256xf32>
    %16 = vector.shape_cast %15 : vector<1x18x256xf32> to vector<18x256xf32>
    %cst_29 = arith.constant dense<0.000000e+00> : vector<64x256xf32>
    %17 = tpu.matmul %14, %16, %cst_29 {dimension_numbers = #tpu.dot_dimension_numbers<[1], [0], [0], [1], [0, 0, 1, 1], [], []>} : vector<64x18xf32>, vector<18x256xf32>, vector<64x256xf32> -> vector<64x256xf32>
    %18 = arith.addf %12, %17 : vector<64x256xf32>
    %c0_30 = arith.constant 0 : index
    %c2 = arith.constant 2 : index
    %c0_31 = arith.constant 0 : index
    %19 = vector.load %arg9[%c0_30, %c2, %c0_31] : memref<4x18x18xf32, #tpu.memory_space<vmem>>, vector<4x16x18xf32>
    %20 = vector.shape_cast %19 : vector<4x16x18xf32> to vector<64x18xf32>
    %c2_32 = arith.constant 2 : index
    %c0_33 = arith.constant 0 : index
    %c0_34 = arith.constant 0 : index
    %21 = vector.load %arg2[%c2_32, %c0_33, %c0_34] : memref<3x18x256xf32, #tpu.memory_space<vmem>>, vector<1x18x256xf32>
    %22 = vector.shape_cast %21 : vector<1x18x256xf32> to vector<18x256xf32>
    %cst_35 = arith.constant dense<0.000000e+00> : vector<64x256xf32>
    %23 = tpu.matmul %20, %22, %cst_35 {dimension_numbers = #tpu.dot_dimension_numbers<[1], [0], [0], [1], [0, 0, 1, 1], [], []>} : vector<64x18xf32>, vector<18x256xf32>, vector<64x256xf32> -> vector<64x256xf32>
    %24 = arith.addf %18, %23 : vector<64x256xf32>
    %c0_36 = arith.constant 0 : index
    %c0_37 = arith.constant 0 : index
    %25 = vector.load %arg5[%c0_36, %c0_37] : memref<1x256xf32, #tpu.memory_space<vmem>>, vector<1x256xf32>
    %26 = vector.broadcast %25 : vector<1x256xf32> to vector<64x256xf32>
    %27 = arith.addf %24, %26 : vector<64x256xf32>
    %cst_38 = arith.constant 0.000000e+00 : f32
    %28 = vector.broadcast %cst_38 : f32 to vector<64x256xf32>
    %29 = arith.maximumf %27, %28 : vector<64x256xf32>
    %30 = vector.shape_cast %29 : vector<64x256xf32> to vector<64x8x32xf32>
    %31 = vector.extract_strided_slice %30 {offsets = [0, 0, 0], sizes = [64, 8, 16], strides = [1, 1, 1]} : vector<64x8x32xf32> to vector<64x8x16xf32>
    %32 = vector.extract_strided_slice %30 {offsets = [0, 0, 16], sizes = [64, 8, 16], strides = [1, 1, 1]} : vector<64x8x32xf32> to vector<64x8x16xf32>
    %33 = arith.maximumf %31, %32 : vector<64x8x16xf32>
    %34 = vector.shape_cast %33 : vector<64x8x16xf32> to vector<32x2x128xf32>
    %35 = vector.extract_strided_slice %34 {offsets = [0, 0, 0], sizes = [32, 1, 128], strides = [1, 1, 1]} : vector<32x2x128xf32> to vector<32x1x128xf32>
    %36 = vector.shape_cast %35 : vector<32x1x128xf32> to vector<32x128xf32>
    %37 = vector.extract_strided_slice %34 {offsets = [0, 1, 0], sizes = [32, 1, 128], strides = [1, 1, 1]} : vector<32x2x128xf32> to vector<32x1x128xf32>
    %38 = vector.shape_cast %37 : vector<32x1x128xf32> to vector<32x128xf32>
    %39 = arith.maximumf %36, %38 : vector<32x128xf32>
    %40 = vector.shape_cast %39 : vector<32x128xf32> to vector<4x8x128xf32>
    %cst_39 = arith.constant 0.000000e+00 : f32
    %41 = vector.broadcast %cst_39 : f32 to vector<4x1x160xf32>
    %c0_40 = arith.constant 0 : index
    %c0_41 = arith.constant 0 : index
    %c0_42 = arith.constant 0 : index
    %42 = vector.load %arg10[%c0_40, %c0_41, %c0_42] : memref<4x10x160xf32, #tpu.memory_space<vmem>>, vector<4x1x160xf32>
    tpu.vector_store %arg10[%c0_40, %c0_41, %c0_42], %41 {strides = array<i32>} : memref<4x10x160xf32, #tpu.memory_space<vmem>>, vector<4x1x160xf32>,
    %c0_43 = arith.constant 0 : index
    %c9 = arith.constant 9 : index
    %c0_44 = arith.constant 0 : index
    %43 = vector.load %arg10[%c0_43, %c9, %c0_44] : memref<4x10x160xf32, #tpu.memory_space<vmem>>, vector<4x1x160xf32>
    tpu.vector_store %arg10[%c0_43, %c9, %c0_44], %41 {strides = array<i32>} : memref<4x10x160xf32, #tpu.memory_space<vmem>>, vector<4x1x160xf32>,
    %cst_45 = arith.constant 0.000000e+00 : f32
    %44 = vector.broadcast %cst_45 : f32 to vector<4x10x16xf32>
    %c0_46 = arith.constant 0 : index
    %c0_47 = arith.constant 0 : index
    %c0_48 = arith.constant 0 : index
    %45 = vector.load %arg10[%c0_46, %c0_47, %c0_48] : memref<4x10x160xf32, #tpu.memory_space<vmem>>, vector<4x10x16xf32>
    tpu.vector_store %arg10[%c0_46, %c0_47, %c0_48], %44 {strides = array<i32>} : memref<4x10x160xf32, #tpu.memory_space<vmem>>, vector<4x10x16xf32>,
    %c0_49 = arith.constant 0 : index
    %c0_50 = arith.constant 0 : index
    %c144 = arith.constant 144 : index
    %46 = vector.load %arg10[%c0_49, %c0_50, %c144] : memref<4x10x160xf32, #tpu.memory_space<vmem>>, vector<4x10x16xf32>
    tpu.vector_store %arg10[%c0_49, %c0_50, %c144], %44 {strides = array<i32>} : memref<4x10x160xf32, #tpu.memory_space<vmem>>, vector<4x10x16xf32>,
    %c0_51 = arith.constant 0 : index
    %c1_52 = arith.constant 1 : index
    %c16 = arith.constant 16 : index
    %47 = vector.load %arg10[%c0_51, %c1_52, %c16] : memref<4x10x160xf32, #tpu.memory_space<vmem>>, vector<4x8x128xf32>
    tpu.vector_store %arg10[%c0_51, %c1_52, %c16], %40 {strides = array<i32>} : memref<4x10x160xf32, #tpu.memory_space<vmem>>, vector<4x8x128xf32>,
    %c0_53 = arith.constant 0 : index
    %c0_54 = arith.constant 0 : index
    %c0_55 = arith.constant 0 : index
    %48 = vector.load %arg10[%c0_53, %c0_54, %c0_55] : memref<4x10x160xf32, #tpu.memory_space<vmem>>, vector<4x8x160xf32>
    %49 = vector.shape_cast %48 : vector<4x8x160xf32> to vector<32x160xf32>
    %c0_56 = arith.constant 0 : index
    %c0_57 = arith.constant 0 : index
    %c0_58 = arith.constant 0 : index
    %50 = vector.load %arg3[%c0_56, %c0_57, %c0_58] : memref<3x160x256xf32, #tpu.memory_space<vmem>>, vector<1x160x256xf32>
    %51 = vector.shape_cast %50 : vector<1x160x256xf32> to vector<160x256xf32>
    %cst_59 = arith.constant dense<0.000000e+00> : vector<32x256xf32>
    %52 = tpu.matmul %49, %51, %cst_59 {dimension_numbers = #tpu.dot_dimension_numbers<[1], [0], [0], [1], [0, 0, 1, 1], [], []>} : vector<32x160xf32>, vector<160x256xf32>, vector<32x256xf32> -> vector<32x256xf32>
    %c0_60 = arith.constant 0 : index
    %c1_61 = arith.constant 1 : index
    %c0_62 = arith.constant 0 : index
    %53 = vector.load %arg10[%c0_60, %c1_61, %c0_62] : memref<4x10x160xf32, #tpu.memory_space<vmem>>, vector<4x8x160xf32>
    %54 = vector.shape_cast %53 : vector<4x8x160xf32> to vector<32x160xf32>
    %c1_63 = arith.constant 1 : index
    %c0_64 = arith.constant 0 : index
    %c0_65 = arith.constant 0 : index
    %55 = vector.load %arg3[%c1_63, %c0_64, %c0_65] : memref<3x160x256xf32, #tpu.memory_space<vmem>>, vector<1x160x256xf32>
    %56 = vector.shape_cast %55 : vector<1x160x256xf32> to vector<160x256xf32>
    %cst_66 = arith.constant dense<0.000000e+00> : vector<32x256xf32>
    %57 = tpu.matmul %54, %56, %cst_66 {dimension_numbers = #tpu.dot_dimension_numbers<[1], [0], [0], [1], [0, 0, 1, 1], [], []>} : vector<32x160xf32>, vector<160x256xf32>, vector<32x256xf32> -> vector<32x256xf32>
    %58 = arith.addf %52, %57 : vector<32x256xf32>
    %c0_67 = arith.constant 0 : index
    %c2_68 = arith.constant 2 : index
    %c0_69 = arith.constant 0 : index
    %59 = vector.load %arg10[%c0_67, %c2_68, %c0_69] : memref<4x10x160xf32, #tpu.memory_space<vmem>>, vector<4x8x160xf32>
    %60 = vector.shape_cast %59 : vector<4x8x160xf32> to vector<32x160xf32>
    %c2_70 = arith.constant 2 : index
    %c0_71 = arith.constant 0 : index
    %c0_72 = arith.constant 0 : index
    %61 = vector.load %arg3[%c2_70, %c0_71, %c0_72] : memref<3x160x256xf32, #tpu.memory_space<vmem>>, vector<1x160x256xf32>
    %62 = vector.shape_cast %61 : vector<1x160x256xf32> to vector<160x256xf32>
    %cst_73 = arith.constant dense<0.000000e+00> : vector<32x256xf32>
    %63 = tpu.matmul %60, %62, %cst_73 {dimension_numbers = #tpu.dot_dimension_numbers<[1], [0], [0], [1], [0, 0, 1, 1], [], []>} : vector<32x160xf32>, vector<160x256xf32>, vector<32x256xf32> -> vector<32x256xf32>
    %64 = arith.addf %58, %63 : vector<32x256xf32>
    %c0_74 = arith.constant 0 : index
    %c0_75 = arith.constant 0 : index
    %65 = vector.load %arg6[%c0_74, %c0_75] : memref<1x256xf32, #tpu.memory_space<vmem>>, vector<1x256xf32>
    %66 = vector.broadcast %65 : vector<1x256xf32> to vector<32x256xf32>
    %67 = arith.addf %64, %66 : vector<32x256xf32>
    %cst_76 = arith.constant 0.000000e+00 : f32
    %68 = vector.broadcast %cst_76 : f32 to vector<32x256xf32>
    %69 = arith.maximumf %67, %68 : vector<32x256xf32>
    %70 = vector.shape_cast %69 : vector<32x256xf32> to vector<32x4x64xf32>
    %71 = vector.extract_strided_slice %70 {offsets = [0, 0, 0], sizes = [32, 4, 32], strides = [1, 1, 1]} : vector<32x4x64xf32> to vector<32x4x32xf32>
    %72 = vector.extract_strided_slice %70 {offsets = [0, 0, 32], sizes = [32, 4, 32], strides = [1, 1, 1]} : vector<32x4x64xf32> to vector<32x4x32xf32>
    %73 = arith.maximumf %71, %72 : vector<32x4x32xf32>
    %74 = vector.shape_cast %73 : vector<32x4x32xf32> to vector<16x2x128xf32>
    %75 = vector.extract_strided_slice %74 {offsets = [0, 0, 0], sizes = [16, 1, 128], strides = [1, 1, 1]} : vector<16x2x128xf32> to vector<16x1x128xf32>
    %76 = vector.shape_cast %75 : vector<16x1x128xf32> to vector<16x128xf32>
    %77 = vector.extract_strided_slice %74 {offsets = [0, 1, 0], sizes = [16, 1, 128], strides = [1, 1, 1]} : vector<16x2x128xf32> to vector<16x1x128xf32>
    %78 = vector.shape_cast %77 : vector<16x1x128xf32> to vector<16x128xf32>
    %79 = arith.maximumf %76, %78 : vector<16x128xf32>
    %80 = vector.shape_cast %79 : vector<16x128xf32> to vector<4x4x128xf32>
    %cst_77 = arith.constant 0.000000e+00 : f32
    %81 = vector.broadcast %cst_77 : f32 to vector<4x1x192xf32>
    %c0_78 = arith.constant 0 : index
    %c0_79 = arith.constant 0 : index
    %c0_80 = arith.constant 0 : index
    %82 = vector.load %arg11[%c0_78, %c0_79, %c0_80] : memref<4x6x192xf32, #tpu.memory_space<vmem>>, vector<4x1x192xf32>
    tpu.vector_store %arg11[%c0_78, %c0_79, %c0_80], %81 {strides = array<i32>} : memref<4x6x192xf32, #tpu.memory_space<vmem>>, vector<4x1x192xf32>,
    %c0_81 = arith.constant 0 : index
    %c5 = arith.constant 5 : index
    %c0_82 = arith.constant 0 : index
    %83 = vector.load %arg11[%c0_81, %c5, %c0_82] : memref<4x6x192xf32, #tpu.memory_space<vmem>>, vector<4x1x192xf32>
    tpu.vector_store %arg11[%c0_81, %c5, %c0_82], %81 {strides = array<i32>} : memref<4x6x192xf32, #tpu.memory_space<vmem>>, vector<4x1x192xf32>,
    %cst_83 = arith.constant 0.000000e+00 : f32
    %84 = vector.broadcast %cst_83 : f32 to vector<4x6x32xf32>
    %c0_84 = arith.constant 0 : index
    %c0_85 = arith.constant 0 : index
    %c0_86 = arith.constant 0 : index
    %85 = vector.load %arg11[%c0_84, %c0_85, %c0_86] : memref<4x6x192xf32, #tpu.memory_space<vmem>>, vector<4x6x32xf32>
    tpu.vector_store %arg11[%c0_84, %c0_85, %c0_86], %84 {strides = array<i32>} : memref<4x6x192xf32, #tpu.memory_space<vmem>>, vector<4x6x32xf32>,
    %c0_87 = arith.constant 0 : index
    %c0_88 = arith.constant 0 : index
    %c160 = arith.constant 160 : index
    %86 = vector.load %arg11[%c0_87, %c0_88, %c160] : memref<4x6x192xf32, #tpu.memory_space<vmem>>, vector<4x6x32xf32>
    tpu.vector_store %arg11[%c0_87, %c0_88, %c160], %84 {strides = array<i32>} : memref<4x6x192xf32, #tpu.memory_space<vmem>>, vector<4x6x32xf32>,
    %c0_89 = arith.constant 0 : index
    %c1_90 = arith.constant 1 : index
    %c32 = arith.constant 32 : index
    %87 = vector.load %arg11[%c0_89, %c1_90, %c32] : memref<4x6x192xf32, #tpu.memory_space<vmem>>, vector<4x4x128xf32>
    tpu.vector_store %arg11[%c0_89, %c1_90, %c32], %80 {strides = array<i32>} : memref<4x6x192xf32, #tpu.memory_space<vmem>>, vector<4x4x128xf32>,
    %c0_91 = arith.constant 0 : index
    %c0_92 = arith.constant 0 : index
    %c0_93 = arith.constant 0 : index
    %88 = vector.load %arg11[%c0_91, %c0_92, %c0_93] : memref<4x6x192xf32, #tpu.memory_space<vmem>>, vector<4x4x192xf32>
    %89 = vector.shape_cast %88 : vector<4x4x192xf32> to vector<16x192xf32>
    %c0_94 = arith.constant 0 : index
    %c0_95 = arith.constant 0 : index
    %c0_96 = arith.constant 0 : index
    %90 = vector.load %arg4[%c0_94, %c0_95, %c0_96] : memref<3x192x256xf32, #tpu.memory_space<vmem>>, vector<1x192x256xf32>
    %91 = vector.shape_cast %90 : vector<1x192x256xf32> to vector<192x256xf32>
    %cst_97 = arith.constant dense<0.000000e+00> : vector<16x256xf32>
    %92 = tpu.matmul %89, %91, %cst_97 {dimension_numbers = #tpu.dot_dimension_numbers<[1], [0], [0], [1], [0, 0, 1, 1], [], []>} : vector<16x192xf32>, vector<192x256xf32>, vector<16x256xf32> -> vector<16x256xf32>
    %c0_98 = arith.constant 0 : index
    %c1_99 = arith.constant 1 : index
    %c0_100 = arith.constant 0 : index
    %93 = vector.load %arg11[%c0_98, %c1_99, %c0_100] : memref<4x6x192xf32, #tpu.memory_space<vmem>>, vector<4x4x192xf32>
    %94 = vector.shape_cast %93 : vector<4x4x192xf32> to vector<16x192xf32>
    %c1_101 = arith.constant 1 : index
    %c0_102 = arith.constant 0 : index
    %c0_103 = arith.constant 0 : index
    %95 = vector.load %arg4[%c1_101, %c0_102, %c0_103] : memref<3x192x256xf32, #tpu.memory_space<vmem>>, vector<1x192x256xf32>
    %96 = vector.shape_cast %95 : vector<1x192x256xf32> to vector<192x256xf32>
    %cst_104 = arith.constant dense<0.000000e+00> : vector<16x256xf32>
    %97 = tpu.matmul %94, %96, %cst_104 {dimension_numbers = #tpu.dot_dimension_numbers<[1], [0], [0], [1], [0, 0, 1, 1], [], []>} : vector<16x192xf32>, vector<192x256xf32>, vector<16x256xf32> -> vector<16x256xf32>
    %98 = arith.addf %92, %97 : vector<16x256xf32>
    %c0_105 = arith.constant 0 : index
    %c2_106 = arith.constant 2 : index
    %c0_107 = arith.constant 0 : index
    %99 = vector.load %arg11[%c0_105, %c2_106, %c0_107] : memref<4x6x192xf32, #tpu.memory_space<vmem>>, vector<4x4x192xf32>
    %100 = vector.shape_cast %99 : vector<4x4x192xf32> to vector<16x192xf32>
    %c2_108 = arith.constant 2 : index
    %c0_109 = arith.constant 0 : index
    %c0_110 = arith.constant 0 : index
    %101 = vector.load %arg4[%c2_108, %c0_109, %c0_110] : memref<3x192x256xf32, #tpu.memory_space<vmem>>, vector<1x192x256xf32>
    %102 = vector.shape_cast %101 : vector<1x192x256xf32> to vector<192x256xf32>
    %cst_111 = arith.constant dense<0.000000e+00> : vector<16x256xf32>
    %103 = tpu.matmul %100, %102, %cst_111 {dimension_numbers = #tpu.dot_dimension_numbers<[1], [0], [0], [1], [0, 0, 1, 1], [], []>} : vector<16x192xf32>, vector<192x256xf32>, vector<16x256xf32> -> vector<16x256xf32>
    %104 = arith.addf %98, %103 : vector<16x256xf32>
    %c0_112 = arith.constant 0 : index
    %c0_113 = arith.constant 0 : index
    %105 = vector.load %arg7[%c0_112, %c0_113] : memref<1x256xf32, #tpu.memory_space<vmem>>, vector<1x256xf32>
    %106 = vector.broadcast %105 : vector<1x256xf32> to vector<16x256xf32>
    %107 = arith.addf %104, %106 : vector<16x256xf32>
    %cst_114 = arith.constant 0.000000e+00 : f32
    %108 = vector.broadcast %cst_114 : f32 to vector<16x256xf32>
    %109 = arith.maximumf %107, %108 : vector<16x256xf32>
    %110 = vector.shape_cast %109 : vector<16x256xf32> to vector<16x2x128xf32>
    %111 = vector.extract_strided_slice %110 {offsets = [0, 0, 0], sizes = [16, 2, 64], strides = [1, 1, 1]} : vector<16x2x128xf32> to vector<16x2x64xf32>
    %112 = vector.extract_strided_slice %110 {offsets = [0, 0, 64], sizes = [16, 2, 64], strides = [1, 1, 1]} : vector<16x2x128xf32> to vector<16x2x64xf32>
    %113 = arith.maximumf %111, %112 : vector<16x2x64xf32>
    %114 = vector.shape_cast %113 : vector<16x2x64xf32> to vector<8x2x128xf32>
    %115 = vector.extract_strided_slice %114 {offsets = [0, 0, 0], sizes = [8, 1, 128], strides = [1, 1, 1]} : vector<8x2x128xf32> to vector<8x1x128xf32>
    %116 = vector.shape_cast %115 : vector<8x1x128xf32> to vector<8x128xf32>
    %117 = vector.extract_strided_slice %114 {offsets = [0, 1, 0], sizes = [8, 1, 128], strides = [1, 1, 1]} : vector<8x2x128xf32> to vector<8x1x128xf32>
    %118 = vector.shape_cast %117 : vector<8x1x128xf32> to vector<8x128xf32>
    %119 = arith.maximumf %116, %118 : vector<8x128xf32>
    %120 = vector.shape_cast %119 : vector<8x128xf32> to vector<4x2x128xf32>
    %c0_115 = arith.constant 0 : index
    %c0_116 = arith.constant 0 : index
    %c0_117 = arith.constant 0 : index
    %121 = vector.load %arg8[%c0_115, %c0_116, %c0_117] : memref<4x2x128xf32, #tpu.memory_space<vmem>>, vector<4x2x128xf32>
    tpu.vector_store %arg8[%c0_115, %c0_116, %c0_117], %120 {strides = array<i32>} : memref<4x2x128xf32, #tpu.memory_space<vmem>>, vector<4x2x128xf32>,
    return
  }
  func.func @transform_0(%arg0: i32) -> (i32, i32, i32) {
    %c0_i32 = arith.constant 0 : i32
    %c0_i32_0 = arith.constant 0 : i32
    %c0_i32_1 = arith.constant 0 : i32
    return %arg0, %c0_i32, %c0_i32_0 : i32, i32, i32
  }
  func.func @transform_1(%arg0: i32) -> (i32, i32, i32) {
    %c0_i32 = arith.constant 0 : i32
    %c0_i32_0 = arith.constant 0 : i32
    %c0_i32_1 = arith.constant 0 : i32
    %c0_i32_2 = arith.constant 0 : i32
    return %c0_i32, %c0_i32_0, %c0_i32_1 : i32, i32, i32
  }
  func.func @transform_2(%arg0: i32) -> (i32, i32, i32) {
    %c0_i32 = arith.constant 0 : i32
    %c0_i32_0 = arith.constant 0 : i32
    %c0_i32_1 = arith.constant 0 : i32
    %c0_i32_2 = arith.constant 0 : i32
    return %c0_i32, %c0_i32_0, %c0_i32_1 : i32, i32, i32
  }
  func.func @transform_3(%arg0: i32) -> (i32, i32, i32) {
    %c0_i32 = arith.constant 0 : i32
    %c0_i32_0 = arith.constant 0 : i32
    %c0_i32_1 = arith.constant 0 : i32
    %c0_i32_2 = arith.constant 0 : i32
    return %c0_i32, %c0_i32_0, %c0_i32_1 : i32, i32, i32
  }
  func.func @transform_4(%arg0: i32) -> (i32, i32) {
    %c0_i32 = arith.constant 0 : i32
    %c0_i32_0 = arith.constant 0 : i32
    %c0_i32_1 = arith.constant 0 : i32
    return %c0_i32, %c0_i32_0 : i32, i32
  }
  func.func @transform_5(%arg0: i32) -> (i32, i32) {
    %c0_i32 = arith.constant 0 : i32
    %c0_i32_0 = arith.constant 0 : i32
    %c0_i32_1 = arith.constant 0 : i32
    return %c0_i32, %c0_i32_0 : i32, i32
  }
  func.func @transform_6(%arg0: i32) -> (i32, i32) {
    %c0_i32 = arith.constant 0 : i32
    %c0_i32_0 = arith.constant 0 : i32
    %c0_i32_1 = arith.constant 0 : i32
    return %c0_i32, %c0_i32_0 : i32, i32
  }
  func.func @transform_7(%arg0: i32) -> (i32, i32, i32) {
    %c0_i32 = arith.constant 0 : i32
    %c0_i32_0 = arith.constant 0 : i32
    %c0_i32_1 = arith.constant 0 : i32
    return %arg0, %c0_i32, %c0_i32_0 : i32, i32, i32
  }
}

</mosaic_0001>

<bundles_post_ra>
// kernel: cnn_encoder.1
= control target key start
LH: loop header
LB: loop body
LE: loop exit
PB: predicated region body
PF: predicated region fallthrough
CT: control target
= control target key end

     0   :  { %s9657_s24 = smov 0   ;;  %s14535_s0 = inlined_call_operand.vmem [shape: f32[8,16,16], index: 0, kind: input, shape index: {}]   ;;  %s14536_s1 = inlined_call_operand.vmem [shape: f32[3,18,256], index: 1, kind: input, shape index: {}]   ;;  %s14537_s2 = inlined_call_operand.vmem [shape: f32[3,160,256], index: 2, kind: input, shape index: {}]   ;;  %s14538_s3 = inlined_call_operand.vmem [shape: f32[3,192,256], index: 3, kind: input, shape index: {}]   ;;  %s14539_s4 = inlined_call_operand.vmem [shape: f32[1,256], index: 4, kind: input, shape index: {}]   ;;  %s14540_s5 = inlined_call_operand.vmem [shape: f32[1,256], index: 5, kind: input, shape index: {}]   ;;  %s14541_s6 = inlined_call_operand.vmem [shape: f32[1,256], index: 6, kind: input, shape index: {}]   ;;  %s14542_s7 = inlined_call_operand.vmem [shape: f32[8,2,128], index: 7, kind: output, shape index: {}]  }
   0x1 LB: > { %s8958_s25 = sadd.s32 4294967295, %s9604_s24   ;;  %p8962_p0 = scmp.ge.s32.totalorder %s9604_s24, 1  ;;  %s9604_s24 = sphi %s9657_s24, %s17_s24  }
   0x2   : > { %p239_p1 = scmp.lt.s32.totalorder %s9604_s24, 3 }
   0x4   : > { %p240_p2 = pnand %p8962_p0, %p239_p1 }
   0x6   : > { %243 = sbr.rel (%p240_p2) target bundleno = 2752 (0xac0), region = 48 }
   0xd   : > { %s9665_s26 = sshll.u32 %s8958_s25, 2  ;;  %vm293_vm0 = vcmask 139264   ;;  %vm302_vm1 = vcmask 7168   ;;  %vm316_vm2 = vcmask 146568   ;;  %v14545_v0 = vmov 0.0   ;;  %v8969_v1 = vld [vmem:[%s14536_s1 + $0x38] sm:$0xff] }
   0xe   : > { %p273_p3 = scmp.lt.s32.totalorder %s9665_s26, 7  ;;  %294 = vst.msk [vmem:[#allocation2] sm:$0x1] %vm293_vm0, %v14545_v0  ;;  %295 = vst.msk [vmem:[#allocation2 + $0x18] sm:$0x1] %vm293_vm0, %v14545_v0  ;;  %v8971_v2 = vld [vmem:[%s14536_s1 + $0x48] sm:$0xff]  ;;  %496 = vmatprep.mubr.f32.mxu0 %v14545_v0 }
   0xf   : > { %304 = vst.msk [vmem:[#allocation2 + $0x8] sm:$0xff] %vm302_vm1, %v14545_v0  ;;  %308 = vst.msk [vmem:[#allocation2 + $0x20] sm:$0xff] %vm302_vm1, %v14545_v0  ;;  %v8968_v3 = vld [vmem:[%s14536_s1 + $0x30] sm:$0xff]  ;;  %vm305_vm3 = vcmask 1024   ;;  %v9219_v4 = vpack.c.bf16 %v8971_v2, %v8969_v1  ;;  %v8970_v5 = vld [vmem:[%s14536_s1 + $0x40] sm:$0xff]  ;;  %vm319_vm4 = vcmask 140424   ;;  %v14543_v2 = vlaneseq }
  0x10   : > { %296 = vst.msk [vmem:[#allocation2 + $0x30] sm:$0x1] %vm293_vm0, %v14545_v0  ;;  %297 = vst.msk [vmem:[#allocation2 + $0x48] sm:$0x1] %vm293_vm0, %v14545_v0  ;;  %s15039_s26 = smov (!%p273_p3, %s9665_s26), 7  ;;  %v9221_v6 = vpack.c.bf16 %v8970_v5, %v8968_v3  ;;  %vm14622_vm5 = vcmask 1041408  }
  0x11   : > { %298 = vst.msk [vmem:[#allocation2 + $0x11] sm:$0x1] %vm293_vm0, %v14545_v0  ;;  %299 = vst.msk [vmem:[#allocation2 + $0x29] sm:$0x1] %vm293_vm0, %v14545_v0  ;;  %v8973_v7 = vld [vmem:[%s14536_s1 + $0x58] sm:$0x3]  ;;  %9220 = vmatprep.subr.bf16.mxu0 %v9219_v4 }
  0x12   : > { %300 = vst.msk [vmem:[#allocation2 + $0x41] sm:$0x1] %vm293_vm0, %v14545_v0  ;;  %301 = vst.msk [vmem:[#allocation2 + $0x59] sm:$0x1] %vm293_vm0, %v14545_v0  ;;  %v380_v8 = vld [vmem:[%s14536_s1 + $0x8] sm:$0xff]  ;;  %v382_v9 = vld [vmem:[%s14536_s1 + $0x18] sm:$0xff]  ;;  %9222 = vmatpush1.bf16.msra.mxu0 %v9221_v6 }
  0x13   : > { %311 = vst.msk [vmem:[#allocation2 + $0x38] sm:$0xff] %vm302_vm1, %v14545_v0  ;;  %314 = vst.msk [vmem:[#allocation2 + $0x50] sm:$0xff] %vm302_vm1, %v14545_v0  ;;  %s9218_s18 = sshll.u32 %s15039_s26, 4  ;;  %8974 = vmatprep.subr.msk.mxu0 %vm14622_vm5, %v8973_v7  ;;  %v8972_v10 = vld [vmem:[%s14536_s1 + $0x50] sm:$0x3]  ;;  %v9223_v11 = vpack.c.bf16 %v382_v9, %v380_v8  ;;  %s9607_s25 = smov 1  }
  0x14   : > { %303 = vst.msk [vmem:[#allocation2] sm:$0xff] %vm302_vm1, %v14545_v0  ;;  %307 = vst.msk [vmem:[#allocation2 + $0x18] sm:$0xff] %vm302_vm1, %v14545_v0  ;;  %s277_s21 = scalar_lea.vmem %s14535_s0, %s9218_s18  ;;  %vm362_vm6 = vcmask 138248   ;;  %v379_v22 = vld [vmem:[%s14536_s1] sm:$0xff]  ;;  %v381_v23 = vld [vmem:[%s14536_s1 + $0x10] sm:$0xff]  ;;  %vm400_vm7 = vcmask 146432  }
  0x15   : > { %318 = vst.msk [vmem:[#allocation2 + $0x8] sm:$0xff] %vm316_vm2, %v14545_v0  ;;  %322 = vst.msk [vmem:[#allocation2 + $0x20] sm:$0xff] %vm316_vm2, %v14545_v0  ;;  %v285_v12 = vld [vmem:[%s277_s21] sm:$0xff]  ;;  %v287_v13 = vld [vmem:[%s277_s21 + $0x10] sm:$0xff]  ;;  %v9225_v26 = vpack.c.bf16 %v381_v23, %v379_v22  ;;  %v9846_v3 = vshrl.u32 %v14543_v2, 7  ;;  %s9608_s28 = smov 64  }
  0x16   : > { %310 = vst.msk [vmem:[#allocation2 + $0x30] sm:$0xff] %vm302_vm1, %v14545_v0  ;;  %313 = vst.msk [vmem:[#allocation2 + $0x48] sm:$0xff] %vm302_vm1, %v14545_v0  ;;  %338 = vrot.lane.b32.xlu0 %v285_v12, %s9607_s25  ;;  %342 = vrot.lane.b32.xlu1 %v287_v13, %s9607_s25  ;;  %v286_v14 = vld [vmem:[%s277_s21 + $0x8] sm:$0xff]  ;;  %v288_v15 = vld [vmem:[%s277_s21 + $0x18] sm:$0xff]  ;;  %s9609_s29 = smov 96   ;;  %s9610_s30 = smov 32  }
  0x17   : > { %325 = vst.msk [vmem:[#allocation2 + $0x38] sm:$0xff] %vm316_vm2, %v14545_v0  ;;  %328 = vst.msk [vmem:[#allocation2 + $0x50] sm:$0xff] %vm316_vm2, %v14545_v0  ;;  %8975 = vmatpush1.msk.msra.mxu0 %vm14622_vm5, %v8972_v10  ;;  %v290_v16 = vld [vmem:[%s277_s21 + $0x28] sm:$0xff]  ;;  %v289_v17 = vld [vmem:[%s277_s21 + $0x20] sm:$0xff]  ;;  %v9849_v4 = vsub.s32 0, %v9846_v3  ;;  %v9855_v6 = vsub.s32 1, %v9846_v3 }
  0x18   : > { %306 = vst.msk [vmem:[#allocation2 + $0x10] sm:$0x3] %vm305_vm3, %v14545_v0  ;;  %309 = vst.msk [vmem:[#allocation2 + $0x28] sm:$0x3] %vm305_vm3, %v14545_v0  ;;  %9224 = vmatprep.subr.bf16.mxu0 %v9223_v11  ;;  %v292_v18 = vld [vmem:[%s277_s21 + $0x38] sm:$0xff]  ;;  %v291_v19 = vld [vmem:[%s277_s21 + $0x30] sm:$0xff] }
  0x19   : > { %312 = vst.msk [vmem:[#allocation2 + $0x40] sm:$0x3] %vm305_vm3, %v14545_v0  ;;  %315 = vst.msk [vmem:[#allocation2 + $0x58] sm:$0x3] %vm305_vm3, %v14545_v0  ;;  %v384_v27 = vld [vmem:[%s14536_s1 + $0x28] sm:$0x3] }
  0x1a   : > { %317 = vst.msk [vmem:[#allocation2] sm:$0xff] %vm316_vm2, %v14545_v0  ;;  %321 = vst.msk [vmem:[#allocation2 + $0x18] sm:$0xff] %vm316_vm2, %v14545_v0  ;;  %340 = vrot.lane.b32.xlu0 %v286_v14, %s9607_s25  ;;  %344 = vrot.lane.b32.xlu1 %v288_v15, %s9607_s25  ;;  %v8995_v31 = vld [vmem:[%s14536_s1 + $0x68] sm:$0xff]  ;;  %v8997_v32 = vld [vmem:[%s14536_s1 + $0x78] sm:$0xff]  ;;  %s9613_s8 = smov 112   ;;  %s9614_s9 = smov 16  }
  0x1b   : > { %324 = vst.msk [vmem:[#allocation2 + $0x30] sm:$0xff] %vm316_vm2, %v14545_v0  ;;  %327 = vst.msk [vmem:[#allocation2 + $0x48] sm:$0xff] %vm316_vm2, %v14545_v0  ;;  %v383_v33 = vld [vmem:[%s14536_s1 + $0x20] sm:$0x3]  ;;  %v9227_v34 = vpack.c.bf16 %v8997_v32, %v8995_v31  ;;  %v8996_v45 = vld [vmem:[%s14536_s1 + $0x70] sm:$0xff]  ;;  %s9615_s10 = smov 48  }
  0x1c   : > { %320 = vst.msk [vmem:[#allocation2 + $0x10] sm:$0x3] %vm319_vm4, %v14545_v0  ;;  %323 = vst.msk [vmem:[#allocation2 + $0x28] sm:$0x3] %vm319_vm4, %v14545_v0  ;;  %v8994_v44 = vld [vmem:[%s14536_s1 + $0x60] sm:$0xff]  ;;  %s9616_s11 = smov 80  }
  0x1d   : > { %326 = vst.msk [vmem:[#allocation2 + $0x40] sm:$0x3] %vm319_vm4, %v14545_v0  ;;  %329 = vst.msk [vmem:[#allocation2 + $0x58] sm:$0x3] %vm319_vm4, %v14545_v0  ;;  %v9229_v46 = vpack.c.bf16 %v8996_v45, %v8994_v44  ;;  %v8999_v48 = vld [vmem:[%s14536_s1 + $0x88] sm:$0x3] }
  0x1e   : > { %348 = vrot.lane.b32.xlu1 %v290_v16, %s9607_s25  ;;  %346 = vrot.lane.b32.xlu0 %v289_v17, %s9607_s25  ;;  %v8998_v49 = vld [vmem:[%s14536_s1 + $0x80] sm:$0x3]  ;;  %14624 = vst [vmem:[#allocation5_spill] sm:$0xff] %v9849_v4  ;;  %14625 = vst [vmem:[#allocation6_spill] sm:$0xff] %v9855_v6  ;;  %vm5482_vm8 = vcmask 130048   ;;  %vm5515_vm9 = vcmask 261120  }
  0x1f   : > { %v862_v5 = vld [vmem:[%s14539_s4] sm:$0x3]  ;;  %vm5548_vm10 = vcmask 392192   ;;  %vm5581_vm11 = vcmask 523264   ;;  %vm5614_vm12 = vcmask 654336   ;;  %vm5647_vm13 = vcmask 785408  }
  0x20   : > { %v9858_v7 = vrot.slane %v862_v5, %v9849_v4  ;;  %v9861_v8 = vrot.slane %v862_v5, %v9855_v6  ;;  %vm5680_vm14 = vcmask 916480   ;;  %vm5921_vm15 = vcmask 1042434  }
  0x21   : > { %vm5924_vm0 = vcmask 1043459   ;;  %vm14623_vm1 = vcmask 1044484   ;;  %vm5930_vm2 = vcmask 1045509   ;;  %vm5933_vm3 = vcmask 1046534  }
  0x22   : > { %352 = vrot.lane.b32.xlu1 %v292_v18, %s9607_s25  ;;  %350 = vrot.lane.b32.xlu0 %v291_v19, %s9607_s25  ;;  %vm5936_vm4 = vcmask 1047559  }
  0x88   : > { %v339_v20 = vpop.permute.xlu0 %338  ;;  %v343_v21 = vpop.permute.xlu1 %342 }
  0x89   : > { %363 = vst.msk [vmem:[#allocation2 + $0x1] sm:$0xff] %vm362_vm6, %v339_v20  ;;  %365 = vst.msk [vmem:[#allocation2 + $0x19] sm:$0xff] %vm362_vm6, %v343_v21 }
  0x8c   : > { %v341_v24 = vpop.permute.xlu0 %340  ;;  %v345_v25 = vpop.permute.xlu1 %344 }
  0x8d   : > { %364 = vst.msk [vmem:[#allocation2 + $0x9] sm:$0xff] %vm362_vm6, %v341_v24  ;;  %366 = vst.msk [vmem:[#allocation2 + $0x21] sm:$0xff] %vm362_vm6, %v345_v25 }
  0x90   : > { %v385_v28 = vld [vmem:[#allocation2 + $0x1] sm:$0xff]  ;;  %v349_v29 = vpop.permute.xlu1 %348  ;;  %v347_v30 = vpop.permute.xlu0 %346  ;;  %v387_v38 = vld [vmem:[#allocation2 + $0x19] sm:$0xff] }
  0x91   : > { %8976 = vmatmul.mubr.msk.f32.vlgmr.msra.gmra.mrb[0].mxu0 %vm400_vm7, %v385_v28  ;;  %368 = vst.msk [vmem:[#allocation2 + $0x39] sm:$0xff] %vm362_vm6, %v349_v29  ;;  %367 = vst.msk [vmem:[#allocation2 + $0x31] sm:$0xff] %vm362_vm6, %v347_v30  ;;  %v371_v47 = vld [vmem:[#allocation2] sm:$0xff]  ;;  %v373_v51 = vld [vmem:[#allocation2 + $0x18] sm:$0xff] }
  0x92   : > { %9226 = vmatpush1.bf16.msra.mxu0 %v9225_v26  ;;  %502 = vmatprep.mubr.f32.mxu0 %v14545_v0 }
  0x93   : > { %8984 = vmatprep.subr.msk.mxu0 %vm14622_vm5, %v384_v27 }
  0x94   : > { %v386_v35 = vld [vmem:[#allocation2 + $0x9] sm:$0xff]  ;;  %v353_v36 = vpop.permute.xlu1 %352  ;;  %v351_v37 = vpop.permute.xlu0 %350  ;;  %v388_v39 = vld [vmem:[#allocation2 + $0x21] sm:$0xff] }
  0x95   : > { %8977 = vmatmul.mubr.msk.f32.gmra.mrb[2].mxu0 %vm400_vm7, %v386_v35  ;;  %370 = vst.msk [vmem:[#allocation2 + $0x51] sm:$0xff] %vm362_vm6, %v353_v36  ;;  %369 = vst.msk [vmem:[#allocation2 + $0x49] sm:$0xff] %vm362_vm6, %v351_v37  ;;  %v372_v50 = vld [vmem:[#allocation2 + $0x8] sm:$0xff]  ;;  %v374_v52 = vld [vmem:[#allocation2 + $0x20] sm:$0xff] }
  0x96   : > { %508 = vmatprep.mubr.f32.mxu0 %v14545_v0  ;;  %8985 = vmatpush1.msk.msra.mxu0 %vm14622_vm5, %v383_v33  ;;  %v688_v57 = vld [vmem:[#allocation2 + $0x2] sm:$0xff]  ;;  %v689_v58 = vld [vmem:[#allocation2 + $0xa] sm:$0xff]  ;;  %v690_v59 = vld [vmem:[#allocation2 + $0x1a] sm:$0xff] }
  0x97   : > { %9228 = vmatprep.subr.bf16.mxu0 %v9227_v34  ;;  %v691_v60 = vld [vmem:[#allocation2 + $0x22] sm:$0xff] }
  0x98   : > { %v389_v40 = vld [vmem:[#allocation2 + $0x31] sm:$0xff]  ;;  %v390_v41 = vld [vmem:[#allocation2 + $0x39] sm:$0xff] }
  0x99   : > { %8978 = vmatmul.mubr.msk.f32.gmra.mrb[4].mxu0 %vm400_vm7, %v387_v38  ;;  %v375_v53 = vld [vmem:[#allocation2 + $0x30] sm:$0xff]  ;;  %v376_v54 = vld [vmem:[#allocation2 + $0x38] sm:$0xff] }
  0x9a   : > { %514 = vmatprep.mubr.f32.mxu0 %v14545_v0  ;;  %v692_v61 = vld [vmem:[#allocation2 + $0x32] sm:$0xff]  ;;  %v693_v62 = vld [vmem:[#allocation2 + $0x3a] sm:$0xff] }
  0x9c   : > { %v391_v42 = vld [vmem:[#allocation2 + $0x49] sm:$0xff]  ;;  %v392_v43 = vld [vmem:[#allocation2 + $0x51] sm:$0xff] }
  0x9d   : > { %8979 = vmatmul.mubr.msk.f32.gmra.mrb[6].mxu0 %vm400_vm7, %v388_v39  ;;  %v377_v55 = vld [vmem:[#allocation2 + $0x48] sm:$0xff]  ;;  %v378_v56 = vld [vmem:[#allocation2 + $0x50] sm:$0xff] }
  0x9e   : > { %520 = vmatprep.mubr.f32.mxu0 %v14545_v0  ;;  %v694_v63 = vld [vmem:[#allocation2 + $0x4a] sm:$0xff]  ;;  %v695_v1 = vld [vmem:[#allocation2 + $0x52] sm:$0xff] }
  0xa1   : > { %8980 = vmatmul.mubr.msk.f32.gmra.mrb[8].mxu0 %vm400_vm7, %v389_v40 }
  0xa2   : > { %526 = vmatprep.mubr.f32.mxu0 %v14545_v0 }
  0xa5   : > { %8981 = vmatmul.mubr.msk.f32.gmra.mrb[10].mxu0 %vm400_vm7, %v390_v41 }
  0xa6   : > { %532 = vmatprep.mubr.f32.mxu0 %v14545_v0 }
  0xa9   : > { %8982 = vmatmul.mubr.msk.f32.gmra.mrb[12].mxu0 %vm400_vm7, %v391_v42 }
  0xaa   : > { %538 = vmatprep.mubr.f32.mxu0 %v14545_v0 }
  0xad   : > { %8983 = vmatmul.mubr.msk.f32.gmra.mrb[14].mxu0 %vm400_vm7, %v392_v43 }
  0xae   : > { %639 = vmatprep.mubr.f32.mxu0 %v14545_v0 }
  0xb1   : > { %8986 = vmatmul.mubr.msk.f32.vlgmr.msra.gmra.mrb[0].mxu0 %vm400_vm7, %v371_v47 }
  0xb2   : > { %9230 = vmatpush1.bf16.msra.mxu0 %v9229_v46  ;;  %645 = vmatprep.mubr.f32.mxu0 %v14545_v0 }
  0xb3   : > { %9000 = vmatprep.subr.msk.mxu0 %vm14622_vm5, %v8999_v48 }
  0xb5   : > { %8987 = vmatmul.mubr.msk.f32.gmra.mrb[2].mxu0 %vm400_vm7, %v372_v50 }
  0xb6   : > { %651 = vmatprep.mubr.f32.mxu0 %v14545_v0  ;;  %9001 = vmatpush1.msk.msra.mxu0 %vm14622_vm5, %v8998_v49  ;;  %vm5869_vm5 = vcmask 123904  }
  0xb9   : > { %8988 = vmatmul.mubr.msk.f32.gmra.mrb[4].mxu0 %vm400_vm7, %v373_v51 }
  0xba   : > { %657 = vmatprep.mubr.f32.mxu0 %v14545_v0 }
  0xbd   : > { %8989 = vmatmul.mubr.msk.f32.gmra.mrb[6].mxu0 %vm400_vm7, %v374_v52 }
  0xbe   : > { %663 = vmatprep.mubr.f32.mxu0 %v14545_v0 }
  0xc1   : > { %8990 = vmatmul.mubr.msk.f32.gmra.mrb[8].mxu0 %vm400_vm7, %v375_v53 }
  0xc2   : > { %669 = vmatprep.mubr.f32.mxu0 %v14545_v0 }
  0xc5   : > { %8991 = vmatmul.mubr.msk.f32.gmra.mrb[10].mxu0 %vm400_vm7, %v376_v54 }
  0xc6   : > { %675 = vmatprep.mubr.f32.mxu0 %v14545_v0 }
  0xc9   : > { %8992 = vmatmul.mubr.msk.f32.gmra.mrb[12].mxu0 %vm400_vm7, %v377_v55 }
  0xca   : > { %681 = vmatprep.mubr.f32.mxu0 %v14545_v0 }
  0xcd   : > { %8993 = vmatmul.mubr.msk.f32.gmra.mrb[14].mxu0 %vm400_vm7, %v378_v56 }
  0xce   : > { %797 = vmatprep.mubr.f32.mxu0 %v14545_v0 }
  0xd1   : > { %9002 = vmatmul.mubr.msk.f32.vlgmr.msra.gmra.mrb[0].mxu0 %vm400_vm7, %v688_v57  ;;  %v9611_v57 = vmov 1983009808  }
  0xd2   : > { %803 = vmatprep.mubr.f32.mxu0 %v14545_v0 }
  0xd5   : > { %9003 = vmatmul.mubr.msk.f32.gmra.mrb[2].mxu0 %vm400_vm7, %v689_v58  ;;  %v1069_v58 = vunpack.c.l.s4 %v9611_v57 }
  0xd6   : > { %809 = vmatprep.mubr.f32.mxu0 %v14545_v0 }
  0xd9   : > { %9004 = vmatmul.mubr.msk.f32.gmra.mrb[4].mxu0 %vm400_vm7, %v690_v59 }
  0xda   : > { %815 = vmatprep.mubr.f32.mxu0 %v14545_v0 }
  0xdd   : > { %9005 = vmatmul.mubr.msk.f32.gmra.mrb[6].mxu0 %vm400_vm7, %v691_v60 }
  0xde   : > { %821 = vmatprep.mubr.f32.mxu0 %v14545_v0 }
  0xe1   : > { %9006 = vmatmul.mubr.msk.f32.gmra.mrb[8].mxu0 %vm400_vm7, %v692_v61  ;;  %v1070_v61 = vunpack.c.0.s8 %v1069_v58 }
  0xe2   : > { %827 = vmatprep.mubr.f32.mxu0 %v14545_v0 }
  0xe5   : > { %9007 = vmatmul.mubr.msk.f32.gmra.mrb[10].mxu0 %vm400_vm7, %v693_v62  ;;  %v9612_v62 = vmov 1934713408  }
  0xe6   : > { %833 = vmatprep.mubr.f32.mxu0 %v14545_v0 }
  0xe9   : > { %9008 = vmatmul.mubr.msk.f32.gmra.mrb[12].mxu0 %vm400_vm7, %v694_v63  ;;  %v1133_v63 = vunpack.c.l.s4 %v9612_v62 }
  0xea   : > { %839 = vmatprep.mubr.f32.mxu0 %v14545_v0 }
  0xed   : > { %9009 = vmatmul.mubr.msk.f32.gmra.mrb[14].mxu0 %vm400_vm7, %v695_v1  ;;  %vm5877_vm7 = vcmask 261248  }
 0x1a4   : > { %v799_v9 = vpop.f32.mrb[0].mxu0 }
 0x1a5   : > { %v874_v10 = vadd.f32 %v9858_v7, %v799_v9  ;;  %v801_v11 = vpop.f32.mrb[1].mxu0 }
 0x1a6   : > { %v875_v13 = vadd.f32 %v9861_v8, %v801_v11 }
 0x1a7   : > { %v9864_v12 = vmax.f32 %v874_v10, 0.0  ;;  %v1134_v10 = vunpack.c.0.s8 %v1133_v63 }
 0x1a8   : > { %v805_v14 = vpop.f32.mrb[2].mxu0  ;;  %v9871_v16 = vmax.f32 %v875_v13, 0.0 }
 0x1a9   : > { %938 = vrot.lane.b32.xlu1 %v9864_v12, %s9608_s28  ;;  %914 = vrot.lane.b32.xlu0 %v9864_v12, %s9609_s29  ;;  %v807_v15 = vpop.f32.mrb[3].mxu0  ;;  %v876_v19 = vadd.f32 %v9858_v7, %v805_v14 }
 0x1aa   : > { %v877_v23 = vadd.f32 %v9861_v8, %v807_v15 }
 0x1ab   : > { %v9882_v22 = vmax.f32 %v876_v19, 0.0 }
 0x1ac   : > { %v811_v17 = vpop.f32.mrb[4].mxu0  ;;  %v9889_v26 = vmax.f32 %v877_v23, 0.0 }
 0x1ad   : > { %962 = vrot.lane.b32.xlu0 %v9864_v12, %s9610_s30  ;;  %994 = vrot.lane.b32.xlu1 %v9871_v16, %s9609_s29  ;;  %v813_v18 = vpop.f32.mrb[5].mxu0  ;;  %v878_v29 = vadd.f32 %v9858_v7, %v811_v17 }
 0x1ae   : > { %v879_v35 = vadd.f32 %v9861_v8, %v813_v18 }
 0x1af   : > { %v9902_v34 = vmax.f32 %v878_v29, 0.0 }
 0x1b0   : > { %v817_v20 = vpop.f32.mrb[6].mxu0  ;;  %v9911_v40 = vmax.f32 %v879_v35, 0.0 }
 0x1b1   : > { %1018 = vrot.lane.b32.xlu0 %v9871_v16, %s9608_s28  ;;  %1042 = vrot.lane.b32.xlu1 %v9871_v16, %s9610_s30  ;;  %v819_v21 = vpop.f32.mrb[7].mxu0  ;;  %v880_v41 = vadd.f32 %v9858_v7, %v817_v20 }
 0x1b2   : > { %v881_v43 = vadd.f32 %v9861_v8, %v819_v21  ;;  %v10016_v21 = vsub.s32 %v1134_v10, %v9846_v3 }
 0x1b3   : > { %v9922_v42 = vmax.f32 %v880_v41, 0.0 }
 0x1b4   : > { %v823_v24 = vpop.f32.mrb[8].mxu0  ;;  %v9929_v44 = vmax.f32 %v881_v43, 0.0  ;;  %14627 = vst [vmem:[#allocation8_spill] sm:$0xff] %v10016_v21 }
 0x1b5   : > { %940 = vrot.lane.b32.xlu1 %v9882_v22, %s9608_s28  ;;  %916 = vrot.lane.b32.xlu0 %v9882_v22, %s9609_s29  ;;  %v825_v25 = vpop.f32.mrb[9].mxu0  ;;  %v882_v45 = vadd.f32 %v9858_v7, %v823_v24 }
 0x1b6   : > { %v883_v47 = vadd.f32 %v9861_v8, %v825_v25 }
 0x1b7   : > { %v9940_v46 = vmax.f32 %v882_v45, 0.0 }
 0x1b8   : > { %v829_v27 = vpop.f32.mrb[10].mxu0  ;;  %v9947_v48 = vmax.f32 %v883_v47, 0.0 }
 0x1b9   : > { %964 = vrot.lane.b32.xlu0 %v9882_v22, %s9610_s30  ;;  %996 = vrot.lane.b32.xlu1 %v9889_v26, %s9609_s29  ;;  %v831_v28 = vpop.f32.mrb[11].mxu0  ;;  %v884_v49 = vadd.f32 %v9858_v7, %v829_v27 }
 0x1ba   : > { %v885_v51 = vadd.f32 %v9861_v8, %v831_v28 }
 0x1bb   : > { %v9958_v50 = vmax.f32 %v884_v49, 0.0 }
 0x1bc   : > { %v835_v30 = vpop.f32.mrb[12].mxu0  ;;  %v9965_v52 = vmax.f32 %v885_v51, 0.0 }
 0x1bd   : > { %v886_v31 = vadd.f32 %v9858_v7, %v835_v30  ;;  %1020 = vrot.lane.b32.xlu0 %v9889_v26, %s9608_s28  ;;  %1044 = vrot.lane.b32.xlu1 %v9889_v26, %s9610_s30  ;;  %v837_v32 = vpop.f32.mrb[13].mxu0 }
 0x1be   : > { %v887_v33 = vadd.f32 %v9861_v8, %v837_v32 }
 0x1bf   : > { %v9975_v53 = vmax.f32 %v886_v31, 0.0 }
 0x1c0   : > { %v841_v36 = vpop.f32.mrb[14].mxu0  ;;  %v9981_v54 = vmax.f32 %v887_v33, 0.0 }
 0x1c1   : > { %v888_v37 = vadd.f32 %v9858_v7, %v841_v36  ;;  %942 = vrot.lane.b32.xlu1 %v9902_v34, %s9608_s28  ;;  %918 = vrot.lane.b32.xlu0 %v9902_v34, %s9609_s29  ;;  %v843_v38 = vpop.f32.mrb[15].mxu0  ;;  %v10008_v7 = vsub.s32 %v1070_v61, %v9846_v3 }
 0x1c2   : > { %v889_v39 = vadd.f32 %v9861_v8, %v843_v38 }
 0x1c3   : > { %v9991_v55 = vmax.f32 %v888_v37, 0.0  ;;  %14626 = vst [vmem:[#allocation7_spill] sm:$0xff] %v10008_v7 }
 0x1c4   : > { %v9997_v56 = vmax.f32 %v889_v39, 0.0 }
 0x1c5   : > { %966 = vrot.lane.b32.xlu0 %v9902_v34, %s9610_s30  ;;  %998 = vrot.lane.b32.xlu1 %v9911_v40, %s9609_s29 }
 0x1c9   : > { %1022 = vrot.lane.b32.xlu0 %v9911_v40, %s9608_s28  ;;  %1046 = vrot.lane.b32.xlu1 %v9911_v40, %s9610_s30 }
 0x1cd   : > { %944 = vrot.lane.b32.xlu1 %v9922_v42, %s9608_s28  ;;  %920 = vrot.lane.b32.xlu0 %v9922_v42, %s9609_s29 }
 0x1d1   : > { %968 = vrot.lane.b32.xlu0 %v9922_v42, %s9610_s30  ;;  %1000 = vrot.lane.b32.xlu1 %v9929_v44, %s9609_s29 }
 0x1d5   : > { %1024 = vrot.lane.b32.xlu0 %v9929_v44, %s9608_s28  ;;  %1048 = vrot.lane.b32.xlu1 %v9929_v44, %s9610_s30 }
 0x1d9   : > { %946 = vrot.lane.b32.xlu1 %v9940_v46, %s9608_s28  ;;  %922 = vrot.lane.b32.xlu0 %v9940_v46, %s9609_s29 }
 0x1dd   : > { %970 = vrot.lane.b32.xlu0 %v9940_v46, %s9610_s30  ;;  %1002 = vrot.lane.b32.xlu1 %v9947_v48, %s9609_s29 }
 0x1e1   : > { %1026 = vrot.lane.b32.xlu0 %v9947_v48, %s9608_s28  ;;  %1050 = vrot.lane.b32.xlu1 %v9947_v48, %s9610_s30 }
 0x1e5   : > { %948 = vrot.lane.b32.xlu1 %v9958_v50, %s9608_s28  ;;  %924 = vrot.lane.b32.xlu0 %v9958_v50, %s9609_s29 }
 0x1e9   : > { %972 = vrot.lane.b32.xlu0 %v9958_v50, %s9610_s30  ;;  %1004 = vrot.lane.b32.xlu1 %v9965_v52, %s9609_s29 }
 0x1ed   : > { %1028 = vrot.lane.b32.xlu0 %v9965_v52, %s9608_s28  ;;  %1052 = vrot.lane.b32.xlu1 %v9965_v52, %s9610_s30 }
 0x1f1   : > { %950 = vrot.lane.b32.xlu1 %v9975_v53, %s9608_s28  ;;  %926 = vrot.lane.b32.xlu0 %v9975_v53, %s9609_s29 }
 0x1f5   : > { %974 = vrot.lane.b32.xlu0 %v9975_v53, %s9610_s30  ;;  %1006 = vrot.lane.b32.xlu1 %v9981_v54, %s9609_s29 }
 0x1f9   : > { %1030 = vrot.lane.b32.xlu0 %v9981_v54, %s9608_s28  ;;  %1054 = vrot.lane.b32.xlu1 %v9981_v54, %s9610_s30 }
 0x1fd   : > { %952 = vrot.lane.b32.xlu1 %v9991_v55, %s9608_s28  ;;  %928 = vrot.lane.b32.xlu0 %v9991_v55, %s9609_s29 }
 0x201   : > { %976 = vrot.lane.b32.xlu0 %v9991_v55, %s9610_s30  ;;  %1008 = vrot.lane.b32.xlu1 %v9997_v56, %s9609_s29 }
 0x205   : > { %1032 = vrot.lane.b32.xlu0 %v9997_v56, %s9608_s28  ;;  %1056 = vrot.lane.b32.xlu1 %v9997_v56, %s9610_s30 }
 0x21b   : > { %v939_v59 = vpop.permute.xlu1 %938  ;;  %v915_v60 = vpop.permute.xlu0 %914 }
 0x21c   : > { %v1066_v8 = vcombine.low %v9864_v12, %v939_v59  ;;  %v1067_v30 = vcombine.high %v9864_v12, %v939_v59 }
 0x21e   : > { %v1074_v15 = vrot.slane %v1066_v8, %v10008_v7  ;;  %v1081_v41 = vrot.slane %v1067_v30, %v10008_v7 }
 0x21f   : > { %v963_v1 = vpop.permute.xlu0 %962  ;;  %v995_v5 = vpop.permute.xlu1 %994 }
 0x220   : > { %v1082_v9 = vcombine.low %v915_v60, %v963_v1  ;;  %v1083_v23 = vcombine.high %v915_v60, %v963_v1 }
 0x222   : > { %v1090_v11 = vrot.slane %v1082_v9, %v10008_v7  ;;  %v1097_v3 = vrot.slane %v1083_v23, %v10008_v7 }
 0x223   : > { %v1019_v13 = vpop.permute.xlu0 %1018  ;;  %v1043_v14 = vpop.permute.xlu1 %1042 }
 0x224   : > { %v1098_v17 = vcombine.low %v9871_v16, %v1019_v13  ;;  %v1099_v18 = vcombine.high %v9871_v16, %v1019_v13  ;;  %v1114_v19 = vcombine.low %v995_v5, %v1043_v14  ;;  %v1115_v20 = vcombine.high %v995_v5, %v1043_v14 }
 0x225   : > { %v1130_v24 = vcombine.low %v1074_v15, %v1090_v11  ;;  %v1131_v35 = vcombine.high %v1074_v15, %v1090_v11  ;;  %v1146_v49 = vcombine.low %v1081_v41, %v1097_v3  ;;  %v1147_v8 = vcombine.high %v1081_v41, %v1097_v3 }
 0x226   : > { %v1106_v25 = vrot.slane %v1098_v17, %v10008_v7  ;;  %v1122_v27 = vrot.slane %v1114_v19, %v10008_v7  ;;  %v1113_v31 = vrot.slane %v1099_v18, %v10008_v7  ;;  %v1129_v16 = vrot.slane %v1115_v20, %v10008_v7 }
 0x227   : > { %v10020_v28 = vpop.permute.xlu1 %940  ;;  %v10022_v29 = vpop.permute.xlu0 %916  ;;  %v1138_v38 = vrot.slane %v1130_v24, %v10016_v21  ;;  %v1145_v59 = vrot.slane %v1131_v35, %v10016_v21  ;;  %v1154_v17 = vrot.slane %v1146_v49, %v10016_v21 }
 0x228   : > { %v1162_v32 = vcombine.low %v1106_v25, %v1122_v27  ;;  %v1163_v33 = vcombine.high %v1106_v25, %v1122_v27  ;;  %v1178_v43 = vcombine.low %v1113_v31, %v1129_v16  ;;  %v1179_v60 = vcombine.high %v1113_v31, %v1129_v16 }
 0x229   : > { %v1202_v61 = vcombine.low %v9882_v22, %v10020_v28 }
 0x22a   : > { %v1170_v39 = vrot.slane %v1162_v32, %v10016_v21  ;;  %v1177_v47 = vrot.slane %v1163_v33, %v10016_v21  ;;  %v1186_v5 = vrot.slane %v1178_v43, %v10016_v21  ;;  %v1193_v25 = vrot.slane %v1179_v60, %v10016_v21 }
 0x22b   : > { %v965_v36 = vpop.permute.xlu0 %964  ;;  %v997_v37 = vpop.permute.xlu1 %996  ;;  %v1210_v20 = vrot.slane %v1202_v61, %v10008_v7  ;;  %v1161_v32 = vrot.slane %v1147_v8, %v10016_v21  ;;  %v1203_v33 = vcombine.high %v9882_v22, %v10020_v28 }
 0x22c   : > { %v10031_v45 = vcombine.low %v1138_v38, %v1170_v39  ;;  %v10033_v12 = vcombine.high %v1138_v38, %v1170_v39  ;;  %v1218_v51 = vcombine.low %v10022_v29, %v965_v36  ;;  %v10045_v1 = vcombine.low %v1145_v59, %v1177_v47 }
 0x22d   : > { %v10048_v9 = vcombine.high %v1145_v59, %v1177_v47  ;;  %v10064_v24 = vcombine.low %v1154_v17, %v1186_v5  ;;  %v10067_v27 = vcombine.high %v1154_v17, %v1186_v5  ;;  %v1219_v30 = vcombine.high %v10022_v29, %v965_v36 }
 0x22e   : > { %2218 = vrot.lane.b32.xlu0 %v10031_v45, %s9613_s8  ;;  %2220 = vrot.lane.b32.xlu1 %v10033_v12, %s9613_s8  ;;  %v1226_v10 = vrot.slane %v1218_v51, %v10008_v7  ;;  %v10081_v36 = vcombine.low %v1161_v32, %v1193_v25  ;;  %v10084_v38 = vcombine.high %v1161_v32, %v1193_v25 }
 0x22f   : > { %v1021_v57 = vpop.permute.xlu0 %1020  ;;  %v1045_v58 = vpop.permute.xlu1 %1044  ;;  %v1233_v39 = vrot.slane %v1219_v30, %v10008_v7  ;;  %v1217_v47 = vrot.slane %v1203_v33, %v10008_v7 }
 0x230   : > { %v1234_v62 = vcombine.low %v9889_v26, %v1021_v57  ;;  %v1250_v63 = vcombine.low %v997_v37, %v1045_v58  ;;  %v1235_v18 = vcombine.high %v9889_v26, %v1021_v57  ;;  %v1251_v19 = vcombine.high %v997_v37, %v1045_v58 }
 0x231   : > { %v1266_v31 = vcombine.low %v1210_v20, %v1226_v10  ;;  %v1267_v41 = vcombine.high %v1210_v20, %v1226_v10  ;;  %v1282_v61 = vcombine.low %v1217_v47, %v1233_v39 }
 0x232   : > { %v1242_v11 = vrot.slane %v1234_v62, %v10008_v7  ;;  %v1258_v13 = vrot.slane %v1250_v63, %v10008_v7  ;;  %2222 = vrot.lane.b32.xlu0 %v10045_v1, %s9613_s8  ;;  %2224 = vrot.lane.b32.xlu1 %v10048_v9, %s9613_s8  ;;  %v1249_v3 = vrot.slane %v1235_v18, %v10008_v7 }
 0x233   : > { %v10055_v14 = vpop.permute.xlu1 %942  ;;  %v10057_v15 = vpop.permute.xlu0 %918  ;;  %v1265_v35 = vrot.slane %v1251_v19, %v10008_v7  ;;  %v1274_v43 = vrot.slane %v1266_v31, %v10016_v21  ;;  %v1281_v8 = vrot.slane %v1267_v41, %v10016_v21  ;;  %v1290_v32 = vrot.slane %v1282_v61, %v10016_v21 }
 0x234   : > { %v1298_v23 = vcombine.low %v1242_v11, %v1258_v13  ;;  %v1299_v29 = vcombine.high %v1242_v11, %v1258_v13  ;;  %v1338_v11 = vcombine.low %v9902_v34, %v10055_v14 }
 0x235   : > { %v1314_v49 = vcombine.low %v1249_v3, %v1265_v35  ;;  %v1315_v10 = vcombine.high %v1249_v3, %v1265_v35 }
 0x236   : > { %2226 = vrot.lane.b32.xlu0 %v10064_v24, %s9613_s8  ;;  %2228 = vrot.lane.b32.xlu1 %v10067_v27, %s9613_s8  ;;  %v1306_v37 = vrot.slane %v1298_v23, %v10016_v21  ;;  %v1313_v59 = vrot.slane %v1299_v29, %v10016_v21  ;;  %v1283_v23 = vcombine.high %v1217_v47, %v1233_v39 }
 0x237   : > { %v10072_v26 = vpop.permute.xlu0 %966  ;;  %v999_v16 = vpop.permute.xlu1 %998  ;;  %v1322_v19 = vrot.slane %v1314_v49, %v10016_v21  ;;  %v1346_v35 = vrot.slane %v1338_v11, %v10008_v7  ;;  %v1329_v39 = vrot.slane %v1315_v10, %v10016_v21 }
 0x238   : > { %v10094_v58 = vcombine.low %v1274_v43, %v1306_v37  ;;  %v10097_v60 = vcombine.high %v1274_v43, %v1306_v37  ;;  %v1354_v62 = vcombine.low %v10057_v15, %v10072_v26  ;;  %v10114_v18 = vcombine.low %v1281_v8, %v1313_v59 }
 0x239   : > { %v10117_v20 = vcombine.high %v1281_v8, %v1313_v59  ;;  %v10131_v37 = vcombine.low %v1290_v32, %v1322_v19  ;;  %v10134_v41 = vcombine.high %v1290_v32, %v1322_v19  ;;  %v1355_v43 = vcombine.high %v10057_v15, %v10072_v26 }
 0x23a   : > { %2230 = vrot.lane.b32.xlu0 %v10081_v36, %s9613_s8  ;;  %2232 = vrot.lane.b32.xlu1 %v10084_v38, %s9613_s8  ;;  %v1362_v25 = vrot.slane %v1354_v62, %v10008_v7 }
 0x23b   : > { %v1023_v22 = vpop.permute.xlu0 %1022  ;;  %v1047_v28 = vpop.permute.xlu1 %1046  ;;  %v1369_v61 = vrot.slane %v1355_v43, %v10008_v7 }
 0x23c   : > { %v1370_v51 = vcombine.low %v9911_v40, %v1023_v22  ;;  %v1386_v57 = vcombine.low %v999_v16, %v1047_v28  ;;  %v1371_v33 = vcombine.high %v9911_v40, %v1023_v22  ;;  %v1387_v3 = vcombine.high %v999_v16, %v1047_v28 }
 0x23d   : > { %v1402_v47 = vcombine.low %v1346_v35, %v1362_v25  ;;  %v1297_v22 = vrot.slane %v1283_v23, %v10016_v21  ;;  %v1339_v28 = vcombine.high %v9902_v34, %v10055_v14  ;;  %v1403_v62 = vcombine.high %v1346_v35, %v1362_v25 }
 0x23e   : > { %2234 = vrot.lane.b32.xlu0 %v10094_v58, %s9613_s8  ;;  %2236 = vrot.lane.b32.xlu1 %v10097_v60, %s9613_s8  ;;  %v1378_v13 = vrot.slane %v1370_v51, %v10008_v7  ;;  %v1394_v17 = vrot.slane %v1386_v57, %v10008_v7  ;;  %v1385_v49 = vrot.slane %v1371_v33, %v10008_v7 }
 0x23f   : > { %v10103_v63 = vpop.permute.xlu1 %944  ;;  %v10105_v5 = vpop.permute.xlu0 %920  ;;  %v1401_v51 = vrot.slane %v1387_v3, %v10008_v7  ;;  %v10147_v15 = vcombine.low %v1297_v22, %v1329_v39  ;;  %v10150_v59 = vcombine.high %v1297_v22, %v1329_v39  ;;  %v1410_v8 = vrot.slane %v1402_v47, %v10016_v21 }
 0x240   : > { %v1434_v29 = vcombine.low %v1378_v13, %v1394_v17  ;;  %v1435_v57 = vcombine.high %v1378_v13, %v1394_v17  ;;  %v1353_v10 = vrot.slane %v1339_v28, %v10008_v7  ;;  %v1474_v43 = vcombine.low %v9922_v42, %v10103_v63 }
 0x241   : > { %v1450_v11 = vcombine.low %v1385_v49, %v1401_v51  ;;  %v1451_v39 = vcombine.high %v1385_v49, %v1401_v51 }
 0x242   : > { %2238 = vrot.lane.b32.xlu0 %v10114_v18, %s9613_s8  ;;  %2240 = vrot.lane.b32.xlu1 %v10117_v20, %s9613_s8  ;;  %v1442_v26 = vrot.slane %v1434_v29, %v10016_v21  ;;  %v1449_v23 = vrot.slane %v1435_v57, %v10016_v21  ;;  %v1418_v32 = vcombine.low %v1353_v10, %v1369_v61 }
 0x243   : > { %v10122_v30 = vpop.permute.xlu0 %968  ;;  %v10124_v31 = vpop.permute.xlu1 %1000  ;;  %v1417_v29 = vrot.slane %v1403_v62, %v10016_v21  ;;  %v1458_v57 = vrot.slane %v1450_v11, %v10016_v21 }
 0x244   : > { %v10165_v19 = vcombine.low %v1410_v8, %v1442_v26  ;;  %v10168_v25 = vcombine.high %v1410_v8, %v1442_v26  ;;  %v1490_v33 = vcombine.low %v10105_v5, %v10122_v30  ;;  %v1419_v8 = vcombine.high %v1353_v10, %v1369_v61 }
 0x245   : > { %v10185_v28 = vcombine.low %v1417_v29, %v1449_v23  ;;  %v10188_v26 = vcombine.high %v1417_v29, %v1449_v23  ;;  %v1426_v49 = vrot.slane %v1418_v32, %v10016_v21  ;;  %v1482_v61 = vrot.slane %v1474_v43, %v10008_v7 }
 0x246   : > { %2242 = vrot.lane.b32.xlu0 %v10131_v37, %s9613_s8  ;;  %2244 = vrot.lane.b32.xlu1 %v10134_v41, %s9613_s8  ;;  %v1498_v62 = vrot.slane %v1490_v33, %v10008_v7  ;;  %v1465_v33 = vrot.slane %v1451_v39, %v10016_v21 }
 0x247   : > { %v1025_v40 = vpop.permute.xlu0 %1024  ;;  %v1049_v16 = vpop.permute.xlu1 %1048  ;;  %v10203_v23 = vcombine.low %v1426_v49, %v1458_v57  ;;  %v10206_v29 = vcombine.high %v1426_v49, %v1458_v57 }
 0x248   : > { %v1506_v13 = vcombine.low %v9929_v44, %v1025_v40  ;;  %v1522_v17 = vcombine.low %v10124_v31, %v1049_v16  ;;  %v1507_v51 = vcombine.high %v9929_v44, %v1025_v40  ;;  %v1491_v44 = vcombine.high %v10105_v5, %v10122_v30 }
 0x249   : > { %v1433_v40 = vrot.slane %v1419_v8, %v10016_v21 }
 0x24a   : > { %2246 = vrot.lane.b32.xlu0 %v10147_v15, %s9613_s8  ;;  %2248 = vrot.lane.b32.xlu1 %v10150_v59, %s9613_s8  ;;  %v1514_v47 = vrot.slane %v1506_v13, %v10008_v7  ;;  %v1530_v22 = vrot.slane %v1522_v17, %v10008_v7  ;;  %v1523_v13 = vcombine.high %v10124_v31, %v1049_v16 }
 0x24b   : > { %v10155_v34 = vpop.permute.xlu1 %946  ;;  %v10157_v14 = vpop.permute.xlu0 %922  ;;  %v1538_v31 = vcombine.low %v1482_v61, %v1498_v62  ;;  %v1475_v16 = vcombine.high %v9922_v42, %v10103_v63  ;;  %v1521_v32 = vrot.slane %v1507_v51, %v10008_v7  ;;  %v10219_v57 = vcombine.low %v1433_v40, %v1465_v33 }
 0x24c   : > { %v1570_v10 = vcombine.low %v1514_v47, %v1530_v22  ;;  %v1537_v43 = vrot.slane %v1523_v13, %v10008_v7  ;;  %v1571_v39 = vcombine.high %v1514_v47, %v1530_v22  ;;  %v10226_v8 = vcombine.high %v1433_v40, %v1465_v33 }
 0x24d   : > { %v1505_v42 = vrot.slane %v1491_v44, %v10008_v7  ;;  %v1539_v63 = vcombine.high %v1482_v61, %v1498_v62  ;;  %v1546_v51 = vrot.slane %v1538_v31, %v10016_v21  ;;  %v1489_v47 = vrot.slane %v1475_v16, %v10008_v7 }
 0x24e   : > { %2250 = vrot.lane.b32.xlu0 %v10165_v19, %s9613_s8  ;;  %2252 = vrot.lane.b32.xlu1 %v10168_v25, %s9613_s8  ;;  %v1578_v5 = vrot.slane %v1570_v10, %v10016_v21  ;;  %v1586_v22 = vcombine.low %v1521_v32, %v1537_v43  ;;  %v1585_v62 = vrot.slane %v1571_v39, %v10016_v21 }
 0x24f   : > { %v10174_v3 = vpop.permute.xlu0 %970  ;;  %v10176_v35 = vpop.permute.xlu1 %1002  ;;  %v1554_v44 = vcombine.low %v1489_v47, %v1505_v42  ;;  %v1553_v40 = vrot.slane %v1539_v63, %v10016_v21  ;;  %v1587_v16 = vcombine.high %v1521_v32, %v1537_v43  ;;  %v1610_v2 = vcombine.low %v9940_v46, %v10155_v34 }
 0x250   : > { %v10239_v33 = vcombine.low %v1546_v51, %v1578_v5  ;;  %v10242_v61 = vcombine.high %v1546_v51, %v1578_v5  ;;  %v1626_v31 = vcombine.low %v10157_v14, %v10174_v3  ;;  %v1594_v4 = vrot.slane %v1586_v22, %v10016_v21 }
 0x251   : > { %v10259_v51 = vcombine.low %v1553_v40, %v1585_v62  ;;  %v10262_v63 = vcombine.high %v1553_v40, %v1585_v62  ;;  %v1555_v32 = vcombine.high %v1489_v47, %v1505_v42  ;;  %v1618_v22 = vrot.slane %v1610_v2, %v10008_v7 }
 0x252   : > { %2254 = vrot.lane.b32.xlu0 %v10185_v28, %s9613_s8  ;;  %2256 = vrot.lane.b32.xlu1 %v10188_v26, %s9613_s8  ;;  %14628 = vst [vmem:[#allocation9_spill] sm:$0xff] %v10239_v33  ;;  %14629 = vst [vmem:[#allocation10_spill] sm:$0xff] %v10242_v61  ;;  %v1634_v43 = vrot.slane %v1626_v31, %v10008_v7  ;;  %v1601_v47 = vrot.slane %v1587_v16, %v10016_v21 }
 0x253   : > { %v10198_v17 = vpop.permute.xlu0 %1026  ;;  %v10200_v11 = vpop.permute.xlu1 %1050  ;;  %14630 = vst [vmem:[#allocation11_spill] sm:$0xff] %v10259_v51  ;;  %14631 = vst [vmem:[#allocation12_spill] sm:$0xff] %v10262_v63  ;;  %v1611_v2 = vcombine.high %v9940_v46, %v10155_v34 }
 0x254   : > { %v1642_v13 = vcombine.low %v9947_v48, %v10198_v17  ;;  %v1658_v10 = vcombine.low %v10176_v35, %v10200_v11 }
 0x255   : > { %v1625_v34 = vrot.slane %v1611_v2, %v10008_v7 }
 0x256   : > { %2258 = vrot.lane.b32.xlu0 %v10203_v23, %s9613_s8  ;;  %2260 = vrot.lane.b32.xlu1 %v10206_v29, %s9613_s8  ;;  %v1650_v39 = vrot.slane %v1642_v13, %v10008_v7  ;;  %v1666_v5 = vrot.slane %v1658_v10, %v10008_v7  ;;  %v1659_v13 = vcombine.high %v10176_v35, %v10200_v11 }
 0x257   : > { %v10222_v30 = vpop.permute.xlu1 %948  ;;  %v10224_v49 = vpop.permute.xlu0 %924  ;;  %v1569_v35 = vrot.slane %v1555_v32, %v10016_v21  ;;  %v1675_v32 = vcombine.high %v1618_v22, %v1634_v43 }
 0x258   : > { %v1706_v10 = vcombine.low %v1650_v39, %v1666_v5 }
 0x25a   : > { %2262 = vrot.lane.b32.xlu0 %v10219_v57, %s9613_s8  ;;  %2264 = vrot.lane.b32.xlu1 %v10226_v8, %s9613_s8 }
 0x25b   : > { %v10251_v0 = vpop.permute.xlu0 %972  ;;  %v10253_v6 = vpop.permute.xlu1 %1004 }
 0x25e   : > { %2266 = vrot.lane.b32.xlu0 %v10239_v33, %s9613_s8  ;;  %2268 = vrot.lane.b32.xlu1 %v10242_v61, %s9613_s8  ;;  %v1562_v33 = vrot.slane %v1554_v44, %v10016_v21  ;;  %v1643_v61 = vcombine.high %v9947_v48, %v10198_v17  ;;  %v1627_v48 = vcombine.high %v10157_v14, %v10174_v3 }
 0x25f   : > { %v1029_v62 = vpop.permute.xlu0 %1028  ;;  %v1053_v31 = vpop.permute.xlu1 %1052  ;;  %v1674_v17 = vcombine.low %v1618_v22, %v1634_v43  ;;  %v1673_v44 = vrot.slane %v1659_v13, %v10008_v7  ;;  %v1714_v14 = vrot.slane %v1706_v10, %v10016_v21  ;;  %v10294_v3 = vcombine.high %v1569_v35, %v1601_v47 }
 0x260   : > { %v10275_v42 = vcombine.low %v1562_v33, %v1594_v4  ;;  %v10278_v40 = vcombine.high %v1562_v33, %v1594_v4  ;;  %v1657_v11 = vrot.slane %v1643_v61, %v10008_v7  ;;  %v1707_v4 = vcombine.high %v1650_v39, %v1666_v5 }
 0x261   : > { %v10291_v33 = vcombine.low %v1569_v35, %v1601_v47  ;;  %14633 = vst [vmem:[#allocation14_spill] sm:$0xff] %v10294_v3  ;;  %v1641_v16 = vrot.slane %v1627_v48, %v10008_v7  ;;  %v1682_v46 = vrot.slane %v1674_v17, %v10016_v21  ;;  %v1778_v5 = vcombine.low %v9965_v52, %v1029_v62 }
 0x262   : > { %2270 = vrot.lane.b32.xlu0 %v10259_v51, %s9613_s8  ;;  %2272 = vrot.lane.b32.xlu1 %v10262_v63, %s9613_s8  ;;  %v1722_v61 = vcombine.low %v1657_v11, %v1673_v44  ;;  %v1794_v10 = vcombine.low %v10253_v6, %v1053_v31  ;;  %v1721_v22 = vrot.slane %v1707_v4, %v10016_v21 }
 0x263   : > { %14632 = vst [vmem:[#allocation13_spill] sm:$0xff] %v10291_v33  ;;  %v10301_v13 = vpop.permute.xlu1 %950  ;;  %v10303_v39 = vpop.permute.xlu0 %926  ;;  %v10309_v43 = vcombine.low %v1682_v46, %v1714_v14  ;;  %v10312_v47 = vcombine.high %v1682_v46, %v1714_v14  ;;  %v1690_v48 = vcombine.low %v1625_v34, %v1641_v16  ;;  %v1762_v17 = vcombine.low %v10224_v49, %v10251_v0 }
 0x264   : > { %v1689_v35 = vrot.slane %v1675_v32, %v10016_v21  ;;  %v1723_v2 = vcombine.high %v1657_v11, %v1673_v44  ;;  %v1786_v4 = vrot.slane %v1778_v5, %v10008_v7  ;;  %v1802_v14 = vrot.slane %v1794_v10, %v10008_v7 }
 0x265   : > { %14634 = vst [vmem:[#allocation15_spill] sm:$0xff] %v10309_v43  ;;  %14635 = vst [vmem:[#allocation16_spill] sm:$0xff] %v10312_v47  ;;  %v1691_v11 = vcombine.high %v1625_v34, %v1641_v16  ;;  %v1770_v44 = vrot.slane %v1762_v17, %v10008_v7  ;;  %v1698_v5 = vrot.slane %v1690_v48, %v10016_v21 }
 0x266   : > { %2274 = vrot.lane.b32.xlu0 %v10275_v42, %s9613_s8  ;;  %2276 = vrot.lane.b32.xlu1 %v10278_v40, %s9613_s8  ;;  %v10325_v46 = vcombine.low %v1689_v35, %v1721_v22  ;;  %v10332_v32 = vcombine.high %v1689_v35, %v1721_v22  ;;  %v1779_v10 = vcombine.high %v9965_v52, %v1029_v62 }
 0x267   : > { %v10328_v63 = vpop.permute.xlu0 %974  ;;  %v1842_v51 = vcombine.low %v1786_v4, %v1802_v14  ;;  %v1737_v16 = vrot.slane %v1723_v2, %v10016_v21  ;;  %v1763_v17 = vcombine.high %v10224_v49, %v10251_v0  ;;  %v1747_v52 = vcombine.high %v9958_v50, %v10222_v30 }
 0x268   : > { %v1793_v62 = vrot.slane %v1779_v10, %v10008_v7 }
 0x269   : > { %v1850_v49 = vrot.slane %v1842_v51, %v10016_v21 }
 0x26a   : > { %2278 = vrot.lane.b32.xlu0 %v10291_v33, %s9613_s8  ;;  %2280 = vrot.lane.b32.xlu1 %v10294_v3, %s9613_s8  ;;  %v1746_v3 = vcombine.low %v9958_v50, %v10222_v30  ;;  %v1730_v33 = vrot.slane %v1722_v61, %v10016_v21  ;;  %v1761_v30 = vrot.slane %v1747_v52, %v10008_v7 }
 0x26c   : > { %v1754_v61 = vrot.slane %v1746_v3, %v10008_v7  ;;  %v10343_v22 = vcombine.low %v1698_v5, %v1730_v33  ;;  %v10346_v34 = vcombine.high %v1698_v5, %v1730_v33  ;;  %v1031_v3 = vpop.permute.xlu0 %1030  ;;  %v1843_v33 = vcombine.high %v1786_v4, %v1802_v14 }
 0x26d   : > { %v1914_v4 = vcombine.low %v9981_v54, %v1031_v3 }
 0x26e   : > { %2282 = vrot.lane.b32.xlu0 %v10309_v43, %s9613_s8  ;;  %2284 = vrot.lane.b32.xlu1 %v10312_v47, %s9613_s8  ;;  %v10330_v43 = vpop.permute.xlu1 %1006  ;;  %v1795_v47 = vcombine.high %v10253_v6, %v1053_v31  ;;  %14636 = vst [vmem:[#allocation17_spill] sm:$0xff] %v10346_v34  ;;  %v1810_v48 = vcombine.low %v1754_v61, %v1770_v44 }
 0x26f   : > { %v1705_v6 = vrot.slane %v1691_v11, %v10016_v21  ;;  %v1777_v11 = vrot.slane %v1763_v17, %v10008_v7  ;;  %v1811_v5 = vcombine.high %v1754_v61, %v1770_v44  ;;  %v1857_v10 = vrot.slane %v1843_v33, %v10016_v21 }
 0x270   : > { %v1809_v31 = vrot.slane %v1795_v47, %v10008_v7  ;;  %v1818_v50 = vrot.slane %v1810_v48, %v10016_v21  ;;  %v10378_v61 = vpop.permute.xlu0 %928  ;;  %v1898_v48 = vcombine.low %v10303_v39, %v10328_v63  ;;  %v1922_v33 = vrot.slane %v1914_v4, %v10008_v7 }
 0x271   : > { %v10359_v0 = vcombine.low %v1705_v6, %v1737_v16  ;;  %v10362_v2 = vcombine.high %v1705_v6, %v1737_v16  ;;  %v1826_v17 = vcombine.low %v1761_v30, %v1777_v11  ;;  %v1825_v6 = vrot.slane %v1811_v5, %v10016_v21 }
 0x272   : > { %2286 = vrot.lane.b32.xlu0 %v10325_v46, %s9613_s8  ;;  %2288 = vrot.lane.b32.xlu1 %v10332_v32, %s9613_s8  ;;  %v1055_v35 = vpop.permute.xlu1 %1054  ;;  %v1858_v47 = vcombine.low %v1793_v62, %v1809_v31  ;;  %v10373_v14 = vcombine.low %v1818_v50, %v1850_v49  ;;  %v10380_v16 = vcombine.high %v1818_v50, %v1850_v49 }
 0x273   : > { %14637 = vst [vmem:[#allocation18_spill] sm:$0xff] %v10359_v0  ;;  %14638 = vst [vmem:[#allocation19_spill] sm:$0xff] %v10362_v2  ;;  %v1930_v51 = vcombine.low %v10330_v43, %v1055_v35  ;;  %v1859_v52 = vcombine.high %v1793_v62, %v1809_v31  ;;  %v10393_v50 = vcombine.low %v1825_v6, %v1857_v10 }
 0x274   : > { %14639 = vst [vmem:[#allocation20_spill] sm:$0xff] %v10373_v14  ;;  %14640 = vst [vmem:[#allocation21_spill] sm:$0xff] %v10380_v16  ;;  %v1906_v5 = vrot.slane %v1898_v48, %v10008_v7  ;;  %v1834_v62 = vrot.slane %v1826_v17, %v10016_v21  ;;  %v1915_v31 = vcombine.high %v9981_v54, %v1031_v3 }
 0x275   : > { %v1938_v49 = vrot.slane %v1930_v51, %v10008_v7  ;;  %14641 = vst [vmem:[#allocation22_spill] sm:$0xff] %v10393_v50  ;;  %v1931_v4 = vcombine.high %v10330_v43, %v1055_v35  ;;  %v1899_v54 = vcombine.high %v10303_v39, %v10328_v63  ;;  %v1883_v35 = vcombine.high %v9975_v53, %v10301_v13 }
 0x276   : > { %2290 = vrot.lane.b32.xlu0 %v10343_v22, %s9613_s8  ;;  %2292 = vrot.lane.b32.xlu1 %v10346_v34, %s9613_s8  ;;  %v10376_v44 = vpop.permute.xlu1 %952  ;;  %v10396_v34 = vcombine.high %v1825_v6, %v1857_v10  ;;  %v1873_v10 = vrot.slane %v1859_v52, %v10016_v21 }
 0x277   : > { %v1945_v17 = vrot.slane %v1931_v4, %v10008_v7 }
 0x278   : > { %14642 = vst [vmem:[#allocation23_spill] sm:$0xff] %v10396_v34 }
 0x27a   : > { %2294 = vrot.lane.b32.xlu0 %v10359_v0, %s9613_s8  ;;  %2296 = vrot.lane.b32.xlu1 %v10362_v2, %s9613_s8  ;;  %v1882_v2 = vcombine.low %v9975_v53, %v10301_v13  ;;  %v1866_v0 = vrot.slane %v1858_v47, %v10016_v21  ;;  %v10406_v51 = vpop.permute.xlu1 %1008  ;;  %v1897_v13 = vrot.slane %v1883_v35, %v10008_v7 }
 0x27c   : > { %v10411_v47 = vcombine.low %v1834_v62, %v1866_v0  ;;  %v10414_v48 = vcombine.high %v1834_v62, %v1866_v0  ;;  %v1979_v0 = vcombine.high %v1922_v33, %v1938_v49 }
 0x27e   : > { %2298 = vrot.lane.b32.xlu0 %v10373_v14, %s9613_s8  ;;  %2300 = vrot.lane.b32.xlu1 %v10380_v16, %s9613_s8  ;;  %v1827_v14 = vcombine.high %v1761_v30, %v1777_v11  ;;  %v10404_v16 = vpop.permute.xlu0 %976  ;;  %v1890_v11 = vrot.slane %v1882_v2, %v10008_v7  ;;  %v1978_v30 = vcombine.low %v1922_v33, %v1938_v49  ;;  %v1057_v52 = vpop.permute.xlu1 %1056 }
 0x27f   : > { %14643 = vst [vmem:[#allocation24_spill] sm:$0xff] %v10411_v47  ;;  %14644 = vst [vmem:[#allocation25_spill] sm:$0xff] %v10414_v48  ;;  %v1929_v2 = vrot.slane %v1915_v31, %v10008_v7  ;;  %v2066_v49 = vcombine.low %v10406_v51, %v1057_v52 }
 0x280   : > { %v1946_v43 = vcombine.low %v1890_v11, %v1906_v5  ;;  %v1841_v3 = vrot.slane %v1827_v14, %v10016_v21  ;;  %v1986_v63 = vrot.slane %v1978_v30, %v10016_v21  ;;  %v1913_v14 = vrot.slane %v1899_v54, %v10008_v7 }
 0x281   : > { %v1994_v31 = vcombine.low %v1929_v2, %v1945_v17  ;;  %v1993_v30 = vrot.slane %v1979_v0, %v10016_v21  ;;  %v2074_v0 = vrot.slane %v2066_v49, %v10008_v7 }
 0x282   : > { %2302 = vrot.lane.b32.xlu0 %v10393_v50, %s9613_s8  ;;  %2304 = vrot.lane.b32.xlu1 %v10396_v34, %s9613_s8  ;;  %v10427_v6 = vcombine.low %v1841_v3, %v1873_v10  ;;  %v1033_v39 = vpop.permute.xlu0 %1032  ;;  %v10430_v62 = vcombine.high %v1841_v3, %v1873_v10  ;;  %v1954_v53 = vrot.slane %v1946_v43, %v10016_v21 }
 0x283   : > { %v2050_v33 = vcombine.low %v9997_v56, %v1033_v39  ;;  %v2034_v10 = vcombine.low %v10378_v61, %v10404_v16  ;;  %v1995_v43 = vcombine.high %v1929_v2, %v1945_v17  ;;  %v2018_v3 = vcombine.low %v9991_v55, %v10376_v44 }
 0x284   : > { %14645 = vst [vmem:[#allocation26_spill] sm:$0xff] %v10427_v6  ;;  %14646 = vst [vmem:[#allocation27_spill] sm:$0xff] %v10430_v62  ;;  %v10441_v4 = vcombine.low %v1954_v53, %v1986_v63  ;;  %v2051_v49 = vcombine.high %v9997_v56, %v1033_v39 }
 0x285   : > { %v2058_v35 = vrot.slane %v2050_v33, %v10008_v7  ;;  %v2026_v17 = vrot.slane %v2018_v3, %v10008_v7  ;;  %v2009_v33 = vrot.slane %v1995_v43, %v10016_v21  ;;  %v2019_v43 = vcombine.high %v9991_v55, %v10376_v44 }
 0x286   : > { %2306 = vrot.lane.b32.xlu0 %v10411_v47, %s9613_s8  ;;  %2308 = vrot.lane.b32.xlu1 %v10414_v48, %s9613_s8  ;;  %v1947_v47 = vcombine.high %v1890_v11, %v1906_v5  ;;  %14647 = vst [vmem:[#allocation28_spill] sm:$0xff] %v10441_v4  ;;  %v10444_v5 = vcombine.high %v1954_v53, %v1986_v63 }
 0x287   : > { %v1962_v11 = vcombine.low %v1897_v13, %v1913_v14  ;;  %v2002_v53 = vrot.slane %v1994_v31, %v10016_v21  ;;  %v2033_v44 = vrot.slane %v2019_v43, %v10008_v7 }
 0x288   : > { %14648 = vst [vmem:[#allocation29_spill] sm:$0xff] %v10444_v5  ;;  %v1961_v54 = vrot.slane %v1947_v47, %v10016_v21  ;;  %v2042_v47 = vrot.slane %v2034_v10, %v10008_v7 }
 0x289   : > { %v1970_v2 = vrot.slane %v1962_v11, %v10016_v21  ;;  %v2035_v11 = vcombine.high %v10378_v61, %v10404_v16 }
 0x28a   : > { %2310 = vrot.lane.b32.xlu0 %v10427_v6, %s9613_s8  ;;  %2312 = vrot.lane.b32.xlu1 %v10430_v62, %s9613_s8  ;;  %v10457_v63 = vcombine.low %v1961_v54, %v1993_v30  ;;  %v1963_v62 = vcombine.high %v1897_v13, %v1913_v14  ;;  %v10460_v6 = vcombine.high %v1961_v54, %v1993_v30 }
 0x28b   : > { %v2067_v14 = vcombine.high %v10406_v51, %v1057_v52  ;;  %v2114_v13 = vcombine.low %v2058_v35, %v2074_v0  ;;  %v10472_v31 = vcombine.low %v1970_v2, %v2002_v53  ;;  %v10474_v30 = vcombine.high %v1970_v2, %v2002_v53 }
 0x28c   : > { %14649 = vst [vmem:[#allocation30_spill] sm:$0xff] %v10457_v63  ;;  %14650 = vst [vmem:[#allocation31_spill] sm:$0xff] %v10460_v6  ;;  %v1977_v10 = vrot.slane %v1963_v62, %v10016_v21  ;;  %v2082_v54 = vcombine.low %v2026_v17, %v2042_v47  ;;  %v2065_v51 = vrot.slane %v2051_v49, %v10008_v7 }
 0x28d   : > { %14651 = vst [vmem:[#allocation32_spill] sm:$0xff] %v10472_v31  ;;  %14652 = vst [vmem:[#allocation33_spill] sm:$0xff] %v10474_v30  ;;  %v2081_v39 = vrot.slane %v2067_v14, %v10008_v7  ;;  %v2115_v52 = vcombine.high %v2058_v35, %v2074_v0  ;;  %v2122_v62 = vrot.slane %v2114_v13, %v10016_v21 }
 0x28e   : > { %2314 = vrot.lane.b32.xlu0 %v10441_v4, %s9613_s8  ;;  %2316 = vrot.lane.b32.xlu1 %v10444_v5, %s9613_s8  ;;  %v10485_v56 = vcombine.low %v1977_v10, %v2009_v33  ;;  %v10490_v61 = vcombine.high %v1977_v10, %v2009_v33  ;;  %v2049_v16 = vrot.slane %v2035_v11, %v10008_v7 }
 0x28f   : > { %v2083_v3 = vcombine.high %v2026_v17, %v2042_v47  ;;  %v2090_v55 = vrot.slane %v2082_v54, %v10016_v21  ;;  %v2130_v53 = vcombine.low %v2065_v51, %v2081_v39  ;;  %v2129_v35 = vrot.slane %v2115_v52, %v10016_v21 }
 0x290   : > { %14653 = vst [vmem:[#allocation34_spill] sm:$0xff] %v10485_v56  ;;  %14654 = vst [vmem:[#allocation35_spill] sm:$0xff] %v10490_v61  ;;  %v2098_v33 = vcombine.low %v2033_v44, %v2049_v16  ;;  %v2131_v17 = vcombine.high %v2065_v51, %v2081_v39  ;;  %v2099_v52 = vcombine.high %v2033_v44, %v2049_v16 }
 0x291   : > { %v10499_v2 = vcombine.low %v2090_v55, %v2122_v62  ;;  %v10502_v0 = vcombine.high %v2090_v55, %v2122_v62  ;;  %v2097_v47 = vrot.slane %v2083_v3, %v10016_v21  ;;  %v2138_v10 = vrot.slane %v2130_v53, %v10016_v21 }
 0x292   : > { %2318 = vrot.lane.b32.xlu0 %v10457_v63, %s9613_s8  ;;  %2320 = vrot.lane.b32.xlu1 %v10460_v6, %s9613_s8  ;;  %v2106_v51 = vrot.slane %v2098_v33, %v10016_v21 }
 0x293   : > { %14655 = vst [vmem:[#allocation36_spill] sm:$0xff] %v10499_v2  ;;  %14656 = vst [vmem:[#allocation37_spill] sm:$0xff] %v10502_v0  ;;  %v10509_v13 = vcombine.low %v2097_v47, %v2129_v35  ;;  %v10518_v43 = vcombine.high %v2097_v47, %v2129_v35  ;;  %v2113_v35 = vrot.slane %v2099_v52, %v10016_v21 }
 0x294   : > { %v10525_v62 = vcombine.low %v2106_v51, %v2138_v10  ;;  %v10532_v55 = vcombine.high %v2106_v51, %v2138_v10 }
 0x295   : > { %14657 = vst [vmem:[#allocation38_spill] sm:$0xff] %v10509_v13  ;;  %14658 = vst [vmem:[#allocation39_spill] sm:$0xff] %v10518_v43 }
 0x296   : > { %2322 = vrot.lane.b32.xlu0 %v10472_v31, %s9613_s8  ;;  %2324 = vrot.lane.b32.xlu1 %v10474_v30, %s9613_s8  ;;  %14659 = vst [vmem:[#allocation40_spill] sm:$0xff] %v10525_v62  ;;  %14660 = vst [vmem:[#allocation41_spill] sm:$0xff] %v10532_v55 }
 0x29a   : > { %2326 = vrot.lane.b32.xlu0 %v10485_v56, %s9613_s8  ;;  %2328 = vrot.lane.b32.xlu1 %v10490_v61, %s9613_s8 }
 0x29e   : > { %2330 = vrot.lane.b32.xlu0 %v10499_v2, %s9613_s8  ;;  %2332 = vrot.lane.b32.xlu1 %v10502_v0, %s9613_s8 }
 0x2a0   : > { %v2219_v49 = vpop.permute.xlu0 %2218  ;;  %v2221_v14 = vpop.permute.xlu1 %2220 }
 0x2a1   : > { %v10513_v11 = vmax.f32 %v10031_v45, %v2219_v49  ;;  %v10516_v54 = vmax.f32 %v10033_v12, %v2221_v14  ;;  %v2145_v45 = vrot.slane %v2131_v17, %v10016_v21 }
 0x2a2   : > { %2334 = vrot.lane.b32.xlu0 %v10509_v13, %s9613_s8  ;;  %2336 = vrot.lane.b32.xlu1 %v10518_v43, %s9613_s8 }
 0x2a3   : > { %v2481_v12 = vrot.slane %v10513_v11, %v10008_v7  ;;  %v2496_v3 = vrot.slane %v10516_v54, %v10008_v7  ;;  %v10543_v49 = vcombine.low %v2113_v35, %v2145_v45 }
 0x2a4   : > { %v2223_v39 = vpop.permute.xlu0 %2222  ;;  %v2225_v16 = vpop.permute.xlu1 %2224 }
 0x2a5   : > { %v2412_v44 = vmax.f32 %v10045_v1, %v2223_v39  ;;  %v2413_v53 = vmax.f32 %v10048_v9, %v2225_v16  ;;  %14661 = vst [vmem:[#allocation42_spill] sm:$0xff] %v10543_v49  ;;  %v2505_v14 = vcombine.high %v2481_v12, %v2496_v3  ;;  %v10546_v9 = vcombine.high %v2113_v35, %v2145_v45 }
 0x2a6   : > { %2338 = vrot.lane.b32.xlu0 %v10525_v62, %s9613_s8  ;;  %2340 = vrot.lane.b32.xlu1 %v10532_v55, %s9613_s8 }
 0x2a7   : > { %v2547_v33 = vrot.slane %v2412_v44, %v10008_v7  ;;  %v2562_v47 = vrot.slane %v2413_v53, %v10008_v7  ;;  %14662 = vst [vmem:[#allocation43_spill] sm:$0xff] %v10546_v9 }
 0x2a8   : > { %v2227_v17 = vpop.permute.xlu0 %2226  ;;  %v2229_v10 = vpop.permute.xlu1 %2228 }
 0x2a9   : > { %v2414_v1 = vmax.f32 %v10064_v24, %v2227_v17  ;;  %v2570_v51 = vcombine.low %v2547_v33, %v2562_v47  ;;  %v2571_v39 = vcombine.high %v2547_v33, %v2562_v47  ;;  %v2415_v16 = vmax.f32 %v10067_v27, %v2229_v10 }
 0x2aa   : > { %2342 = vrot.lane.b32.xlu0 %v10543_v49, %s9613_s8  ;;  %2344 = vrot.lane.b32.xlu1 %v10546_v9, %s9613_s8  ;;  %v2519_v47 = vrot.slane %v2505_v14, %v10016_v21 }
 0x2ab   : > { %v2613_v52 = vrot.slane %v2414_v1, %v10008_v7  ;;  %v10555_v62 = vrot.slane %v2571_v39, %v10016_v21  ;;  %v10558_v24 = vrot.slane %v2570_v51, %v10016_v21  ;;  %v2628_v45 = vrot.slane %v2415_v16, %v10008_v7 }
 0x2ac   : > { %v2231_v55 = vpop.permute.xlu0 %2230  ;;  %v2233_v33 = vpop.permute.xlu1 %2232 }
 0x2ad   : > { %14663 = vst [vmem:[#allocation44_spill] sm:$0xff] %v10558_v24  ;;  %v2416_v35 = vmax.f32 %v10081_v36, %v2231_v55  ;;  %v2417_v17 = vmax.f32 %v10084_v38, %v2233_v33  ;;  %v2637_v27 = vcombine.high %v2613_v52, %v2628_v45  ;;  %v14664_v36 = vmov 0.0  }
 0x2ae   : > { %4748 = vrot.lane.b32.xlu0 %v10555_v62, %s9610_s30  ;;  %4746 = vrot.lane.b32.xlu1 %v2519_v47, %s9610_s30  ;;  %v2602_v55 = vcombine.high %v10558_v24, %v14664_v36  ;;  %v2504_v38 = vcombine.low %v2481_v12, %v2496_v3  ;;  %v2540_v0 = vcombine.high %v2412_v44, %v14664_v36 }
 0x2af   : > { %v2679_v10 = vrot.slane %v2416_v35, %v10008_v7  ;;  %v2694_v51 = vrot.slane %v2417_v17, %v10008_v7  ;;  %v2651_v33 = vrot.slane %v2637_v27, %v10016_v21  ;;  %v2555_v2 = vcombine.high %v2413_v53, %v14664_v36 }
 0x2b0   : > { %v10569_v39 = vpop.permute.xlu0 %2234  ;;  %v10571_v9 = vpop.permute.xlu1 %2236  ;;  %v10591_v27 = vrot.slane %v2504_v38, %v10016_v21  ;;  %v2554_v44 = vrot.slane %v2540_v0, %v10008_v7  ;;  %v2537_v38 = vcombine.high %v2519_v47, %v14664_v36 }
 0x2b1   : > { %v2702_v14 = vcombine.low %v2679_v10, %v2694_v51  ;;  %v2703_v49 = vcombine.high %v2679_v10, %v2694_v51  ;;  %v2636_v10 = vcombine.low %v2613_v52, %v2628_v45  ;;  %v2569_v53 = vrot.slane %v2555_v2, %v10008_v7 }
 0x2b2   : > { %4620 = vrot.lane.b32.xlu1 %v2602_v55, %s9614_s9  ;;  %4750 = vrot.lane.b32.xlu0 %v2651_v33, %s9610_s30  ;;  %14666 = vst [vmem:[#allocation46_spill] sm:$0xff] %v10591_v27  ;;  %v2606_v55 = vcombine.high %v2414_v1, %v14664_v36  ;;  %v2474_v52 = vcombine.high %v10513_v11, %v14664_v36 }
 0x2b3   : > { %v10578_v43 = vrot.slane %v2702_v14, %v10016_v21  ;;  %v2717_v12 = vrot.slane %v2703_v49, %v10016_v21  ;;  %v2621_v14 = vcombine.high %v2415_v16, %v14664_v36  ;;  %v2489_v45 = vcombine.high %v10516_v54, %v14664_v36 }
 0x2b4   : > { %v10580_v13 = vpop.permute.xlu0 %2238  ;;  %v10585_v24 = vpop.permute.xlu1 %2240  ;;  %v10609_v0 = vrot.slane %v2636_v10, %v10016_v21  ;;  %v2536_v2 = vcombine.high %v10591_v27, %v14664_v36  ;;  %v2586_v16 = vcombine.low %v2554_v44, %v2569_v53  ;;  %v2620_v47 = vrot.slane %v2606_v55, %v10008_v7 }
 0x2b5   : > { %14665 = vst [vmem:[#allocation45_spill] sm:$0xff] %v10578_v43  ;;  %v2734_v3 = vcombine.high %v10578_v43, %v14664_v36  ;;  %v2635_v54 = vrot.slane %v2621_v14, %v10008_v7  ;;  %v2687_v10 = vcombine.high %v2417_v17, %v14664_v36  ;;  %v2669_v43 = vcombine.high %v2651_v33, %v14664_v36 }
 0x2b6   : > { %4752 = vrot.lane.b32.xlu0 %v2717_v12, %s9610_s30  ;;  %14667 = vst [vmem:[#allocation47_spill] sm:$0xff] %v10609_v0  ;;  %v2488_v27 = vrot.slane %v2474_v52, %v10008_v7  ;;  %v2668_v30 = vcombine.high %v10609_v0, %v14664_v36  ;;  %v10637_v52 = vrot.slane %v2586_v16, %v10016_v21 }
 0x2b7   : > { %4624 = vrot.lane.b32.xlu1 %v2734_v3, %s9614_s9  ;;  %v2672_v3 = vcombine.high %v2416_v35, %v14664_v36  ;;  %v2652_v35 = vcombine.low %v2620_v47, %v2635_v54  ;;  %v2701_v33 = vrot.slane %v2687_v10, %v10008_v7  ;;  %v2587_v56 = vcombine.high %v2554_v44, %v2569_v53 }
 0x2b8   : > { %v10594_v51 = vpop.permute.xlu0 %2242  ;;  %v10600_v49 = vpop.permute.xlu1 %2244  ;;  %v10666_v6 = vmax.f32 %v10094_v58, %v10569_v39 }
 0x2b9   : > { %v2686_v17 = vrot.slane %v2672_v3, %v10008_v7  ;;  %v2660_v3 = vrot.slane %v2652_v35, %v10016_v21 }
 0x2ba   : > { %4618 = vrot.lane.b32.xlu0 %v2536_v2, %s9614_s9  ;;  %v2603_v2 = vcombine.high %v10555_v62, %v14664_v36  ;;  %v10685_v39 = vrot.slane %v10666_v6, %v10008_v7 }
 0x2bb   : > { %4874 = vrot.lane.b32.xlu1 %v2537_v38, %s9615_s10  ;;  %v2503_v38 = vrot.slane %v2489_v45, %v10008_v7  ;;  %v2718_v0 = vcombine.low %v2686_v17, %v2701_v33  ;;  %v2719_v58 = vcombine.high %v2686_v17, %v2701_v33  ;;  %v2421_v17 = vmax.f32 %v10117_v20, %v10585_v24 }
 0x2bc   : > { %v10614_v1 = vpop.permute.xlu0 %2246  ;;  %v10618_v11 = vpop.permute.xlu1 %2248  ;;  %v10720_v20 = vmax.f32 %v10131_v37, %v10594_v51  ;;  %v10724_v24 = vmax.f32 %v10134_v41, %v10600_v49 }
 0x2bd   : > { %v2520_v45 = vcombine.low %v2488_v27, %v2503_v38  ;;  %v2521_v31 = vcombine.high %v2488_v27, %v2503_v38  ;;  %v2726_v61 = vrot.slane %v2718_v0, %v10016_v21  ;;  %v10670_v27 = vmax.f32 %v10097_v60, %v10571_v9 }
 0x2be   : > { %4622 = vrot.lane.b32.xlu0 %v2668_v30, %s9614_s9  ;;  %v2733_v33 = vrot.slane %v2719_v58, %v10016_v21  ;;  %v10731_v58 = vmax.f32 %v10147_v15, %v10614_v1  ;;  %v2877_v15 = vrot.slane %v10720_v20, %v10008_v7  ;;  %v2892_v49 = vrot.slane %v10724_v24, %v10008_v7 }
 0x2bf   : > { %4878 = vrot.lane.b32.xlu1 %v2669_v43, %s9615_s10  ;;  %v2528_v10 = vrot.slane %v2520_v45, %v10016_v21  ;;  %v2653_v45 = vcombine.high %v2620_v47, %v2635_v54  ;;  %v2535_v44 = vrot.slane %v2521_v31, %v10016_v21  ;;  %v10689_v60 = vrot.slane %v10670_v27, %v10008_v7 }
 0x2c0   : > { %v10629_v55 = vpop.permute.xlu0 %2250  ;;  %v10632_v14 = vpop.permute.xlu1 %2252  ;;  %v10698_v47 = vmax.f32 %v10114_v18, %v10580_v13  ;;  %v2901_v63 = vcombine.high %v2877_v15, %v2892_v49 }
 0x2c1   : > { %v2667_v31 = vrot.slane %v2653_v45, %v10016_v21  ;;  %v2769_v38 = vcombine.high %v10685_v39, %v10689_v60  ;;  %v2826_v45 = vrot.slane %v2421_v17, %v10008_v7 }
 0x2c2   : > { %4876 = vrot.lane.b32.xlu0 %v2603_v2, %s9615_s10  ;;  %v2735_v2 = vcombine.high %v2717_v12, %v14664_v36  ;;  %v10674_v12 = vrot.slane %v2587_v56, %v10016_v21  ;;  %v2538_v56 = vcombine.high %v2528_v10, %v14664_v36  ;;  %v2811_v18 = vrot.slane %v10698_v47, %v10008_v7 }
 0x2c3   : > { %5004 = vrot.lane.b32.xlu1 %v10637_v52, %s9608_s28  ;;  %v2671_v34 = vcombine.high %v2667_v31, %v14664_v36 }
 0x2c4   : > { %v10643_v43 = vpop.permute.xlu0 %2254  ;;  %v10646_v30 = vpop.permute.xlu1 %2256  ;;  %v2835_v51 = vcombine.high %v2811_v18, %v2826_v45  ;;  %v2834_v4 = vcombine.low %v2811_v18, %v2826_v45  ;;  %v2738_v45 = vcombine.high %v10666_v6, %v14664_v36 }
 0x2c6   : > { %5002 = vrot.lane.b32.xlu0 %v2528_v10, %s9608_s28  ;;  %v2670_v10 = vcombine.high %v2660_v3, %v14664_v36  ;;  %v10778_v50 = vrot.slane %v2834_v4, %v10016_v21  ;;  %v2768_v4 = vcombine.low %v10685_v39, %v10689_v60  ;;  %v2804_v60 = vcombine.high %v10698_v47, %v14664_v36 }
 0x2c7   : > { %5006 = vrot.lane.b32.xlu1 %v2660_v3, %s9608_s28  ;;  %v10727_v3 = vrot.slane %v2769_v38, %v10016_v21 }
 0x2c8   : > { %v10651_v16 = vpop.permute.xlu0 %2258  ;;  %v10654_v62 = vpop.permute.xlu1 %2260  ;;  %14669 = vst [vmem:[#allocation49_spill] sm:$0xff] %v10778_v50  ;;  %v2866_v6 = vcombine.high %v10778_v50, %v14664_v36 }
 0x2ca   : > { %4880 = vrot.lane.b32.xlu0 %v2735_v2, %s9615_s10 }
 0x2cb   : > { %5008 = vrot.lane.b32.xlu1 %v2726_v61, %s9608_s28 }
 0x2cc   : > { %v10659_v5 = vpop.permute.xlu0 %2262  ;;  %v10662_v35 = vpop.permute.xlu1 %2264 }
 0x2ce   : > { %5260 = vrot.lane.b32.xlu0 %v10674_v12, %s9609_s29 }
 0x2cf   : > { %5258 = vrot.lane.b32.xlu1 %v2535_v44, %s9609_s29 }
 0x2d0   : > { %v10677_v53 = vpop.permute.xlu0 %2266  ;;  %v10681_v0 = vpop.permute.xlu1 %2268 }
 0x2d2   : > { %5130 = vrot.lane.b32.xlu0 %v2538_v56, %s9616_s11  ;;  %v10735_v56 = vmax.f32 %v10150_v59, %v10618_v11  ;;  %v2604_v59 = vcombine.high %v10637_v52, %v14664_v36  ;;  %v2539_v11 = vcombine.high %v2535_v44, %v14664_v36  ;;  %v2849_v52 = vrot.slane %v2835_v51, %v10016_v21 }
 0x2d3   : > { %5262 = vrot.lane.b32.xlu1 %v2667_v31, %s9609_s29  ;;  %v2900_v51 = vcombine.low %v2877_v15, %v2892_v49  ;;  %v2752_v49 = vrot.slane %v2738_v45, %v10008_v7 }
 0x2d4   : > { %v10694_v9 = vpop.permute.xlu0 %2270  ;;  %v10701_v54 = vpop.permute.xlu1 %2272  ;;  %v10757_v1 = vrot.slane %v10735_v56, %v10008_v7 }
 0x2d5   : > { %v10799_v15 = vrot.slane %v2900_v51, %v10016_v21  ;;  %v2819_v51 = vcombine.high %v2421_v17, %v14664_v36 }
 0x2d6   : > { %5134 = vrot.lane.b32.xlu0 %v2670_v10, %s9616_s11  ;;  %v2736_v10 = vcombine.high %v2726_v61, %v14664_v36  ;;  %v10753_v61 = vrot.slane %v10731_v58, %v10008_v7 }
 0x2d7   : > { %5264 = vrot.lane.b32.xlu1 %v2733_v33, %s9609_s29  ;;  %14670 = vst [vmem:[#allocation50_spill] sm:$0xff] %v10799_v15  ;;  %v2932_v50 = vcombine.high %v10799_v15, %v14664_v36  ;;  %v2833_v47 = vrot.slane %v2819_v51, %v10008_v7  ;;  %v2801_v15 = vcombine.high %v10727_v3, %v14664_v36 }
 0x2d8   : > { %v10710_v2 = vpop.permute.xlu0 %2274  ;;  %v10715_v13 = vpop.permute.xlu1 %2276  ;;  %v2967_v48 = vcombine.high %v10753_v61, %v10757_v1 }
 0x2da   : > { %5136 = vrot.lane.b32.xlu0 %v2736_v10, %s9616_s11  ;;  %v10781_v18 = vrot.slane %v2967_v48, %v10016_v21  ;;  %v2605_v48 = vcombine.high %v10674_v12, %v14664_v36  ;;  %v10812_v12 = vrot.slane %v2768_v4, %v10016_v21 }
 0x2db   : > { %4754 = vrot.lane.b32.xlu1 %v10727_v3, %s9610_s30  ;;  %v2867_v3 = vcombine.high %v2849_v52, %v14664_v36 }
 0x2dc   : > { %v10740_v37 = vpop.permute.xlu0 %2278  ;;  %v10743_v41 = vpop.permute.xlu1 %2280  ;;  %14671 = vst [vmem:[#allocation51_spill] sm:$0xff] %v10812_v12  ;;  %v2800_v17 = vcombine.high %v10812_v12, %v14664_v36  ;;  %v2966_v12 = vcombine.low %v10753_v61, %v10757_v1  ;;  %v2951_v61 = vcombine.high %v10735_v56, %v14664_v36 }
 0x2de   : > { %5386 = vrot.lane.b32.xlu0 %v2539_v11, %s9613_s8  ;;  %v2915_v11 = vrot.slane %v2901_v63, %v10016_v21  ;;  %v10859_v1 = vrot.slane %v2966_v12, %v10016_v21  ;;  %v2965_v56 = vrot.slane %v2951_v61, %v10008_v7 }
 0x2df   : > { %5132 = vrot.lane.b32.xlu1 %v2604_v59, %s9616_s11 }
 0x2e0   : > { %v10761_v38 = vpop.permute.xlu0 %2282  ;;  %v10764_v10 = vpop.permute.xlu1 %2284  ;;  %14676 = vst [vmem:[#allocation56_spill] sm:$0xff] %v10859_v1  ;;  %v2998_v12 = vcombine.high %v10859_v1, %v14664_v36 }
 0x2e1   : > { %14668 = vst [vmem:[#allocation48_spill] sm:$0xff] %v10764_v10 }
 0x2e2   : > { %5390 = vrot.lane.b32.xlu0 %v2671_v34, %s9613_s8  ;;  %v2753_v34 = vcombine.high %v10670_v27, %v14664_v36 }
 0x2e3   : > { %4756 = vrot.lane.b32.xlu1 %v2849_v52, %s9610_s30 }
 0x2e4   : > { %v10771_v44 = vpop.permute.xlu0 %2286  ;;  %v10774_v59 = vpop.permute.xlu1 %2288  ;;  %v2767_v10 = vrot.slane %v2753_v34, %v10008_v7 }
 0x2e6   : > { %4760 = vrot.lane.b32.xlu0 %v10781_v18, %s9610_s30  ;;  %v2784_v4 = vcombine.low %v2752_v49, %v2767_v10 }
 0x2e7   : > { %4758 = vrot.lane.b32.xlu1 %v2915_v11, %s9610_s30 }
 0x2e8   : > { %v10784_v31 = vpop.permute.xlu0 %2290  ;;  %v10792_v63 = vpop.permute.xlu1 %2292 }
 0x2ea   : > { %4628 = vrot.lane.b32.xlu0 %v2866_v6, %s9614_s9  ;;  %v2818_v6 = vrot.slane %v2804_v60, %v10008_v7 }
 0x2eb   : > { %5388 = vrot.lane.b32.xlu1 %v2605_v48, %s9613_s8  ;;  %v2737_v48 = vcombine.high %v2733_v33, %v14664_v36  ;;  %v2870_v33 = vcombine.high %v10720_v20, %v14664_v36  ;;  %v2792_v20 = vrot.slane %v2784_v4, %v10016_v21 }
 0x2ec   : > { %v10804_v27 = vpop.permute.xlu0 %2294  ;;  %v10809_v39 = vpop.permute.xlu1 %2296  ;;  %v2850_v51 = vcombine.low %v2818_v6, %v2833_v47 }
 0x2ee   : > { %4630 = vrot.lane.b32.xlu0 %v2932_v50, %s9614_s9  ;;  %v2858_v4 = vrot.slane %v2850_v51, %v10016_v21  ;;  %v2785_v51 = vcombine.high %v2752_v49, %v2767_v10 }
 0x2ef   : > { %5392 = vrot.lane.b32.xlu1 %v2737_v48, %s9613_s8  ;;  %v2885_v48 = vcombine.high %v10724_v24, %v14664_v36 }
 0x2f0   : > { %v10821_v45 = vpop.permute.xlu0 %2298  ;;  %v10824_v34 = vpop.permute.xlu1 %2300 }
 0x2f1   : > { %14672 = vst [vmem:[#allocation52_spill] sm:$0xff] %v10824_v34  ;;  %v2884_v34 = vrot.slane %v2870_v33, %v10008_v7  ;;  %v2899_v24 = vrot.slane %v2885_v48, %v10008_v7  ;;  %v2933_v33 = vcombine.high %v2915_v11, %v14664_v36 }
 0x2f2   : > { %4882 = vrot.lane.b32.xlu0 %v2801_v15, %s9615_s10 }
 0x2f3   : > { %4626 = vrot.lane.b32.xlu1 %v2800_v17, %s9614_s9  ;;  %v2916_v52 = vcombine.low %v2884_v34, %v2899_v24 }
 0x2f4   : > { %v10837_v50 = vpop.permute.xlu0 %2302  ;;  %v10840_v60 = vpop.permute.xlu1 %2304 }
 0x2f5   : > { %14673 = vst [vmem:[#allocation53_spill] sm:$0xff] %v10840_v60  ;;  %v2936_v60 = vcombine.high %v10731_v58, %v14664_v36  ;;  %v2917_v58 = vcombine.high %v2884_v34, %v2899_v24  ;;  %v2799_v24 = vrot.slane %v2785_v51, %v10016_v21  ;;  %v2999_v51 = vcombine.high %v10781_v18, %v14664_v36 }
 0x2f6   : > { %4884 = vrot.lane.b32.xlu0 %v2867_v3, %s9615_s10  ;;  %v10916_v18 = vmax.f32 %v10168_v25, %v10632_v14 }
 0x2f7   : > { %5010 = vrot.lane.b32.xlu1 %v2792_v20, %s9608_s28  ;;  %v2931_v34 = vrot.slane %v2917_v58, %v10016_v21 }
 0x2f8   : > { %v10849_v17 = vpop.permute.xlu0 %2306  ;;  %v10852_v15 = vpop.permute.xlu1 %2308 }
 0x2f9   : > { %14674 = vst [vmem:[#allocation54_spill] sm:$0xff] %v10849_v17  ;;  %14675 = vst [vmem:[#allocation55_spill] sm:$0xff] %v10852_v15  ;;  %v2950_v15 = vrot.slane %v2936_v60, %v10008_v7  ;;  %v2924_v17 = vrot.slane %v2916_v52, %v10016_v21  ;;  %v2851_v60 = vcombine.high %v2818_v6, %v2833_v47 }
 0x2fa   : > { %4886 = vrot.lane.b32.xlu0 %v2933_v33, %s9615_s10  ;;  %v2868_v47 = vcombine.high %v2858_v4, %v14664_v36 }
 0x2fb   : > { %5012 = vrot.lane.b32.xlu1 %v2858_v4, %s9608_s28  ;;  %v2865_v52 = vrot.slane %v2851_v60, %v10016_v21  ;;  %v2983_v58 = vcombine.high %v2950_v15, %v2965_v56  ;;  %v2934_v60 = vcombine.high %v2924_v17, %v14664_v36  ;;  %v2428_v4 = vmax.f32 %v10185_v28, %v10643_v43 }
 0x2fc   : > { %v10864_v48 = vpop.permute.xlu0 %2310  ;;  %v10867_v3 = vpop.permute.xlu1 %2312  ;;  %v3024_v28 = vrot.slane %v10916_v18, %v10008_v7  ;;  %v10941_v43 = vmax.f32 %v10219_v57, %v10659_v5 }
 0x2fd   : > { %14677 = vst [vmem:[#allocation57_spill] sm:$0xff] %v10867_v3  ;;  %v2982_v3 = vcombine.low %v2950_v15, %v2965_v56  ;;  %v10912_v15 = vmax.f32 %v10165_v19, %v10629_v55  ;;  %v2429_v56 = vmax.f32 %v10188_v26, %v10646_v30  ;;  %v3075_v55 = vrot.slane %v2428_v4, %v10008_v7 }
 0x2fe   : > { %5014 = vrot.lane.b32.xlu0 %v2924_v17, %s9608_s28  ;;  %v10945_v30 = vmax.f32 %v10226_v8, %v10662_v35  ;;  %v3207_v35 = vrot.slane %v10941_v43, %v10008_v7 }
 0x2ff   : > { %4632 = vrot.lane.b32.xlu1 %v2998_v12, %s9614_s9  ;;  %v2990_v49 = vrot.slane %v2982_v3, %v10016_v21  ;;  %v3009_v25 = vrot.slane %v10912_v15, %v10008_v7  ;;  %v3090_v26 = vrot.slane %v2429_v56, %v10008_v7 }
 0x300   : > { %v10875_v11 = vpop.permute.xlu0 %2314  ;;  %v10878_v33 = vpop.permute.xlu1 %2316 }
 0x301   : > { %v3033_v57 = vcombine.high %v3009_v25, %v3024_v28  ;;  %v3098_v8 = vcombine.low %v3075_v55, %v3090_v26 }
 0x302   : > { %5266 = vrot.lane.b32.xlu0 %v2799_v24, %s9609_s29 }
 0x303   : > { %5270 = vrot.lane.b32.xlu1 %v2931_v34, %s9609_s29 }
 0x304   : > { %v10883_v61 = vpop.permute.xlu0 %2318  ;;  %v10886_v10 = vpop.permute.xlu1 %2320 }
 0x306   : > { %5268 = vrot.lane.b32.xlu0 %v2865_v52, %s9609_s29 }
 0x307   : > { %5016 = vrot.lane.b32.xlu1 %v2990_v49, %s9608_s28 }
 0x308   : > { %v10891_v12 = vpop.permute.xlu0 %2322  ;;  %v10894_v6 = vpop.permute.xlu1 %2324 }
 0x309   : > { %14678 = vst [vmem:[#allocation58_spill] sm:$0xff] %v10891_v12  ;;  %14679 = vst [vmem:[#allocation59_spill] sm:$0xff] %v10894_v6  ;;  %v2997_v12 = vrot.slane %v2983_v58, %v10016_v21  ;;  %v2802_v58 = vcombine.high %v2792_v20, %v14664_v36  ;;  %v3000_v20 = vcombine.high %v2990_v49, %v14664_v36 }
 0x30a   : > { %4888 = vrot.lane.b32.xlu0 %v2999_v51, %s9615_s10  ;;  %v2431_v51 = vmax.f32 %v10206_v29, %v10654_v62 }
 0x30b   : > { %5140 = vrot.lane.b32.xlu1 %v2868_v47, %s9616_s11  ;;  %v2803_v47 = vcombine.high %v2799_v24, %v14664_v36  ;;  %v2430_v24 = vmax.f32 %v10203_v23, %v10651_v16  ;;  %v3222_v23 = vrot.slane %v10945_v30, %v10008_v7  ;;  %v3001_v29 = vcombine.high %v2997_v12, %v14664_v36 }
 0x30c   : > { %v10900_v1 = vpop.permute.xlu0 %2326  ;;  %v10903_v3 = vpop.permute.xlu1 %2328  ;;  %v3099_v16 = vcombine.high %v3075_v55, %v3090_v26  ;;  %v3156_v49 = vrot.slane %v2431_v51, %v10008_v7 }
 0x30d   : > { %v3141_v62 = vrot.slane %v2430_v24, %v10008_v7 }
 0x30e   : > { %5272 = vrot.lane.b32.xlu0 %v2997_v12, %s9609_s29  ;;  %v3047_v12 = vrot.slane %v3033_v57, %v10016_v21  ;;  %v3113_v26 = vrot.slane %v3099_v16, %v10016_v21  ;;  %v3068_v16 = vcombine.high %v2428_v4, %v14664_v36 }
 0x30f   : > { %5142 = vrot.lane.b32.xlu1 %v2934_v60, %s9616_s11  ;;  %v2869_v60 = vcombine.high %v2865_v52, %v14664_v36  ;;  %v2935_v52 = vcombine.high %v2931_v34, %v14664_v36  ;;  %v3165_v55 = vcombine.high %v3141_v62, %v3156_v49 }
 0x310   : > { %v10908_v6 = vpop.permute.xlu0 %2330  ;;  %v10921_v17 = vpop.permute.xlu1 %2332  ;;  %v3082_v4 = vrot.slane %v3068_v16, %v10008_v7 }
 0x311   : > { %v3179_v57 = vrot.slane %v3165_v55, %v10016_v21  ;;  %v3149_v55 = vcombine.high %v2431_v51, %v14664_v36 }
 0x312   : > { %5138 = vrot.lane.b32.xlu0 %v2802_v58, %s9616_s11 }
 0x313   : > { %5394 = vrot.lane.b32.xlu1 %v2803_v47, %s9613_s8 }
 0x314   : > { %v10928_v19 = vpop.permute.xlu0 %2334  ;;  %v10936_v14 = vpop.permute.xlu1 %2336 }
 0x316   : > { %5396 = vrot.lane.b32.xlu0 %v2869_v60, %s9613_s8  ;;  %v10974_v60 = vrot.slane %v3098_v8, %v10016_v21 }
 0x317   : > { %5144 = vrot.lane.b32.xlu1 %v3000_v20, %s9616_s11 }
 0x318   : > { %v10954_v47 = vpop.permute.xlu0 %2338  ;;  %v10957_v5 = vpop.permute.xlu1 %2340  ;;  %14684 = vst [vmem:[#allocation64_spill] sm:$0xff] %v10974_v60  ;;  %v3130_v8 = vcombine.high %v10974_v60, %v14664_v36 }
 0x319   : > { %14680 = vst [vmem:[#allocation60_spill] sm:$0xff] %v10954_v47  ;;  %14681 = vst [vmem:[#allocation61_spill] sm:$0xff] %v10957_v5  ;;  %v3230_v5 = vcombine.low %v3207_v35, %v3222_v23 }
 0x31a   : > { %5398 = vrot.lane.b32.xlu0 %v2935_v52, %s9613_s8 }
 0x31b   : > { %5400 = vrot.lane.b32.xlu1 %v3001_v29, %s9613_s8  ;;  %v10985_v52 = vrot.slane %v3230_v5, %v10016_v21 }
 0x31c   : > { %v10968_v58 = vpop.permute.xlu0 %2342  ;;  %v10971_v20 = vpop.permute.xlu1 %2344 }
 0x31d   : > { %14682 = vst [vmem:[#allocation62_spill] sm:$0xff] %v10968_v58  ;;  %14683 = vst [vmem:[#allocation63_spill] sm:$0xff] %v10971_v20  ;;  %v3032_v20 = vcombine.low %v3009_v25, %v3024_v28  ;;  %v3231_v58 = vcombine.high %v3207_v35, %v3222_v23  ;;  %v3262_v5 = vcombine.high %v10985_v52, %v14664_v36 }
 0x31e   : > { %4764 = vrot.lane.b32.xlu0 %v3113_v26, %s9610_s30  ;;  %14687 = vst [vmem:[#allocation67_spill] sm:$0xff] %v10985_v52  ;;  %v3164_v25 = vcombine.low %v3141_v62, %v3156_v49  ;;  %v3065_v62 = vcombine.high %v3047_v12, %v14664_v36  ;;  %v3002_v49 = vcombine.high %v10912_v15, %v14664_v36 }
 0x31f   : > { %4762 = vrot.lane.b32.xlu1 %v3047_v12, %s9610_s30  ;;  %v3245_v35 = vrot.slane %v3231_v58, %v10016_v21  ;;  %v3017_v58 = vcombine.high %v10916_v18, %v14664_v36  ;;  %v11030_v15 = vrot.slane %v3149_v55, %v10008_v7 }
 0x320   : > { %v10980_v34 = vpop.permute.xlu0 %4748  ;;  %v10982_v29 = vpop.permute.xlu1 %4746 }
 0x321   : > { %14685 = vst [vmem:[#allocation65_spill] sm:$0xff] %v10980_v34  ;;  %14686 = vst [vmem:[#allocation66_spill] sm:$0xff] %v10982_v29  ;;  %v3083_v29 = vcombine.high %v2429_v56, %v14664_v36  ;;  %v10999_v34 = vrot.slane %v3032_v20, %v10016_v21  ;;  %v3134_v56 = vcombine.high %v2430_v24, %v14664_v36 }
 0x322   : > { %4766 = vrot.lane.b32.xlu0 %v3179_v57, %s9610_s30  ;;  %v11018_v20 = vrot.slane %v3164_v25, %v10016_v21  ;;  %v3031_v25 = vrot.slane %v3017_v58, %v10008_v7 }
 0x323   : > { %4636 = vrot.lane.b32.xlu1 %v3130_v8, %s9614_s9  ;;  %14688 = vst [vmem:[#allocation68_spill] sm:$0xff] %v10999_v34  ;;  %v3097_v23 = vrot.slane %v3083_v29, %v10008_v7  ;;  %v3064_v24 = vcombine.high %v10999_v34, %v14664_v36  ;;  %v11027_v12 = vrot.slane %v3134_v56, %v10008_v7 }
 0x324   : > { %v10993_v47 = vpop.permute.xlu1 %4620  ;;  %v11001_v28 = vpop.permute.xlu0 %4750  ;;  %14690 = vst [vmem:[#allocation70_spill] sm:$0xff] %v11018_v20  ;;  %v3197_v29 = vcombine.high %v3179_v57, %v14664_v36  ;;  %v3200_v56 = vcombine.high %v10941_v43, %v14664_v36  ;;  %v3215_v57 = vcombine.high %v10945_v30, %v14664_v36  ;;  %v14694_v30 = vld [vmem:[#allocation9_spill] sm:$0xff] }
 0x325   : > { %14689 = vst [vmem:[#allocation69_spill] sm:$0xff] %v11001_v28  ;;  %v3114_v51 = vcombine.low %v3082_v4, %v3097_v23  ;;  %v3180_v55 = vcombine.low %v11027_v12, %v11030_v15  ;;  %v3115_v43 = vcombine.high %v3082_v4, %v3097_v23  ;;  %v11061_v34 = vmax.f32 %v14694_v30, %v10677_v53 }
 0x326   : > { %4768 = vrot.lane.b32.xlu0 %v3245_v35, %s9610_s30 }
 0x327   : > { %4640 = vrot.lane.b32.xlu1 %v3262_v5, %s9614_s9  ;;  %v3016_v5 = vrot.slane %v3002_v49, %v10008_v7  ;;  %v3122_v58 = vrot.slane %v3114_v51, %v10016_v21  ;;  %v14695_v51 = vld [vmem:[#allocation10_spill] sm:$0xff]  ;;  %v11077_v53 = vrot.slane %v11061_v34, %v10008_v7 }
 0x328   : > { %v11020_v16 = vpop.permute.xlu0 %4752 }
 0x329   : > { %v11010_v8 = vpop.permute.xlu1 %4624  ;;  %14691 = vst [vmem:[#allocation71_spill] sm:$0xff] %v11020_v16 }
 0x32a   : > { %4634 = vrot.lane.b32.xlu0 %v3064_v24, %s9614_s9  ;;  %v3048_v24 = vcombine.low %v3016_v5, %v3031_v25 }
 0x32b   : > { %4890 = vrot.lane.b32.xlu1 %v3065_v62, %s9615_s10  ;;  %v3196_v62 = vcombine.high %v11018_v20, %v14664_v36  ;;  %v3229_v20 = vrot.slane %v3215_v57, %v10008_v7 }
 0x32c   : > { %v11037_v52 = vpop.permute.xlu0 %4618  ;;  %v3056_v4 = vrot.slane %v3048_v24, %v10016_v21  ;;  %v3263_v24 = vcombine.high %v3245_v35, %v14664_v36  ;;  %v11106_v35 = vmax.f32 %v10275_v42, %v10710_v2 }
 0x32d   : > { %v11032_v18 = vpop.permute.xlu1 %4874 }
 0x32e   : > { %14692 = vst [vmem:[#allocation72_spill] sm:$0xff] %v11032_v18  ;;  %4638 = vrot.lane.b32.xlu0 %v3196_v62, %s9614_s9  ;;  %v3214_v62 = vrot.slane %v3200_v56, %v10008_v7 }
 0x32f   : > { %4894 = vrot.lane.b32.xlu1 %v3197_v29, %s9615_s10  ;;  %v3131_v29 = vcombine.high %v3113_v26, %v14664_v36  ;;  %v3188_v26 = vrot.slane %v3180_v55, %v10016_v21  ;;  %v3129_v55 = vrot.slane %v3115_v43, %v10016_v21  ;;  %v11110_v43 = vmax.f32 %v10278_v40, %v10715_v13 }
 0x330   : > { %v11052_v60 = vpop.permute.xlu0 %4622  ;;  %v3247_v23 = vcombine.high %v3214_v62, %v3229_v20  ;;  %v3246_v57 = vcombine.low %v3214_v62, %v3229_v20  ;;  %v3405_v13 = vrot.slane %v11106_v35, %v10008_v7 }
 0x331   : > { %v11049_v49 = vpop.permute.xlu1 %4878 }
 0x332   : > { %14693 = vst [vmem:[#allocation73_spill] sm:$0xff] %v11049_v49  ;;  %4892 = vrot.lane.b32.xlu0 %v3131_v29, %s9615_s10  ;;  %v11065_v49 = vmax.f32 %v14695_v51, %v10681_v0  ;;  %v3254_v20 = vrot.slane %v3246_v57, %v10016_v21 }
 0x333   : > { %5020 = vrot.lane.b32.xlu1 %v3122_v58, %s9608_s28 }
 0x334   : > { %v11070_v18 = vpop.permute.xlu0 %4876  ;;  %v11081_v0 = vrot.slane %v11065_v49, %v10008_v7 }
 0x335   : > { %v11067_v16 = vpop.permute.xlu1 %5004 }
 0x336   : > { %14696 = vst [vmem:[#allocation9_spill] sm:$0xff] %v11067_v16  ;;  %5018 = vrot.lane.b32.xlu0 %v3056_v4, %s9608_s28  ;;  %v3297_v30 = vcombine.high %v11077_v53, %v11081_v0  ;;  %v11096_v16 = vrot.slane %v3247_v23, %v10016_v21  ;;  %v14702_v23 = vld [vmem:[#allocation11_spill] sm:$0xff] }
 0x337   : > { %5022 = vrot.lane.b32.xlu1 %v3188_v26, %s9608_s28  ;;  %v11121_v57 = vmax.f32 %v14702_v23, %v10694_v9  ;;  %v3420_v9 = vrot.slane %v11110_v43, %v10008_v7 }
 0x338   : > { %v11086_v29 = vpop.permute.xlu0 %5002 }
 0x339   : > { %v11083_v56 = vpop.permute.xlu1 %5006  ;;  %14698 = vst [vmem:[#allocation74_spill] sm:$0xff] %v11086_v29 }
 0x33a   : > { %14697 = vst [vmem:[#allocation10_spill] sm:$0xff] %v11083_v56  ;;  %4896 = vrot.lane.b32.xlu0 %v3263_v24, %s9615_s10  ;;  %v3049_v56 = vcombine.high %v3016_v5, %v3031_v25  ;;  %v11115_v5 = vrot.slane %v3297_v30, %v10016_v21  ;;  %v3181_v25 = vcombine.high %v11027_v12, %v11030_v15  ;;  %v14703_v24 = vld [vmem:[#allocation12_spill] sm:$0xff] }
 0x33b   : > { %5276 = vrot.lane.b32.xlu1 %v3129_v55, %s9609_s29  ;;  %v11125_v42 = vmax.f32 %v14703_v24, %v10701_v54  ;;  %v3132_v54 = vcombine.high %v3122_v58, %v14664_v36  ;;  %v3339_v15 = vrot.slane %v11121_v57, %v10008_v7  ;;  %v3429_v24 = vcombine.high %v3405_v13, %v3420_v9 }
 0x33c   : > { %v11098_v28 = vpop.permute.xlu0 %4880  ;;  %v3063_v40 = vrot.slane %v3049_v56, %v10016_v21  ;;  %v3195_v23 = vrot.slane %v3181_v25, %v10016_v21 }
 0x33d   : > { %v11093_v51 = vpop.permute.xlu1 %5008  ;;  %14700 = vst [vmem:[#allocation76_spill] sm:$0xff] %v11098_v28  ;;  %v3354_v56 = vrot.slane %v11125_v42, %v10008_v7  ;;  %v11160_v25 = vrot.slane %v3429_v24, %v10016_v21  ;;  %v3296_v24 = vcombine.low %v11077_v53, %v11081_v0 }
 0x33e   : > { %14699 = vst [vmem:[#allocation75_spill] sm:$0xff] %v11093_v51  ;;  %5024 = vrot.lane.b32.xlu0 %v3254_v20, %s9608_s28 }
 0x33f   : > { %5280 = vrot.lane.b32.xlu1 %v11096_v16, %s9609_s29  ;;  %v3363_v58 = vcombine.high %v3339_v15, %v3354_v56  ;;  %v11201_v53 = vrot.slane %v3296_v24, %v10016_v21  ;;  %v3332_v24 = vcombine.high %v11121_v57, %v14664_v36 }
 0x340   : > { %v11127_v2 = vpop.permute.xlu0 %5260 }
 0x341   : > { %v11112_v62 = vpop.permute.xlu1 %5258  ;;  %14704 = vst [vmem:[#allocation11_spill] sm:$0xff] %v11127_v2  ;;  %v3066_v2 = vcombine.high %v3056_v4, %v14664_v36  ;;  %14715 = vst [vmem:[#allocation83_spill] sm:$0xff] %v11201_v53  ;;  %v3346_v57 = vrot.slane %v3332_v24, %v10008_v7  ;;  %v3398_v24 = vcombine.high %v11106_v35, %v14664_v36 }
 0x342   : > { %14701 = vst [vmem:[#allocation77_spill] sm:$0xff] %v11112_v62  ;;  %5274 = vrot.lane.b32.xlu0 %v3063_v40, %s9609_s29  ;;  %v3461_v35 = vcombine.high %v11160_v25, %v14664_v36 }
 0x343   : > { %4770 = vrot.lane.b32.xlu1 %v11115_v5, %s9610_s30 }
 0x344   : > { %v11144_v30 = vpop.permute.xlu0 %5130 }
 0x345   : > { %v11137_v12 = vpop.permute.xlu1 %5262  ;;  %14706 = vst [vmem:[#allocation78_spill] sm:$0xff] %v11144_v30 }
 0x346   : > { %14705 = vst [vmem:[#allocation12_spill] sm:$0xff] %v11137_v12  ;;  %5278 = vrot.lane.b32.xlu0 %v3195_v23, %s9609_s29  ;;  %v3198_v12 = vcombine.high %v3188_v26, %v14664_v36 }
 0x347   : > { %5148 = vrot.lane.b32.xlu1 %v3132_v54, %s9616_s11  ;;  %v14710_v54 = vld [vmem:[#allocation13_spill] sm:$0xff] }
 0x348   : > { %v11152_v51 = vpop.permute.xlu0 %5134  ;;  %v2440_v28 = vmax.f32 %v14710_v54, %v10740_v37  ;;  %v3362_v54 = vcombine.low %v3339_v15, %v3354_v56  ;;  %v3281_v15 = vcombine.high %v11065_v49, %v14664_v36 }
 0x349   : > { %v11149_v62 = vpop.permute.xlu1 %5264  ;;  %14708 = vst [vmem:[#allocation80_spill] sm:$0xff] %v11152_v51  ;;  %v3377_v51 = vrot.slane %v3363_v58, %v10016_v21 }
 0x34a   : > { %14707 = vst [vmem:[#allocation79_spill] sm:$0xff] %v11149_v62  ;;  %5146 = vrot.lane.b32.xlu0 %v3066_v2, %s9616_s11  ;;  %v14711_v62 = vld [vmem:[#allocation14_spill] sm:$0xff]  ;;  %v3264_v2 = vcombine.high %v3254_v20, %v14664_v36  ;;  %v3067_v20 = vcombine.high %v3063_v40, %v14664_v36  ;;  %v3265_v40 = vcombine.high %v11096_v16, %v14664_v36 }
 0x34b   : > { %5150 = vrot.lane.b32.xlu1 %v3198_v12, %s9616_s11  ;;  %v2441_v26 = vmax.f32 %v14711_v62, %v10743_v41  ;;  %v11176_v12 = vrot.slane %v2440_v28, %v10008_v7  ;;  %v3133_v62 = vcombine.high %v3129_v55, %v14664_v36  ;;  %v3266_v55 = vcombine.high %v11061_v34, %v14664_v36 }
 0x34c   : > { %v11166_v29 = vpop.permute.xlu0 %5136  ;;  %v11210_v56 = vrot.slane %v3362_v54, %v10016_v21  ;;  %v3328_v16 = vcombine.high %v11201_v53, %v14664_v36 }
 0x34d   : > { %v11157_v30 = vpop.permute.xlu1 %4754  ;;  %14712 = vst [vmem:[#allocation13_spill] sm:$0xff] %v11166_v29  ;;  %v11179_v37 = vrot.slane %v2441_v26, %v10008_v7  ;;  %v3280_v49 = vrot.slane %v3266_v55, %v10008_v7  ;;  %v3329_v55 = vcombine.high %v11115_v5, %v14664_v36  ;;  %v3464_v5 = vcombine.high %v2440_v28, %v14664_v36 }
 0x34e   : > { %14709 = vst [vmem:[#allocation81_spill] sm:$0xff] %v11157_v30  ;;  %4772 = vrot.lane.b32.xlu0 %v3377_v51, %s9610_s30  ;;  %14717 = vst [vmem:[#allocation85_spill] sm:$0xff] %v11210_v56  ;;  %v3479_v53 = vcombine.high %v2441_v26, %v14664_v36  ;;  %v11272_v26 = vmax.f32 %v10325_v46, %v10771_v44 }
 0x34f   : > { %4774 = vrot.lane.b32.xlu1 %v11160_v25, %s9610_s30  ;;  %v3495_v30 = vcombine.high %v11176_v12, %v11179_v37 }
 0x350   : > { %v11181_v41 = vpop.permute.xlu0 %5386  ;;  %v11301_v25 = vrot.slane %v11272_v26, %v10008_v7 }
 0x351   : > { %v11172_v4 = vpop.permute.xlu1 %5132  ;;  %14713 = vst [vmem:[#allocation14_spill] sm:$0xff] %v11181_v41  ;;  %v3199_v41 = vcombine.high %v3195_v23, %v14664_v36  ;;  %v3428_v23 = vcombine.low %v3405_v13, %v3420_v9 }
 0x352   : > { %5404 = vrot.lane.b32.xlu0 %v3133_v62, %s9613_s8  ;;  %v3295_v62 = vrot.slane %v3281_v15, %v10008_v7 }
 0x353   : > { %5152 = vrot.lane.b32.xlu1 %v3264_v2, %s9616_s11  ;;  %v11227_v13 = vrot.slane %v3428_v23, %v10016_v21 }
 0x354   : > { %v11193_v29 = vpop.permute.xlu0 %5390 }
 0x355   : > { %v11188_v58 = vpop.permute.xlu1 %4756  ;;  %14719 = vst [vmem:[#allocation87_spill] sm:$0xff] %v11227_v13  ;;  %v3460_v23 = vcombine.high %v11227_v13, %v14664_v36 }
 0x356   : > { %14714 = vst [vmem:[#allocation82_spill] sm:$0xff] %v11188_v58  ;;  %5406 = vrot.lane.b32.xlu0 %v3199_v41, %s9613_s8  ;;  %v11215_v41 = vrot.slane %v3495_v30, %v10016_v21  ;;  %v3394_v30 = vcombine.high %v11210_v56, %v14664_v36  ;;  %v3313_v56 = vcombine.high %v3280_v49, %v3295_v62 }
 0x357   : > { %5402 = vrot.lane.b32.xlu1 %v3067_v20, %s9613_s8  ;;  %v3347_v20 = vcombine.high %v11125_v42, %v14664_v36 }
 0x358   : > { %v11212_v2 = vpop.permute.xlu0 %4760  ;;  %v11289_v46 = vrot.slane %v3313_v56, %v10016_v21  ;;  %v11309_v56 = vmax.f32 %v10343_v22, %v10784_v31 }
 0x359   : > { %v11203_v0 = vpop.permute.xlu1 %4758  ;;  %14718 = vst [vmem:[#allocation86_spill] sm:$0xff] %v11212_v2 }
 0x35a   : > { %14716 = vst [vmem:[#allocation84_spill] sm:$0xff] %v11203_v0  ;;  %4776 = vrot.lane.b32.xlu0 %v11215_v41, %s9610_s30 }
 0x35b   : > { %5408 = vrot.lane.b32.xlu1 %v3265_v40, %s9613_s8  ;;  %v3312_v40 = vcombine.low %v3280_v49, %v3295_v62  ;;  %v11276_v49 = vmax.f32 %v10332_v32, %v10774_v59  ;;  %v3412_v32 = vrot.slane %v3398_v24, %v10008_v7 }
 0x35c   : > { %v11229_v9 = vpop.permute.xlu0 %4628 }
 0x35d   : > { %v11220_v34 = vpop.permute.xlu1 %5388  ;;  %14720 = vst [vmem:[#allocation88_spill] sm:$0xff] %v11229_v9  ;;  %v11259_v13 = vrot.slane %v3312_v40, %v10016_v21 }
 0x35e   : > { %4644 = vrot.lane.b32.xlu0 %v3394_v30, %s9614_s9  ;;  %v3395_v30 = vcombine.high %v3377_v51, %v14664_v36  ;;  %v3494_v51 = vcombine.low %v11176_v12, %v11179_v37  ;;  %v11283_v12 = vrot.slane %v3464_v5, %v10008_v7  ;;  %v3493_v37 = vrot.slane %v3479_v53, %v10008_v7 }
 0x35f   : > { %4642 = vrot.lane.b32.xlu1 %v3328_v16, %s9614_s9  ;;  %v3361_v16 = vrot.slane %v3347_v20, %v10008_v7  ;;  %v3413_v20 = vcombine.high %v11110_v43, %v14664_v36  ;;  %v11305_v53 = vrot.slane %v11276_v49, %v10008_v7 }
 0x360   : > { %v11243_v15 = vpop.permute.xlu0 %4630  ;;  %v11295_v59 = vrot.slane %v3494_v51, %v10016_v21 }
 0x361   : > { %v11239_v54 = vpop.permute.xlu1 %5392  ;;  %14721 = vst [vmem:[#allocation89_spill] sm:$0xff] %v11243_v15  ;;  %v3378_v28 = vcombine.low %v3346_v57, %v3361_v16  ;;  %v3379_v43 = vcombine.high %v3346_v57, %v3361_v16  ;;  %v3427_v44 = vrot.slane %v3413_v20, %v10008_v7  ;;  %v3510_v57 = vcombine.low %v11283_v12, %v3493_v37  ;;  %v14726_v16 = vld [vmem:[#allocation17_spill] sm:$0xff] }
 0x362   : > { %4646 = vrot.lane.b32.xlu0 %v3460_v23, %s9614_s9  ;;  %14724 = vst [vmem:[#allocation92_spill] sm:$0xff] %v11295_v59  ;;  %v3627_v31 = vcombine.high %v11301_v25, %v11305_v53  ;;  %v11331_v20 = vrot.slane %v11309_v56, %v10008_v7  ;;  %v3526_v51 = vcombine.high %v11295_v59, %v14664_v36 }
 0x363   : > { %4898 = vrot.lane.b32.xlu1 %v3329_v55, %s9615_s10  ;;  %v3386_v23 = vrot.slane %v3378_v28, %v10016_v21  ;;  %v11322_v24 = vrot.slane %v3379_v43, %v10016_v21  ;;  %v3444_v22 = vcombine.low %v3412_v32, %v3427_v44  ;;  %v3518_v0 = vrot.slane %v3510_v57, %v10016_v21 }
 0x364   : > { %v11256_v2 = vpop.permute.xlu0 %4882  ;;  %v11366_v57 = vrot.slane %v3627_v31, %v10016_v21 }
 0x365   : > { %v11251_v42 = vpop.permute.xlu1 %4626 }
 0x366   : > { %5026 = vrot.lane.b32.xlu0 %v11259_v13, %s9608_s28 }
 0x367   : > { %4900 = vrot.lane.b32.xlu1 %v3395_v30, %s9615_s10  ;;  %v11317_v30 = vmax.f32 %v14726_v16, %v10792_v63  ;;  %v14730_v16 = vld [vmem:[#allocation19_spill] sm:$0xff] }
 0x368   : > { %v11286_v55 = vpop.permute.xlu0 %4884 }
 0x369   : > { %v11278_v62 = vpop.permute.xlu1 %5010  ;;  %14723 = vst [vmem:[#allocation91_spill] sm:$0xff] %v11286_v55  ;;  %v11339_v28 = vrot.slane %v11317_v30, %v10008_v7  ;;  %v3452_v55 = vrot.slane %v3444_v22, %v10016_v21  ;;  %v3445_v22 = vcombine.high %v3412_v32, %v3427_v44 }
 0x36a   : > { %14722 = vst [vmem:[#allocation90_spill] sm:$0xff] %v11278_v62  ;;  %5282 = vrot.lane.b32.xlu0 %v11289_v46, %s9609_s29 }
 0x36b   : > { %4902 = vrot.lane.b32.xlu1 %v3461_v35, %s9615_s10  ;;  %v14729_v35 = vld [vmem:[#allocation18_spill] sm:$0xff] }
 0x36c   : > { %v11319_v5 = vpop.permute.xlu0 %4886  ;;  %v11343_v43 = vmax.f32 %v14729_v35, %v10804_v27  ;;  %v3693_v27 = vcombine.high %v11331_v20, %v11339_v28 }
 0x36d   : > { %v11311_v40 = vpop.permute.xlu1 %5012  ;;  %14727 = vst [vmem:[#allocation17_spill] sm:$0xff] %v11319_v5 }
 0x36e   : > { %14725 = vst [vmem:[#allocation93_spill] sm:$0xff] %v11311_v40  ;;  %5284 = vrot.lane.b32.xlu0 %v11322_v24, %s9609_s29  ;;  %v11347_v40 = vmax.f32 %v14730_v16, %v10809_v39  ;;  %v3735_v35 = vrot.slane %v11343_v43, %v10008_v7  ;;  %v11382_v62 = vrot.slane %v3693_v27, %v10016_v21 }
 0x36f   : > { %5028 = vrot.lane.b32.xlu1 %v3386_v23, %s9608_s28 }
 0x370   : > { %v11349_v5 = vpop.permute.xlu0 %5014  ;;  %v3750_v39 = vrot.slane %v11347_v40, %v10008_v7 }
 0x371   : > { %v11333_v63 = vpop.permute.xlu1 %4632  ;;  %14731 = vst [vmem:[#allocation18_spill] sm:$0xff] %v11349_v5  ;;  %v14735_v5 = vld [vmem:[#allocation48_spill] sm:$0xff] }
 0x372   : > { %14728 = vst [vmem:[#allocation94_spill] sm:$0xff] %v11333_v63  ;;  %5032 = vrot.lane.b32.xlu0 %v3518_v0, %s9608_s28  ;;  %v14736_v63 = vld [vmem:[#allocation16_spill] sm:$0xff]  ;;  %v3759_v9 = vcombine.high %v3735_v35, %v3750_v39 }
 0x373   : > { %4648 = vrot.lane.b32.xlu1 %v3526_v51, %s9614_s9  ;;  %v14734_v51 = vld [vmem:[#allocation15_spill] sm:$0xff]  ;;  %v2443_v58 = vmax.f32 %v14736_v63, %v14735_v5 }
 0x374   : > { %v11363_v16 = vpop.permute.xlu0 %5266  ;;  %v11396_v27 = vrot.slane %v3759_v9, %v10016_v21 }
 0x375   : > { %v11354_v59 = vpop.permute.xlu1 %5270  ;;  %14733 = vst [vmem:[#allocation95_spill] sm:$0xff] %v11363_v16  ;;  %v3527_v16 = vcombine.high %v11215_v41, %v14664_v36  ;;  %v3552_v44 = vrot.slane %v2443_v58, %v10008_v7  ;;  %v3459_v41 = vrot.slane %v3445_v22, %v10016_v21  ;;  %v3330_v22 = vcombine.high %v11259_v13, %v14664_v36 }
 0x376   : > { %14732 = vst [vmem:[#allocation19_spill] sm:$0xff] %v11354_v59  ;;  %4780 = vrot.lane.b32.xlu0 %v11366_v57, %s9610_s30  ;;  %v2442_v59 = vmax.f32 %v14734_v51, %v10761_v38  ;;  %v3511_v38 = vcombine.high %v11283_v12, %v3493_v37  ;;  %v3396_v13 = vcombine.high %v3386_v23, %v14664_v36 }
 0x377   : > { %5030 = vrot.lane.b32.xlu1 %v3452_v55, %s9608_s28  ;;  %v3758_v23 = vcombine.low %v3735_v35, %v3750_v39  ;;  %v3692_v39 = vcombine.low %v11331_v20, %v11339_v28  ;;  %v3611_v20 = vcombine.high %v11276_v49, %v14664_v36 }
 0x378   : > { %v11379_v31 = vpop.permute.xlu0 %5268  ;;  %v3537_v32 = vrot.slane %v2442_v59, %v10008_v7  ;;  %v3525_v37 = vrot.slane %v3511_v38, %v10016_v21 }
 0x379   : > { %v11375_v15 = vpop.permute.xlu1 %5016  ;;  %14738 = vst [vmem:[#allocation48_spill] sm:$0xff] %v11379_v31  ;;  %v11474_v28 = vrot.slane %v3692_v39, %v10016_v21  ;;  %v3728_v39 = vcombine.high %v11343_v43, %v14664_v36  ;;  %v3725_v43 = vcombine.high %v11382_v62, %v14664_v36 }
 0x37a   : > { %14737 = vst [vmem:[#allocation15_spill] sm:$0xff] %v11375_v15  ;;  %4782 = vrot.lane.b32.xlu0 %v11382_v62, %s9610_s30 }
 0x37b   : > { %4904 = vrot.lane.b32.xlu1 %v3527_v16, %s9615_s10  ;;  %v3561_v16 = vcombine.high %v3537_v32, %v3552_v44  ;;  %14750 = vst [vmem:[#allocation106_spill] sm:$0xff] %v11474_v28 }
 0x37c   : > { %v11393_v63 = vpop.permute.xlu0 %4888 }
 0x37d   : > { %v11390_v5 = vpop.permute.xlu1 %5140  ;;  %14739 = vst [vmem:[#allocation16_spill] sm:$0xff] %v11393_v63  ;;  %v3575_v15 = vrot.slane %v3561_v16, %v10016_v21  ;;  %v3462_v63 = vcombine.high %v3452_v55, %v14664_v36 }
 0x37e   : > { %4784 = vrot.lane.b32.xlu0 %v11396_v27, %s9610_s30 }
 0x37f   : > { %5286 = vrot.lane.b32.xlu1 %v3459_v41, %s9609_s29 }
 0x380   : > { %v11404_v51 = vpop.permute.xlu0 %5272 }
 0x381   : > { %v11401_v12 = vpop.permute.xlu1 %5142  ;;  %14741 = vst [vmem:[#allocation97_spill] sm:$0xff] %v11404_v51  ;;  %v3626_v51 = vcombine.low %v11301_v25, %v11305_v53  ;;  %v3528_v25 = vcombine.high %v3518_v0, %v14664_v36  ;;  %v3560_v53 = vcombine.low %v3537_v32, %v3552_v44  ;;  %v3530_v44 = vcombine.high %v2442_v59, %v14664_v36 }
 0x382   : > { %14740 = vst [vmem:[#allocation96_spill] sm:$0xff] %v11401_v12  ;;  %5154 = vrot.lane.b32.xlu0 %v3330_v22, %s9616_s11  ;;  %v3463_v12 = vcombine.high %v3459_v41, %v14664_v36 }
 0x383   : > { %5288 = vrot.lane.b32.xlu1 %v3525_v37, %s9609_s29  ;;  %v11433_v16 = vrot.slane %v3626_v51, %v10016_v21  ;;  %v11454_v0 = vrot.slane %v3560_v53, %v10016_v21 }
 0x384   : > { %v11413_v31 = vpop.permute.xlu0 %5138 }
 0x385   : > { %v11410_v9 = vpop.permute.xlu1 %5394  ;;  %14745 = vst [vmem:[#allocation101_spill] sm:$0xff] %v11433_v16  ;;  %v3658_v35 = vcombine.high %v11433_v16, %v14664_v36  ;;  %14748 = vst [vmem:[#allocation104_spill] sm:$0xff] %v11454_v0 }
 0x386   : > { %5158 = vrot.lane.b32.xlu0 %v3462_v63, %s9616_s11  ;;  %v3331_v63 = vcombine.high %v11289_v46, %v14664_v36  ;;  %v11445_v46 = vrot.slane %v3758_v23, %v10016_v21 }
 0x387   : > { %4778 = vrot.lane.b32.xlu1 %v3575_v15, %s9610_s30 }
 0x388   : > { %v11423_v22 = vpop.permute.xlu0 %5396  ;;  %14747 = vst [vmem:[#allocation103_spill] sm:$0xff] %v11445_v46  ;;  %v3790_v23 = vcombine.high %v11445_v46, %v14664_v36 }
 0x389   : > { %v11418_v38 = vpop.permute.xlu1 %5144  ;;  %14743 = vst [vmem:[#allocation99_spill] sm:$0xff] %v11423_v22 }
 0x38a   : > { %14742 = vst [vmem:[#allocation98_spill] sm:$0xff] %v11418_v38  ;;  %5414 = vrot.lane.b32.xlu0 %v3463_v12, %s9613_s8  ;;  %v3397_v12 = vcombine.high %v11322_v24, %v14664_v36  ;;  %v3529_v24 = vcombine.high %v3525_v37, %v14664_v36  ;;  %v3544_v37 = vrot.slane %v3530_v44, %v10008_v7 }
 0x38b   : > { %5156 = vrot.lane.b32.xlu1 %v3396_v13, %s9616_s11  ;;  %v3545_v13 = vcombine.high %v2443_v58, %v14664_v36  ;;  %v3592_v58 = vcombine.high %v11454_v0, %v14664_v36 }
 0x38c   : > { %v11435_v38 = vpop.permute.xlu0 %5398 }
 0x38d   : > { %v11428_v55 = vpop.permute.xlu1 %5400  ;;  %14746 = vst [vmem:[#allocation102_spill] sm:$0xff] %v11435_v38  ;;  %v3559_v53 = vrot.slane %v3545_v13, %v10008_v7  ;;  %v3724_v13 = vcombine.high %v11474_v28, %v14664_v36 }
 0x38e   : > { %14744 = vst [vmem:[#allocation100_spill] sm:$0xff] %v11428_v55  ;;  %5160 = vrot.lane.b32.xlu0 %v3528_v25, %s9616_s11  ;;  %v3596_v25 = vcombine.high %v11272_v26, %v14664_v36  ;;  %v3593_v26 = vcombine.high %v3575_v15, %v14664_v36  ;;  %v14758_v55 = vld [vmem:[#allocation21_spill] sm:$0xff] }
 0x38f   : > { %5410 = vrot.lane.b32.xlu1 %v3331_v63, %s9613_s8  ;;  %v3576_v15 = vcombine.low %v3544_v37, %v3559_v53 }
 0x390   : > { %v11447_v51 = vpop.permute.xlu0 %4764  ;;  %v3610_v49 = vrot.slane %v3596_v25, %v10008_v7  ;;  %v3677_v25 = vcombine.high %v11317_v30, %v14664_v36 }
 0x391   : > { %v11440_v41 = vpop.permute.xlu1 %4762  ;;  %v3584_v62 = vrot.slane %v3576_v15, %v10016_v21  ;;  %v3577_v15 = vcombine.high %v3544_v37, %v3559_v53 }
 0x392   : > { %4652 = vrot.lane.b32.xlu0 %v3658_v35, %s9614_s9  ;;  %v3625_v35 = vrot.slane %v3611_v20, %v10008_v7  ;;  %v3742_v20 = vrot.slane %v3728_v39, %v10008_v7  ;;  %v3691_v16 = vrot.slane %v3677_v25, %v10008_v7 }
 0x393   : > { %5412 = vrot.lane.b32.xlu1 %v3397_v12, %s9613_s8 }
 0x394   : > { %v11463_v63 = vpop.permute.xlu0 %4766 }
 0x395   : > { %v11458_v32 = vpop.permute.xlu1 %4636  ;;  %14749 = vst [vmem:[#allocation105_spill] sm:$0xff] %v11463_v63 }
 0x396   : > { %4656 = vrot.lane.b32.xlu0 %v3790_v23, %s9614_s9  ;;  %v3662_v23 = vcombine.high %v11309_v56, %v14664_v36  ;;  %v3659_v56 = vcombine.high %v11366_v57, %v14664_v36  ;;  %v3791_v57 = vcombine.high %v11396_v27, %v14664_v36 }
 0x397   : > { %5416 = vrot.lane.b32.xlu1 %v3529_v24, %s9613_s8  ;;  %v3743_v24 = vcombine.high %v11347_v40, %v14664_v36  ;;  %v3642_v40 = vcombine.low %v3610_v49, %v3625_v35 }
 0x398   : > { %v11482_v12 = vpop.permute.xlu0 %4768  ;;  %v3676_v30 = vrot.slane %v3662_v23, %v10008_v7  ;;  %v14756_v23 = vld [vmem:[#allocation20_spill] sm:$0xff] }
 0x399   : > { %v11476_v59 = vpop.permute.xlu1 %4640  ;;  %14752 = vst [vmem:[#allocation108_spill] sm:$0xff] %v11482_v12  ;;  %v11531_v25 = vmax.f32 %v14756_v23, %v10821_v45  ;;  %v14764_v23 = vld [vmem:[#allocation53_spill] sm:$0xff] }
 0x39a   : > { %14751 = vst [vmem:[#allocation107_spill] sm:$0xff] %v11476_v59  ;;  %4906 = vrot.lane.b32.xlu0 %v3593_v26, %s9615_s10  ;;  %v3757_v26 = vrot.slane %v3743_v24, %v10008_v7  ;;  %v3650_v24 = vrot.slane %v3642_v40, %v10016_v21  ;;  %v3594_v59 = vcombine.high %v3584_v62, %v14664_v36 }
 0x39b   : > { %4650 = vrot.lane.b32.xlu1 %v3592_v58, %s9614_s9  ;;  %v11547_v45 = vrot.slane %v11531_v25, %v10008_v7 }
 0x39c   : > { %v11501_v58 = vpop.permute.xlu0 %4634  ;;  %v3774_v39 = vcombine.low %v3742_v20, %v3757_v26  ;;  %v3775_v37 = vcombine.high %v3742_v20, %v3757_v26  ;;  %v14763_v26 = vld [vmem:[#allocation22_spill] sm:$0xff] }
 0x39d   : > { %v11493_v44 = vpop.permute.xlu1 %4890 }
 0x39e   : > { %14753 = vst [vmem:[#allocation109_spill] sm:$0xff] %v11493_v44  ;;  %4910 = vrot.lane.b32.xlu0 %v3725_v43, %s9615_s10  ;;  %v3708_v43 = vcombine.low %v3676_v30, %v3691_v16  ;;  %v3782_v12 = vrot.slane %v3774_v39, %v10016_v21 }
 0x39f   : > { %4654 = vrot.lane.b32.xlu1 %v3724_v13, %s9614_s9 }
 0x3a0   : > { %v11515_v28 = vpop.permute.xlu0 %4638  ;;  %v3716_v27 = vrot.slane %v3708_v43, %v10016_v21 }
 0x3a1   : > { %v11509_v46 = vpop.permute.xlu1 %4894 }
 0x3a2   : > { %14754 = vst [vmem:[#allocation110_spill] sm:$0xff] %v11509_v46  ;;  %5034 = vrot.lane.b32.xlu0 %v3584_v62, %s9608_s28  ;;  %v3643_v46 = vcombine.high %v3610_v49, %v3625_v35  ;;  %v3591_v49 = vrot.slane %v3577_v15, %v10016_v21  ;;  %v3709_v35 = vcombine.high %v3676_v30, %v3691_v16 }
 0x3a3   : > { %4908 = vrot.lane.b32.xlu1 %v3659_v56, %s9615_s10  ;;  %v14757_v56 = vld [vmem:[#allocation52_spill] sm:$0xff]  ;;  %v11574_v30 = vrot.slane %v3775_v37, %v10016_v21 }
 0x3a4   : > { %v11523_v0 = vpop.permute.xlu0 %4892  ;;  %v11535_v38 = vmax.f32 %v14758_v55, %v14757_v56  ;;  %v3657_v43 = vrot.slane %v3643_v46, %v10016_v21  ;;  %v14765_v56 = vld [vmem:[#allocation23_spill] sm:$0xff]  ;;  %v3723_v15 = vrot.slane %v3709_v35, %v10016_v21  ;;  %v14772_v35 = vld [vmem:[#allocation25_spill] sm:$0xff] }
 0x3a5   : > { %v11520_v13 = vpop.permute.xlu1 %5020 }
 0x3a6   : > { %14755 = vst [vmem:[#allocation111_spill] sm:$0xff] %v11520_v13  ;;  %4912 = vrot.lane.b32.xlu0 %v3791_v57, %s9615_s10  ;;  %v11551_v55 = vrot.slane %v11535_v38, %v10008_v7  ;;  %v11565_v57 = vmax.f32 %v14763_v26, %v10837_v50 }
 0x3a7   : > { %5036 = vrot.lane.b32.xlu1 %v3650_v24, %s9608_s28 }
 0x3a8   : > { %v11540_v13 = vpop.permute.xlu0 %5018  ;;  %v3825_v20 = vcombine.high %v11547_v45, %v11551_v55  ;;  %v3867_v50 = vrot.slane %v11565_v57, %v10008_v7 }
 0x3a9   : > { %v11537_v40 = vpop.permute.xlu1 %5022  ;;  %14760 = vst [vmem:[#allocation52_spill] sm:$0xff] %v11540_v13 }
 0x3aa   : > { %14759 = vst [vmem:[#allocation20_spill] sm:$0xff] %v11537_v40  ;;  %5038 = vrot.lane.b32.xlu0 %v3716_v27, %s9608_s28  ;;  %v3839_v37 = vrot.slane %v3825_v20, %v10016_v21 }
 0x3ab   : > { %5040 = vrot.lane.b32.xlu1 %v3782_v12, %s9608_s28 }
 0x3ac   : > { %v11556_v39 = vpop.permute.xlu0 %4896 }
 0x3ad   : > { %v11553_v53 = vpop.permute.xlu1 %5276  ;;  %14762 = vst [vmem:[#allocation112_spill] sm:$0xff] %v11556_v39  ;;  %v14771_v39 = vld [vmem:[#allocation55_spill] sm:$0xff] }
 0x3ae   : > { %14761 = vst [vmem:[#allocation21_spill] sm:$0xff] %v11553_v53  ;;  %5292 = vrot.lane.b32.xlu0 %v3657_v43, %s9609_s29  ;;  %v11569_v53 = vmax.f32 %v14765_v56, %v14764_v23  ;;  %v14769_v56 = vld [vmem:[#allocation54_spill] sm:$0xff]  ;;  %v2455_v40 = vmax.f32 %v14772_v35, %v14771_v39  ;;  %v3792_v39 = vcombine.high %v3782_v12, %v14664_v36 }
 0x3af   : > { %5290 = vrot.lane.b32.xlu1 %v3591_v49, %s9609_s29 }
 0x3b0   : > { %v11576_v46 = vpop.permute.xlu0 %5024  ;;  %v3882_v26 = vrot.slane %v11569_v53, %v10008_v7 }
 0x3b1   : > { %v11571_v16 = vpop.permute.xlu1 %5280  ;;  %14767 = vst [vmem:[#allocation53_spill] sm:$0xff] %v11576_v46 }
 0x3b2   : > { %14766 = vst [vmem:[#allocation22_spill] sm:$0xff] %v11571_v16  ;;  %5294 = vrot.lane.b32.xlu0 %v3723_v15, %s9609_s29  ;;  %v14770_v16 = vld [vmem:[#allocation24_spill] sm:$0xff]  ;;  %v3891_v22 = vcombine.high %v3867_v50, %v3882_v26  ;;  %v3890_v20 = vcombine.low %v3867_v50, %v3882_v26  ;;  %v3595_v26 = vcombine.high %v3591_v49, %v14664_v36 }
 0x3b3   : > { %5296 = vrot.lane.b32.xlu1 %v11574_v30, %s9609_s29  ;;  %v2454_v46 = vmax.f32 %v14770_v16, %v14769_v56  ;;  %v3948_v16 = vrot.slane %v2455_v40, %v10008_v7 }
 0x3b4   : > { %v11593_v13 = vpop.permute.xlu0 %5274  ;;  %v11612_v35 = vrot.slane %v3890_v20, %v10016_v21 }
 0x3b5   : > { %v11586_v23 = vpop.permute.xlu1 %4770  ;;  %14773 = vst [vmem:[#allocation54_spill] sm:$0xff] %v11593_v13  ;;  %v3933_v44 = vrot.slane %v2454_v46, %v10008_v7 }
 0x3b6   : > { %14768 = vst [vmem:[#allocation23_spill] sm:$0xff] %v11586_v23  ;;  %5162 = vrot.lane.b32.xlu0 %v3594_v59, %s9616_s11  ;;  %v3660_v23 = vcombine.high %v3650_v24, %v14664_v36  ;;  %v3905_v59 = vrot.slane %v3891_v22, %v10016_v21  ;;  %14776 = vst [vmem:[#allocation25_spill] sm:$0xff] %v11612_v35  ;;  %v3922_v20 = vcombine.high %v11612_v35, %v14664_v36 }
 0x3b7   : > { %4786 = vrot.lane.b32.xlu1 %v3839_v37, %s9610_s30  ;;  %v3956_v24 = vcombine.low %v3933_v44, %v3948_v16  ;;  %v3957_v12 = vcombine.high %v3933_v44, %v3948_v16  ;;  %v14781_v16 = vld [vmem:[#allocation26_spill] sm:$0xff] }
 0x3b8   : > { %v11603_v56 = vpop.permute.xlu0 %5278 }
 0x3b9   : > { %v11598_v63 = vpop.permute.xlu1 %5148  ;;  %14774 = vst [vmem:[#allocation24_spill] sm:$0xff] %v11603_v56  ;;  %v11623_v56 = vrot.slane %v3956_v24, %v10016_v21  ;;  %v3971_v44 = vrot.slane %v3957_v12, %v10016_v21 }
 0x3ba   : > { %5168 = vrot.lane.b32.xlu0 %v3792_v39, %s9616_s11  ;;  %v3726_v39 = vcombine.high %v3716_v27, %v14664_v36  ;;  %v14782_v27 = vld [vmem:[#allocation57_spill] sm:$0xff] }
 0x3bb   : > { %5164 = vrot.lane.b32.xlu1 %v3660_v23, %s9616_s11  ;;  %14778 = vst [vmem:[#allocation114_spill] sm:$0xff] %v11623_v56 }
 0x3bc   : > { %v11614_v50 = vpop.permute.xlu0 %5146 }
 0x3bd   : > { %v11608_v62 = vpop.permute.xlu1 %5150 }
 0x3be   : > { %14775 = vst [vmem:[#allocation55_spill] sm:$0xff] %v11608_v62  ;;  %5418 = vrot.lane.b32.xlu0 %v3595_v26, %s9613_s8  ;;  %v2456_v26 = vmax.f32 %v14781_v16, %v10864_v48 }
 0x3bf   : > { %4788 = vrot.lane.b32.xlu1 %v3905_v59, %s9610_s30 }
 0x3c0   : > { %v11625_v22 = vpop.permute.xlu0 %4772  ;;  %v3999_v12 = vrot.slane %v2456_v26, %v10008_v7 }
 0x3c1   : > { %v11619_v23 = vpop.permute.xlu1 %4774  ;;  %14779 = vst [vmem:[#allocation115_spill] sm:$0xff] %v11625_v22  ;;  %v3988_v22 = vcombine.high %v11623_v56, %v14664_v36  ;;  %v3926_v56 = vcombine.high %v2454_v46, %v14664_v36  ;;  %v3824_v46 = vcombine.low %v11547_v45, %v11551_v55 }
 0x3c2   : > { %14777 = vst [vmem:[#allocation113_spill] sm:$0xff] %v11619_v23  ;;  %4660 = vrot.lane.b32.xlu0 %v3922_v20, %s9614_s9  ;;  %v14783_v23 = vld [vmem:[#allocation27_spill] sm:$0xff]  ;;  %v3661_v20 = vcombine.high %v3657_v43, %v14664_v36  ;;  %v3941_v43 = vcombine.high %v2455_v40, %v14664_v36 }
 0x3c3   : > { %5166 = vrot.lane.b32.xlu1 %v3726_v39, %s9616_s11  ;;  %v2457_v24 = vmax.f32 %v14783_v23, %v14782_v27  ;;  %v3857_v23 = vcombine.high %v3839_v37, %v14664_v36  ;;  %v3794_v37 = vcombine.high %v11531_v25, %v14664_v36 }
 0x3c4   : > { %v11638_v13 = vpop.permute.xlu0 %5404 }
 0x3c5   : > { %v11631_v49 = vpop.permute.xlu1 %5152  ;;  %14784 = vst [vmem:[#allocation26_spill] sm:$0xff] %v11638_v13  ;;  %v4014_v48 = vrot.slane %v2457_v24, %v10008_v7  ;;  %v3923_v13 = vcombine.high %v3905_v59, %v14664_v36  ;;  %v11675_v59 = vrot.slane %v3926_v56, %v10008_v7  ;;  %v3808_v45 = vrot.slane %v3794_v37, %v10008_v7 }
 0x3c6   : > { %14780 = vst [vmem:[#allocation116_spill] sm:$0xff] %v11631_v49  ;;  %4662 = vrot.lane.b32.xlu0 %v3988_v22, %s9614_s9  ;;  %v3727_v22 = vcombine.high %v3723_v15, %v14664_v36  ;;  %v3860_v56 = vcombine.high %v11565_v57, %v14664_v36 }
 0x3c7   : > { %4790 = vrot.lane.b32.xlu1 %v3971_v44, %s9610_s30  ;;  %v4022_v35 = vcombine.low %v3999_v12, %v4014_v48  ;;  %v4023_v15 = vcombine.high %v3999_v12, %v4014_v48 }
 0x3c8   : > { %v11649_v16 = vpop.permute.xlu0 %5406 }
 0x3c9   : > { %v11644_v39 = vpop.permute.xlu1 %5402  ;;  %14786 = vst [vmem:[#allocation27_spill] sm:$0xff] %v11649_v16  ;;  %v11681_v25 = vrot.slane %v4022_v35, %v10016_v21  ;;  %v3875_v35 = vcombine.high %v11569_v53, %v14664_v36 }
 0x3ca   : > { %14785 = vst [vmem:[#allocation57_spill] sm:$0xff] %v11644_v39  ;;  %4914 = vrot.lane.b32.xlu0 %v3857_v23, %s9615_s10  ;;  %v3793_v23 = vcombine.high %v11574_v30, %v14664_v36  ;;  %v11691_v30 = vrot.slane %v3824_v46, %v10016_v21 }
 0x3cb   : > { %5420 = vrot.lane.b32.xlu1 %v3661_v20, %s9613_s8  ;;  %v3809_v20 = vcombine.high %v11535_v38, %v14664_v36  ;;  %14790 = vst [vmem:[#allocation120_spill] sm:$0xff] %v11681_v25  ;;  %v4054_v37 = vcombine.high %v11681_v25, %v14664_v36  ;;  %v3889_v53 = vrot.slane %v3875_v35, %v10008_v7 }
 0x3cc   : > { %v11659_v49 = vpop.permute.xlu0 %4776  ;;  %14792 = vst [vmem:[#allocation122_spill] sm:$0xff] %v11691_v30 }
 0x3cd   : > { %v11654_v27 = vpop.permute.xlu1 %5408  ;;  %14788 = vst [vmem:[#allocation118_spill] sm:$0xff] %v11659_v49  ;;  %v3823_v55 = vrot.slane %v3809_v20, %v10008_v7  ;;  %v3874_v20 = vrot.slane %v3860_v56, %v10008_v7  ;;  %v4007_v49 = vcombine.high %v2457_v24, %v14664_v36 }
 0x3ce   : > { %14787 = vst [vmem:[#allocation117_spill] sm:$0xff] %v11654_v27  ;;  %4916 = vrot.lane.b32.xlu0 %v3923_v13, %s9615_s10  ;;  %v3989_v13 = vcombine.high %v3971_v44, %v14664_v36  ;;  %v4037_v44 = vrot.slane %v4023_v15, %v10016_v21  ;;  %v3856_v15 = vcombine.high %v11691_v30, %v14664_v36 }
 0x3cf   : > { %5422 = vrot.lane.b32.xlu1 %v3727_v22, %s9613_s8  ;;  %v11678_v22 = vrot.slane %v3941_v43, %v10008_v7  ;;  %v3840_v57 = vcombine.low %v3808_v45, %v3823_v55  ;;  %v3906_v56 = vcombine.low %v3874_v20, %v3889_v53  ;;  %v4021_v24 = vrot.slane %v4007_v49, %v10008_v7  ;;  %v14801_v49 = vld [vmem:[#allocation31_spill] sm:$0xff] }
 0x3d0   : > { %v11683_v38 = vpop.permute.xlu0 %4644 }
 0x3d1   : > { %v11670_v40 = vpop.permute.xlu1 %4642  ;;  %14791 = vst [vmem:[#allocation121_spill] sm:$0xff] %v11683_v38  ;;  %v3972_v48 = vcombine.low %v11675_v59, %v11678_v22  ;;  %v14811_v38 = vld [vmem:[#allocation33_spill] sm:$0xff] }
 0x3d2   : > { %14789 = vst [vmem:[#allocation119_spill] sm:$0xff] %v11670_v40  ;;  %4918 = vrot.lane.b32.xlu0 %v3989_v13, %s9615_s10  ;;  %v3992_v13 = vcombine.high %v2456_v26, %v14664_v36 }
 0x3d3   : > { %5424 = vrot.lane.b32.xlu1 %v3793_v23, %s9613_s8  ;;  %v3841_v23 = vcombine.high %v3808_v45, %v3823_v55  ;;  %v11719_v27 = vrot.slane %v3972_v48, %v10016_v21  ;;  %v3907_v45 = vcombine.high %v3874_v20, %v3889_v53  ;;  %v11750_v20 = vmax.f32 %v14801_v49, %v10886_v10 }
 0x3d4   : > { %v11702_v43 = vpop.permute.xlu0 %4646  ;;  %v4006_v26 = vrot.slane %v3992_v13, %v10008_v7 }
 0x3d5   : > { %v11697_v12 = vpop.permute.xlu1 %4898  ;;  %14794 = vst [vmem:[#allocation124_spill] sm:$0xff] %v11702_v43  ;;  %v11734_v48 = vrot.slane %v3841_v23, %v10016_v21  ;;  %v3914_v23 = vrot.slane %v3906_v56, %v10016_v21 }
 0x3d6   : > { %14793 = vst [vmem:[#allocation123_spill] sm:$0xff] %v11697_v12  ;;  %4664 = vrot.lane.b32.xlu0 %v4054_v37, %s9614_s9  ;;  %v11727_v37 = vrot.slane %v3840_v57, %v10016_v21  ;;  %v14800_v57 = vld [vmem:[#allocation30_spill] sm:$0xff]  ;;  %v4038_v13 = vcombine.low %v4006_v26, %v4021_v24  ;;  %v4039_v10 = vcombine.high %v4006_v26, %v4021_v24  ;;  %v14810_v12 = vld [vmem:[#allocation59_spill] sm:$0xff] }
 0x3d7   : > { %4792 = vrot.lane.b32.xlu1 %v4037_v44, %s9610_s30  ;;  %v4055_v24 = vcombine.high %v4037_v44, %v14664_v36  ;;  %v11795_v43 = vmax.f32 %v14811_v38, %v14810_v12 }
 0x3d8   : > { %v11716_v25 = vpop.permute.xlu0 %5026 }
 0x3d9   : > { %v11710_v46 = vpop.permute.xlu1 %4900  ;;  %14796 = vst [vmem:[#allocation126_spill] sm:$0xff] %v11716_v25 }
 0x3da   : > { %14795 = vst [vmem:[#allocation125_spill] sm:$0xff] %v11710_v46  ;;  %5046 = vrot.lane.b32.xlu0 %v11719_v27, %s9608_s28  ;;  %v11744_v46 = vmax.f32 %v14800_v57, %v10883_v61  ;;  %v3921_v61 = vrot.slane %v3907_v45, %v10016_v21  ;;  %v3973_v57 = vcombine.high %v11675_v59, %v11678_v22  ;;  %v14805_v45 = vld [vmem:[#allocation34_spill] sm:$0xff]  ;;  %v14806_v59 = vld [vmem:[#allocation35_spill] sm:$0xff] }
 0x3db   : > { %4658 = vrot.lane.b32.xlu1 %v3856_v15, %s9614_s9  ;;  %v14799_v15 = vld [vmem:[#allocation28_spill] sm:$0xff]  ;;  %v11782_v22 = vmax.f32 %v14806_v59, %v10903_v3  ;;  %v4046_v3 = vrot.slane %v4038_v13, %v10016_v21  ;;  %v4212_v59 = vrot.slane %v11795_v43, %v10008_v7 }
 0x3dc   : > { %v11731_v55 = vpop.permute.xlu0 %5282  ;;  %v11740_v30 = vmax.f32 %v14799_v15, %v10875_v11  ;;  %v11769_v56 = vrot.slane %v11744_v46, %v10008_v7  ;;  %v3987_v38 = vrot.slane %v3973_v57, %v10016_v21 }
 0x3dd   : > { %v11724_v35 = vpop.permute.xlu1 %4902  ;;  %14798 = vst [vmem:[#allocation128_spill] sm:$0xff] %v11731_v55  ;;  %v14803_v55 = vld [vmem:[#allocation29_spill] sm:$0xff] }
 0x3de   : > { %14797 = vst [vmem:[#allocation127_spill] sm:$0xff] %v11724_v35  ;;  %5298 = vrot.lane.b32.xlu0 %v11734_v48, %s9609_s29  ;;  %v11757_v11 = vmax.f32 %v14803_v55, %v10878_v33  ;;  %v4065_v49 = vrot.slane %v11740_v30, %v10008_v7  ;;  %v11774_v33 = vrot.slane %v11750_v20, %v10008_v7  ;;  %v14809_v35 = vld [vmem:[#allocation32_spill] sm:$0xff] }
 0x3df   : > { %5042 = vrot.lane.b32.xlu1 %v11727_v37, %s9608_s28  ;;  %v11778_v55 = vmax.f32 %v14805_v45, %v10900_v1 }
 0x3e0   : > { %v11759_v15 = vpop.permute.xlu0 %5284  ;;  %v4155_v44 = vcombine.high %v11769_v56, %v11774_v33 }
 0x3e1   : > { %v11752_v53 = vpop.permute.xlu1 %5028  ;;  %14804 = vst [vmem:[#allocation30_spill] sm:$0xff] %v11759_v15  ;;  %v4080_v15 = vrot.slane %v11757_v11, %v10008_v7  ;;  %v4263_v45 = vrot.slane %v11778_v55, %v10008_v7 }
 0x3e2   : > { %14802 = vst [vmem:[#allocation28_spill] sm:$0xff] %v11752_v53  ;;  %5300 = vrot.lane.b32.xlu0 %v3921_v61, %s9609_s29  ;;  %v14808_v53 = vld [vmem:[#allocation58_spill] sm:$0xff]  ;;  %v11823_v57 = vrot.slane %v4155_v44, %v10016_v21 }
 0x3e3   : > { %5044 = vrot.lane.b32.xlu1 %v3914_v23, %s9608_s28  ;;  %v11791_v25 = vmax.f32 %v14809_v35, %v14808_v53  ;;  %v4278_v35 = vrot.slane %v11782_v22, %v10008_v7  ;;  %v4089_v12 = vcombine.high %v4065_v49, %v4080_v15 }
 0x3e4   : > { %v11797_v1 = vpop.permute.xlu0 %5032 }
 0x3e5   : > { %v11784_v26 = vpop.permute.xlu1 %4648  ;;  %14812 = vst [vmem:[#allocation29_spill] sm:$0xff] %v11797_v1  ;;  %v4197_v13 = vrot.slane %v11791_v25, %v10008_v7  ;;  %v4053_v1 = vrot.slane %v4039_v10, %v10016_v21  ;;  %v11828_v39 = vrot.slane %v4089_v12, %v10016_v21 }
 0x3e6   : > { %14807 = vst [vmem:[#allocation31_spill] sm:$0xff] %v11784_v26  ;;  %5048 = vrot.lane.b32.xlu0 %v4046_v3, %s9608_s28  ;;  %v4287_v26 = vcombine.high %v4263_v45, %v4278_v35 }
 0x3e7   : > { %4920 = vrot.lane.b32.xlu1 %v4055_v24, %s9615_s10 }
 0x3e8   : > { %v11815_v24 = vpop.permute.xlu0 %4780 }
 0x3e9   : > { %v11808_v53 = vpop.permute.xlu1 %5030  ;;  %14814 = vst [vmem:[#allocation35_spill] sm:$0xff] %v11815_v24  ;;  %v11837_v24 = vrot.slane %v4287_v26, %v10016_v21  ;;  %v3858_v26 = vcombine.high %v11727_v37, %v14664_v36  ;;  %v4154_v37 = vcombine.low %v11769_v56, %v11774_v33  ;;  %v4286_v56 = vcombine.low %v4263_v45, %v4278_v35 }
 0x3ea   : > { %14813 = vst [vmem:[#allocation34_spill] sm:$0xff] %v11808_v53  ;;  %5304 = vrot.lane.b32.xlu0 %v4053_v1, %s9609_s29  ;;  %v4221_v53 = vcombine.high %v4197_v13, %v4212_v59  ;;  %v4073_v45 = vcombine.high %v11757_v11, %v14664_v36  ;;  %v4139_v11 = vcombine.high %v11750_v20, %v14664_v36 }
 0x3eb   : > { %5302 = vrot.lane.b32.xlu1 %v3987_v38, %s9609_s29 }
 0x3ec   : > { %v11825_v40 = vpop.permute.xlu0 %4782  ;;  %v11842_v44 = vrot.slane %v4221_v53, %v10016_v21 }
 0x3ed   : > { %v11820_v16 = vpop.permute.xlu1 %4904  ;;  %14816 = vst [vmem:[#allocation32_spill] sm:$0xff] %v11825_v40  ;;  %v3924_v40 = vcombine.high %v3914_v23, %v14664_v36  ;;  %v4088_v23 = vcombine.low %v4065_v49, %v4080_v15  ;;  %v4220_v15 = vcombine.low %v4197_v13, %v4212_v59  ;;  %v4057_v49 = vcombine.high %v4053_v1, %v14664_v36 }
 0x3ee   : > { %14815 = vst [vmem:[#allocation58_spill] sm:$0xff] %v11820_v16  ;;  %4794 = vrot.lane.b32.xlu0 %v11828_v39, %s9610_s30 }
 0x3ef   : > { %4796 = vrot.lane.b32.xlu1 %v11823_v57, %s9610_s30  ;;  %v11894_v13 = vrot.slane %v4220_v15, %v10016_v21  ;;  %v11923_v15 = vrot.slane %v4073_v45, %v10008_v7 }
 0x3f0   : > { %v11839_v16 = vpop.permute.xlu0 %4784 }
 0x3f1   : > { %v11834_v10 = vpop.permute.xlu1 %5286  ;;  %14818 = vst [vmem:[#allocation33_spill] sm:$0xff] %v11839_v16  ;;  %v3990_v16 = vcombine.high %v11719_v27, %v14664_v36  ;;  %v3991_v27 = vcombine.high %v3987_v38, %v14664_v36  ;;  %v4056_v38 = vcombine.high %v4046_v3, %v14664_v36  ;;  %14825 = vst [vmem:[#allocation135_spill] sm:$0xff] %v11894_v13 }
 0x3f2   : > { %14817 = vst [vmem:[#allocation59_spill] sm:$0xff] %v11834_v10  ;;  %4798 = vrot.lane.b32.xlu0 %v11842_v44, %s9610_s30  ;;  %v11903_v3 = vrot.slane %v4286_v56, %v10016_v21  ;;  %v4271_v56 = vcombine.high %v11782_v22, %v14664_v36 }
 0x3f3   : > { %4800 = vrot.lane.b32.xlu1 %v11837_v24, %s9610_s30 }
 0x3f4   : > { %v11851_v62 = vpop.permute.xlu0 %5154  ;;  %14827 = vst [vmem:[#allocation137_spill] sm:$0xff] %v11903_v3 }
 0x3f5   : > { %v11848_v12 = vpop.permute.xlu1 %5288  ;;  %14820 = vst [vmem:[#allocation130_spill] sm:$0xff] %v11851_v62 }
 0x3f6   : > { %14819 = vst [vmem:[#allocation129_spill] sm:$0xff] %v11848_v12  ;;  %5170 = vrot.lane.b32.xlu0 %v3858_v26, %s9616_s11  ;;  %v3925_v12 = vcombine.high %v3921_v61, %v14664_v36 }
 0x3f7   : > { %5172 = vrot.lane.b32.xlu1 %v3924_v40, %s9616_s11  ;;  %v3859_v40 = vcombine.high %v11734_v48, %v14664_v36  ;;  %v11884_v48 = vrot.slane %v4154_v37, %v10016_v21 }
 0x3f8   : > { %v11861_v10 = vpop.permute.xlu0 %5158 }
 0x3f9   : > { %v11857_v53 = vpop.permute.xlu1 %4778  ;;  %14823 = vst [vmem:[#allocation133_spill] sm:$0xff] %v11884_v48 }
 0x3fa   : > { %14821 = vst [vmem:[#allocation131_spill] sm:$0xff] %v11857_v53  ;;  %5428 = vrot.lane.b32.xlu0 %v3925_v12, %s9613_s8  ;;  %v4058_v12 = vcombine.high %v11740_v30, %v14664_v36 }
 0x3fb   : > { %5174 = vrot.lane.b32.xlu1 %v3990_v16, %s9616_s11  ;;  %v11878_v16 = vrot.slane %v4088_v23, %v10016_v21  ;;  %v4186_v23 = vcombine.high %v11884_v48, %v14664_v36 }
 0x3fc   : > { %v11872_v26 = vpop.permute.xlu0 %5414  ;;  %v11912_v30 = vrot.slane %v4058_v12, %v10008_v7  ;;  %v4153_v12 = vrot.slane %v4139_v11, %v10008_v7 }
 0x3fd   : > { %v11866_v62 = vpop.permute.xlu1 %5156  ;;  %14822 = vst [vmem:[#allocation132_spill] sm:$0xff] %v11878_v16  ;;  %v4120_v1 = vcombine.high %v11878_v16, %v14664_v36  ;;  %v14836_v16 = vld [vmem:[#allocation36_spill] sm:$0xff] }
 0x3fe   : > { %5430 = vrot.lane.b32.xlu0 %v3991_v27, %s9613_s8  ;;  %v4252_v27 = vcombine.high %v11894_v13, %v14664_v36  ;;  %v4104_v22 = vcombine.low %v11912_v30, %v11923_v15  ;;  %v2466_v48 = vmax.f32 %v14836_v16, %v10908_v6 }
 0x3ff   : > { %5426 = vrot.lane.b32.xlu1 %v3859_v40, %s9613_s8  ;;  %v4124_v40 = vcombine.high %v11744_v46, %v14664_v36  ;;  %v4318_v46 = vcombine.high %v11903_v3, %v14664_v36 }
 0x400   : > { %v11886_v33 = vpop.permute.xlu0 %5160 }
 0x401   : > { %v11880_v61 = vpop.permute.xlu1 %5410  ;;  %14824 = vst [vmem:[#allocation134_spill] sm:$0xff] %v11886_v33  ;;  %v4138_v20 = vrot.slane %v4124_v40, %v10008_v7  ;;  %v4187_v40 = vcombine.high %v11823_v57, %v14664_v36 }
 0x402   : > { %5176 = vrot.lane.b32.xlu0 %v4056_v38, %s9616_s11 }
 0x403   : > { %5432 = vrot.lane.b32.xlu1 %v4057_v49, %s9613_s8  ;;  %v4256_v49 = vcombine.high %v11778_v55, %v14664_v36  ;;  %v4121_v55 = vcombine.high %v11828_v39, %v14664_v36  ;;  %v4170_v11 = vcombine.low %v4138_v20, %v4153_v12  ;;  %v4190_v39 = vcombine.high %v11791_v25, %v14664_v36 }
 0x404   : > { %v11905_v35 = vpop.permute.xlu0 %4652  ;;  %v4171_v3 = vcombine.high %v4138_v20, %v4153_v12  ;;  %v4329_v12 = vrot.slane %v2466_v48, %v10008_v7 }
 0x405   : > { %v11896_v59 = vpop.permute.xlu1 %5412  ;;  %14828 = vst [vmem:[#allocation138_spill] sm:$0xff] %v11905_v35  ;;  %v11944_v45 = vrot.slane %v4256_v49, %v10008_v7  ;;  %v4205_v49 = vcombine.high %v11795_v43, %v14664_v36  ;;  %v4204_v25 = vrot.slane %v4190_v39, %v10008_v7  ;;  %v14839_v39 = vld [vmem:[#allocation38_spill] sm:$0xff] }
 0x406   : > { %14826 = vst [vmem:[#allocation136_spill] sm:$0xff] %v11896_v59  ;;  %4668 = vrot.lane.b32.xlu0 %v4186_v23, %s9614_s9  ;;  %v11947_v23 = vrot.slane %v4271_v56, %v10008_v7  ;;  %v4253_v56 = vcombine.high %v11842_v44, %v14664_v36  ;;  %v11978_v44 = vrot.slane %v4170_v11, %v10016_v21  ;;  %v14840_v11 = vld [vmem:[#allocation39_spill] sm:$0xff] }
 0x407   : > { %4666 = vrot.lane.b32.xlu1 %v4120_v1, %s9614_s9  ;;  %v4219_v43 = vrot.slane %v4205_v49, %v10008_v7  ;;  %v2468_v49 = vmax.f32 %v14839_v39, %v10928_v19  ;;  %v2469_v20 = vmax.f32 %v14840_v11, %v10936_v14  ;;  %v12006_v19 = vrot.slane %v4171_v3, %v10016_v21 }
 0x408   : > { %v11929_v38 = vpop.permute.xlu0 %4656  ;;  %v4302_v13 = vcombine.low %v11944_v45, %v11947_v23  ;;  %v4322_v14 = vcombine.high %v2466_v48, %v14664_v36  ;;  %v4105_v3 = vcombine.high %v11912_v30, %v11923_v15  ;;  %v14845_v48 = vld [vmem:[#allocation61_spill] sm:$0xff] }
 0x409   : > { %v11918_v37 = vpop.permute.xlu1 %5416  ;;  %14830 = vst [vmem:[#allocation140_spill] sm:$0xff] %v11929_v38  ;;  %v4236_v6 = vcombine.low %v4204_v25, %v4219_v43  ;;  %v12012_v11 = vrot.slane %v2468_v49, %v10008_v7  ;;  %v14853_v38 = vld [vmem:[#allocation43_spill] sm:$0xff] }
 0x40a   : > { %14829 = vst [vmem:[#allocation139_spill] sm:$0xff] %v11918_v37  ;;  %4672 = vrot.lane.b32.xlu0 %v4318_v46, %s9614_s9 }
 0x40b   : > { %4670 = vrot.lane.b32.xlu1 %v4252_v27, %s9614_s9 }
 0x40c   : > { %v11949_v27 = vpop.permute.xlu0 %4906 }
 0x40d   : > { %v11937_v1 = vpop.permute.xlu1 %4650  ;;  %14832 = vst [vmem:[#allocation142_spill] sm:$0xff] %v11949_v27 }
 0x40e   : > { %14831 = vst [vmem:[#allocation141_spill] sm:$0xff] %v11937_v1  ;;  %4924 = vrot.lane.b32.xlu0 %v4187_v40, %s9615_s10  ;;  %v14862_v1 = vld [vmem:[#allocation65_spill] sm:$0xff] }
 0x40f   : > { %4922 = vrot.lane.b32.xlu1 %v4121_v55, %s9615_s10  ;;  %v11968_v55 = vrot.slane %v4104_v22, %v10016_v21  ;;  %v14837_v22 = vld [vmem:[#allocation37_spill] sm:$0xff] }
 0x410   : > { %v11965_v57 = vpop.permute.xlu0 %4910  ;;  %v2467_v37 = vmax.f32 %v14837_v22, %v10921_v17  ;;  %v4319_v17 = vcombine.high %v11837_v24, %v14664_v36  ;;  %v12015_v24 = vrot.slane %v2469_v20, %v10008_v7 }
 0x411   : > { %v11959_v46 = vpop.permute.xlu1 %4654  ;;  %14834 = vst [vmem:[#allocation144_spill] sm:$0xff] %v11965_v57  ;;  %v11987_v57 = vrot.slane %v4302_v13, %v10016_v21  ;;  %v4237_v13 = vcombine.high %v4204_v25, %v4219_v43  ;;  %v14843_v25 = vld [vmem:[#allocation60_spill] sm:$0xff] }
 0x412   : > { %14833 = vst [vmem:[#allocation143_spill] sm:$0xff] %v11959_v46  ;;  %5050 = vrot.lane.b32.xlu0 %v11968_v55, %s9608_s28  ;;  %v4344_v22 = vrot.slane %v2467_v37, %v10008_v7  ;;  %v4337_v39 = vcombine.high %v2467_v37, %v14664_v36  ;;  %v14844_v43 = vld [vmem:[#allocation40_spill] sm:$0xff] }
 0x413   : > { %4926 = vrot.lane.b32.xlu1 %v4253_v56, %s9615_s10 }
 0x414   : > { %v11984_v56 = vpop.permute.xlu0 %5034  ;;  %v4353_v27 = vcombine.high %v4329_v12, %v4344_v22  ;;  %v12039_v30 = vrot.slane %v4337_v39, %v10008_v7  ;;  %v4352_v15 = vcombine.low %v4329_v12, %v4344_v22 }
 0x415   : > { %v11975_v40 = vpop.permute.xlu1 %4908  ;;  %14838 = vst [vmem:[#allocation36_spill] sm:$0xff] %v11984_v56 }
 0x416   : > { %14835 = vst [vmem:[#allocation145_spill] sm:$0xff] %v11975_v40  ;;  %5056 = vrot.lane.b32.xlu0 %v11987_v57, %s9608_s28 }
 0x417   : > { %5052 = vrot.lane.b32.xlu1 %v11978_v44, %s9608_s28 }
 0x418   : > { %v12003_v56 = vpop.permute.xlu0 %4912 }
 0x419   : > { %v11997_v16 = vpop.permute.xlu1 %5036  ;;  %14842 = vst [vmem:[#allocation38_spill] sm:$0xff] %v12003_v56  ;;  %v14846_v56 = vld [vmem:[#allocation41_spill] sm:$0xff] }
 0x41a   : > { %14841 = vst [vmem:[#allocation37_spill] sm:$0xff] %v11997_v16  ;;  %v2470_v16 = vmax.f32 %v14844_v43, %v14843_v25  ;;  %5308 = vrot.lane.b32.xlu0 %v12006_v19, %s9609_s29  ;;  %v2471_v37 = vmax.f32 %v14846_v56, %v14845_v48  ;;  %v12033_v25 = vrot.slane %v4237_v13, %v10016_v21 }
 0x41b   : > { %4928 = vrot.lane.b32.xlu1 %v4319_v17, %s9615_s10  ;;  %v12028_v17 = vrot.slane %v4236_v6, %v10016_v21  ;;  %v12036_v43 = vrot.slane %v4322_v14, %v10008_v7  ;;  %v4388_v56 = vcombine.high %v2468_v49, %v14664_v36  ;;  %v4303_v6 = vcombine.high %v11944_v45, %v11947_v23  ;;  %v14850_v23 = vld [vmem:[#allocation62_spill] sm:$0xff] }
 0x41c   : > { %v12030_v53 = vpop.permute.xlu0 %5038  ;;  %v4403_v48 = vcombine.high %v2469_v20, %v14664_v36  ;;  %v4418_v13 = vcombine.low %v12012_v11, %v12015_v24  ;;  %v4454_v14 = vcombine.high %v2470_v16, %v14664_v36  ;;  %v12053_v12 = vrot.slane %v2470_v16, %v10008_v7  ;;  %v14851_v20 = vld [vmem:[#allocation42_spill] sm:$0xff] }
 0x41d   : > { %v12025_v40 = vpop.permute.xlu1 %5040  ;;  %14848 = vst [vmem:[#allocation60_spill] sm:$0xff] %v12030_v53  ;;  %v4469_v49 = vcombine.high %v2471_v37, %v14664_v36  ;;  %v12057_v22 = vrot.slane %v2471_v37, %v10008_v7  ;;  %v12062_v45 = vrot.slane %v4105_v3, %v10016_v21  ;;  %v14852_v53 = vld [vmem:[#allocation63_spill] sm:$0xff]  ;;  %v12071_v16 = vrot.slane %v4353_v27, %v10016_v21 }
 0x41e   : > { %14847 = vst [vmem:[#allocation39_spill] sm:$0xff] %v12025_v40  ;;  %5310 = vrot.lane.b32.xlu0 %v12033_v25, %s9609_s29  ;;  %v2472_v40 = vmax.f32 %v14851_v20, %v14850_v23  ;;  %v2473_v35 = vmax.f32 %v14853_v38, %v14852_v53  ;;  %v12074_v37 = vrot.slane %v4352_v15, %v10016_v21  ;;  %v14857_v15 = vld [vmem:[#allocation44_spill] sm:$0xff] }
 0x41f   : > { %5054 = vrot.lane.b32.xlu1 %v12028_v17, %s9608_s28  ;;  %v12081_v23 = vrot.slane %v4388_v56, %v10008_v7  ;;  %v12086_v53 = vrot.slane %v4403_v48, %v10008_v7  ;;  %v4419_v38 = vcombine.high %v12012_v11, %v12015_v24  ;;  %v12091_v27 = vrot.slane %v4418_v13, %v10016_v21 }
 0x420   : > { %v12068_v33 = vpop.permute.xlu0 %5292  ;;  %14855 = vst [vmem:[#allocation41_spill] sm:$0xff] %v12074_v37  ;;  %v5484_v20 = vsel %vm5482_vm8, %v14857_v15, %v10993_v47  ;;  %v12099_v56 = vrot.slane %v4454_v14, %v10008_v7  ;;  %v12102_v3 = vrot.slane %v4469_v49, %v10008_v7  ;;  %v4484_v48 = vcombine.low %v12053_v12, %v12057_v22  ;;  %v14859_v14 = vld [vmem:[#allocation46_spill] sm:$0xff] }
 0x421   : > { %v12059_v39 = vpop.permute.xlu1 %5290  ;;  %14854 = vst [vmem:[#allocation61_spill] sm:$0xff] %v12068_v33  ;;  %14856 = vst [vmem:[#allocation62_spill] sm:$0xff] %v12091_v27  ;;  %v12109_v24 = vrot.slane %v4303_v6, %v10016_v21  ;;  %v12112_v13 = vrot.slane %v2472_v40, %v10008_v7  ;;  %v12115_v47 = vrot.slane %v2473_v35, %v10008_v7  ;;  %v14861_v33 = vld [vmem:[#allocation47_spill] sm:$0xff] }
 0x422   : > { %14849 = vst [vmem:[#allocation40_spill] sm:$0xff] %v12059_v39  ;;  %4802 = vrot.lane.b32.xlu0 %v12071_v16, %s9610_s30  ;;  %v5483_v15 = vsel %vm5482_vm8, %v14859_v14, %v11037_v52  ;;  %v4122_v39 = vcombine.high %v11968_v55, %v14664_v36  ;;  %v4535_v6 = vcombine.high %v2473_v35, %v14664_v36  ;;  %v14870_v55 = vld [vmem:[#allocation71_spill] sm:$0xff] }
 0x423   : > { %5306 = vrot.lane.b32.xlu1 %v12062_v45, %s9609_s29  ;;  %v5485_v46 = vsel %vm5482_vm8, %v14861_v33, %v11052_v60  ;;  %v5517_v59 = vsel %vm5515_vm9, %v5484_v20, %v14862_v1  ;;  %v4485_v35 = vcombine.high %v12053_v12, %v12057_v22  ;;  %v12143_v60 = vrot.slane %v4484_v48, %v10016_v21  ;;  %v14864_v33 = vld [vmem:[#allocation45_spill] sm:$0xff]  ;;  %v14865_v20 = vld [vmem:[#allocation66_spill] sm:$0xff] }
 0x424   : > { %v12120_v49 = vpop.permute.xlu0 %5294  ;;  %v5486_v1 = vsel %vm5482_vm8, %v14864_v33, %v11010_v8  ;;  %v5516_v14 = vsel %vm5515_vm9, %v5483_v15, %v14865_v20  ;;  %v4188_v12 = vcombine.high %v11978_v44, %v14664_v36  ;;  %v14867_v22 = vld [vmem:[#allocation69_spill] sm:$0xff]  ;;  %v12163_v8 = vrot.slane %v4419_v38, %v10016_v21 }
 0x425   : > { %v12106_v11 = vpop.permute.xlu1 %5296  ;;  %14860 = vst [vmem:[#allocation63_spill] sm:$0xff] %v12120_v49  ;;  %14863 = vst [vmem:[#allocation43_spill] sm:$0xff] %v12143_v60  ;;  %v12171_v44 = vrot.slane %v4535_v6, %v10008_v7  ;;  %v14868_v20 = vld [vmem:[#allocation9_spill] sm:$0xff]  ;;  %v5519_v15 = vsel %vm5515_vm9, %v5486_v1, %v14870_v55  ;;  %v4123_v55 = vcombine.high %v12062_v45, %v14664_v36 }
 0x426   : > { %14858 = vst [vmem:[#allocation42_spill] sm:$0xff] %v12106_v11  ;;  %v4520_v11 = vcombine.high %v2472_v40, %v14664_v36  ;;  %v5550_v40 = vsel %vm5548_vm10, %v5517_v59, %v11070_v18  ;;  %5178 = vrot.lane.b32.xlu0 %v4122_v39, %s9616_s11  ;;  %v4550_v59 = vcombine.low %v12112_v13, %v12115_v47  ;;  %v14871_v6 = vld [vmem:[#allocation73_spill] sm:$0xff] }
 0x427   : > { %5312 = vrot.lane.b32.xlu1 %v12109_v24, %s9609_s29  ;;  %v5518_v39 = vsel %vm5515_vm9, %v5485_v46, %v14867_v22  ;;  %v5583_v18 = vsel %vm5581_vm11, %v5550_v40, %v14868_v20  ;;  %v4551_v46 = vcombine.high %v12112_v13, %v12115_v47  ;;  %v14869_v22 = vld [vmem:[#allocation72_spill] sm:$0xff]  ;;  %v14872_v20 = vld [vmem:[#allocation74_spill] sm:$0xff]  ;;  %v4499_v45 = vrot.slane %v4485_v35, %v10016_v21 }
 0x428   : > { %v12160_v48 = vpop.permute.xlu0 %5162  ;;  %v12168_v33 = vrot.slane %v4520_v11, %v10008_v7  ;;  %v5549_v38 = vsel %vm5548_vm10, %v5516_v14, %v14869_v22  ;;  %v5616_v11 = vsel %vm5614_vm12, %v5583_v18, %v11172_v4  ;;  %v5551_v40 = vsel %vm5548_vm10, %v5518_v39, %v14871_v6  ;;  %v14873_v7 = vld [vmem:[#allocation76_spill] sm:$0xff]  ;;  %v14875_v4 = vld [vmem:[#allocation10_spill] sm:$0xff]  ;;  %v14878_v6 = vld [vmem:[#allocation11_spill] sm:$0xff] }
 0x429   : > { %v12150_v52 = vpop.permute.xlu1 %4786  ;;  %v5552_v13 = vsel %vm5548_vm10, %v5519_v15, %v14873_v7  ;;  %v12197_v1 = vrot.slane %v4550_v59, %v10016_v21  ;;  %v5584_v14 = vsel %vm5581_vm11, %v5551_v40, %v14875_v4  ;;  %v14876_v18 = vld [vmem:[#allocation78_spill] sm:$0xff]  ;;  %v14877_v15 = vld [vmem:[#allocation80_spill] sm:$0xff]  ;;  %v5649_v40 = vsel %vm5647_vm13, %v5616_v11, %v14878_v6  ;;  %v14880_v4 = vld [vmem:[#allocation51_spill] sm:$0xff] }
 0x42a   : > { %14866 = vst [vmem:[#allocation44_spill] sm:$0xff] %v12150_v52  ;;  %4804 = vrot.lane.b32.xlu0 %v12163_v8, %s9610_s30  ;;  %v4566_v7 = vcombine.low %v12168_v33, %v12171_v44  ;;  %v5617_v59 = vsel %vm5614_vm12, %v5584_v14, %v14877_v15  ;;  %v14881_v14 = vld [vmem:[#allocation13_spill] sm:$0xff] }
 0x42b   : > { %5180 = vrot.lane.b32.xlu1 %v4188_v12, %s9616_s11  ;;  %v5582_v12 = vsel %vm5581_vm11, %v5549_v38, %v14872_v20  ;;  %14874 = vst [vmem:[#allocation46_spill] sm:$0xff] %v12197_v1  ;;  %v4254_v38 = vcombine.high %v12028_v17, %v14664_v36  ;;  %v14879_v20 = vld [vmem:[#allocation75_spill] sm:$0xff]  ;;  %v5682_v17 = vsel %vm5680_vm14, %v5649_v40, %v11220_v34  ;;  %v14882_v11 = vld [vmem:[#allocation77_spill] sm:$0xff]  ;;  %v14884_v40 = vld [vmem:[#allocation14_spill] sm:$0xff] }
 0x42c   : > { %v5615_v39 = vsel %vm5614_vm12, %v5582_v12, %v14876_v18  ;;  %v12203_v22 = vpop.permute.xlu0 %5168  ;;  %v5585_v12 = vsel %vm5581_vm11, %v5552_v13, %v14879_v20  ;;  %v5487_v18 = vsel %vm5482_vm8, %v14880_v4, %v11251_v42  ;;  %v4255_v13 = vcombine.high %v12033_v25, %v14664_v36 }
 0x42d   : > { %v12192_v47 = vpop.permute.xlu1 %5164  ;;  %v5618_v15 = vsel %vm5614_vm12, %v5585_v12, %v14881_v14  ;;  %v4320_v34 = vcombine.high %v11987_v57, %v14664_v36  ;;  %v4321_v12 = vcombine.high %v12109_v24, %v14664_v36  ;;  %v5746_v4 = vrot.slane %v5682_v17, 1  ;;  %v14887_v14 = vld [vmem:[#allocation81_spill] sm:$0xff] }
 0x42e   : > { %5182 = vrot.lane.b32.xlu0 %v4254_v38, %s9616_s11  ;;  %v14885_v38 = vld [vmem:[#allocation12_spill] sm:$0xff]  ;;  %v5520_v57 = vsel %vm5515_vm9, %v5487_v18, %v14887_v14  ;;  %v12262_v24 = vcombine.high %v12074_v37, %v14664_v36 }
 0x42f   : > { %5434 = vrot.lane.b32.xlu1 %v4123_v55, %s9613_s8  ;;  %v5648_v55 = vsel %vm5647_vm13, %v5615_v39, %v14882_v11  ;;  %v5650_v35 = vsel %vm5647_vm13, %v5617_v59, %v14885_v38  ;;  %v4189_v39 = vcombine.high %v12006_v19, %v14664_v36  ;;  %v4450_v59 = vcombine.high %v12091_v27, %v14664_v36  ;;  %v14888_v11 = vld [vmem:[#allocation79_spill] sm:$0xff] }
 0x430   : > { %v5681_v42 = vsel %vm5680_vm14, %v5648_v55, %v14884_v40  ;;  %v12239_v20 = vpop.permute.xlu0 %5418  ;;  %v5683_v25 = vsel %vm5680_vm14, %v5650_v35, %v11193_v29  ;;  %v5651_v55 = vsel %vm5647_vm13, %v5618_v15, %v14888_v11  ;;  %v12256_v19 = vrot.slane %v4551_v46, %v10016_v21 }
 0x431   : > { %v12229_v6 = vpop.permute.xlu1 %4788  ;;  %14886 = vst [vmem:[#allocation65_spill] sm:$0xff] %v12239_v20  ;;  %v4385_v29 = vcombine.high %v12071_v16, %v14664_v36  ;;  %v5745_v18 = vrot.slane %v5681_v42, 1  ;;  %v14889_v15 = vcombine.low %v12036_v43, %v12039_v30  ;;  %v12276_v46 = vcombine.high %v12143_v60, %v14664_v36 }
 0x432   : > { %14883 = vst [vmem:[#allocation47_spill] sm:$0xff] %v12229_v6  ;;  %4806 = vrot.lane.b32.xlu0 %v4499_v45, %s9610_s30  ;;  %v5747_v16 = vrot.slane %v5683_v25, 1  ;;  %v5553_v35 = vsel %vm5548_vm10, %v5520_v57, %v11256_v2  ;;  %v14890_v11 = vcombine.high %v12036_v43, %v12039_v30  ;;  %v12294_v60 = vcombine.high %v12163_v8, %v14664_v36  ;;  %v14910_v6 = vld [vmem:[#allocation91_spill] sm:$0xff] }
 0x433   : > { %5438 = vrot.lane.b32.xlu1 %v4255_v13, %s9613_s8  ;;  %v5684_v13 = vsel %vm5680_vm14, %v5651_v55, %v11239_v54  ;;  %v12272_v38 = vrot.slane %v14889_v15, %v10016_v21  ;;  %v12283_v54 = vcombine.high %v4499_v45, %v14664_v36  ;;  %v5810_v15 = vmax.f32 %v5682_v17, %v5746_v4 }
 0x434   : > { %v12280_v14 = vpop.permute.xlu0 %4660  ;;  %v12289_v55 = vrot.slane %v14890_v11, %v10016_v21  ;;  %v14891_v2 = vcombine.low %v12081_v23, %v12086_v53  ;;  %v14892_v45 = vcombine.high %v12081_v23, %v12086_v53  ;;  %v5748_v30 = vrot.slane %v5684_v13, 1  ;;  %v14895_v11 = vld [vmem:[#allocation90_spill] sm:$0xff] }
 0x435   : > { %v12266_v40 = vpop.permute.xlu1 %5166  ;;  %v12311_v8 = vcombine.high %v12197_v1, %v14664_v36  ;;  %v14893_v17 = vcombine.low %v12099_v56, %v12102_v3  ;;  %v14894_v23 = vcombine.high %v12099_v56, %v12102_v3  ;;  %v5809_v4 = vmax.f32 %v5681_v42, %v5745_v18 }
 0x436   : > { %v12300_v57 = vrot.slane %v14891_v2, %v10016_v21  ;;  %v12306_v43 = vrot.slane %v14892_v45, %v10016_v21  ;;  %5184 = vrot.lane.b32.xlu0 %v4320_v34, %s9616_s11  ;;  %v5586_v34 = vsel %vm5581_vm11, %v5553_v35, %v14895_v11  ;;  %v12331_v45 = vcombine.high %v12256_v19, %v14664_v36  ;;  %v14898_v35 = vld [vmem:[#allocation88_spill] sm:$0xff] }
 0x437   : > { %5440 = vrot.lane.b32.xlu1 %v4321_v12, %s9613_s8  ;;  %v12317_v12 = vrot.slane %v14893_v17, %v10016_v21  ;;  %v12323_v53 = vrot.slane %v14894_v23, %v10016_v21  ;;  %v12334_v17 = vrot.slane %v4566_v7, %v10016_v21  ;;  %v5811_v1 = vmax.f32 %v5683_v25, %v5747_v16  ;;  %v14899_v23 = vld [vmem:[#allocation49_spill] sm:$0xff] }
 0x438   : > { %v5619_v3 = vsel %vm5614_vm12, %v5586_v34, %v11413_v31  ;;  %v12338_v56 = vpop.permute.xlu0 %4662  ;;  %v12342_v42 = vcombine.high %v12272_v38, %v14664_v36  ;;  %v12346_v18 = vcombine.high %v12289_v55, %v14664_v36  ;;  %v5488_v11 = vsel %vm5482_vm8, %v14899_v23, %v14898_v35  ;;  %v14900_v16 = vld [vmem:[#allocation89_spill] sm:$0xff]  ;;  %v14901_v34 = vld [vmem:[#allocation50_spill] sm:$0xff]  ;;  %v14903_v23 = vld [vmem:[#allocation95_spill] sm:$0xff] }
 0x439   : > { %v12327_v2 = vpop.permute.xlu1 %4790  ;;  %14897 = vst [vmem:[#allocation66_spill] sm:$0xff] %v12338_v56  ;;  %v5920_v7 = vrot.slane %v5810_v15, 6  ;;  %v12354_v31 = vcombine.high %v12300_v57, %v14664_v36  ;;  %v12358_v25 = vcombine.high %v12306_v43, %v14664_v36  ;;  %v5489_v27 = vsel %vm5482_vm8, %v14901_v34, %v14900_v16  ;;  %v14906_v34 = vld [vmem:[#allocation82_spill] sm:$0xff]  ;;  %v14908_v56 = vld [vmem:[#allocation56_spill] sm:$0xff] }
 0x43a   : > { %14896 = vst [vmem:[#allocation45_spill] sm:$0xff] %v12327_v2  ;;  %v5812_v37 = vmax.f32 %v5684_v13, %v5748_v30  ;;  %5436 = vrot.lane.b32.xlu0 %v4189_v39, %s9613_s8  ;;  %v12366_v15 = vcombine.high %v12317_v12, %v14664_v36  ;;  %v5919_v35 = vrot.slane %v5809_v4, 7  ;;  %v5652_v2 = vsel %vm5647_vm13, %v5619_v3, %v14903_v23  ;;  %v14907_v4 = vld [vmem:[#allocation94_spill] sm:$0xff]  ;;  %v14909_v23 = vld [vmem:[#allocation68_spill] sm:$0xff] }
 0x43b   : > { %4676 = vrot.lane.b32.xlu1 %v4450_v59, %s9614_s9  ;;  %v12370_v59 = vcombine.high %v12323_v53, %v14664_v36  ;;  %v12378_v16 = vcombine.high %v12334_v17, %v14664_v36  ;;  %v14905_v39 = vcombine.high %v12168_v33, %v12171_v44  ;;  %v5923_v30 = vrot.slane %v5811_v1, 5  ;;  %v14911_v44 = vld [vmem:[#allocation84_spill] sm:$0xff] }
 0x43c   : > { %v5490_v3 = vsel %vm5482_vm8, %v14908_v56, %v14907_v4  ;;  %v5491_v52 = vsel %vm5482_vm8, %v14909_v23, %v11501_v58  ;;  %v12394_v49 = vpop.permute.xlu0 %4914  ;;  %v5522_v1 = vsel %vm5515_vm9, %v5489_v27, %v14911_v44  ;;  %v5926_v56 = vrot.slane %v5812_v37, 4  ;;  %v14914_v4 = vld [vmem:[#allocation93_spill] sm:$0xff]  ;;  %v14915_v27 = vld [vmem:[#allocation86_spill] sm:$0xff] }
 0x43d   : > { %14902 = vst [vmem:[#allocation69_spill] sm:$0xff] %v12370_v59  ;;  %v12374_v20 = vpop.permute.xlu1 %5420  ;;  %14904 = vst [vmem:[#allocation9_spill] sm:$0xff] %v12378_v16  ;;  %v12384_v13 = vrot.slane %v14905_v39, %v10016_v21  ;;  %v5521_v59 = vsel %vm5515_vm9, %v5488_v11, %v14906_v34  ;;  %v5922_v16 = vsel %vm5921_vm15, %v5920_v7, %v5919_v35  ;;  %v14912_v11 = vld [vmem:[#allocation64_spill] sm:$0xff]  ;;  %v14913_v34 = vld [vmem:[#allocation17_spill] sm:$0xff] }
 0x43e   : > { %v5554_v33 = vsel %vm5548_vm10, %v5521_v59, %v14910_v6  ;;  %v5492_v39 = vsel %vm5482_vm8, %v14912_v11, %v11458_v32  ;;  %v5555_v58 = vsel %vm5548_vm10, %v5522_v1, %v14913_v34  ;;  %v5685_v7 = vsel %vm5680_vm14, %v5652_v2, %v11410_v9  ;;  %4808 = vrot.lane.b32.xlu0 %v12256_v19, %s9610_s30  ;;  %v14918_v2 = vld [vmem:[#allocation16_spill] sm:$0xff] }
 0x43f   : > { %4930 = vrot.lane.b32.xlu1 %v4385_v29, %s9615_s10  ;;  %v5587_v23 = vsel %vm5581_vm11, %v5554_v33, %v14914_v4  ;;  %v5523_v6 = vsel %vm5515_vm9, %v5490_v3, %v14915_v27  ;;  %v5524_v37 = vsel %vm5515_vm9, %v5491_v52, %v11440_v41  ;;  %v14916_v29 = vld [vmem:[#allocation70_spill] sm:$0xff]  ;;  %v5525_v3 = vsel %vm5515_vm9, %v5492_v39, %v11447_v51  ;;  %v14920_v39 = vld [vmem:[#allocation48_spill] sm:$0xff]  ;;  %v14924_v27 = vld [vmem:[#allocation15_spill] sm:$0xff] }
 0x440   : > { %v5620_v32 = vsel %vm5614_vm12, %v5587_v23, %v11390_v5  ;;  %v5493_v59 = vsel %vm5482_vm8, %v14916_v29, %v11515_v28  ;;  %v14917_v33 = vld [vmem:[#allocation18_spill] sm:$0xff]  ;;  %v5556_v19 = vsel %vm5548_vm10, %v5523_v6, %v14918_v2  ;;  %v12430_v44 = vpop.permute.xlu0 %4916  ;;  %v12434_v5 = vcombine.high %v12384_v13, %v14664_v36  ;;  %v14919_v28 = vld [vmem:[#allocation96_spill] sm:$0xff]  ;;  %v14923_v23 = vld [vmem:[#allocation99_spill] sm:$0xff] }
 0x441   : > { %v12422_v35 = vpop.permute.xlu1 %5422  ;;  %v5588_v9 = vsel %vm5581_vm11, %v5555_v58, %v14917_v33  ;;  %v5925_v41 = vsel %vm5924_vm0, %v5923_v30, %v5922_v16  ;;  %v5749_v1 = vrot.slane %v5685_v7, 1  ;;  %v5558_v11 = vsel %vm5548_vm10, %v5525_v3, %v11523_v0  ;;  %v14921_v58 = vld [vmem:[#allocation109_spill] sm:$0xff]  ;;  %v14926_v6 = vld [vmem:[#allocation67_spill] sm:$0xff] }
 0x442   : > { %v5621_v52 = vsel %vm5614_vm12, %v5588_v9, %v14919_v28  ;;  %v12444_v51 = vsel %vm14623_vm1, %v5926_v56, %v5925_v41  ;;  %v5653_v34 = vsel %vm5647_vm13, %v5620_v32, %v14920_v39  ;;  %v5557_v4 = vsel %vm5548_vm10, %v5524_v37, %v14921_v58  ;;  %v14922_v16 = vld [vmem:[#allocation105_spill] sm:$0xff]  ;;  %4674 = vrot.lane.b32.xlu0 %v12262_v24, %s9614_s9  ;;  %v14925_v56 = vld [vmem:[#allocation107_spill] sm:$0xff]  ;;  %v14927_v32 = vld [vmem:[#allocation52_spill] sm:$0xff] }
 0x443   : > { %5058 = vrot.lane.b32.xlu1 %v12272_v38, %s9608_s28  ;;  %v5526_v30 = vsel %vm5515_vm9, %v5493_v59, %v14922_v16  ;;  %v5686_v0 = vsel %vm5680_vm14, %v5653_v34, %v14923_v23  ;;  %v5589_v38 = vsel %vm5581_vm11, %v5556_v19, %v14924_v27  ;;  %v5494_v29 = vsel %vm5482_vm8, %v14926_v6, %v14925_v56  ;;  %v14928_v9 = vld [vmem:[#allocation98_spill] sm:$0xff]  ;;  %v14929_v2 = vld [vmem:[#allocation19_spill] sm:$0xff]  ;;  %v9013_v34 = vld [vmem:[%s14537_s2 + $0x158] sm:$0xff] }
 0x444   : > { %v5590_v33 = vsel %vm5581_vm11, %v5557_v4, %v14927_v32  ;;  %v5622_v59 = vsel %vm5614_vm12, %v5589_v38, %v14928_v9  ;;  %v5654_v24 = vsel %vm5647_vm13, %v5621_v52, %v14929_v2  ;;  %v14930_v3 = vld [vmem:[#allocation111_spill] sm:$0xff]  ;;  %v12473_v28 = vpop.permute.xlu0 %4918  ;;  %v9011_v39 = vld [vmem:[%s14537_s2 + $0x148] sm:$0xff]  ;;  %v9010_v52 = vld [vmem:[%s14537_s2 + $0x140] sm:$0xff]  ;;  %v12484_v58 = vmax.f32 %v5685_v7, %v5749_v1 }
 0x445   : > { %v12463_v37 = vpop.permute.xlu1 %5424  ;;  %v5591_v41 = vsel %vm5581_vm11, %v5558_v11, %v14930_v3  ;;  %v5623_v19 = vsel %vm5614_vm12, %v5590_v33, %v11614_v50  ;;  %v14931_v11 = vld [vmem:[#allocation110_spill] sm:$0xff]  ;;  %v9231_v16 = vpack.c.bf16 %v9013_v34, %v9011_v39  ;;  %v9012_v23 = vld [vmem:[%s14537_s2 + $0x150] sm:$0xff]  ;;  %v5750_v27 = vrot.slane %v5686_v0, 1  ;;  %v14932_v38 = vld [vmem:[#allocation20_spill] sm:$0xff] }
 0x446   : > { %v5559_v4 = vsel %vm5548_vm10, %v5526_v30, %v14931_v11  ;;  %v5624_v50 = vsel %vm5614_vm12, %v5591_v41, %v11598_v63  ;;  %v14933_v7 = vld [vmem:[#allocation108_spill] sm:$0xff]  ;;  %4678 = vrot.lane.b32.xlu0 %v12276_v46, %s9614_s9  ;;  %v9233_v30 = vpack.c.bf16 %v9012_v23, %v9010_v52  ;;  %v14934_v63 = vld [vmem:[#allocation97_spill] sm:$0xff]  ;;  %v14936_v33 = vld [vmem:[#allocation55_spill] sm:$0xff] }
 0x447   : > { %4934 = vrot.lane.b32.xlu1 %v12283_v54, %s9615_s10  ;;  %v5592_v56 = vsel %vm5581_vm11, %v5559_v4, %v14932_v38  ;;  %v5527_v1 = vsel %vm5515_vm9, %v5494_v29, %v14933_v7  ;;  %v5655_v6 = vsel %vm5647_vm13, %v5622_v59, %v14934_v63  ;;  %v14935_v54 = vld [vmem:[#allocation112_spill] sm:$0xff]  ;;  %v14937_v2 = vld [vmem:[#allocation54_spill] sm:$0xff]  ;;  %9232 = vmatprep.subr.bf16.mxu1 %v9231_v16  ;;  %v14939_v29 = vld [vmem:[#allocation53_spill] sm:$0xff] }
 0x448   : > { %v5560_v32 = vsel %vm5548_vm10, %v5527_v1, %v14935_v54  ;;  %v5625_v9 = vsel %vm5614_vm12, %v5592_v56, %v14936_v33  ;;  %v5656_v3 = vsel %vm5647_vm13, %v5623_v19, %v14937_v2  ;;  %v14940_v46 = vld [vmem:[#allocation21_spill] sm:$0xff]  ;;  %v14942_v11 = vld [vmem:[#allocation119_spill] sm:$0xff]  ;;  %v12520_v38 = vpop.permute.xlu0 %4664  ;;  %9234 = vmatpush1.bf16.msra.mxu1 %v9233_v30  ;;  %v9015_v19 = vld [vmem:[%s14537_s2 + $0x168] sm:$0xff]  ;;  %v12541_v33 = vmax.f32 %v5686_v0, %v5750_v27 }
 0x449   : > { %v12509_v41 = vpop.permute.xlu1 %4792  ;;  %v5593_v39 = vsel %vm5581_vm11, %v5560_v32, %v14939_v29  ;;  %v5657_v34 = vsel %vm5647_vm13, %v5624_v50, %v14940_v46  ;;  %v14941_v52 = vld [vmem:[#allocation57_spill] sm:$0xff]  ;;  %v14943_v4 = vld [vmem:[#allocation83_spill] sm:$0xff]  ;;  %v9017_v16 = vld [vmem:[%s14537_s2 + $0x178] sm:$0xff] }
 0x44a   : > { %14938 = vst [vmem:[#allocation72_spill] sm:$0xff] %v12509_v41  ;;  %v5689_v59 = vsel %vm5680_vm14, %v5656_v3, %v14941_v52  ;;  %v5495_v23 = vsel %vm5482_vm8, %v14943_v4, %v14942_v11  ;;  %v9014_v50 = vld [vmem:[%s14537_s2 + $0x160] sm:$0xff]  ;;  %v14944_v7 = vld [vmem:[#allocation26_spill] sm:$0xff]  ;;  %v14945_v63 = vld [vmem:[#allocation116_spill] sm:$0xff]  ;;  %v9235_v54 = vpack.c.bf16 %v9017_v16, %v9015_v19  ;;  %4932 = vrot.lane.b32.xlu0 %v12294_v60, %s9615_s10 }
 0x44b   : > { %v5690_v1 = vsel %vm5680_vm14, %v5657_v34, %v14944_v7  ;;  %v5626_v30 = vsel %vm5614_vm12, %v5593_v39, %v14945_v63  ;;  %5060 = vrot.lane.b32.xlu1 %v12300_v57, %s9608_s28  ;;  %v9016_v32 = vld [vmem:[%s14537_s2 + $0x170] sm:$0xff]  ;;  %v14946_v2 = vld [vmem:[#allocation102_spill] sm:$0xff]  ;;  %v14947_v29 = vld [vmem:[#allocation24_spill] sm:$0xff]  ;;  %v5753_v52 = vrot.slane %v5689_v59, 1 }
 0x44c   : > { %v5687_v3 = vsel %vm5680_vm14, %v5654_v24, %v14946_v2  ;;  %v5658_v46 = vsel %vm5647_vm13, %v5625_v9, %v14947_v29  ;;  %v9237_v39 = vpack.c.bf16 %v9016_v32, %v9014_v50  ;;  %v14948_v34 = vld [vmem:[#allocation27_spill] sm:$0xff]  ;;  %v14949_v11 = vld [vmem:[#allocation124_spill] sm:$0xff]  ;;  %9236 = vmatprep.subr.bf16.mxu1 %v9235_v54  ;;  %v5754_v24 = vrot.slane %v5690_v1, 1  ;;  %v14952_v9 = vld [vmem:[#allocation22_spill] sm:$0xff]  ;;  %v12565_v29 = vpop.permute.xlu0 %5046 }
 0x44d   : > { %v5691_v57 = vsel %vm5680_vm14, %v5658_v46, %v14948_v34  ;;  %v14950_v4 = vld [vmem:[#allocation87_spill] sm:$0xff]  ;;  %v12556_v16 = vpop.permute.xlu1 %4658  ;;  %v5659_v7 = vsel %vm5647_vm13, %v5626_v30, %v14952_v9  ;;  %v14953_v60 = vld [vmem:[#allocation121_spill] sm:$0xff]  ;;  %v5751_v46 = vrot.slane %v5687_v3, 1  ;;  %v14956_v34 = vld [vmem:[#allocation100_spill] sm:$0xff] }
 0x44e   : > { %v5497_v19 = vsel %vm5482_vm8, %v14950_v4, %v14949_v11  ;;  %v14951_v0 = vld [vmem:[#allocation23_spill] sm:$0xff]  ;;  %v14954_v50 = vld [vmem:[#allocation85_spill] sm:$0xff]  ;;  %9238 = vmatpush1.bf16.msra.mxu1 %v9237_v39  ;;  %v14958_v4 = vld [vmem:[#allocation126_spill] sm:$0xff]  ;;  %4680 = vrot.lane.b32.xlu0 %v12311_v8, %s9614_s9 }
 0x44f   : > { %v5528_v27 = vsel %vm5515_vm9, %v5495_v23, %v14951_v0  ;;  %v5496_v63 = vsel %vm5482_vm8, %v14954_v50, %v14953_v60  ;;  %v14955_v32 = vld [vmem:[#allocation123_spill] sm:$0xff]  ;;  %v5688_v23 = vsel %vm5680_vm14, %v5655_v6, %v14956_v34  ;;  %v14957_v11 = vld [vmem:[#allocation117_spill] sm:$0xff]  ;;  %5062 = vrot.lane.b32.xlu1 %v12317_v12, %s9608_s28  ;;  %v9019_v0 = vld [vmem:[%s14537_s2 + $0x188] sm:$0xff] }
 0x450   : > { %v5561_v2 = vsel %vm5548_vm10, %v5528_v27, %v14955_v32  ;;  %v5692_v54 = vsel %vm5680_vm14, %v5659_v7, %v14957_v11  ;;  %v9021_v39 = vld [vmem:[%s14537_s2 + $0x198] sm:$0xff]  ;;  %v9018_v6 = vld [vmem:[%s14537_s2 + $0x180] sm:$0xff]  ;;  %v5755_v27 = vrot.slane %v5691_v57, 1  ;;  %v14960_v60 = vld [vmem:[#allocation130_spill] sm:$0xff]  ;;  %v12603_v41 = vpop.permute.xlu0 %5298 }
 0x451   : > { %v5594_v30 = vsel %vm5581_vm11, %v5561_v2, %v14958_v4  ;;  %v14959_v9 = vld [vmem:[#allocation113_spill] sm:$0xff]  ;;  %v9239_v12 = vpack.c.bf16 %v9021_v39, %v9019_v0  ;;  %v9020_v32 = vld [vmem:[%s14537_s2 + $0x190] sm:$0xff]  ;;  %v5817_v2 = vmax.f32 %v5689_v59, %v5753_v52  ;;  %v12597_v21 = vpop.permute.xlu1 %5042  ;;  %v14964_v0 = vld [vmem:[#allocation34_spill] sm:$0xff] }
 0x452   : > { %v5530_v7 = vsel %vm5515_vm9, %v5497_v19, %v14959_v9  ;;  %v5627_v50 = vsel %vm5614_vm12, %v5594_v30, %v14960_v60  ;;  %v14961_v34 = vld [vmem:[#allocation115_spill] sm:$0xff]  ;;  %v9241_v19 = vpack.c.bf16 %v9020_v32, %v9018_v6  ;;  %v5818_v9 = vmax.f32 %v5690_v1, %v5754_v24  ;;  %v14963_v60 = vld [vmem:[#allocation125_spill] sm:$0xff]  ;;  %v14965_v59 = vld [vmem:[#allocation28_spill] sm:$0xff]  ;;  %5314 = vrot.lane.b32.xlu0 %v12289_v55, %s9609_s29 }
 0x453   : > { %v5529_v11 = vsel %vm5515_vm9, %v5496_v63, %v14961_v34  ;;  %v14962_v4 = vld [vmem:[#allocation127_spill] sm:$0xff]  ;;  %v5756_v30 = vrot.slane %v5692_v54, 1  ;;  %9240 = vmatprep.subr.bf16.mxu1 %v9239_v12  ;;  %5316 = vrot.lane.b32.xlu1 %v12306_v43, %s9609_s29  ;;  %v5752_v1 = vrot.slane %v5688_v23, 1  ;;  %v5819_v43 = vmax.f32 %v5691_v57, %v5755_v27  ;;  %v14971_v55 = vld [vmem:[#allocation118_spill] sm:$0xff] }
 0x454   : > { %v5563_v56 = vsel %vm5548_vm10, %v5530_v7, %v14962_v4  ;;  %v5562_v8 = vsel %vm5548_vm10, %v5529_v11, %v14963_v60  ;;  %v14966_v7 = vld [vmem:[#allocation128_spill] sm:$0xff]  ;;  %9242 = vmatpush1.bf16.msra.mxu1 %v9241_v19  ;;  %v14967_v24 = vld [vmem:[#allocation31_spill] sm:$0xff]  ;;  %v5938_v11 = vrot.slane %v5817_v2, 7  ;;  %v14969_v19 = vrot.slane %v12484_v58, 3  ;;  %v14973_v58 = vld [vmem:[#allocation58_spill] sm:$0xff] }
 0x455   : > { %v5596_v39 = vsel %vm5581_vm11, %v5563_v56, %v14964_v0  ;;  %v5595_v52 = vsel %vm5581_vm11, %v5562_v8, %v14965_v59  ;;  %v5660_v6 = vsel %vm5647_vm13, %v5627_v50, %v14966_v7  ;;  %v14968_v56 = vld [vmem:[#allocation92_spill] sm:$0xff]  ;;  %v5815_v50 = vmax.f32 %v5687_v3, %v5751_v46  ;;  %v12623_v4 = vpop.permute.xlu1 %5044  ;;  %v14970_v0 = vld [vmem:[#allocation59_spill] sm:$0xff]  ;;  %v14972_v46 = vld [vmem:[#allocation30_spill] sm:$0xff] }
 0x456   : > { %v5629_v63 = vsel %vm5614_vm12, %v5596_v39, %v11861_v10  ;;  %v5498_v32 = vsel %vm5482_vm8, %v14968_v56, %v14967_v24  ;;  %v5628_v12 = vsel %vm5614_vm12, %v5595_v52, %v11866_v62  ;;  %v5693_v34 = vsel %vm5680_vm14, %v5660_v6, %v11880_v61  ;;  %v12631_v39 = vpop.permute.xlu0 %5300  ;;  %v14974_v2 = vld [vmem:[#allocation136_spill] sm:$0xff]  ;;  %5318 = vrot.lane.b32.xlu0 %v12323_v53, %s9609_s29  ;;  %v14975_v7 = vld [vmem:[#allocation141_spill] sm:$0xff]  ;;  %v14977_v24 = vld [vmem:[#allocation143_spill] sm:$0xff] }
 0x457   : > { %v5932_v10 = vrot.slane %v12541_v33, 2  ;;  %v5931_v60 = vsel %vm5930_vm2, %v14969_v19, %v12444_v51  ;;  %v5939_v8 = vrot.slane %v5818_v9, 6  ;;  %v5820_v62 = vmax.f32 %v5692_v54, %v5756_v30  ;;  %4936 = vrot.lane.b32.xlu1 %v12331_v45, %s9615_s10  ;;  %v14976_v6 = vld [vmem:[#allocation104_spill] sm:$0xff]  ;;  %v14978_v56 = vld [vmem:[#allocation106_spill] sm:$0xff] }
 0x458   : > { %v5662_v61 = vsel %vm5647_vm13, %v5629_v63, %v14970_v0  ;;  %v5531_v33 = vsel %vm5515_vm9, %v5498_v32, %v14971_v55  ;;  %v5757_v57 = vrot.slane %v5693_v34, 1  ;;  %v5661_v27 = vsel %vm5647_vm13, %v5628_v12, %v14972_v46  ;;  %v9023_v12 = vld [vmem:[%s14537_s2 + $0x1a8] sm:$0xff]  ;;  %v14982_v46 = vld [vmem:[#allocation101_spill] sm:$0xff] }
 0x459   : > { %v5695_v3 = vsel %vm5680_vm14, %v5662_v61, %v11872_v26  ;;  %v12641_v51 = vmax.f32 %v5688_v23, %v5752_v1  ;;  %v5564_v54 = vsel %vm5548_vm10, %v5531_v33, %v14973_v58  ;;  %v5694_v9 = vsel %vm5680_vm14, %v5661_v27, %v14974_v2  ;;  %v12650_v52 = vpop.permute.xlu1 %4920  ;;  %v14980_v61 = vld [vmem:[#allocation134_spill] sm:$0xff]  ;;  %v9026_v58 = vld [vmem:[%s14537_s2 + $0x1c0] sm:$0xff]  ;;  %v14984_v2 = vld [vmem:[#allocation103_spill] sm:$0xff] }
 0x45a   : > { %v5935_v26 = vrot.slane %v5815_v50, 1  ;;  %v5941_v30 = vrot.slane %v5819_v43, 5  ;;  %v5940_v59 = vsel %vm5921_vm15, %v5939_v8, %v5938_v11  ;;  %v5934_v45 = vsel %vm5933_vm3, %v5932_v10, %v5931_v60  ;;  %v12659_v53 = vpop.permute.xlu0 %5048  ;;  %v9025_v10 = vld [vmem:[%s14537_s2 + $0x1b8] sm:$0xff]  ;;  %v9022_v50 = vld [vmem:[%s14537_s2 + $0x1a0] sm:$0xff]  ;;  %v14981_v33 = vld [vmem:[#allocation138_spill] sm:$0xff]  ;;  %5186 = vrot.lane.b32.xlu0 %v12342_v42, %s9616_s11 }
 0x45b   : > { %v5943_v23 = vrot.slane %v5820_v62, 4  ;;  %v5759_v63 = vrot.slane %v5695_v3, 1  ;;  %v5499_v1 = vsel %vm5482_vm8, %v14976_v6, %v14975_v7  ;;  %v5501_v32 = vsel %vm5482_vm8, %v14978_v56, %v14977_v24  ;;  %v14979_v43 = vld [vmem:[#allocation29_spill] sm:$0xff]  ;;  %5064 = vrot.lane.b32.xlu1 %v12334_v17, %s9608_s28  ;;  %v9024_v62 = vld [vmem:[%s14537_s2 + $0x1b0] sm:$0xff]  ;;  %v9027_v17 = vld [vmem:[%s14537_s2 + $0x1c8] sm:$0xff] }
 0x45c   : > { %v5597_v11 = vsel %vm5581_vm11, %v5564_v54, %v14979_v43  ;;  %v12672_v19 = vmax.f32 %v5693_v34, %v5757_v57  ;;  %v5758_v60 = vrot.slane %v5694_v9, 1  ;;  %v9243_v8 = vpack.c.bf16 %v9025_v10, %v9023_v12  ;;  %v9029_v57 = vld [vmem:[%s14537_s2 + $0x1d8] sm:$0xff]  ;;  %v9028_v12 = vld [vmem:[%s14537_s2 + $0x1d0] sm:$0xff] }
 0x45d   : > { %v5942_v0 = vsel %vm5924_vm0, %v5941_v30, %v5940_v59  ;;  %v5630_v55 = vsel %vm5614_vm12, %v5597_v11, %v14980_v61  ;;  %v5500_v27 = vsel %vm5482_vm8, %v14982_v46, %v14981_v33  ;;  %v9245_v34 = vpack.c.bf16 %v9024_v62, %v9022_v50  ;;  %v14983_v54 = vld [vmem:[#allocation140_spill] sm:$0xff]  ;;  %v14985_v59 = vld [vmem:[#allocation131_spill] sm:$0xff]  ;;  %v12703_v24 = vpop.permute.xlu1 %5302  ;;  %v14987_v62 = vld [vmem:[#allocation129_spill] sm:$0xff] }
 0x45e   : > { %v5502_v30 = vsel %vm5482_vm8, %v14984_v2, %v14983_v54  ;;  %v5532_v42 = vsel %vm5515_vm9, %v5499_v1, %v14985_v59  ;;  %v14986_v7 = vld [vmem:[#allocation32_spill] sm:$0xff]  ;;  %9244 = vmatprep.subr.bf16.mxu1 %v9243_v8  ;;  %v9247_v56 = vpack.c.bf16 %v9029_v57, %v9027_v17  ;;  %v12709_v10 = vsel %vm14623_vm1, %v5943_v23, %v5942_v0  ;;  %v12713_v43 = vpop.permute.xlu0 %5304  ;;  %v14988_v33 = vld [vmem:[#allocation35_spill] sm:$0xff]  ;;  %v14991_v0 = vld [vmem:[#allocation33_spill] sm:$0xff] }
 0x45f   : > { %v5534_v6 = vsel %vm5515_vm9, %v5501_v32, %v14986_v7  ;;  %v12711_v50 = vmax.f32 %v5695_v3, %v5759_v63  ;;  %v12716_v1 = vsel %vm5936_vm4, %v5935_v26, %v5934_v45  ;;  %9246 = vmatpush1.bf16.msra.mxu1 %v9245_v34  ;;  %v9249_v32 = vpack.c.bf16 %v9028_v12, %v9026_v58  ;;  %v14989_v3 = vld [vmem:[#allocation142_spill] sm:$0xff]  ;;  %v14990_v45 = vld [vmem:[#allocation145_spill] sm:$0xff]  ;;  %v14993_v34 = vld [vmem:[#allocation36_spill] sm:$0xff] }
 0x460   : > { %v5945_v11 = vrot.slane %v12672_v19, 3  ;;  %v12719_v8 = vmax.f32 %v5694_v9, %v5758_v60  ;;  %v5663_v61 = vsel %vm5647_vm13, %v5630_v55, %v14987_v62  ;;  %v5533_v23 = vsel %vm5515_vm9, %v5500_v27, %v14988_v33  ;;  %5188 = vrot.lane.b32.xlu1 %v12354_v31, %s9616_s11  ;;  %9248 = vmatprep.subr.bf16.mxu1 %v9247_v56  ;;  %v14992_v60 = vld [vmem:[#allocation144_spill] sm:$0xff]  ;;  %v9031_v31 = vld [vmem:[%s14537_s2 + $0x1e8] sm:$0xff]  ;;  %v12746_v27 = vld [vmem:[%s14537_s2 + $0x1e0] sm:$0xff] }
 0x461   : > { %v5565_v26 = vsel %vm5548_vm10, %v5532_v42, %v14989_v3  ;;  %v5566_v63 = vsel %vm5548_vm10, %v5533_v23, %v14990_v45  ;;  %v5535_v9 = vsel %vm5515_vm9, %v5502_v30, %v14991_v0  ;;  %v5567_v46 = vsel %vm5548_vm10, %v5534_v6, %v14992_v60  ;;  %5442 = vrot.lane.b32.xlu0 %v12346_v18, %s9613_s8  ;;  %v9033_v55 = vld [vmem:[%s14537_s2 + $0x1f8] sm:$0xff]  ;;  %v14994_v57 = vld [vmem:[#allocation38_spill] sm:$0xff]  ;;  %v14995_v18 = vld [vmem:[#allocation37_spill] sm:$0xff]  ;;  %v12754_v2 = vpop.permute.xlu1 %4796 }
 0x462   : > { %v5598_v17 = vsel %vm5581_vm11, %v5565_v26, %v14993_v34  ;;  %v5568_v58 = vsel %vm5548_vm10, %v5535_v9, %v14994_v57  ;;  %v5599_v54 = vsel %vm5581_vm11, %v5566_v63, %v14995_v18  ;;  %v9251_v30 = vpack.c.bf16 %v9033_v55, %v9031_v31  ;;  %v9032_v59 = vld [vmem:[%s14537_s2 + $0x1f0] sm:$0xff]  ;;  %v14996_v42 = vld [vmem:[#allocation60_spill] sm:$0xff]  ;;  %v12765_v62 = vpop.permute.xlu0 %4794  ;;  %v14998_v23 = vld [vmem:[#allocation25_spill] sm:$0xff] }
 0x463   : > { %v5600_v7 = vsel %vm5581_vm11, %v5567_v46, %v14996_v42  ;;  %v14997_v6 = vld [vmem:[#allocation39_spill] sm:$0xff]  ;;  %v5632_v12 = vsel %vm5614_vm12, %v5599_v54, %v12192_v47  ;;  %9250 = vmatpush1.bf16.msra.mxu1 %v9249_v32  ;;  %v9253_v33 = vpack.c.bf16 %v9032_v59, %v12746_v27  ;;  %v5504_v3 = vsel %vm5482_vm8, %v14998_v23, %v12280_v14  ;;  %v9035_v47 = vld [vmem:[%s14537_s2 + $0x208] sm:$0xff]  ;;  %v9037_v32 = vld [vmem:[%s14537_s2 + $0x218] sm:$0xff] }
 0x464   : > { %v5601_v56 = vsel %vm5581_vm11, %v5568_v58, %v14997_v6  ;;  %v5633_v26 = vsel %vm5614_vm12, %v5600_v7, %v12266_v40  ;;  %5190 = vrot.lane.b32.xlu1 %v12366_v15, %s9616_s11  ;;  %9252 = vmatprep.subr.bf16.mxu1 %v9251_v30  ;;  %v12784_v45 = vld [vmem:[%s14537_s2 + $0x200] sm:$0xff]  ;;  %v14999_v14 = vlaneseq  ;;  %v15000_v40 = vld [vmem:[#allocation122_spill] sm:$0xff]  ;;  %v9255_v63 = vpack.c.bf16 %v9037_v32, %v9035_v47  ;;  %v12795_v0 = vld [vmem:[%s14537_s2 + $0x210] sm:$0xff] }
 0x465   : > { %v5503_v15 = vsel %vm5482_vm8, %v15000_v40, %v12556_v16  ;;  %5444 = vrot.lane.b32.xlu0 %v12358_v25, %s9613_s8  ;;  %vm5879_vm1 = vcmask 255104   ;;  %v9039_v25 = vld [vmem:[%s14537_s2 + $0x228] sm:$0xff]  ;;  %v9041_v16 = vld [vmem:[%s14537_s2 + $0x238] sm:$0xff]  ;;  %v15001_v9 = vld [vmem:[#allocation139_spill] sm:$0xff]  ;;  %v5631_v46 = vsel %vm5614_vm12, %v5598_v17, %v12160_v48  ;;  %v5634_v31 = vsel %vm5614_vm12, %v5601_v56, %v12203_v22  ;;  %v12821_v34 = vpop.permute.xlu1 %4800 }
 0x466   : > { %vm5843_vm6 = vcmp.lt.s32.totalorder %v14999_v14, 160  ;;  %v12813_v60 = vsel %vm5680_vm14, %v5663_v61, %v15001_v9  ;;  %v15002_v55 = vld [vmem:[#allocation61_spill] sm:$0xff]  ;;  %v15003_v22 = vld [vmem:[#allocation47_spill] sm:$0xff]  ;;  %v12861_v58 = vpop.permute.xlu0 %4798  ;;  %v9257_v18 = vpack.c.bf16 %v12795_v0, %v12784_v45  ;;  %v5947_v54 = vrot.slane %v12719_v8, 2  ;;  %v15005_v59 = vld [vmem:[#allocation44_spill] sm:$0xff] }
 0x467   : > { %5845 = vst.msk [vmem:[#allocation3] ss:$8 sm:$0x3] %vm5843_vm6, %v14664_v36  ;;  %5848 = vst.msk [vmem:[#allocation3 + $0x20] ss:$8 sm:$0x3] %vm5843_vm6, %v14664_v36  ;;  %v5665_v27 = vsel %vm5647_vm13, %v5632_v12, %v15002_v55  ;;  %v5537_v61 = vsel %vm5515_vm9, %v5504_v3, %v15003_v22  ;;  %9254 = vmatpush1.bf16.msra.mxu1 %v9253_v33  ;;  %v9259_v7 = vpack.c.bf16 %v9041_v16, %v9039_v25 }
 0x468   : > { %5851 = vst.msk [vmem:[#allocation3 + $0x40] ss:$8 sm:$0x3] %vm5843_vm6, %v14664_v36  ;;  %5854 = vst.msk [vmem:[#allocation3 + $0x60] ss:$8 sm:$0x3] %vm5843_vm6, %v14664_v36  ;;  %v5698_v48 = vsel %vm5680_vm14, %v5665_v27, %v12374_v20  ;;  %v5536_v20 = vsel %vm5515_vm9, %v5503_v15, %v15005_v59  ;;  %9256 = vmatprep.subr.bf16.mxu1 %v9255_v63  ;;  %v5570_v3 = vsel %vm5548_vm10, %v5537_v61, %v12430_v44 }
 0x469   : > { %5857 = vst.msk [vmem:[#allocation3 + $0x11] ss:$8 sm:$0x3] %vm5843_vm6, %v14664_v36  ;;  %5860 = vst.msk [vmem:[#allocation3 + $0x31] ss:$8 sm:$0x3] %vm5843_vm6, %v14664_v36  ;;  %v5603_v25 = vsel %vm5581_vm11, %v5570_v3, %v12623_v4  ;;  %v5173_v16 = vpop.permute.xlu1 %5172  ;;  %v5946_v22 = vsel %vm5930_vm2, %v5945_v11, %v12709_v10 }
 0x46a   : > { %5863 = vst.msk [vmem:[#allocation3 + $0x51] ss:$8 sm:$0x3] %vm5843_vm6, %v14664_v36  ;;  %5866 = vst.msk [vmem:[#allocation3 + $0x71] ss:$8 sm:$0x3] %vm5843_vm6, %v14664_v36  ;;  %v5636_v55 = vsel %vm5614_vm12, %v5603_v25, %v5173_v16 }
 0x46b   : > { %5868 = vst.msk [vmem:[#allocation3] sm:$0xff] %vm5482_vm8, %v14664_v36  ;;  %5871 = vst.msk [vmem:[#allocation3 + $0x20] sm:$0xff] %vm5482_vm8, %v14664_v36  ;;  %v15004_v17 = vld [vmem:[#allocation63_spill] sm:$0xff]  ;;  %v15006_v42 = vld [vmem:[#allocation9_spill] sm:$0xff]  ;;  %v5762_v0 = vrot.slane %v5698_v48, 1  ;;  %9258 = vmatpush1.bf16.msra.mxu1 %v9257_v18  ;;  %vm6005_vm6 = vcmask 1040512  }
 0x46c   : > { %5878 = vst.msk [vmem:[#allocation3 + $0x8] sm:$0xff] %vm5877_vm7, %v14664_v36  ;;  %5881 = vst.msk [vmem:[#allocation3 + $0x28] sm:$0xff] %vm5877_vm7, %v14664_v36  ;;  %v5666_v57 = vsel %vm5647_vm13, %v5633_v26, %v15004_v17  ;;  %5192 = vrot.lane.b32.xlu1 %v15006_v42, %s9616_s11  ;;  %v9038_v6 = vld [vmem:[%s14537_s2 + $0x220] sm:$0xff]  ;;  %v9040_v56 = vld [vmem:[%s14537_s2 + $0x230] sm:$0xff]  ;;  %9260 = vmatprep.subr.bf16.mxu1 %v9259_v7 }
 0x46d   : > { %5873 = vst.msk [vmem:[#allocation3 + $0x40] sm:$0xff] %vm5482_vm8, %v14664_v36  ;;  %5875 = vst.msk [vmem:[#allocation3 + $0x60] sm:$0xff] %vm5482_vm8, %v14664_v36  ;;  %v5699_v30 = vsel %vm5680_vm14, %v5666_v57, %v12422_v35  ;;  %v15007_v8 = vld [vmem:[#allocation40_spill] sm:$0xff]  ;;  %v15008_v35 = vld [vmem:[#allocation66_spill] sm:$0xff]  ;;  %v9261_v27 = vpack.c.bf16 %v9040_v56, %v9038_v6  ;;  %v5175_v7 = vpop.permute.xlu1 %5174 }
 0x46e   : > { %5883 = vst.msk [vmem:[#allocation3 + $0x48] sm:$0xff] %vm5877_vm7, %v14664_v36  ;;  %5885 = vst.msk [vmem:[#allocation3 + $0x68] sm:$0xff] %vm5877_vm7, %v14664_v36  ;;  %v5664_v12 = vsel %vm5647_vm13, %v5631_v46, %v15007_v8  ;;  %v15009_v33 = vld [vmem:[#allocation114_spill] sm:$0xff]  ;;  %v15011_v32 = vld [vmem:[#allocation69_spill] sm:$0xff]  ;;  %v5763_v9 = vrot.slane %v5699_v30, 1  ;;  %v5569_v46 = vsel %vm5548_vm10, %v5536_v20, %v12394_v49  ;;  %v5826_v20 = vmax.f32 %v5698_v48, %v5762_v0 }
 0x46f   : > { %5870 = vst.msk [vmem:[#allocation3 + $0x10] sm:$0x3] %vm5869_vm5, %v14664_v36  ;;  %5872 = vst.msk [vmem:[#allocation3 + $0x30] sm:$0x3] %vm5869_vm5, %v14664_v36  ;;  %v5505_v23 = vsel %vm5482_vm8, %v15009_v33, %v15008_v35  ;;  %v15010_v26 = vld [vmem:[#allocation42_spill] sm:$0xff]  ;;  %5446 = vrot.lane.b32.xlu0 %v15011_v32, %s9613_s8  ;;  %v9045_v40 = vld [vmem:[%s14537_s2 + $0x258] sm:$0xff]  ;;  %9262 = vmatpush1.bf16.msra.mxu1 %v9261_v27 }
 0x470   : > { %5880 = vst.msk [vmem:[#allocation3 + $0x18] sm:$0x3] %vm5879_vm1, %v14664_v36  ;;  %5882 = vst.msk [vmem:[#allocation3 + $0x38] sm:$0x3] %vm5879_vm1, %v14664_v36  ;;  %v5667_v47 = vsel %vm5647_vm13, %v5634_v31, %v15010_v26  ;;  %v9043_v45 = vld [vmem:[%s14537_s2 + $0x248] sm:$0xff]  ;;  %v15012_v15 = vld [vmem:[#allocation65_spill] sm:$0xff]  ;;  %v5171_v31 = vpop.permute.xlu0 %5170  ;;  %5448 = vrot.lane.b32.xlu1 %v12434_v5, %s9613_s8  ;;  %v5669_v5 = vsel %vm5647_vm13, %v5636_v55, %v12631_v39  ;;  %v5827_v6 = vmax.f32 %v5699_v30, %v5763_v9 }
 0x471   : > { %5874 = vst.msk [vmem:[#allocation3 + $0x50] sm:$0x3] %vm5869_vm5, %v14664_v36  ;;  %5876 = vst.msk [vmem:[#allocation3 + $0x70] sm:$0x3] %vm5869_vm5, %v14664_v36  ;;  %v5697_v63 = vsel %vm5680_vm14, %v5664_v12, %v15012_v15  ;;  %v5700_v44 = vsel %vm5680_vm14, %v5667_v47, %v12463_v37  ;;  %v5760_v37 = vrot.slane %v12813_v60, 1  ;;  %v15013_v61 = vld [vmem:[#allocation45_spill] sm:$0xff]  ;;  %v9263_v49 = vpack.c.bf16 %v9045_v40, %v9043_v45  ;;  %v5427_v47 = vpop.permute.xlu1 %5426 }
 0x472   : > { %5884 = vst.msk [vmem:[#allocation3 + $0x58] sm:$0x3] %vm5879_vm1, %v14664_v36  ;;  %5886 = vst.msk [vmem:[#allocation3 + $0x78] sm:$0x3] %vm5879_vm1, %v14664_v36  ;;  %v5538_v4 = vsel %vm5515_vm9, %v5505_v23, %v15013_v61  ;;  %v9042_v17 = vld [vmem:[%s14537_s2 + $0x240] sm:$0xff]  ;;  %v9044_v19 = vld [vmem:[%s14537_s2 + $0x250] sm:$0xff] }
 0x473   : > { %v5761_v57 = vrot.slane %v5697_v63, 1  ;;  %v5571_v10 = vsel %vm5548_vm10, %v5538_v4, %v12473_v28  ;;  %v5764_v11 = vrot.slane %v5700_v44, 1  ;;  %5320 = vrot.lane.b32.xlu0 %v12384_v13, %s9609_s29  ;;  %v9047_v18 = vld [vmem:[%s14537_s2 + $0x268] sm:$0xff]  ;;  %v9049_v59 = vld [vmem:[%s14537_s2 + $0x278] sm:$0xff]  ;;  %v5602_v28 = vsel %vm5581_vm11, %v5569_v46, %v12597_v21  ;;  %9264 = vmatprep.subr.bf16.mxu1 %v9263_v49  ;;  %v9048_v30 = vld [vmem:[%s14537_s2 + $0x270] sm:$0xff] }
 0x474   : > { %v5604_v42 = vsel %vm5581_vm11, %v5571_v10, %v12565_v29  ;;  %v5948_v13 = vsel %vm5933_vm3, %v5947_v54, %v5946_v22  ;;  %v5635_v39 = vsel %vm5614_vm12, %v5602_v28, %v5171_v31  ;;  %v5429_v56 = vpop.permute.xlu0 %5428  ;;  %v9265_v12 = vpack.c.bf16 %v9044_v19, %v9042_v17  ;;  %v15014_v48 = vld [vmem:[#allocation120_spill] sm:$0xff]  ;;  %5979 = vrot.lane.b32.xlu1 %v12641_v51, %s9614_s9  ;;  %v9046_v54 = vld [vmem:[%s14537_s2 + $0x260] sm:$0xff] }
 0x475   : > { %v5637_v8 = vsel %vm5614_vm12, %v5604_v42, %v5175_v7  ;;  %v5949_v35 = vrot.slane %v12711_v50, 1  ;;  %v5506_v29 = vsel %vm5482_vm8, %v15014_v48, %v12520_v38  ;;  %v5702_v33 = vsel %vm5680_vm14, %v5669_v5, %v5429_v56  ;;  %v15015_v40 = vld [vmem:[#allocation72_spill] sm:$0xff]  ;;  %v5433_v55 = vpop.permute.xlu1 %5432 }
 0x476   : > { %v9267_v21 = vpack.c.bf16 %v9049_v59, %v9047_v18  ;;  %v5825_v50 = vmax.f32 %v5697_v63, %v5761_v57  ;;  %v5828_v23 = vmax.f32 %v5700_v44, %v5764_v11  ;;  %v5766_v3 = vrot.slane %v5702_v33, 1  ;;  %9266 = vmatpush1.bf16.msra.mxu1 %v9265_v12 }
 0x477   : > { %5977 = vrot.lane.b32.xlu0 %v12716_v1, %s9614_s9  ;;  %v5670_v38 = vsel %vm5647_vm13, %v5637_v8, %v12703_v24  ;;  %v5824_v51 = vmax.f32 %v12813_v60, %v5760_v37  ;;  %v5668_v26 = vsel %vm5647_vm13, %v5635_v39, %v12603_v41  ;;  %v5950_v32 = vsel %vm5936_vm4, %v5949_v35, %v5948_v13  ;;  %v6032_v13 = vld [vmem:[%s14537_s2 + $0x18] sm:$0xff] }
 0x478   : > { %v5952_v45 = vrot.slane %v5826_v20, 6  ;;  %v5539_v15 = vsel %vm5515_vm9, %v5506_v29, %v15015_v40  ;;  %v5431_v63 = vpop.permute.xlu0 %5430  ;;  %v5701_v0 = vsel %vm5680_vm14, %v5668_v26, %v5427_v47  ;;  %v9269_v1 = vpack.c.bf16 %v9048_v30, %v9046_v54  ;;  %9268 = vmatprep.subr.bf16.mxu1 %v9267_v21 }
 0x479   : > { %v5954_v44 = vrot.slane %v5827_v6, 5  ;;  %v5572_v24 = vsel %vm5548_vm10, %v5539_v15, %v12650_v52  ;;  %v5703_v60 = vsel %vm5680_vm14, %v5670_v38, %v5431_v63  ;;  %v5765_v25 = vrot.slane %v5701_v0, 1  ;;  %5983 = vrot.lane.b32.xlu1 %v5824_v51, %s9614_s9  ;;  %v4667_v18 = vpop.permute.xlu1 %4666 }
 0x47a   : > { %v5951_v41 = vrot.slane %v5825_v50, 7  ;;  %v5956_v16 = vrot.slane %v5828_v23, 4  ;;  %v5830_v9 = vmax.f32 %v5702_v33, %v5766_v3  ;;  %v5767_v46 = vrot.slane %v5703_v60, 1  ;;  %9270 = vmatpush1.bf16.msra.mxu1 %v9269_v1 }
 0x47b   : > { %5981 = vrot.lane.b32.xlu0 %v5950_v32, %s9614_s9  ;;  %v5829_v31 = vmax.f32 %v5701_v0, %v5765_v25  ;;  %v5605_v52 = vsel %vm5581_vm11, %v5572_v24, %v12659_v53  ;;  %vm15016_vm5 = vcmask 1044484   ;;  %vm6007_vm7 = vcmask 122880  }
 0x47c   : > { %v5953_v27 = vsel %vm5921_vm15, %v5952_v45, %v5951_v41  ;;  %v5831_v22 = vmax.f32 %v5703_v60, %v5767_v46  ;;  %v5177_v37 = vpop.permute.xlu0 %5176  ;;  %v5960_v19 = vrot.slane %v5830_v9, 2  ;;  %vm15025_vm1 = vmmov %vm15016_vm5 }
 0x47d   : > { %v5955_v61 = vsel %vm5924_vm0, %v5954_v44, %v5953_v27  ;;  %v5958_v4 = vrot.slane %v5829_v31, 3  ;;  %v5638_v49 = vsel %vm5614_vm12, %v5605_v52, %v5177_v37  ;;  %v4671_v7 = vpop.permute.xlu1 %4670  ;;  %v15017_v31 = vld [vmem:[#allocation133_spill] sm:$0xff] }
 0x47e   : > { %v5957_v17 = vsel %vm15016_vm5, %v5956_v16, %v5955_v61  ;;  %v5671_v57 = vsel %vm5647_vm13, %v5638_v49, %v12713_v43  ;;  %v5962_v10 = vrot.slane %v5831_v22, 1  ;;  %v6030_v43 = vld [vmem:[%s14537_s2 + $0x8] sm:$0xff]  ;;  %v15018_v22 = vld [vmem:[#allocation132_spill] sm:$0xff]  ;;  %vm15030_vm5 = vmmov %vm15025_vm1 }
 0x47f   : > { %v5959_v11 = vsel %vm5930_vm2, %v5958_v4, %v5957_v17  ;;  %v5704_v5 = vsel %vm5680_vm14, %v5671_v57, %v5433_v55  ;;  %v9271_v39 = vpack.c.bf16 %v6032_v13, %v6030_v43  ;;  %v5507_v37 = vsel %vm5482_vm8, %v15018_v22, %v4667_v18  ;;  %v15019_v4 = vld [vmem:[#allocation137_spill] sm:$0xff] }
 0x480   : > { %v5768_v59 = vrot.slane %v5704_v5, 1  ;;  %v4669_v53 = vpop.permute.xlu0 %4668  ;;  %v5961_v20 = vsel %vm5933_vm3, %v5960_v19, %v5959_v11  ;;  %v15020_v19 = vld [vmem:[#allocation135_spill] sm:$0xff] }
 0x481   : > { %v5963_v42 = vsel %vm5936_vm4, %v5962_v10, %v5961_v20  ;;  %9272 = vmatprep.subr.bf16.mxu1 %v9271_v39  ;;  %v4923_v56 = vpop.permute.xlu1 %4922  ;;  %v5508_v55 = vsel %vm5482_vm8, %v15017_v31, %v4669_v53  ;;  %v5509_v57 = vsel %vm5482_vm8, %v15020_v19, %v4671_v7  ;;  %v5540_v10 = vsel %vm5515_vm9, %v5507_v37, %v12765_v62 }
 0x482   : > { %v5832_v28 = vmax.f32 %v5704_v5, %v5768_v59  ;;  %5985 = vrot.lane.b32.xlu0 %v5963_v42, %s9614_s9  ;;  %v5541_v61 = vsel %vm5515_vm9, %v5508_v55, %v12754_v2  ;;  %v15021_v5 = vld [vmem:[#allocation41_spill] sm:$0xff]  ;;  %v5573_v53 = vsel %vm5548_vm10, %v5540_v10, %v4923_v56  ;;  %v5542_v7 = vsel %vm5515_vm9, %v5509_v57, %v12861_v58  ;;  %v15023_v55 = vld [vmem:[#allocation43_spill] sm:$0xff] }
 0x484   : > { %v4673_v6 = vpop.permute.xlu0 %4672  ;;  %5987 = vrot.lane.b32.xlu1 %v5832_v28, %s9614_s9 }
 0x485   : > { %v4927_v12 = vpop.permute.xlu1 %4926  ;;  %v5510_v49 = vsel %vm5482_vm8, %v15019_v4, %v4673_v6 }
 0x486   : > { %v5543_v28 = vsel %vm5515_vm9, %v5510_v49, %v12821_v34  ;;  %v5575_v6 = vsel %vm5548_vm10, %v5542_v7, %v4927_v12 }
 0x488   : > { %v4925_v8 = vpop.permute.xlu0 %4924 }
 0x489   : > { %v5053_v48 = vpop.permute.xlu1 %5052  ;;  %v5574_v17 = vsel %vm5548_vm10, %v5541_v61, %v4925_v8 }
 0x48a   : > { %v5607_v11 = vsel %vm5581_vm11, %v5574_v17, %v5053_v48  ;;  %v15022_v48 = vld [vmem:[#allocation62_spill] sm:$0xff] }
 0x48c   : > { %v5051_v35 = vpop.permute.xlu0 %5050 }
 0x48d   : > { %v4929_v33 = vpop.permute.xlu1 %4928  ;;  %v5606_v42 = vsel %vm5581_vm11, %v5573_v53, %v5051_v35 }
 0x48e   : > { %v5576_v62 = vsel %vm5548_vm10, %v5543_v28, %v4929_v33 }
 0x490   : > { %v5057_v29 = vpop.permute.xlu0 %5056 }
 0x491   : > { %v5055_v54 = vpop.permute.xlu1 %5054 }
 0x492   : > { %v5608_v8 = vsel %vm5581_vm11, %v5575_v6, %v5055_v54 }
 0x494   : > { %v5309_v21 = vpop.permute.xlu0 %5308 }
 0x495   : > { %v5307_v50 = vpop.permute.xlu1 %5306 }
 0x498   : > { %v5311_v30 = vpop.permute.xlu0 %5310 }
 0x499   : > { %v12987_v3 = vpop.permute.xlu1 %5312 }
 0x49c   : > { %v4803_v23 = vpop.permute.xlu0 %4802 }
 0x49d   : > { %v5181_v51 = vpop.permute.xlu1 %5180 }
 0x49e   : > { %v5640_v2 = vsel %vm5614_vm12, %v5607_v11, %v5181_v51 }
 0x49f   : > { %v5673_v39 = vsel %vm5647_vm13, %v5640_v2, %v5309_v21 }
 0x4a0   : > { %v5179_v38 = vpop.permute.xlu0 %5178 }
 0x4a1   : > { %v5435_v47 = vpop.permute.xlu1 %5434  ;;  %v5639_v43 = vsel %vm5614_vm12, %v5606_v42, %v5179_v38  ;;  %v5609_v38 = vsel %vm5581_vm11, %v5576_v62, %v5057_v29 }
 0x4a2   : > { %v5672_v33 = vsel %vm5647_vm13, %v5639_v43, %v5307_v50 }
 0x4a3   : > { %v5705_v12 = vsel %vm5680_vm14, %v5672_v33, %v5435_v47 }
 0x4a4   : > { %v4805_v26 = vpop.permute.xlu0 %4804  ;;  %v5769_v22 = vrot.slane %v5705_v12, 1 }
 0x4a5   : > { %v5439_v45 = vpop.permute.xlu1 %5438 }
 0x4a6   : > { %v5833_v49 = vmax.f32 %v5705_v12, %v5769_v22 }
 0x4a8   : > { %v5183_v32 = vpop.permute.xlu0 %5182  ;;  %v5964_v53 = vrot.slane %v5833_v49, 7 }
 0x4a9   : > { %v12989_v15 = vpop.permute.xlu1 %5440  ;;  %v5641_v58 = vsel %vm5614_vm12, %v5608_v8, %v5183_v32 }
 0x4aa   : > { %v5674_v31 = vsel %vm5647_vm13, %v5641_v58, %v5311_v30 }
 0x4ac   : > { %v4807_v40 = vpop.permute.xlu0 %4806 }
 0x4ad   : > { %v4677_v0 = vpop.permute.xlu1 %4676 }
 0x4ae   : > { %v5512_v34 = vsel %vm5482_vm8, %v15022_v48, %v4677_v0 }
 0x4af   : > { %v5545_v54 = vsel %vm5515_vm9, %v5512_v34, %v4805_v26 }
 0x4b0   : > { %v5185_v63 = vpop.permute.xlu0 %5184 }
 0x4b1   : > { %v4931_v44 = vpop.permute.xlu1 %4930  ;;  %v5642_v21 = vsel %vm5614_vm12, %v5609_v38, %v5185_v63 }
 0x4b2   : > { %v5675_v47 = vsel %vm5647_vm13, %v5642_v21, %v12987_v3 }
 0x4b4   : > { %v5437_v1 = vpop.permute.xlu0 %5436 }
 0x4b5   : > { %v5059_v60 = vpop.permute.xlu1 %5058  ;;  %v5706_v35 = vsel %vm5680_vm14, %v5673_v39, %v5437_v1 }
 0x4b8   : > { %v12991_v24 = vpop.permute.xlu0 %4808 }
 0x4b9   : > { %v4935_v41 = vpop.permute.xlu1 %4934 }
 0x4bc   : > { %v4675_v25 = vpop.permute.xlu0 %4674 }
 0x4bd   : > { %v5061_v9 = vpop.permute.xlu1 %5060  ;;  %v5511_v18 = vsel %vm5482_vm8, %v15021_v5, %v4675_v25  ;;  %v5770_v25 = vrot.slane %v5706_v35, 1 }
 0x4be   : > { %v5544_v13 = vsel %vm5515_vm9, %v5511_v18, %v4803_v23 }
 0x4bf   : > { %v5577_v23 = vsel %vm5548_vm10, %v5544_v13, %v4931_v44  ;;  %v5707_v44 = vsel %vm5680_vm14, %v5674_v31, %v5439_v45  ;;  %v5834_v26 = vmax.f32 %v5706_v35, %v5770_v25 }
 0x4c0   : > { %v4679_v16 = vpop.permute.xlu0 %4678  ;;  %v5610_v0 = vsel %vm5581_vm11, %v5577_v23, %v5059_v60  ;;  %v5771_v61 = vrot.slane %v5707_v44, 1 }
 0x4c1   : > { %v5063_v27 = vpop.permute.xlu1 %5062  ;;  %v5513_v32 = vsel %vm5482_vm8, %v15023_v55, %v4679_v16  ;;  %v5708_v16 = vsel %vm5680_vm14, %v5675_v47, %v12989_v15  ;;  %v6029_v47 = vld [vmem:[%s14537_s2] sm:$0xff] }
 0x4c2   : > { %v5546_v37 = vsel %vm5515_vm9, %v5513_v32, %v4807_v40  ;;  %v5772_v57 = vrot.slane %v5708_v16, 1  ;;  %v5835_v5 = vmax.f32 %v5707_v44, %v5771_v61 }
 0x4c3   : > { %v5579_v17 = vsel %vm5548_vm10, %v5546_v37, %v4935_v41 }
 0x4c4   : > { %v4933_v46 = vpop.permute.xlu0 %4932  ;;  %v5612_v10 = vsel %vm5581_vm11, %v5579_v17, %v5063_v27  ;;  %v5836_v7 = vmax.f32 %v5708_v16, %v5772_v57  ;;  %v5967_v43 = vrot.slane %v5835_v5, 5  ;;  %v6033_v17 = vld [vmem:[%s14537_s2 + $0x20] sm:$0xff] }
 0x4c5   : > { %v5317_v59 = vpop.permute.xlu1 %5316  ;;  %v5578_v50 = vsel %vm5548_vm10, %v5545_v54, %v4933_v46 }
 0x4c6   : > { %v5611_v30 = vsel %vm5581_vm11, %v5578_v50, %v5061_v9  ;;  %v5965_v9 = vrot.slane %v5834_v26, 6  ;;  %v5969_v58 = vrot.slane %v5836_v7, 4  ;;  %v6034_v26 = vld [vmem:[%s14537_s2 + $0x28] sm:$0xff] }
 0x4c8   : > { %v12997_v52 = vpop.permute.xlu0 %4680  ;;  %v5966_v62 = vsel %vm5921_vm15, %v5965_v9, %v5964_v53 }
 0x4c9   : > { %v4937_v56 = vpop.permute.xlu1 %4936  ;;  %v5968_v35 = vsel %vm5924_vm0, %v5967_v43, %v5966_v62 }
 0x4cc   : > { %v5315_v20 = vpop.permute.xlu0 %5314 }
 0x4cd   : > { %v5065_v1 = vpop.permute.xlu1 %5064 }
 0x4d0   : > { %v5319_v51 = vpop.permute.xlu0 %5318 }
 0x4d2   : > { %v5189_v60 = vpop.permute.xlu1 %5188 }
 0x4d3   : > { %v5644_v45 = vsel %vm5614_vm12, %v5611_v30, %v5189_v60  ;;  %v6036_v60 = vld [vmem:[%s14537_s2 + $0x38] sm:$0xff] }
 0x4d4   : > { %v5187_v29 = vpop.permute.xlu0 %5186  ;;  %v5677_v40 = vsel %vm5647_vm13, %v5644_v45, %v5317_v59  ;;  %v9275_v5 = vpack.c.bf16 %v6036_v60, %v6034_v26  ;;  %v6054_v26 = vld [vmem:[%s14537_s2 + $0xc8] sm:$0xff] }
 0x4d5   : > { %v5643_v63 = vsel %vm5614_vm12, %v5610_v0, %v5187_v29 }
 0x4d6   : > { %v5676_v4 = vsel %vm5647_vm13, %v5643_v63, %v5315_v20  ;;  %v5191_v11 = vpop.permute.xlu1 %5190  ;;  %v15024_v20 = vld [vmem:[#allocation46_spill] sm:$0xff]  ;;  %v6031_v63 = vld [vmem:[%s14537_s2 + $0x10] sm:$0xff] }
 0x4d7   : > { %v5645_v18 = vsel %vm5614_vm12, %v5612_v10, %v5191_v11  ;;  %v5514_v42 = vsel %vm5482_vm8, %v15024_v20, %v12997_v52  ;;  %vm6001_vm8 = vcmask 1047681  }
 0x4d8   : > { %v5443_v46 = vpop.permute.xlu0 %5442  ;;  %v5678_v59 = vsel %vm5647_vm13, %v5645_v18, %v5319_v51  ;;  %v5547_v39 = vsel %vm5515_vm9, %v5514_v42, %v12991_v24  ;;  %v5970_v24 = vsel %vm15025_vm1, %v5969_v58, %v5968_v35  ;;  %v6046_v58 = vld [vmem:[%s14537_s2 + $0x88] sm:$0xff] }
 0x4d9   : > { %v5709_v3 = vsel %vm5680_vm14, %v5676_v4, %v5443_v46  ;;  %v5580_v52 = vsel %vm5548_vm10, %v5547_v39, %v4937_v56  ;;  %vm6003_vm10 = vcmask 130049   ;;  %v6042_v39 = vld [vmem:[%s14537_s2 + $0x68] sm:$0xff] }
 0x4da   : > { %v5773_v19 = vrot.slane %v5709_v3, 1  ;;  %v5613_v51 = vsel %vm5581_vm11, %v5580_v52, %v5065_v1 }
 0x4dc   : > { %v5445_v15 = vpop.permute.xlu0 %5444  ;;  %v5837_v41 = vmax.f32 %v5709_v3, %v5773_v19  ;;  %v9273_v3 = vpack.c.bf16 %v6031_v63, %v6029_v47  ;;  %v6035_v19 = vld [vmem:[%s14537_s2 + $0x30] sm:$0xff]  ;;  %v6049_v47 = vld [vmem:[%s14537_s2 + $0xa0] sm:$0xff] }
 0x4dd   : > { %v5710_v2 = vsel %vm5680_vm14, %v5677_v40, %v5445_v15  ;;  %v6038_v40 = vld [vmem:[%s14537_s2 + $0x48] sm:$0xff]  ;;  %v6040_v15 = vld [vmem:[%s14537_s2 + $0x58] sm:$0xff]  ;;  %v9277_v7 = vpack.c.bf16 %v6035_v19, %v6033_v17  ;;  %v6051_v63 = vld [vmem:[%s14537_s2 + $0xb0] sm:$0xff] }
 0x4de   : > { %v5774_v28 = vrot.slane %v5710_v2, 1  ;;  %v5193_v27 = vpop.permute.xlu1 %5192  ;;  %v5971_v48 = vrot.slane %v5837_v41, 3  ;;  %v9279_v43 = vpack.c.bf16 %v6040_v15, %v6038_v40  ;;  %v6059_v17 = vld [vmem:[%s14537_s2 + $0xf0] sm:$0xff]  ;;  %v6062_v19 = vld [vmem:[%s14537_s2 + $0x108] sm:$0xff]  ;;  %v6064_v40 = vld [vmem:[%s14537_s2 + $0x118] sm:$0xff] }
 0x4df   : > { %v5646_v12 = vsel %vm5614_vm12, %v5613_v51, %v5193_v27  ;;  %vm6101_vm12 = vcmask 1046528   ;;  %v6068_v15 = vld [vmem:[%s14537_s2 + $0x138] sm:$0xff] }
 0x4e0   : > { %v5838_v13 = vmax.f32 %v5710_v2, %v5774_v28  ;;  %v5972_v56 = vsel %vm5930_vm2, %v5971_v48, %v5970_v24  ;;  %v6041_v48 = vld [vmem:[%s14537_s2 + $0x60] sm:$0xff]  ;;  %vm7884_vm2 = vcmp.lt.s32.totalorder %v14999_v14, 192 }
 0x4e1   : > { %v5447_v6 = vpop.permute.xlu0 %5446  ;;  %7886 = vst.msk [vmem:[#allocation4] ss:$8 sm:$0x3] %vm7884_vm2, %v14664_v36  ;;  %7898 = vst.msk [vmem:[#allocation4 + $0x5] ss:$8 sm:$0x3] %vm7884_vm2, %v14664_v36 }
 0x4e2   : > { %v5711_v8 = vsel %vm5680_vm14, %v5678_v59, %v5447_v6  ;;  %v5973_v33 = vrot.slane %v5838_v13, 2  ;;  %v5449_v38 = vpop.permute.xlu1 %5448  ;;  %v6037_v13 = vld [vmem:[%s14537_s2 + $0x40] sm:$0xff]  ;;  %v6039_v6 = vld [vmem:[%s14537_s2 + $0x50] sm:$0xff]  ;;  %7889 = vst.msk [vmem:[#allocation4 + $0x10] ss:$8 sm:$0x3] %vm7884_vm2, %v14664_v36 }
 0x4e3   : > { %v5775_v34 = vrot.slane %v5711_v8, 1  ;;  %v9281_v35 = vpack.c.bf16 %v6039_v6, %v6037_v13  ;;  %7892 = vst.msk [vmem:[#allocation4 + $0x20] ss:$8 sm:$0x3] %vm7884_vm2, %v14664_v36 }
 0x4e4   : > { %v5974_v0 = vsel %vm5933_vm3, %v5973_v33, %v5972_v56  ;;  %vm7909_vm3 = vcmask 259072   ;;  %7895 = vst.msk [vmem:[#allocation4 + $0x30] ss:$8 sm:$0x3] %vm7884_vm2, %v14664_v36 }
 0x4e5   : > { %v5839_v23 = vmax.f32 %v5711_v8, %v5775_v34  ;;  %v5321_v21 = vpop.permute.xlu0 %5320  ;;  %v6044_v8 = vld [vmem:[%s14537_s2 + $0x78] sm:$0xff]  ;;  %v6043_v34 = vld [vmem:[%s14537_s2 + $0x70] sm:$0xff]  ;;  %7901 = vst.msk [vmem:[#allocation4 + $0x15] ss:$8 sm:$0x3] %vm7884_vm2, %v14664_v36 }
 0x4e6   : > { %v5679_v25 = vsel %vm5647_vm13, %v5646_v12, %v5321_v21  ;;  %v5980_v55 = vpop.permute.xlu1 %5979  ;;  %v9283_v52 = vpack.c.bf16 %v6044_v8, %v6042_v39  ;;  %7904 = vst.msk [vmem:[#allocation4 + $0x25] ss:$8 sm:$0x3] %vm7884_vm2, %v14664_v36  ;;  %7907 = vst.msk [vmem:[#allocation4 + $0x35] ss:$8 sm:$0x3] %vm7884_vm2, %v14664_v36 }
 0x4e7   : > { %v5975_v54 = vrot.slane %v5839_v23, 1  ;;  %v5712_v31 = vsel %vm5680_vm14, %v5679_v25, %v5449_v38  ;;  %6006 = vst.msk [vmem:[#allocation3 + $0x10] sm:$0x1] %vm6005_vm6, %v5980_v55  ;;  %v6048_v38 = vld [vmem:[%s14537_s2 + $0x98] sm:$0xff]  ;;  %v9285_v25 = vpack.c.bf16 %v6043_v34, %v6041_v48  ;;  %vm6401_vm14 = vcmask 1045504  }
 0x4e8   : > { %v5776_v1 = vrot.slane %v5712_v31, 1  ;;  %6008 = vst.msk [vmem:[#allocation3 + $0x18] sm:$0x1] %vm6007_vm7, %v5980_v55  ;;  %v6050_v55 = vld [vmem:[%s14537_s2 + $0xa8] sm:$0xff]  ;;  %vm8886_vm2 = vcmask 1041409  }
 0x4e9   : > { %v5978_v32 = vpop.permute.xlu0 %5977  ;;  %v5976_v50 = vsel %vm5936_vm4, %v5975_v54, %v5974_v0  ;;  %v6047_v0 = vld [vmem:[%s14537_s2 + $0x90] sm:$0xff]  ;;  %vm7914_vm4 = vcmask 521472   ;;  %7910 = vst.msk [vmem:[#allocation4] sm:$0x3f] %vm7909_vm3, %v14664_v36  ;;  %7911 = vst.msk [vmem:[#allocation4 + $0x10] sm:$0x3f] %vm7909_vm3, %v14664_v36 }
 0x4ea   : > { %v5840_v29 = vmax.f32 %v5712_v31, %v5776_v1  ;;  %6002 = vst.msk [vmem:[#allocation3] sm:$0xfe] %vm6001_vm8, %v5978_v32  ;;  %5989 = vrot.lane.b32.xlu0 %v5976_v50, %s9614_s9  ;;  %v9287_v31 = vpack.c.bf16 %v6048_v38, %v6046_v58  ;;  %v6045_v1 = vld [vmem:[%s14537_s2 + $0x80] sm:$0xff]  ;;  %v9065_v38 = vld [vmem:[%s14537_s2 + $0x2b8] sm:$0xff] }
 0x4eb   : > { %6004 = vst.msk [vmem:[#allocation3 + $0x8] sm:$0xfe] %vm6003_vm10, %v5978_v32  ;;  %v5984_v22 = vpop.permute.xlu1 %5983  ;;  %v6052_v32 = vld [vmem:[%s14537_s2 + $0xb8] sm:$0xff]  ;;  %v9058_v58 = vld [vmem:[%s14537_s2 + $0x280] sm:$0xff] }
 0x4ec   : > { %5991 = vrot.lane.b32.xlu1 %v5840_v29, %s9614_s9  ;;  %6011 = vst.msk [vmem:[#allocation3 + $0x30] sm:$0x1] %vm6005_vm6, %v5984_v22 }
 0x4ed   : > { %v5982_v44 = vpop.permute.xlu0 %5981  ;;  %6012 = vst.msk [vmem:[#allocation3 + $0x38] sm:$0x1] %vm6007_vm7, %v5984_v22  ;;  %v9289_v22 = vpack.c.bf16 %v6047_v0, %v6045_v1 }
 0x4ee   : > { %6009 = vst.msk [vmem:[#allocation3 + $0x20] sm:$0xfe] %vm6001_vm8, %v5982_v44  ;;  %v6071_v30 = vld [vmem:[#allocation3 + $0x10] sm:$0x1] }
 0x4ef   : > { %6010 = vst.msk [vmem:[#allocation3 + $0x28] sm:$0xfe] %vm6003_vm10, %v5982_v44  ;;  %v6072_v37 = vld [vmem:[#allocation3 + $0x18] sm:$0x1]  ;;  %v6103_v4 = vrot.slane %v6071_v30, 1  ;;  %v9291_v44 = vpack.c.bf16 %v6052_v32, %v6050_v55  ;;  %v9293_v30 = vpack.c.bf16 %v6051_v63, %v6049_v47  ;;  %v9066_v32 = vld [vmem:[%s14537_s2 + $0x2c0] sm:$0xff] }
 0x4f0   : > { %v6106_v16 = vrot.slane %v6072_v37, 1  ;;  %v6056_v37 = vld [vmem:[%s14537_s2 + $0xd8] sm:$0xff]  ;;  %7915 = vst.msk [vmem:[#allocation4 + $0x8] sm:$0x3f] %vm7914_vm4, %v14664_v36  ;;  %7916 = vst.msk [vmem:[#allocation4 + $0x18] sm:$0x3f] %vm7914_vm4, %v14664_v36 }
 0x4f1   : > { %v6069_v46 = vld [vmem:[#allocation3] sm:$0xfe]  ;;  %v9295_v60 = vpack.c.bf16 %v6056_v37, %v6054_v26  ;;  %v6372_v37 = vld [vmem:[#allocation3 + $0x18] sm:$0x3]  ;;  %7912 = vst.msk [vmem:[#allocation4 + $0x20] sm:$0x3f] %vm7909_vm3, %v14664_v36 }
 0x4f2   : > { %v6070_v61 = vld [vmem:[#allocation3 + $0x8] sm:$0xfe]  ;;  %v6102_v49 = vrot.slane %v6069_v46, 1  ;;  %7913 = vst.msk [vmem:[#allocation4 + $0x30] sm:$0x3f] %vm7909_vm3, %v14664_v36 }
 0x4f3   : > { %v6105_v45 = vrot.slane %v6070_v61, 1  ;;  %v6075_v11 = vld [vmem:[#allocation3 + $0x30] sm:$0x1]  ;;  %v6053_v61 = vld [vmem:[%s14537_s2 + $0xc0] sm:$0xff]  ;;  %v6058_v46 = vld [vmem:[%s14537_s2 + $0xe8] sm:$0xff] }
 0x4f4   : > { %v6104_v9 = vsel %vm6101_vm12, %v6102_v49, %v6103_v4  ;;  %v6076_v10 = vld [vmem:[#allocation3 + $0x38] sm:$0x1]  ;;  %v5986_v18 = vpop.permute.xlu0 %5985  ;;  %v6109_v42 = vrot.slane %v6075_v11, 1  ;;  %v6063_v11 = vld [vmem:[%s14537_s2 + $0x110] sm:$0xff]  ;;  %v6370_v26 = vld [vmem:[#allocation3 + $0x8] sm:$0xfc] }
 0x4f5   : > { %v6107_v57 = vsel %vm6101_vm12, %v6105_v45, %v6106_v16  ;;  %v6112_v2 = vrot.slane %v6076_v10, 1  ;;  %v6073_v20 = vld [vmem:[#allocation3 + $0x20] sm:$0xfe]  ;;  %6013 = vst.msk [vmem:[#allocation3 + $0x40] sm:$0xfe] %vm6001_vm8, %v5986_v18  ;;  %v6055_v16 = vld [vmem:[%s14537_s2 + $0xd0] sm:$0xff] }
 0x4f6   : > { %9050 = vmatprep.mubr.msk.f32.mxu1 %vm5515_vm9, %v6107_v57  ;;  %v6074_v53 = vld [vmem:[#allocation3 + $0x28] sm:$0xfe]  ;;  %6014 = vst.msk [vmem:[#allocation3 + $0x48] sm:$0xfe] %vm6003_vm10, %v5986_v18  ;;  %v6108_v28 = vrot.slane %v6073_v20, 1  ;;  %v5988_v59 = vpop.permute.xlu1 %5987  ;;  %v6060_v4 = vld [vmem:[%s14537_s2 + $0xf8] sm:$0xff]  ;;  %v9297_v45 = vpack.c.bf16 %v6055_v16, %v6053_v61 }
 0x4f7   : > { %6244 = vmatmul.mubr.f32.vlgmr.msra.gmra.mrb[0].mxu1 %v6104_v9  ;;  %v6111_v41 = vrot.slane %v6074_v53, 1  ;;  %6015 = vst.msk [vmem:[#allocation3 + $0x50] sm:$0x1] %vm6005_vm6, %v5988_v59  ;;  %v9299_v49 = vpack.c.bf16 %v6060_v4, %v6058_v46  ;;  %v9303_v9 = vpack.c.bf16 %v6064_v40, %v6062_v19  ;;  %v6061_v10 = vld [vmem:[%s14537_s2 + $0x100] sm:$0xff]  ;;  %v6067_v20 = vld [vmem:[%s14537_s2 + $0x130] sm:$0xff]  ;;  %v6024_v1 = vld [vmem:[#allocation3 + $0x28] sm:$0xff] }
 0x4f8   : > { %9274 = vmatpush1.bf16.msra.mxu1 %v9273_v3  ;;  %6016 = vst.msk [vmem:[#allocation3 + $0x58] sm:$0x1] %vm6007_vm7, %v5988_v59  ;;  %v6110_v27 = vsel %vm6101_vm12, %v6108_v28, %v6109_v42  ;;  %v6057_v3 = vld [vmem:[%s14537_s2 + $0xe0] sm:$0xff]  ;;  %v9305_v18 = vpack.c.bf16 %v6063_v11, %v6061_v10  ;;  %v9059_v42 = vld [vmem:[%s14537_s2 + $0x288] sm:$0xff]  ;;  %v9072_v61 = vld [vmem:[%s14537_s2 + $0x2f0] sm:$0xff] }
 0x4f9   : > { %v6113_v62 = vsel %vm6101_vm12, %v6111_v41, %v6112_v2  ;;  %9276 = vmatprep.subr.bf16.mxu1 %v9275_v5  ;;  %v9301_v57 = vpack.c.bf16 %v6059_v17, %v6057_v3  ;;  %v6066_v5 = vld [vmem:[%s14537_s2 + $0x128] sm:$0xff]  ;;  %v6065_v2 = vld [vmem:[%s14537_s2 + $0x120] sm:$0xff]  ;;  %v9061_v41 = vld [vmem:[%s14537_s2 + $0x298] sm:$0xff]  ;;  %v6406_v3 = vrot.slane %v6372_v37, 2  ;;  %7917 = vst.msk [vmem:[#allocation4 + $0x28] sm:$0x3f] %vm7914_vm4, %v14664_v36 }
 0x4fa   : > { %9051 = vmatprep.mubr.msk.f32.mxu1 %vm5515_vm9, %v6113_v62  ;;  %v9307_v53 = vpack.c.bf16 %v6068_v15, %v6066_v5  ;;  %v9309_v28 = vpack.c.bf16 %v6067_v20, %v6065_v2  ;;  %v9311_v59 = vpack.c.bf16 %v9061_v41, %v9059_v42  ;;  %v9075_v46 = vld [vmem:[%s14537_s2 + $0x308] sm:$0xff]  ;;  %v9077_v4 = vld [vmem:[%s14537_s2 + $0x318] sm:$0xff]  ;;  %v9074_v40 = vld [vmem:[%s14537_s2 + $0x300] sm:$0xff]  ;;  %7918 = vst.msk [vmem:[#allocation4 + $0x38] sm:$0x3f] %vm7914_vm4, %v14664_v36 }
 0x4fb   : > { %6250 = vmatmul.mubr.f32.gmra.mrb[2].mxu1 %v6110_v27  ;;  %v9327_v19 = vpack.c.bf16 %v9077_v4, %v9075_v46  ;;  %v9079_v10 = vld [vmem:[%s14537_s2 + $0x328] sm:$0xff]  ;;  %v9081_v11 = vld [vmem:[%s14537_s2 + $0x338] sm:$0xff]  ;;  %v9080_v2 = vld [vmem:[%s14537_s2 + $0x330] sm:$0xff] }
 0x4fc   : > { %9278 = vmatpush1.bf16.msra.mxu1 %v9277_v7  ;;  %v6077_v33 = vld [vmem:[#allocation3 + $0x40] sm:$0xfe]  ;;  %v9083_v20 = vld [vmem:[%s14537_s2 + $0x348] sm:$0xff]  ;;  %v9085_v42 = vld [vmem:[%s14537_s2 + $0x358] sm:$0xff] }
 0x4fd   : > { %9280 = vmatprep.subr.bf16.mxu1 %v9279_v43  ;;  %v6078_v51 = vld [vmem:[#allocation3 + $0x48] sm:$0xfe]  ;;  %v6114_v12 = vrot.slane %v6077_v33, 1  ;;  %v6025_v16 = vld [vmem:[#allocation3 + $0x40] sm:$0xff] }
 0x4fe   : > { %v6117_v23 = vrot.slane %v6078_v51, 1  ;;  %v6079_v24 = vld [vmem:[#allocation3 + $0x50] sm:$0x1]  ;;  %v9063_v33 = vld [vmem:[%s14537_s2 + $0x2a8] sm:$0xff] }
 0x4ff   : > { %v6080_v21 = vld [vmem:[#allocation3 + $0x58] sm:$0x1]  ;;  %v6115_v54 = vrot.slane %v6079_v24, 1  ;;  %v9060_v51 = vld [vmem:[%s14537_s2 + $0x290] sm:$0xff]  ;;  %v9062_v24 = vld [vmem:[%s14537_s2 + $0x2a0] sm:$0xff] }
 0x500   : > { %9282 = vmatpush1.bf16.msra.mxu1 %v9281_v35  ;;  %v6118_v56 = vrot.slane %v6080_v21, 1  ;;  %v9315_v21 = vpack.c.bf16 %v9065_v38, %v9063_v33  ;;  %v6026_v47 = vld [vmem:[#allocation3 + $0x48] sm:$0xff]  ;;  %v9097_v33 = vld [vmem:[%s14537_s2 + $0x3b8] sm:$0xff] }
 0x501   : > { %9284 = vmatprep.subr.bf16.mxu1 %v9283_v52  ;;  %v6116_v29 = vsel %vm6101_vm12, %v6114_v12, %v6115_v54  ;;  %v9313_v12 = vpack.c.bf16 %v9060_v51, %v9058_v58  ;;  %v9067_v54 = vld [vmem:[%s14537_s2 + $0x2c8] sm:$0xff]  ;;  %v9092_v58 = vld [vmem:[%s14537_s2 + $0x390] sm:$0xff] }
 0x502   : > { %v6119_v50 = vsel %vm6101_vm12, %v6117_v23, %v6118_v56  ;;  %v6022_v23 = vld [vmem:[#allocation3 + $0x8] sm:$0xff]  ;;  %v6021_v56 = vld [vmem:[#allocation3] sm:$0xff] }
 0x503   : > { %9052 = vmatprep.mubr.msk.f32.mxu1 %vm5515_vm9, %v6119_v50  ;;  %v9068_v50 = vld [vmem:[%s14537_s2 + $0x2d0] sm:$0xff]  ;;  %v9095_v51 = vld [vmem:[%s14537_s2 + $0x3a8] sm:$0xff] }
 0x504   : > { %9286 = vmatpush1.bf16.msra.mxu1 %v9285_v25  ;;  %v9064_v25 = vld [vmem:[%s14537_s2 + $0x2b0] sm:$0xff]  ;;  %v9321_v63 = vpack.c.bf16 %v9068_v50, %v9066_v32  ;;  %v6373_v50 = vld [vmem:[#allocation3 + $0x20] sm:$0xfc] }
 0x505   : > { %6256 = vmatmul.mubr.f32.gmra.mrb[4].mxu1 %v6116_v29  ;;  %9288 = vmatprep.subr.bf16.mxu1 %v9287_v31  ;;  %v9069_v31 = vld [vmem:[%s14537_s2 + $0x2d8] sm:$0xff]  ;;  %v9317_v0 = vpack.c.bf16 %v9064_v25, %v9062_v24  ;;  %v6023_v29 = vld [vmem:[#allocation3 + $0x20] sm:$0xff]  ;;  %v6371_v25 = vld [vmem:[#allocation3 + $0x10] sm:$0x3] }
 0x506   : > { %v9319_v55 = vpack.c.bf16 %v9069_v31, %v9067_v54  ;;  %v6369_v24 = vld [vmem:[#allocation3] sm:$0xfc]  ;;  %v6374_v54 = vld [vmem:[#allocation3 + $0x28] sm:$0xfc]  ;;  %v6376_v31 = vld [vmem:[#allocation3 + $0x38] sm:$0x3] }
 0x507   : > { %v6412_v32 = vrot.slane %v6376_v31, 2 }
 0x508   : > { %9290 = vmatpush1.bf16.msra.mxu1 %v9289_v22  ;;  %v9071_v22 = vld [vmem:[%s14537_s2 + $0x2e8] sm:$0xff] }
 0x509   : > { %9292 = vmatprep.subr.bf16.mxu1 %v9291_v44  ;;  %v9073_v44 = vld [vmem:[%s14537_s2 + $0x2f8] sm:$0xff] }
 0x50c   : > { %9294 = vmatpush1.bf16.msra.mxu1 %v9293_v30  ;;  %v9323_v30 = vpack.c.bf16 %v9073_v44, %v9071_v22  ;;  %v6378_v22 = vld [vmem:[#allocation3 + $0x48] sm:$0xfc]  ;;  %v6380_v44 = vld [vmem:[#allocation3 + $0x58] sm:$0x3] }
 0x50d   : > { %9296 = vmatprep.subr.bf16.mxu1 %v9295_v60  ;;  %v9070_v60 = vld [vmem:[%s14537_s2 + $0x2e0] sm:$0xff] }
 0x50e   : > { %v9325_v17 = vpack.c.bf16 %v9072_v61, %v9070_v60  ;;  %v6418_v60 = vrot.slane %v6380_v44, 2  ;;  %v6377_v61 = vld [vmem:[#allocation3 + $0x40] sm:$0xfc] }
 0x510   : > { %9298 = vmatpush1.bf16.msra.mxu1 %v9297_v45 }
 0x511   : > { %9300 = vmatprep.subr.bf16.mxu1 %v9299_v49  ;;  %v6405_v49 = vrot.slane %v6370_v26, 2 }
 0x513   : > { %v6407_v5 = vsel %vm6401_vm14, %v6405_v49, %v6406_v3 }
 0x514   : > { %9302 = vmatpush1.bf16.msra.mxu1 %v9301_v57  ;;  %v9076_v57 = vld [vmem:[%s14537_s2 + $0x310] sm:$0xff] }
 0x515   : > { %9304 = vmatprep.subr.bf16.mxu1 %v9303_v9  ;;  %v9329_v15 = vpack.c.bf16 %v9076_v57, %v9074_v40 }
 0x518   : > { %9306 = vmatpush1.bf16.msra.mxu1 %v9305_v18  ;;  %v9331_v18 = vpack.c.bf16 %v9081_v11, %v9079_v10 }
 0x519   : > { %9308 = vmatprep.subr.bf16.mxu1 %v9307_v53  ;;  %v9078_v53 = vld [vmem:[%s14537_s2 + $0x320] sm:$0xff] }
 0x51a   : > { %v9333_v41 = vpack.c.bf16 %v9080_v2, %v9078_v53  ;;  %v6576_v53 = vld [vmem:[%s14540_s5] sm:$0x3] }
 0x51b   : > { %v15026_v2 = vld [vmem:[#allocation5_spill] sm:$0xff] }
 0x51c   : > { %9310 = vmatpush1.bf16.msra.mxu1 %v9309_v28  ;;  %v9335_v28 = vpack.c.bf16 %v9085_v42, %v9083_v20  ;;  %v6581_v20 = vrot.slane %v6576_v53, %v15026_v2  ;;  %v15027_v42 = vld [vmem:[#allocation6_spill] sm:$0xff] }
 0x51d   : > { %9312 = vmatprep.subr.bf16.mxu1 %v9311_v59  ;;  %v9082_v59 = vld [vmem:[%s14537_s2 + $0x340] sm:$0xff] }
 0x55c   : > { %v5990_v7 = vpop.permute.xlu0 %5989 }
 0x55d   : > { %6017 = vst.msk [vmem:[#allocation3 + $0x60] sm:$0xfe] %vm6001_vm8, %v5990_v7  ;;  %vm15031_vm8 = vmmov %vm15025_vm1 }
 0x55e   : > { %6018 = vst.msk [vmem:[#allocation3 + $0x68] sm:$0xfe] %vm6003_vm10, %v5990_v7  ;;  %v5992_v62 = vpop.permute.xlu1 %5991  ;;  %v9084_v7 = vld [vmem:[%s14537_s2 + $0x350] sm:$0xff]  ;;  %vm8343_vm10 = vcmask 1045508  }
 0x55f   : > { %6019 = vst.msk [vmem:[#allocation3 + $0x70] sm:$0x1] %vm6005_vm6, %v5992_v62  ;;  %vm7977_vm6 = vcmask 258049  }
 0x560   : > { %6020 = vst.msk [vmem:[#allocation3 + $0x78] sm:$0x1] %vm6007_vm7, %v5992_v62  ;;  %v9087_v62 = vld [vmem:[%s14537_s2 + $0x368] sm:$0xff] }
 0x564   : > { %v6081_v43 = vld [vmem:[#allocation3 + $0x60] sm:$0xfe] }
 0x565   : > { %v6082_v27 = vld [vmem:[#allocation3 + $0x68] sm:$0xfe]  ;;  %v6120_v35 = vrot.slane %v6081_v43, 1  ;;  %v6027_v9 = vld [vmem:[#allocation3 + $0x60] sm:$0xff]  ;;  %v9337_v43 = vpack.c.bf16 %v9084_v7, %v9082_v59 }
 0x566   : > { %v6083_v6 = vld [vmem:[#allocation3 + $0x70] sm:$0x1]  ;;  %v6123_v39 = vrot.slane %v6082_v27, 1  ;;  %v6028_v45 = vld [vmem:[#allocation3 + $0x68] sm:$0xff]  ;;  %v9089_v27 = vld [vmem:[%s14537_s2 + $0x378] sm:$0xff] }
 0x567   : > { %v6084_v13 = vld [vmem:[#allocation3 + $0x78] sm:$0x1]  ;;  %v6121_v52 = vrot.slane %v6083_v6, 1  ;;  %v9086_v6 = vld [vmem:[%s14537_s2 + $0x360] sm:$0xff]  ;;  %v6382_v3 = vld [vmem:[#allocation3 + $0x68] sm:$0xfc] }
 0x568   : > { %v6124_v8 = vrot.slane %v6084_v13, 1  ;;  %v9339_v13 = vpack.c.bf16 %v9089_v27, %v9087_v62  ;;  %v6384_v46 = vld [vmem:[#allocation3 + $0x78] sm:$0x3]  ;;  %v6383_v40 = vld [vmem:[#allocation3 + $0x70] sm:$0x3]  ;;  %v6423_v57 = vrot.slane %v6382_v3, 2 }
 0x569   : > { %v6122_v34 = vsel %vm6101_vm12, %v6120_v35, %v6121_v52  ;;  %v9093_v35 = vld [vmem:[%s14537_s2 + $0x398] sm:$0xff]  ;;  %v6421_v11 = vrot.slane %v6383_v40, 2 }
 0x56a   : > { %v6125_v48 = vsel %vm6101_vm12, %v6123_v39, %v6124_v8  ;;  %v9088_v39 = vld [vmem:[%s14537_s2 + $0x370] sm:$0xff]  ;;  %v9091_v8 = vld [vmem:[%s14537_s2 + $0x388] sm:$0xff]  ;;  %vm15035_vm12 = vcmask 1041408  }
 0x56b   : > { %9053 = vmatprep.mubr.msk.f32.mxu1 %vm5515_vm9, %v6125_v48  ;;  %v9341_v52 = vpack.c.bf16 %v9088_v39, %v9086_v6  ;;  %v9343_v48 = vpack.c.bf16 %v9093_v35, %v9091_v8 }
 0x56c   : > { %6262 = vmatmul.mubr.f32.gmra.mrb[6].mxu1 %v6122_v34  ;;  %v9090_v34 = vld [vmem:[%s14537_s2 + $0x380] sm:$0xff] }
 0x56d   : > { %9054 = vmatprep.mubr.msk.f32.mxu1 %vm5515_vm9, %v6022_v23  ;;  %v9345_v38 = vpack.c.bf16 %v9092_v58, %v9090_v34  ;;  %v9347_v23 = vpack.c.bf16 %v9097_v33, %v9095_v51 }
 0x570   : > { %6345 = vmatmul.mubr.f32.vlgmr.msra.gmra.mrb[0].mxu1 %v6021_v56 }
 0x571   : > { %9314 = vmatpush1.bf16.msra.mxu1 %v9313_v12  ;;  %9055 = vmatprep.mubr.msk.f32.mxu1 %vm5515_vm9, %v6024_v1  ;;  %v9094_v12 = vld [vmem:[%s14537_s2 + $0x3a0] sm:$0xff]  ;;  %v6402_v1 = vrot.slane %v6369_v24, 2 }
 0x572   : > { %9316 = vmatprep.subr.bf16.mxu1 %v9315_v21  ;;  %v9096_v21 = vld [vmem:[%s14537_s2 + $0x3b0] sm:$0xff] }
 0x573   : > { %v9349_v56 = vpack.c.bf16 %v9096_v21, %v9094_v12 }
 0x574   : > { %6351 = vmatmul.mubr.f32.gmra.mrb[2].mxu1 %v6023_v29  ;;  %v6375_v29 = vld [vmem:[#allocation3 + $0x30] sm:$0x3] }
 0x575   : > { %9318 = vmatpush1.bf16.msra.mxu1 %v9317_v0  ;;  %9056 = vmatprep.mubr.msk.f32.mxu1 %vm5515_vm9, %v6026_v47  ;;  %v6403_v0 = vrot.slane %v6371_v25, 2  ;;  %v6409_v26 = vrot.slane %v6375_v29, 2 }
 0x576   : > { %9320 = vmatprep.subr.bf16.mxu1 %v9319_v55  ;;  %v6411_v55 = vrot.slane %v6374_v54, 2 }
 0x577   : > { %v6404_v47 = vsel %vm6401_vm14, %v6402_v1, %v6403_v0 }
 0x578   : > { %6357 = vmatmul.mubr.f32.gmra.mrb[4].mxu1 %v6025_v16  ;;  %v6413_v37 = vsel %vm6401_vm14, %v6411_v55, %v6412_v32  ;;  %v6379_v16 = vld [vmem:[#allocation3 + $0x50] sm:$0x3] }
 0x579   : > { %9322 = vmatpush1.bf16.msra.mxu1 %v9321_v63  ;;  %9057 = vmatprep.mubr.msk.f32.mxu1 %vm5515_vm9, %v6028_v45  ;;  %v6408_v63 = vrot.slane %v6373_v50, 2  ;;  %v6414_v45 = vrot.slane %v6377_v61, 2  ;;  %v6415_v49 = vrot.slane %v6379_v16, 2 }
 0x57a   : > { %9324 = vmatprep.subr.bf16.mxu1 %v9323_v30  ;;  %v6417_v30 = vrot.slane %v6378_v22, 2 }
 0x57b   : > { %v6410_v4 = vsel %vm6401_vm14, %v6408_v63, %v6409_v26  ;;  %v6416_v10 = vsel %vm6401_vm14, %v6414_v45, %v6415_v49  ;;  %v15029_v49 = vld [vmem:[#allocation8_spill] sm:$0xff] }
 0x57c   : > { %6363 = vmatmul.mubr.f32.gmra.mrb[6].mxu1 %v6027_v9  ;;  %v6381_v9 = vld [vmem:[#allocation3 + $0x60] sm:$0xfc] }
 0x57d   : > { %9326 = vmatpush1.bf16.msra.mxu1 %v9325_v17  ;;  %9098 = vmatprep.mubr.msk.f32.mxu1 %vm5515_vm9, %v6407_v5  ;;  %v6419_v17 = vsel %vm6401_vm14, %v6417_v30, %v6418_v60 }
 0x57e   : > { %9328 = vmatprep.subr.bf16.mxu1 %v9327_v19  ;;  %v6424_v19 = vrot.slane %v6384_v46, 2 }
 0x580   : > { %v6425_v5 = vsel %vm6401_vm14, %v6423_v57, %v6424_v19 }
 0x581   : > { %9330 = vmatpush1.bf16.msra.mxu1 %v9329_v15  ;;  %v6420_v15 = vrot.slane %v6381_v9, 2 }
 0x582   : > { %9332 = vmatprep.subr.bf16.mxu1 %v9331_v18 }
 0x583   : > { %v6422_v18 = vsel %vm6401_vm14, %v6420_v15, %v6421_v11  ;;  %vm14412_vm14 = vmor %vm15035_vm12, %vm8343_vm10 }
 0x585   : > { %9334 = vmatpush1.bf16.msra.mxu1 %v9333_v41  ;;  %v6585_v41 = vrot.slane %v6576_v53, %v15027_v42 }
 0x586   : > { %9336 = vmatprep.subr.bf16.mxu1 %v9335_v28 }
 0x589   : > { %9338 = vmatpush1.bf16.msra.mxu1 %v9337_v43 }
 0x58a   : > { %9340 = vmatprep.subr.bf16.mxu1 %v9339_v13 }
 0x58d   : > { %9342 = vmatpush1.bf16.msra.mxu1 %v9341_v52 }
 0x58e   : > { %9344 = vmatprep.subr.bf16.mxu1 %v9343_v48 }
 0x591   : > { %9346 = vmatpush1.bf16.msra.mxu1 %v9345_v38 }
 0x592   : > { %9348 = vmatprep.subr.bf16.mxu1 %v9347_v23 }
 0x595   : > { %9350 = vmatpush1.bf16.msra.mxu1 %v9349_v56 }
 0x598   : > { %6544 = vmatmul.mubr.f32.vlgmr.msra.gmra.mrb[0].mxu1 %v6404_v47 }
 0x599   : > { %9099 = vmatprep.mubr.msk.f32.mxu1 %vm5515_vm9, %v6413_v37  ;;  %v15028_v37 = vld [vmem:[#allocation7_spill] sm:$0xff] }
 0x59c   : > { %6550 = vmatmul.mubr.f32.gmra.mrb[2].mxu1 %v6410_v4 }
 0x59d   : > { %9100 = vmatprep.mubr.msk.f32.mxu1 %vm5515_vm9, %v6419_v17 }
 0x5a0   : > { %6556 = vmatmul.mubr.f32.gmra.mrb[4].mxu1 %v6416_v10 }
 0x5a1   : > { %9101 = vmatprep.mubr.msk.f32.mxu1 %vm5515_vm9, %v6425_v5 }
 0x5a4   : > { %6562 = vmatmul.mubr.f32.gmra.mrb[6].mxu1 %v6422_v18 }
 0x66b   : > { %v6545_v28 = vpop.f32.mrb[0].mxu1 }
 0x66c   : > { %v6588_v59 = vadd.f32 %v6581_v20, %v6545_v28  ;;  %v6547_v7 = vpop.f32.mrb[1].mxu1 }
 0x66d   : > { %v6589_v62 = vadd.f32 %v6585_v41, %v6547_v7 }
 0x66e   : > { %v6596_v27 = vmax.f32 %v6588_v59, 0.0 }
 0x66f   : > { %v6597_v43 = vmax.f32 %v6589_v62, 0.0  ;;  %v6551_v13 = vpop.f32.mrb[2].mxu1 }
 0x670   : > { %v6590_v6 = vadd.f32 %v6581_v20, %v6551_v13  ;;  %6608 = vrot.lane.b32.xlu0 %v6596_v27, %s9608_s28  ;;  %v6553_v39 = vpop.f32.mrb[3].mxu1 }
 0x671   : > { %v6636_v8 = vcombine.low %v6596_v27, %v6597_v43  ;;  %v6637_v35 = vcombine.high %v6596_v27, %v6597_v43  ;;  %v6591_v52 = vadd.f32 %v6585_v41, %v6553_v39 }
 0x672   : > { %v13359_v48 = vmax.f32 %v6590_v6, 0.0 }
 0x673   : > { %v13361_v34 = vmax.f32 %v6591_v52, 0.0  ;;  %v6557_v58 = vpop.f32.mrb[4].mxu1  ;;  %v6644_v30 = vrot.slane %v6636_v8, %v15028_v37  ;;  %v6651_v45 = vrot.slane %v6637_v35, %v15028_v37 }
 0x674   : > { %v6592_v51 = vadd.f32 %v6581_v20, %v6557_v58  ;;  %6624 = vrot.lane.b32.xlu0 %v6597_v43, %s9608_s28  ;;  %6610 = vrot.lane.b32.xlu1 %v13359_v48, %s9608_s28  ;;  %v6559_v33 = vpop.f32.mrb[5].mxu1 }
 0x675   : > { %v6704_v38 = vcombine.low %v13359_v48, %v13361_v34  ;;  %v6705_v23 = vcombine.high %v13359_v48, %v13361_v34  ;;  %v6593_v12 = vadd.f32 %v6585_v41, %v6559_v33 }
 0x676   : > { %v13370_v21 = vmax.f32 %v6592_v51, 0.0 }
 0x677   : > { %v13372_v24 = vmax.f32 %v6593_v12, 0.0  ;;  %v6563_v25 = vpop.f32.mrb[6].mxu1  ;;  %v6712_v15 = vrot.slane %v6704_v38, %v15028_v37  ;;  %v6719_v13 = vrot.slane %v6705_v23, %v15028_v37 }
 0x678   : > { %v6594_v56 = vadd.f32 %v6581_v20, %v6563_v25  ;;  %6626 = vrot.lane.b32.xlu1 %v13361_v34, %s9608_s28  ;;  %6612 = vrot.lane.b32.xlu0 %v13370_v21, %s9608_s28  ;;  %v6565_v54 = vpop.f32.mrb[7].mxu1 }
 0x679   : > { %v6772_v31 = vcombine.low %v13370_v21, %v13372_v24  ;;  %v6773_v1 = vcombine.high %v13370_v21, %v13372_v24  ;;  %v6595_v0 = vadd.f32 %v6585_v41, %v6565_v54 }
 0x67a   : > { %v13382_v55 = vmax.f32 %v6594_v56, 0.0 }
 0x67b   : > { %v13384_v32 = vmax.f32 %v6595_v0, 0.0  ;;  %v6780_v51 = vrot.slane %v6772_v31, %v15028_v37 }
 0x67c   : > { %6628 = vrot.lane.b32.xlu0 %v13372_v24, %s9608_s28  ;;  %6614 = vrot.lane.b32.xlu1 %v13382_v55, %s9608_s28 }
 0x67d   : > { %v6840_v50 = vcombine.low %v13382_v55, %v13384_v32  ;;  %v6841_v29 = vcombine.high %v13382_v55, %v13384_v32 }
 0x680   : > { %6630 = vrot.lane.b32.xlu1 %v13384_v32, %s9608_s28 }
 0x6e2   : > { %v6609_v22 = vpop.permute.xlu0 %6608 }
 0x6e6   : > { %v6625_v44 = vpop.permute.xlu0 %6624  ;;  %v6611_v47 = vpop.permute.xlu1 %6610 }
 0x6e7   : > { %v6652_v63 = vcombine.low %v6609_v22, %v6625_v44  ;;  %v6653_v26 = vcombine.high %v6609_v22, %v6625_v44  ;;  %v6787_v44 = vrot.slane %v6773_v1, %v15028_v37 }
 0x6e9   : > { %v6660_v60 = vrot.slane %v6652_v63, %v15028_v37  ;;  %v6667_v61 = vrot.slane %v6653_v26, %v15028_v37 }
 0x6ea   : > { %v6627_v4 = vpop.permute.xlu1 %6626  ;;  %v6613_v18 = vpop.permute.xlu0 %6612 }
 0x6eb   : > { %v6668_v16 = vcombine.low %v6644_v30, %v6660_v60  ;;  %v6669_v46 = vcombine.high %v6644_v30, %v6660_v60  ;;  %v6684_v17 = vcombine.low %v6651_v45, %v6667_v61  ;;  %v6720_v19 = vcombine.low %v6611_v47, %v6627_v4 }
 0x6ec   : > { %v6685_v9 = vcombine.high %v6651_v45, %v6667_v61  ;;  %v6721_v53 = vcombine.high %v6611_v47, %v6627_v4  ;;  %v6848_v61 = vrot.slane %v6840_v50, %v15028_v37 }
 0x6ed   : > { %v13401_v3 = vrot.slane %v6668_v16, %v15029_v49  ;;  %v13410_v57 = vrot.slane %v6669_v46, %v15029_v49  ;;  %v6728_v10 = vrot.slane %v6720_v19, %v15028_v37  ;;  %v13422_v5 = vrot.slane %v6684_v17, %v15029_v49 }
 0x6ee   : > { %v13434_v28 = vrot.slane %v6685_v9, %v15029_v49  ;;  %v6735_v59 = vrot.slane %v6721_v53, %v15028_v37  ;;  %v6629_v43 = vpop.permute.xlu0 %6628  ;;  %v6615_v33 = vpop.permute.xlu1 %6614 }
 0x6ef   : > { %6940 = vrot.lane.b32.xlu0 %v13401_v3, %s9609_s29  ;;  %v13407_v40 = vcombine.high %v13401_v3, %v14664_v36  ;;  %v13419_v11 = vcombine.high %v13410_v57, %v14664_v36  ;;  %v6736_v20 = vcombine.low %v6712_v15, %v6728_v10  ;;  %v13431_v41 = vcombine.high %v13422_v5, %v14664_v36 }
 0x6f0   : > { %v6737_v7 = vcombine.high %v6712_v15, %v6728_v10  ;;  %v13443_v62 = vcombine.high %v13434_v28, %v14664_v36  ;;  %v6752_v6 = vcombine.low %v6719_v13, %v6735_v59  ;;  %v6788_v39 = vcombine.low %v6613_v18, %v6629_v43 }
 0x6f1   : > { %6942 = vrot.lane.b32.xlu1 %v13407_v40, %s9609_s29  ;;  %v13446_v27 = vrot.slane %v6736_v20, %v15029_v49  ;;  %v6753_v52 = vcombine.high %v6719_v13, %v6735_v59  ;;  %v6789_v38 = vcombine.high %v6613_v18, %v6629_v43  ;;  %v6855_v10 = vrot.slane %v6841_v29, %v15028_v37 }
 0x6f2   : > { %v13458_v35 = vrot.slane %v6737_v7, %v15029_v49  ;;  %v6796_v48 = vrot.slane %v6788_v39, %v15028_v37  ;;  %v13470_v58 = vrot.slane %v6752_v6, %v15029_v49  ;;  %v6631_v22 = vpop.permute.xlu1 %6630 }
 0x6f3   : > { %6944 = vrot.lane.b32.xlu0 %v13410_v57, %s9609_s29  ;;  %v13455_v8 = vcombine.high %v13446_v27, %v14664_v36  ;;  %v13482_v25 = vrot.slane %v6753_v52, %v15029_v49  ;;  %v6803_v56 = vrot.slane %v6789_v38, %v15028_v37  ;;  %v6856_v63 = vcombine.low %v6615_v33, %v6631_v22 }
 0x6f4   : > { %v13467_v34 = vcombine.high %v13458_v35, %v14664_v36  ;;  %v6804_v23 = vcombine.low %v6780_v51, %v6796_v48  ;;  %v13479_v12 = vcombine.high %v13470_v58, %v14664_v36  ;;  %v6805_v54 = vcombine.high %v6780_v51, %v6796_v48 }
 0x6f5   : > { %6946 = vrot.lane.b32.xlu1 %v13419_v11, %s9609_s29  ;;  %v13491_v31 = vcombine.high %v13482_v25, %v14664_v36  ;;  %v6820_v47 = vcombine.low %v6787_v44, %v6803_v56  ;;  %v6821_v21 = vcombine.high %v6787_v44, %v6803_v56  ;;  %v6864_v24 = vrot.slane %v6856_v63, %v15028_v37 }
 0x6f6   : > { %v13494_v0 = vrot.slane %v6804_v23, %v15029_v49  ;;  %v13509_v30 = vrot.slane %v6805_v54, %v15029_v49  ;;  %v6857_v16 = vcombine.high %v6615_v33, %v6631_v22 }
 0x6f7   : > { %6948 = vrot.lane.b32.xlu0 %v13422_v5, %s9609_s29  ;;  %v13521_v60 = vrot.slane %v6820_v47, %v15029_v49  ;;  %v6872_v46 = vcombine.low %v6848_v61, %v6864_v24  ;;  %v13536_v45 = vrot.slane %v6821_v21, %v15029_v49  ;;  %v6873_v17 = vcombine.high %v6848_v61, %v6864_v24 }
 0x6f8   : > { %v13506_v26 = vcombine.high %v13494_v0, %v14664_v36  ;;  %v13518_v1 = vcombine.high %v13509_v30, %v14664_v36  ;;  %v6871_v50 = vrot.slane %v6857_v16, %v15028_v37 }
 0x6f9   : > { %6950 = vrot.lane.b32.xlu1 %v13431_v41, %s9609_s29  ;;  %v13533_v4 = vcombine.high %v13521_v60, %v14664_v36  ;;  %v13545_v19 = vcombine.high %v13536_v45, %v14664_v36  ;;  %v13548_v9 = vrot.slane %v6872_v46, %v15029_v49  ;;  %v13563_v53 = vrot.slane %v6873_v17, %v15029_v49 }
 0x6fa   : > { %v6888_v15 = vcombine.low %v6855_v10, %v6871_v50  ;;  %v6889_v20 = vcombine.high %v6855_v10, %v6871_v50 }
 0x6fb   : > { %6952 = vrot.lane.b32.xlu0 %v13434_v28, %s9609_s29  ;;  %v13560_v18 = vcombine.high %v13548_v9, %v14664_v36  ;;  %v13571_v55 = vcombine.high %v13563_v53, %v14664_v36 }
 0x6fc   : > { %v13574_v32 = vrot.slane %v6888_v15, %v15029_v49  ;;  %v13585_v59 = vrot.slane %v6889_v20, %v15029_v49 }
 0x6fd   : > { %6954 = vrot.lane.b32.xlu1 %v13443_v62, %s9609_s29 }
 0x6fe   : > { %v13582_v29 = vcombine.high %v13574_v32, %v14664_v36  ;;  %v13593_v7 = vcombine.high %v13585_v59, %v14664_v36 }
 0x6ff   : > { %6956 = vrot.lane.b32.xlu0 %v13446_v27, %s9609_s29 }
 0x701   : > { %6958 = vrot.lane.b32.xlu1 %v13455_v8, %s9609_s29 }
 0x703   : > { %6960 = vrot.lane.b32.xlu0 %v13458_v35, %s9609_s29 }
 0x705   : > { %6962 = vrot.lane.b32.xlu1 %v13467_v34, %s9609_s29 }
 0x707   : > { %6964 = vrot.lane.b32.xlu0 %v13470_v58, %s9609_s29 }
 0x709   : > { %6966 = vrot.lane.b32.xlu1 %v13479_v12, %s9609_s29 }
 0x70b   : > { %6968 = vrot.lane.b32.xlu0 %v13482_v25, %s9609_s29 }
 0x70d   : > { %6970 = vrot.lane.b32.xlu1 %v13491_v31, %s9609_s29 }
 0x70f   : > { %6972 = vrot.lane.b32.xlu0 %v13494_v0, %s9609_s29 }
 0x711   : > { %6974 = vrot.lane.b32.xlu1 %v13506_v26, %s9609_s29 }
 0x713   : > { %6976 = vrot.lane.b32.xlu0 %v13509_v30, %s9609_s29 }
 0x715   : > { %6978 = vrot.lane.b32.xlu1 %v13518_v1, %s9609_s29 }
 0x717   : > { %6980 = vrot.lane.b32.xlu0 %v13521_v60, %s9609_s29 }
 0x719   : > { %6982 = vrot.lane.b32.xlu1 %v13533_v4, %s9609_s29 }
 0x71b   : > { %6984 = vrot.lane.b32.xlu0 %v13536_v45, %s9609_s29 }
 0x71d   : > { %6986 = vrot.lane.b32.xlu1 %v13545_v19, %s9609_s29 }
 0x71f   : > { %6988 = vrot.lane.b32.xlu0 %v13548_v9, %s9609_s29 }
 0x721   : > { %6990 = vrot.lane.b32.xlu1 %v13560_v18, %s9609_s29 }
 0x723   : > { %6992 = vrot.lane.b32.xlu0 %v13563_v53, %s9609_s29 }
 0x725   : > { %6994 = vrot.lane.b32.xlu1 %v13571_v55, %s9609_s29 }
 0x727   : > { %6996 = vrot.lane.b32.xlu0 %v13574_v32, %s9609_s29 }
 0x729   : > { %6998 = vrot.lane.b32.xlu1 %v13582_v29, %s9609_s29 }
 0x72b   : > { %7000 = vrot.lane.b32.xlu0 %v13585_v59, %s9609_s29 }
 0x72d   : > { %7002 = vrot.lane.b32.xlu1 %v13593_v7, %s9609_s29 }
 0x761   : > { %v6941_v43 = vpop.permute.xlu0 %6940 }
 0x762   : > { %v7036_v13 = vmax.f32 %v13401_v3, %v6941_v43 }
 0x763   : > { %v6943_v6 = vpop.permute.xlu1 %6942 }
 0x764   : > { %v7044_v39 = vmax.f32 %v13407_v40, %v6943_v6  ;;  %v7043_v48 = vrot.slane %v7036_v13, %v15028_v37 }
 0x765   : > { %v6945_v52 = vpop.permute.xlu0 %6944 }
 0x766   : > { %v7051_v51 = vrot.slane %v7044_v39, %v15028_v37  ;;  %v7070_v33 = vmax.f32 %v13410_v57, %v6945_v52 }
 0x767   : > { %v6947_v38 = vpop.permute.xlu1 %6946 }
 0x768   : > { %v7053_v23 = vcombine.high %v7043_v48, %v7051_v51  ;;  %v7078_v56 = vmax.f32 %v13419_v11, %v6947_v38  ;;  %v7077_v22 = vrot.slane %v7070_v33, %v15028_v37  ;;  %v7052_v15 = vcombine.low %v7043_v48, %v7051_v51 }
 0x769   : > { %v6949_v54 = vpop.permute.xlu0 %6948 }
 0x76a   : > { %v7085_v44 = vrot.slane %v7078_v56, %v15028_v37  ;;  %v7104_v3 = vmax.f32 %v13422_v5, %v6949_v54  ;;  %v13607_v40 = vrot.slane %v7053_v23, %v15029_v49  ;;  %v13631_v33 = vrot.slane %v7052_v15, %v15029_v49 }
 0x76b   : > { %v6951_v47 = vpop.permute.xlu1 %6950 }
 0x76c   : > { %v7086_v63 = vcombine.low %v7077_v22, %v7085_v44  ;;  %v7087_v21 = vcombine.high %v7077_v22, %v7085_v44  ;;  %v7112_v24 = vmax.f32 %v13431_v41, %v6951_v47  ;;  %7660 = vrot.lane.b32.xlu0 %v13607_v40, %s9608_s28  ;;  %v7111_v11 = vrot.slane %v7104_v3, %v15028_v37 }
 0x76d   : > { %v6953_v57 = vpop.permute.xlu0 %6952 }
 0x76e   : > { %v7119_v61 = vrot.slane %v7112_v24, %v15028_v37  ;;  %v7138_v16 = vmax.f32 %v13434_v28, %v6953_v57  ;;  %v7101_v5 = vrot.slane %v7087_v21, %v15029_v49  ;;  %v13617_v46 = vrot.slane %v7086_v63, %v15029_v49 }
 0x76f   : > { %v6955_v50 = vpop.permute.xlu1 %6954  ;;  %v7068_v63 = vcombine.high %v13631_v33, %v14664_v36 }
 0x770   : > { %v7121_v17 = vcombine.high %v7111_v11, %v7119_v61  ;;  %v7146_v10 = vmax.f32 %v13443_v62, %v6955_v50  ;;  %7662 = vrot.lane.b32.xlu1 %v7101_v5, %s9608_s28  ;;  %v7145_v20 = vrot.slane %v7138_v16, %v15028_v37  ;;  %v7102_v6 = vcombine.high %v13617_v46, %v14664_v36 }
 0x771   : > { %v13621_v41 = vpop.permute.xlu0 %6956  ;;  %v7120_v52 = vcombine.low %v7111_v11, %v7119_v61  ;;  %v7103_v23 = vcombine.high %v7101_v5, %v14664_v36 }
 0x772   : > { %v7153_v43 = vrot.slane %v7146_v10, %v15028_v37  ;;  %v7135_v28 = vrot.slane %v7121_v17, %v15029_v49 }
 0x773   : > { %v6959_v13 = vpop.permute.xlu1 %6958  ;;  %v13639_v54 = vrot.slane %v7120_v52, %v15029_v49 }
 0x774   : > { %v7155_v39 = vcombine.high %v7145_v20, %v7153_v43  ;;  %7664 = vrot.lane.b32.xlu0 %v7135_v28, %s9608_s28  ;;  %7598 = vrot.lane.b32.xlu1 %v7102_v6, %s9610_s30  ;;  %v7154_v22 = vcombine.low %v7145_v20, %v7153_v43 }
 0x775   : > { %v6961_v62 = vpop.permute.xlu0 %6960  ;;  %v7136_v61 = vcombine.high %v13639_v54, %v14664_v36 }
 0x776   : > { %v7206_v48 = vmax.f32 %v13458_v35, %v6961_v62  ;;  %v7169_v51 = vrot.slane %v7155_v39, %v15029_v49  ;;  %v13650_v57 = vrot.slane %v7154_v22, %v15029_v49 }
 0x777   : > { %v6963_v38 = vpop.permute.xlu1 %6962 }
 0x778   : > { %v7214_v56 = vmax.f32 %v13467_v34, %v6963_v38  ;;  %7666 = vrot.lane.b32.xlu0 %v7169_v51, %s9608_s28  ;;  %7726 = vrot.lane.b32.xlu1 %v7103_v23, %s9609_s29  ;;  %v7213_v3 = vrot.slane %v7206_v48, %v15028_v37  ;;  %v7170_v39 = vcombine.high %v13650_v57, %v14664_v36 }
 0x779   : > { %v6965_v44 = vpop.permute.xlu0 %6964  ;;  %v7069_v23 = vcombine.high %v13607_v40, %v14664_v36 }
 0x77a   : > { %v7221_v35 = vrot.slane %v7214_v56, %v15028_v37  ;;  %v7240_v47 = vmax.f32 %v13470_v58, %v6965_v44 }
 0x77b   : > { %v6967_v21 = vpop.permute.xlu1 %6966 }
 0x77c   : > { %v7223_v34 = vcombine.high %v7213_v3, %v7221_v35  ;;  %v7248_v24 = vmax.f32 %v13479_v12, %v6967_v21  ;;  %7596 = vrot.lane.b32.xlu0 %v7068_v63, %s9610_s30  ;;  %v7247_v58 = vrot.slane %v7240_v47, %v15028_v37  ;;  %v7222_v52 = vcombine.low %v7213_v3, %v7221_v35 }
 0x77d   : > { %v6969_v11 = vpop.permute.xlu0 %6968  ;;  %v7172_v3 = vmax.f32 %v13446_v27, %v13621_v41 }
 0x77e   : > { %v7237_v16 = vrot.slane %v7223_v34, %v15029_v49  ;;  %v7255_v5 = vrot.slane %v7248_v24, %v15028_v37  ;;  %v7274_v50 = vmax.f32 %v13482_v25, %v6969_v11  ;;  %v13675_v56 = vrot.slane %v7222_v52, %v15029_v49 }
 0x77f   : > { %v6971_v17 = vpop.permute.xlu1 %6970  ;;  %v7179_v21 = vrot.slane %v7172_v3, %v15028_v37  ;;  %v7171_v24 = vcombine.high %v7169_v51, %v14664_v36 }
 0x780   : > { %v7257_v10 = vcombine.high %v7247_v58, %v7255_v5  ;;  %v7282_v12 = vmax.f32 %v13491_v31, %v6971_v17  ;;  %7600 = vrot.lane.b32.xlu0 %v7136_v61, %s9610_s30  ;;  %7670 = vrot.lane.b32.xlu1 %v7237_v16, %s9608_s28  ;;  %v7281_v43 = vrot.slane %v7274_v50, %v15028_v37 }
 0x781   : > { %v6973_v15 = vpop.permute.xlu0 %6972  ;;  %v7180_v31 = vmax.f32 %v13455_v8, %v6959_v13  ;;  %v7256_v22 = vcombine.low %v7247_v58, %v7255_v5  ;;  %v7137_v13 = vcombine.high %v7135_v28, %v14664_v36  ;;  %v7238_v63 = vcombine.high %v13675_v56, %v14664_v36 }
 0x782   : > { %v7271_v20 = vrot.slane %v7257_v10, %v15029_v49  ;;  %v7289_v6 = vrot.slane %v7282_v12, %v15028_v37  ;;  %v7308_v10 = vmax.f32 %v13494_v0, %v6973_v15  ;;  %v7239_v52 = vcombine.high %v7237_v16, %v14664_v36 }
 0x783   : > { %v6975_v25 = vpop.permute.xlu1 %6974  ;;  %v7187_v8 = vrot.slane %v7180_v31, %v15028_v37  ;;  %v13685_v35 = vrot.slane %v7256_v22, %v15029_v49 }
 0x784   : > { %v7291_v62 = vcombine.high %v7281_v43, %v7289_v6  ;;  %7602 = vrot.lane.b32.xlu0 %v7170_v39, %s9610_s30  ;;  %7672 = vrot.lane.b32.xlu1 %v7271_v20, %s9608_s28  ;;  %v7290_v40 = vcombine.low %v7281_v43, %v7289_v6  ;;  %v7316_v5 = vmax.f32 %v13506_v26, %v6975_v25 }
 0x785   : > { %v6977_v38 = vpop.permute.xlu0 %6976  ;;  %v7188_v41 = vcombine.low %v7179_v21, %v7187_v8  ;;  %v7189_v34 = vcombine.high %v7179_v21, %v7187_v8  ;;  %v7272_v11 = vcombine.high %v13685_v35, %v14664_v36  ;;  %v7315_v25 = vrot.slane %v7308_v10, %v15028_v37 }
 0x786   : > { %v13670_v48 = vrot.slane %v7291_v62, %v15029_v49  ;;  %v13694_v28 = vrot.slane %v7290_v40, %v15029_v49  ;;  %v7323_v12 = vrot.slane %v7316_v5, %v15028_v37  ;;  %v7342_v62 = vmax.f32 %v13509_v30, %v6977_v38 }
 0x787   : > { %v6979_v44 = vpop.permute.xlu1 %6978  ;;  %v13701_v58 = vrot.slane %v7188_v41, %v15029_v49  ;;  %v7203_v17 = vrot.slane %v7189_v34, %v15029_v49  ;;  %v7273_v22 = vcombine.high %v7271_v20, %v14664_v36 }
 0x788   : > { %7724 = vrot.lane.b32.xlu0 %v7069_v23, %s9609_s29  ;;  %7674 = vrot.lane.b32.xlu1 %v13670_v48, %s9608_s28  ;;  %v7306_v51 = vcombine.high %v13694_v28, %v14664_v36  ;;  %v7350_v39 = vmax.f32 %v13518_v1, %v6979_v44  ;;  %v7349_v30 = vrot.slane %v7342_v62, %v15028_v37 }
 0x789   : > { %v6981_v27 = vpop.permute.xlu0 %6980  ;;  %v7204_v26 = vcombine.high %v13701_v58, %v14664_v36  ;;  %v7205_v1 = vcombine.high %v7203_v17, %v14664_v36  ;;  %v7307_v20 = vcombine.high %v13670_v48, %v14664_v36 }
 0x78a   : > { %v7376_v0 = vmax.f32 %v13521_v60, %v6981_v27  ;;  %v7357_v16 = vrot.slane %v7350_v39, %v15028_v37 }
 0x78b   : > { %v6983_v47 = vpop.permute.xlu1 %6982 }
 0x78c   : > { %7728 = vrot.lane.b32.xlu0 %v7137_v13, %s9609_s29  ;;  %7606 = vrot.lane.b32.xlu1 %v7238_v63, %s9610_s30  ;;  %v7384_v43 = vmax.f32 %v13533_v4, %v6983_v47  ;;  %v7325_v4 = vcombine.high %v7315_v25, %v7323_v12  ;;  %v7383_v60 = vrot.slane %v7376_v0, %v15028_v37 }
 0x78d   : > { %v6985_v50 = vpop.permute.xlu0 %6984  ;;  %v7358_v40 = vcombine.low %v7349_v30, %v7357_v16  ;;  %v7359_v47 = vcombine.high %v7349_v30, %v7357_v16  ;;  %v7324_v63 = vcombine.low %v7315_v25, %v7323_v12 }
 0x78e   : > { %v7391_v31 = vrot.slane %v7384_v43, %v15028_v37  ;;  %v7410_v44 = vmax.f32 %v13536_v45, %v6985_v50  ;;  %v7339_v38 = vrot.slane %v7325_v4, %v15029_v49 }
 0x78f   : > { %v6987_v61 = vpop.permute.xlu1 %6986  ;;  %v13744_v34 = vrot.slane %v7358_v40, %v15029_v49  ;;  %v13752_v5 = vrot.slane %v7324_v63, %v15029_v49 }
 0x790   : > { %7730 = vrot.lane.b32.xlu0 %v7171_v24, %s9609_s29  ;;  %7608 = vrot.lane.b32.xlu1 %v7272_v11, %s9610_s30  ;;  %v7418_v23 = vmax.f32 %v13545_v19, %v6987_v61  ;;  %v7393_v19 = vcombine.high %v7383_v60, %v7391_v31  ;;  %v7417_v45 = vrot.slane %v7410_v44, %v15028_v37 }
 0x791   : > { %v13720_v15 = vpop.permute.xlu0 %6988  ;;  %v7373_v24 = vrot.slane %v7359_v47, %v15029_v49  ;;  %v7392_v50 = vcombine.low %v7383_v60, %v7391_v31  ;;  %v7341_v40 = vcombine.high %v7339_v38, %v14664_v36 }
 0x792   : > { %v7425_v8 = vrot.slane %v7418_v23, %v15028_v37  ;;  %v7407_v21 = vrot.slane %v7393_v19, %v15029_v49 }
 0x793   : > { %v13712_v6 = vpop.permute.xlu1 %6990  ;;  %v7375_v4 = vcombine.high %v7373_v24, %v14664_v36 }
 0x794   : > { %7668 = vrot.lane.b32.xlu0 %v7203_v17, %s9608_s28  ;;  %7610 = vrot.lane.b32.xlu1 %v7306_v51, %s9610_s30  ;;  %v7427_v27 = vcombine.high %v7417_v45, %v7425_v8  ;;  %v7426_v39 = vcombine.low %v7417_v45, %v7425_v8  ;;  %v7444_v8 = vmax.f32 %v13548_v9, %v13720_v15 }
 0x795   : > { %v6993_v13 = vpop.permute.xlu0 %6992  ;;  %v7409_v45 = vcombine.high %v7407_v21, %v14664_v36 }
 0x796   : > { %v7478_v48 = vmax.f32 %v13563_v53, %v6993_v13  ;;  %v13755_v17 = vrot.slane %v7427_v27, %v15029_v49  ;;  %v13779_v23 = vrot.slane %v7426_v39, %v15029_v49  ;;  %v8007_v39 = vld [vmem:[%s14538_s3 + $0x10] sm:$0xff] }
 0x797   : > { %v6995_v3 = vpop.permute.xlu1 %6994 }
 0x798   : > { %7604 = vrot.lane.b32.xlu0 %v7204_v26, %s9610_s30  ;;  %7734 = vrot.lane.b32.xlu1 %v7239_v52, %s9609_s29  ;;  %v7486_v11 = vmax.f32 %v13571_v55, %v6995_v3  ;;  %v7374_v55 = vcombine.high %v13744_v34, %v14664_v36  ;;  %v7485_v53 = vrot.slane %v7478_v48, %v15028_v37 }
 0x799   : > { %v6997_v61 = vpop.permute.xlu0 %6996  ;;  %v13767_v26 = vrot.slane %v7392_v50, %v15029_v49  ;;  %v7442_v44 = vcombine.high %v13779_v23, %v14664_v36 }
 0x79a   : > { %v7493_v51 = vrot.slane %v7486_v11, %v15028_v37  ;;  %v7512_v43 = vmax.f32 %v13574_v32, %v6997_v61 }
 0x79b   : > { %v6999_v41 = vpop.permute.xlu1 %6998 }
 0x79c   : > { %7732 = vrot.lane.b32.xlu0 %v7205_v1, %s9609_s29  ;;  %7736 = vrot.lane.b32.xlu1 %v7273_v22, %s9609_s29  ;;  %v7520_v10 = vmax.f32 %v13582_v29, %v6999_v41  ;;  %v7340_v29 = vcombine.high %v13752_v5, %v14664_v36  ;;  %v7495_v25 = vcombine.high %v7485_v53, %v7493_v51 }
 0x79d   : > { %v7001_v52 = vpop.permute.xlu0 %7000  ;;  %v7519_v32 = vrot.slane %v7512_v43, %v15028_v37  ;;  %v7408_v1 = vcombine.high %v13767_v26, %v14664_v36  ;;  %v7494_v3 = vcombine.low %v7485_v53, %v7493_v51  ;;  %v8008_v53 = vld [vmem:[%s14538_s3 + $0x18] sm:$0xff]  ;;  %v8005_v43 = vld [vmem:[%s14538_s3] sm:$0xff] }
 0x79e   : > { %v7527_v0 = vrot.slane %v7520_v10, %v15028_v37  ;;  %v7546_v31 = vmax.f32 %v13585_v59, %v7001_v52  ;;  %v7509_v16 = vrot.slane %v7495_v25, %v15029_v49  ;;  %v7452_v59 = vmax.f32 %v13560_v18, %v13712_v6  ;;  %v8010_v52 = vld [vmem:[%s14538_s3 + $0x28] sm:$0xff] }
 0x79f   : > { %v7003_v12 = vpop.permute.xlu1 %7002  ;;  %v13800_v18 = vrot.slane %v7494_v3, %v15029_v49  ;;  %v7443_v10 = vcombine.high %v13755_v17, %v14664_v36  ;;  %v9401_v14 = vpack.c.bf16 %v8007_v39, %v8005_v43  ;;  %v9111_v3 = vld [vmem:[%s14538_s3 + $0x1a8] sm:$0xff] }
 0x7a0   : > { %7676 = vrot.lane.b32.xlu0 %v7339_v38, %s9608_s28  ;;  %7738 = vrot.lane.b32.xlu1 %v7307_v20, %s9609_s29  ;;  %v7554_v62 = vmax.f32 %v13593_v7, %v7003_v12  ;;  %v7529_v22 = vcombine.high %v7519_v32, %v7527_v0  ;;  %v7553_v60 = vrot.slane %v7546_v31, %v15028_v37  ;;  %v8006_v12 = vld [vmem:[%s14538_s3 + $0x8] sm:$0xff] }
 0x7a1   : > { %v7459_v13 = vrot.slane %v7452_v59, %v15028_v37  ;;  %v7528_v6 = vcombine.low %v7519_v32, %v7527_v0  ;;  %v7451_v20 = vrot.slane %v7444_v8, %v15028_v37  ;;  %v7510_v27 = vcombine.high %v13800_v18, %v14664_v36  ;;  %v9107_v0 = vld [vmem:[%s14538_s3 + $0x188] sm:$0xff]  ;;  %v8013_v8 = vld [vmem:[%s14538_s3 + $0x40] sm:$0xff] }
 0x7a2   : > { %v7561_v7 = vrot.slane %v7554_v62, %v15028_v37  ;;  %v7543_v30 = vrot.slane %v7529_v22, %v15029_v49  ;;  %v7511_v51 = vcombine.high %v7509_v16, %v14664_v36  ;;  %v9109_v62 = vld [vmem:[%s14538_s3 + $0x198] sm:$0xff]  ;;  %v9108_v22 = vld [vmem:[%s14538_s3 + $0x190] sm:$0xff]  ;;  %v8014_v59 = vld [vmem:[%s14538_s3 + $0x48] sm:$0xff] }
 0x7a3   : > { %v7460_v9 = vcombine.low %v7451_v20, %v7459_v13  ;;  %v7461_v15 = vcombine.high %v7451_v20, %v7459_v13  ;;  %v13808_v63 = vrot.slane %v7528_v6, %v15029_v49  ;;  %v9351_v31 = vpack.c.bf16 %v9109_v62, %v9107_v0  ;;  %v8015_v13 = vld [vmem:[%s14538_s3 + $0x50] sm:$0xff]  ;;  %v9110_v6 = vld [vmem:[%s14538_s3 + $0x1a0] sm:$0xff]  ;;  %v8018_v20 = vld [vmem:[%s14538_s3 + $0x68] sm:$0xff] }
 0x7a4   : > { %7680 = vrot.lane.b32.xlu0 %v7407_v21, %s9608_s28  ;;  %7678 = vrot.lane.b32.xlu1 %v7373_v24, %s9608_s28  ;;  %v7563_v19 = vcombine.high %v7553_v60, %v7561_v7  ;;  %v7562_v38 = vcombine.low %v7553_v60, %v7561_v7  ;;  %v8023_v0 = vld [vmem:[%s14538_s3 + $0x90] sm:$0xff]  ;;  %v8026_v62 = vld [vmem:[%s14538_s3 + $0xa8] sm:$0xff] }
 0x7a5   : > { %v13815_v41 = vrot.slane %v7460_v9, %v15029_v49  ;;  %v7475_v24 = vrot.slane %v7461_v15, %v15029_v49  ;;  %v7544_v21 = vcombine.high %v13808_v63, %v14664_v36  ;;  %9352 = vmatprep.subr.bf16.mxu1 %v9351_v31  ;;  %v8020_v15 = vld [vmem:[%s14538_s3 + $0x78] sm:$0xff] }
 0x7a6   : > { %v7577_v47 = vrot.slane %v7563_v19, %v15029_v49  ;;  %v13819_v11 = vrot.slane %v7562_v38, %v15029_v49  ;;  %v9113_v19 = vld [vmem:[%s14538_s3 + $0x1b8] sm:$0xff] }
 0x7a7   : > { %v7476_v61 = vcombine.high %v13815_v41, %v14664_v36  ;;  %v7477_v50 = vcombine.high %v7475_v24, %v14664_v36  ;;  %v9117_v38 = vld [vmem:[%s14538_s3 + $0x1d8] sm:$0xff] }
 0x7a8   : > { %7682 = vrot.lane.b32.xlu0 %v13755_v17, %s9608_s28  ;;  %7614 = vrot.lane.b32.xlu1 %v7374_v55, %s9610_s30  ;;  %v7578_v48 = vcombine.high %v13819_v11, %v14664_v36  ;;  %v7545_v55 = vcombine.high %v7543_v30, %v14664_v36  ;;  %v9399_v17 = vpack.c.bf16 %v8008_v53, %v8006_v12  ;;  %v9119_v12 = vld [vmem:[%s14538_s3 + $0x1e8] sm:$0xff]  ;;  %v9121_v53 = vld [vmem:[%s14538_s3 + $0x1f8] sm:$0xff] }
 0x7a9   : > { %v7579_v32 = vcombine.high %v7577_v47, %v14664_v36  ;;  %v9363_v39 = vpack.c.bf16 %v9121_v53, %v9119_v12  ;;  %v8027_v12 = vld [vmem:[%s14538_s3 + $0xb0] sm:$0xff]  ;;  %v9122_v53 = vld [vmem:[%s14538_s3 + $0x200] sm:$0xff] }
 0x7aa   : > { %9400 = vmatprep.subr.bf16.mxu0 %v9399_v17 }
 0x7ab   : > { %9402 = vmatpush1.bf16.msra.mxu0 %v9401_v14 }
 0x7ac   : > { %7612 = vrot.lane.b32.xlu0 %v7340_v29, %s9610_s30  ;;  %7742 = vrot.lane.b32.xlu1 %v7375_v4, %s9609_s29  ;;  %v8012_v29 = vld [vmem:[%s14538_s3 + $0x38] sm:$0xff]  ;;  %v8009_v4 = vld [vmem:[%s14538_s3 + $0x20] sm:$0xff] }
 0x7ad   : > { %v9403_v25 = vpack.c.bf16 %v8012_v29, %v8010_v52  ;;  %v9118_v52 = vld [vmem:[%s14538_s3 + $0x1e0] sm:$0xff]  ;;  %v9120_v29 = vld [vmem:[%s14538_s3 + $0x1f0] sm:$0xff] }
 0x7af   : > { %9404 = vmatprep.subr.bf16.mxu0 %v9403_v25  ;;  %v8021_v25 = vld [vmem:[%s14538_s3 + $0x80] sm:$0xff] }
 0x7b0   : > { %7616 = vrot.lane.b32.xlu0 %v7408_v1, %s9610_s30  ;;  %7686 = vrot.lane.b32.xlu1 %v7509_v16, %s9608_s28  ;;  %v8011_v1 = vld [vmem:[%s14538_s3 + $0x30] sm:$0xff]  ;;  %v9106_v16 = vld [vmem:[%s14538_s3 + $0x180] sm:$0xff]  ;;  %v9417_v31 = vpack.c.bf16 %v8023_v0, %v8021_v25 }
 0x7b1   : > { %v9405_v7 = vpack.c.bf16 %v8011_v1, %v8009_v4  ;;  %v9353_v60 = vpack.c.bf16 %v9108_v22, %v9106_v16  ;;  %v8028_v4 = vld [vmem:[%s14538_s3 + $0xb8] sm:$0xff] }
 0x7b2   : > { %v9419_v1 = vpack.c.bf16 %v8028_v4, %v8026_v62  ;;  %v9129_v4 = vld [vmem:[%s14538_s3 + $0x238] sm:$0xff] }
 0x7b3   : > { %9354 = vmatpush1.bf16.msra.mxu1 %v9353_v60  ;;  %9406 = vmatpush1.bf16.msra.mxu0 %v9405_v7 }
 0x7b4   : > { %7618 = vrot.lane.b32.xlu0 %v7442_v44, %s9610_s30  ;;  %7688 = vrot.lane.b32.xlu1 %v7543_v30, %s9608_s28  ;;  %v8016_v44 = vld [vmem:[%s14538_s3 + $0x58] sm:$0xff] }
 0x7b5   : > { %v9407_v30 = vpack.c.bf16 %v8016_v44, %v8014_v59 }
 0x7b7   : > { %9408 = vmatprep.subr.bf16.mxu0 %v9407_v30 }
 0x7b8   : > { %7740 = vrot.lane.b32.xlu0 %v7341_v40, %s9609_s29  ;;  %7690 = vrot.lane.b32.xlu1 %v7577_v47, %s9608_s28  ;;  %v9355_v40 = vpack.c.bf16 %v9113_v19, %v9111_v3  ;;  %v9112_v47 = vld [vmem:[%s14538_s3 + $0x1b0] sm:$0xff] }
 0x7b9   : > { %v9357_v9 = vpack.c.bf16 %v9112_v47, %v9110_v6 }
 0x7ba   : > { %9356 = vmatprep.subr.bf16.mxu1 %v9355_v40 }
 0x7bb   : > { %9358 = vmatpush1.bf16.msra.mxu1 %v9357_v9 }
 0x7bc   : > { %7744 = vrot.lane.b32.xlu0 %v7409_v45, %s9609_s29  ;;  %7622 = vrot.lane.b32.xlu1 %v7510_v27, %s9610_s30  ;;  %v9115_v45 = vld [vmem:[%s14538_s3 + $0x1c8] sm:$0xff]  ;;  %v9409_v27 = vpack.c.bf16 %v8015_v13, %v8013_v8 }
 0x7be   : > { %9410 = vmatpush1.bf16.msra.mxu0 %v9409_v27 }
 0x7c0   : > { %7684 = vrot.lane.b32.xlu0 %v7475_v24, %s9608_s28  ;;  %7624 = vrot.lane.b32.xlu1 %v7544_v21, %s9610_s30  ;;  %v9359_v24 = vpack.c.bf16 %v9117_v38, %v9115_v45  ;;  %v8017_v21 = vld [vmem:[%s14538_s3 + $0x60] sm:$0xff] }
 0x7c2   : > { %9360 = vmatprep.subr.bf16.mxu1 %v9359_v24 }
 0x7c4   : > { %7620 = vrot.lane.b32.xlu0 %v7476_v61, %s9610_s30  ;;  %7626 = vrot.lane.b32.xlu1 %v7578_v48, %s9610_s30  ;;  %v9114_v61 = vld [vmem:[%s14538_s3 + $0x1c0] sm:$0xff]  ;;  %v9411_v48 = vpack.c.bf16 %v8020_v15, %v8018_v20 }
 0x7c6   : > { %9412 = vmatprep.subr.bf16.mxu0 %v9411_v48  ;;  %v9125_v48 = vld [vmem:[%s14538_s3 + $0x218] sm:$0xff] }
 0x7c8   : > { %7748 = vrot.lane.b32.xlu0 %v7477_v50, %s9609_s29  ;;  %7750 = vrot.lane.b32.xlu1 %v7511_v51, %s9609_s29  ;;  %v8019_v50 = vld [vmem:[%s14538_s3 + $0x70] sm:$0xff] }
 0x7c9   : > { %v9116_v51 = vld [vmem:[%s14538_s3 + $0x1d0] sm:$0xff]  ;;  %v9413_v17 = vpack.c.bf16 %v8019_v50, %v8017_v21 }
 0x7ca   : > { %v9361_v43 = vpack.c.bf16 %v9116_v51, %v9114_v61  ;;  %v9123_v61 = vld [vmem:[%s14538_s3 + $0x208] sm:$0xff] }
 0x7cb   : > { %9414 = vmatpush1.bf16.msra.mxu0 %v9413_v17 }
 0x7cc   : > { %7746 = vrot.lane.b32.xlu0 %v7443_v10, %s9609_s29  ;;  %7752 = vrot.lane.b32.xlu1 %v7545_v55, %s9609_s29  ;;  %v8022_v10 = vld [vmem:[%s14538_s3 + $0x88] sm:$0xff]  ;;  %v8024_v55 = vld [vmem:[%s14538_s3 + $0x98] sm:$0xff] }
 0x7cd   : > { %v9415_v14 = vpack.c.bf16 %v8024_v55, %v8022_v10  ;;  %9362 = vmatpush1.bf16.msra.mxu1 %v9361_v43  ;;  %v9367_v55 = vpack.c.bf16 %v9125_v48, %v9123_v61  ;;  %v9124_v43 = vld [vmem:[%s14538_s3 + $0x210] sm:$0xff]  ;;  %v8038_v48 = vld [vmem:[%s14538_s3 + $0x108] sm:$0xff] }
 0x7ce   : > { %9364 = vmatprep.subr.bf16.mxu1 %v9363_v39  ;;  %v9369_v0 = vpack.c.bf16 %v9124_v43, %v9122_v53  ;;  %v9132_v61 = vld [vmem:[%s14538_s3 + $0x250] sm:$0xff]  ;;  %v9135_v53 = vld [vmem:[%s14538_s3 + $0x268] sm:$0xff]  ;;  %v9137_v43 = vld [vmem:[%s14538_s3 + $0x278] sm:$0xff] }
 0x7cf   : > { %9416 = vmatprep.subr.bf16.mxu0 %v9415_v14  ;;  %v9127_v14 = vld [vmem:[%s14538_s3 + $0x228] sm:$0xff] }
 0x7d0   : > { %7754 = vrot.lane.b32.xlu1 %v7579_v32, %s9609_s29  ;;  %v9365_v32 = vpack.c.bf16 %v9120_v29, %v9118_v52  ;;  %9418 = vmatpush1.bf16.msra.mxu0 %v9417_v31  ;;  %v8032_v29 = vld [vmem:[%s14538_s3 + $0xd8] sm:$0xff]  ;;  %v8031_v31 = vld [vmem:[%s14538_s3 + $0xd0] sm:$0xff]  ;;  %s8967_s29 = sshll.u32 %s15039_s26, 1 }
 0x7d1   : > { %9420 = vmatprep.subr.bf16.mxu0 %v9419_v1  ;;  %s14516_s19 = scalar_lea.vmem %s14542_s7, %s8967_s29 }
 0x7d2   : > { %9366 = vmatpush1.bf16.msra.mxu1 %v9365_v32  ;;  %v8029_v32 = vld [vmem:[%s14538_s3 + $0xc0] sm:$0xff] }
 0x7d3   : > { %9368 = vmatprep.subr.bf16.mxu1 %v9367_v55 }
 0x7d6   : > { %9370 = vmatpush1.bf16.msra.mxu1 %v9369_v0 }
 0x7de   : > { %v7661_v16 = vpop.permute.xlu0 %7660 }
 0x7e2   : > { %v7663_v22 = vpop.permute.xlu1 %7662 }
 0x7e6   : > { %v7665_v7 = vpop.permute.xlu0 %7664  ;;  %v7599_v60 = vpop.permute.xlu1 %7598 }
 0x7e7   : > { %v7773_v8 = vsel %vm5515_vm9, %v13617_v46, %v7599_v60  ;;  %v9425_v60 = vpack.c.bf16 %v8031_v31, %v8029_v32  ;;  %v8044_v32 = vld [vmem:[%s14538_s3 + $0x138] sm:$0xff] }
 0x7e8   : > { %v7789_v47 = vsel %vm5581_vm11, %v7773_v8, %v7663_v22 }
 0x7ea   : > { %v7667_v59 = vpop.permute.xlu0 %7666  ;;  %v7727_v3 = vpop.permute.xlu1 %7726 }
 0x7eb   : > { %v7805_v20 = vsel %vm5647_vm13, %v7789_v47, %v7727_v3  ;;  %v9128_v3 = vld [vmem:[%s14538_s3 + $0x230] sm:$0xff]  ;;  %v9131_v47 = vld [vmem:[%s14538_s3 + $0x248] sm:$0xff] }
 0x7ec   : > { %v7837_v24 = vrot.slane %v7805_v20, 1 }
 0x7ee   : > { %v7597_v44 = vpop.permute.xlu0 %7596  ;;  %v7869_v25 = vmax.f32 %v7805_v20, %v7837_v24  ;;  %v9133_v20 = vld [vmem:[%s14538_s3 + $0x258] sm:$0xff]  ;;  %v9130_v24 = vld [vmem:[%s14538_s3 + $0x240] sm:$0xff] }
 0x7ef   : > { %v7772_v40 = vsel %vm5515_vm9, %v13631_v33, %v7597_v44  ;;  %v9126_v44 = vld [vmem:[%s14538_s3 + $0x220] sm:$0xff] }
 0x7f0   : > { %v7788_v9 = vsel %vm5581_vm11, %v7772_v40, %v7661_v16  ;;  %v8036_v40 = vld [vmem:[%s14538_s3 + $0xf8] sm:$0xff] }
 0x7f2   : > { %v7601_v30 = vpop.permute.xlu0 %7600  ;;  %v13981_v19 = vpop.permute.xlu1 %7670 }
 0x7f3   : > { %v7774_v45 = vsel %vm5515_vm9, %v13639_v54, %v7601_v30  ;;  %v8025_v54 = vld [vmem:[%s14538_s3 + $0xa0] sm:$0xff]  ;;  %v8034_v30 = vld [vmem:[%s14538_s3 + $0xe8] sm:$0xff] }
 0x7f4   : > { %v7790_v33 = vsel %vm5581_vm11, %v7774_v45, %v7665_v7  ;;  %v9421_v52 = vpack.c.bf16 %v8027_v12, %v8025_v54  ;;  %v9371_v7 = vpack.c.bf16 %v9129_v4, %v9127_v14  ;;  %v9427_v45 = vpack.c.bf16 %v8036_v40, %v8034_v30  ;;  %v8040_v54 = vld [vmem:[%s14538_s3 + $0x118] sm:$0xff]  ;;  %v9134_v14 = vld [vmem:[%s14538_s3 + $0x260] sm:$0xff]  ;;  %v8042_v4 = vld [vmem:[%s14538_s3 + $0x128] sm:$0xff] }
 0x7f5   : > { %v9435_v30 = vpack.c.bf16 %v8044_v32, %v8042_v4 }
 0x7f6   : > { %v7603_v13 = vpop.permute.xlu0 %7602  ;;  %v13987_v6 = vpop.permute.xlu1 %7672  ;;  %9422 = vmatpush1.bf16.msra.mxu0 %v9421_v52  ;;  %9372 = vmatprep.subr.bf16.mxu1 %v9371_v7  ;;  %v9377_v52 = vpack.c.bf16 %v9132_v61, %v9130_v24  ;;  %v8043_v24 = vld [vmem:[%s14538_s3 + $0x130] sm:$0xff] }
 0x7f7   : > { %v7775_v50 = vsel %vm5515_vm9, %v13650_v57, %v7603_v13  ;;  %v8030_v57 = vld [vmem:[%s14538_s3 + $0xc8] sm:$0xff] }
 0x7f8   : > { %v9423_v62 = vpack.c.bf16 %v8032_v29, %v8030_v57  ;;  %v7791_v16 = vsel %vm5581_vm11, %v7775_v50, %v7667_v59  ;;  %v9373_v59 = vpack.c.bf16 %v9128_v3, %v9126_v44  ;;  %v7936_v50 = vrot.slane %v7869_v25, 6  ;;  %v8037_v57 = vld [vmem:[%s14538_s3 + $0x100] sm:$0xff]  ;;  %v8039_v29 = vld [vmem:[%s14538_s3 + $0x110] sm:$0xff] }
 0x7f9   : > { %v9433_v7 = vpack.c.bf16 %v8039_v29, %v8037_v57  ;;  %v8047_v57 = vld [vmem:[%s14538_s3 + $0x150] sm:$0xff] }
 0x7fa   : > { %v7725_v15 = vpop.permute.xlu0 %7724  ;;  %v13995_v27 = vpop.permute.xlu1 %7674  ;;  %9424 = vmatprep.subr.bf16.mxu0 %v9423_v62  ;;  %9374 = vmatpush1.bf16.msra.mxu1 %v9373_v59  ;;  %v9136_v62 = vld [vmem:[%s14538_s3 + $0x270] sm:$0xff] }
 0x7fb   : > { %v7804_v38 = vsel %vm5647_vm13, %v7788_v9, %v7725_v15  ;;  %9426 = vmatpush1.bf16.msra.mxu0 %v9425_v60  ;;  %v9381_v3 = vpack.c.bf16 %v9136_v62, %v9134_v14 }
 0x7fc   : > { %v7836_v46 = vrot.slane %v7804_v38, 1  ;;  %9428 = vmatprep.subr.bf16.mxu0 %v9427_v45 }
 0x7fe   : > { %v7729_v21 = vpop.permute.xlu0 %7728  ;;  %v7607_v10 = vpop.permute.xlu1 %7606  ;;  %v7868_v17 = vmax.f32 %v7804_v38, %v7836_v46  ;;  %v8033_v38 = vld [vmem:[%s14538_s3 + $0xe0] sm:$0xff]  ;;  %v8035_v46 = vld [vmem:[%s14538_s3 + $0xf0] sm:$0xff] }
 0x7ff   : > { %v7806_v51 = vsel %vm5647_vm13, %v7790_v33, %v7729_v21  ;;  %v9375_v21 = vpack.c.bf16 %v9133_v20, %v9131_v47  ;;  %v9429_v12 = vpack.c.bf16 %v8035_v46, %v8033_v38 }
 0x800   : > { %v7838_v39 = vrot.slane %v7806_v51, 1  ;;  %v7935_v9 = vrot.slane %v7868_v17, 7  ;;  %v7777_v17 = vsel %vm5515_vm9, %v13675_v56, %v7607_v10  ;;  %v9431_v56 = vpack.c.bf16 %v8040_v54, %v8038_v48 }
 0x801   : > { %9376 = vmatprep.subr.bf16.mxu1 %v9375_v21  ;;  %v9379_v10 = vpack.c.bf16 %v9137_v43, %v9135_v53  ;;  %9430 = vmatpush1.bf16.msra.mxu0 %v9429_v12  ;;  %v9140_v21 = vld [vmem:[%s14538_s3 + $0x290] sm:$0xff] }
 0x802   : > { %v7870_v1 = vmax.f32 %v7806_v51, %v7838_v39  ;;  %v7731_v22 = vpop.permute.xlu0 %7730  ;;  %v7609_v13 = vpop.permute.xlu1 %7608  ;;  %v7937_v25 = vsel %vm5921_vm15, %v7936_v50, %v7935_v9  ;;  %9378 = vmatpush1.bf16.msra.mxu1 %v9377_v52  ;;  %9432 = vmatprep.subr.bf16.mxu0 %v9431_v56  ;;  %v8046_v50 = vld [vmem:[%s14538_s3 + $0x148] sm:$0xff]  ;;  %v8045_v52 = vld [vmem:[%s14538_s3 + $0x140] sm:$0xff]  ;;  %v9144_v56 = vld [vmem:[%s14538_s3 + $0x2b0] sm:$0xff] }
 0x803   : > { %v7807_v8 = vsel %vm5647_vm13, %v7791_v16, %v7731_v22  ;;  %v7793_v16 = vsel %vm5581_vm11, %v7777_v17, %v13981_v19  ;;  %9380 = vmatprep.subr.bf16.mxu1 %v9379_v10  ;;  %v8050_v10 = vld [vmem:[%s14538_s3 + $0x168] sm:$0xff] }
 0x804   : > { %v7839_v15 = vrot.slane %v7807_v8, 1  ;;  %v7938_v33 = vrot.slane %v7870_v1, 5 }
 0x805   : > { %9434 = vmatpush1.bf16.msra.mxu0 %v9433_v7 }
 0x806   : > { %v7871_v51 = vmax.f32 %v7807_v8, %v7839_v15  ;;  %v7669_v55 = vpop.permute.xlu0 %7668  ;;  %v7611_v39 = vpop.permute.xlu1 %7610  ;;  %v7939_v31 = vsel %vm5924_vm0, %v7938_v33, %v7937_v25  ;;  %v7778_v8 = vsel %vm5515_vm9, %v13685_v35, %v7609_v13  ;;  %9382 = vmatpush1.bf16.msra.mxu1 %v9381_v3  ;;  %9436 = vmatprep.subr.bf16.mxu0 %v9435_v30  ;;  %v9139_v35 = vld [vmem:[%s14538_s3 + $0x288] sm:$0xff]  ;;  %v9141_v13 = vld [vmem:[%s14538_s3 + $0x298] sm:$0xff]  ;;  %v9138_v33 = vld [vmem:[%s14538_s3 + $0x280] sm:$0xff] }
 0x807   : > { %v7794_v9 = vsel %vm5581_vm11, %v7778_v8, %v13987_v6  ;;  %v9383_v6 = vpack.c.bf16 %v9141_v13, %v9139_v35  ;;  %v9385_v54 = vpack.c.bf16 %v9140_v21, %v9138_v33  ;;  %v8049_v3 = vld [vmem:[%s14538_s3 + $0x160] sm:$0xff]  ;;  %v8051_v30 = vld [vmem:[%s14538_s3 + $0x170] sm:$0xff]  ;;  %v9151_v13 = vld [vmem:[%s14538_s3 + $0x2e8] sm:$0xff] }
 0x808   : > { %v7940_v0 = vrot.slane %v7871_v51, 4  ;;  %v8048_v51 = vld [vmem:[%s14538_s3 + $0x158] sm:$0xff]  ;;  %v9146_v8 = vld [vmem:[%s14538_s3 + $0x2c0] sm:$0xff] }
 0x809   : > { %9384 = vmatprep.subr.bf16.mxu1 %v9383_v6  ;;  %v9439_v17 = vpack.c.bf16 %v8048_v51, %v8046_v50  ;;  %v9167_v50 = vld [vmem:[%s14538_s3 + $0x308] sm:$0xff]  ;;  %v9169_v51 = vld [vmem:[%s14538_s3 + $0x318] sm:$0xff] }
 0x80a   : > { %v7605_v1 = vpop.permute.xlu0 %7604  ;;  %v7941_v22 = vsel %vm15030_vm5, %v7940_v0, %v7939_v31  ;;  %v7735_v44 = vpop.permute.xlu1 %7734  ;;  %9386 = vmatpush1.bf16.msra.mxu1 %v9385_v54  ;;  %v9142_v0 = vld [vmem:[%s14538_s3 + $0x2a0] sm:$0xff] }
 0x80b   : > { %v7776_v60 = vsel %vm5515_vm9, %v13701_v58, %v7605_v1  ;;  %7963 = vrot.lane.b32.xlu0 %v7941_v22, %s9610_s30  ;;  %v7809_v59 = vsel %vm5647_vm13, %v7793_v16, %v7735_v44  ;;  %v7779_v58 = vsel %vm5515_vm9, %v13694_v28, %v7611_v39  ;;  %v8041_v28 = vld [vmem:[%s14538_s3 + $0x120] sm:$0xff]  ;;  %v9145_v39 = vld [vmem:[%s14538_s3 + $0x2b8] sm:$0xff]  ;;  %v9389_v31 = vpack.c.bf16 %v9144_v56, %v9142_v0  ;;  %v9147_v16 = vld [vmem:[%s14538_s3 + $0x2c8] sm:$0xff] }
 0x80c   : > { %v7841_v19 = vrot.slane %v7809_v59, 1  ;;  %v7792_v40 = vsel %vm5581_vm11, %v7776_v60, %v7669_v55  ;;  %v9437_v48 = vpack.c.bf16 %v8043_v24, %v8041_v28  ;;  %v9143_v55 = vld [vmem:[%s14538_s3 + $0x2a8] sm:$0xff]  ;;  %v7795_v43 = vsel %vm5581_vm11, %v7779_v58, %v13995_v27  ;;  %v8052_v1 = vld [vmem:[%s14538_s3 + $0x178] sm:$0xff]  ;;  %v9152_v24 = vld [vmem:[%s14538_s3 + $0x2f0] sm:$0xff] }
 0x80d   : > { %v9387_v25 = vpack.c.bf16 %v9145_v39, %v9143_v55  ;;  %v9441_v27 = vpack.c.bf16 %v8047_v57, %v8045_v52  ;;  %v9149_v22 = vld [vmem:[%s14538_s3 + $0x2d8] sm:$0xff]  ;;  %v9443_v60 = vpack.c.bf16 %v8052_v1, %v8050_v10  ;;  %v9447_v55 = vpack.c.bf16 %v9169_v51, %v9167_v50 }
 0x80e   : > { %v7733_v47 = vpop.permute.xlu0 %7732  ;;  %v7737_v15 = vpop.permute.xlu1 %7736  ;;  %v7873_v45 = vmax.f32 %v7809_v59, %v7841_v19  ;;  %9438 = vmatpush1.bf16.msra.mxu0 %v9437_v48  ;;  %v9391_v44 = vpack.c.bf16 %v9149_v22, %v9147_v16  ;;  %v9153_v28 = vld [vmem:[%s14538_s3 + $0x2f8] sm:$0xff] }
 0x80f   : > { %v7808_v20 = vsel %vm5647_vm13, %v7792_v40, %v7733_v47  ;;  %v7810_v46 = vsel %vm5647_vm13, %v7794_v9, %v7737_v15  ;;  %9440 = vmatprep.subr.bf16.mxu0 %v9439_v17  ;;  %9388 = vmatprep.subr.bf16.mxu1 %v9387_v25  ;;  %v9148_v47 = vld [vmem:[%s14538_s3 + $0x2d0] sm:$0xff]  ;;  %v9445_v9 = vpack.c.bf16 %v8051_v30, %v8049_v3 }
 0x810   : > { %v7840_v38 = vrot.slane %v7808_v20, 1  ;;  %v7842_v61 = vrot.slane %v7810_v46, 1  ;;  %v7943_v62 = vrot.slane %v7873_v45, 6  ;;  %9390 = vmatpush1.bf16.msra.mxu1 %v9389_v31  ;;  %v9393_v15 = vpack.c.bf16 %v9148_v47, %v9146_v8  ;;  %v9150_v45 = vld [vmem:[%s14538_s3 + $0x2e0] sm:$0xff] }
 0x811   : > { %9392 = vmatprep.subr.bf16.mxu1 %v9391_v44  ;;  %v9395_v6 = vpack.c.bf16 %v9153_v28, %v9151_v13 }
 0x812   : > { %v7872_v12 = vmax.f32 %v7808_v20, %v7840_v38  ;;  %v14146_v53 = vpop.permute.xlu0 %7676  ;;  %v7874_v29 = vmax.f32 %v7810_v46, %v7842_v61  ;;  %v7739_v14 = vpop.permute.xlu1 %7738  ;;  %9442 = vmatpush1.bf16.msra.mxu0 %v9441_v27  ;;  %v9397_v61 = vpack.c.bf16 %v9152_v24, %v9150_v45 }
 0x813   : > { %v7811_v32 = vsel %vm5647_vm13, %v7795_v43, %v7739_v14  ;;  %9444 = vmatprep.subr.bf16.mxu0 %v9443_v60 }
 0x814   : > { %v7942_v4 = vrot.slane %v7872_v12, 7  ;;  %v7843_v7 = vrot.slane %v7811_v32, 1  ;;  %v7945_v19 = vrot.slane %v7874_v29, 5  ;;  %9394 = vmatpush1.bf16.msra.mxu1 %v9393_v15 }
 0x815   : > { %9396 = vmatprep.subr.bf16.mxu1 %v9395_v6 }
 0x816   : > { %v7944_v59 = vsel %vm5921_vm15, %v7943_v62, %v7942_v4  ;;  %v7681_v40 = vpop.permute.xlu0 %7680  ;;  %v7875_v58 = vmax.f32 %v7811_v32, %v7843_v7  ;;  %v7679_v20 = vpop.permute.xlu1 %7678  ;;  %9446 = vmatpush1.bf16.msra.mxu0 %v9445_v9 }
 0x817   : > { %v7946_v46 = vsel %vm5924_vm0, %v7945_v19, %v7944_v59  ;;  %9448 = vmatprep.subr.bf16.mxu0 %v9447_v55 }
 0x818   : > { %v7947_v35 = vrot.slane %v7875_v58, 4  ;;  %9398 = vmatpush1.bf16.msra.mxu1 %v9397_v61 }
 0x81a   : > { %v7683_v38 = vpop.permute.xlu0 %7682  ;;  %v7615_v33 = vpop.permute.xlu1 %7614  ;;  %v7948_v21 = vsel %vm15031_vm8, %v7947_v35, %v7946_v46 }
 0x81b   : > { %7965 = vrot.lane.b32.xlu1 %v7948_v21, %s9610_s30  ;;  %v7781_v56 = vsel %vm5515_vm9, %v13744_v34, %v7615_v33 }
 0x81c   : > { %v7797_v31 = vsel %vm5581_vm11, %v7781_v56, %v7679_v20 }
 0x81e   : > { %v7613_v48 = vpop.permute.xlu0 %7612  ;;  %v7743_v54 = vpop.permute.xlu1 %7742 }
 0x81f   : > { %v7780_v25 = vsel %vm5515_vm9, %v13752_v5, %v7613_v48  ;;  %v7813_v16 = vsel %vm5647_vm13, %v7797_v31, %v7743_v54  ;;  %v9166_v31 = vld [vmem:[%s14538_s3 + $0x300] sm:$0xff] }
 0x820   : > { %v7796_v62 = vsel %vm5581_vm11, %v7780_v25, %v14146_v53  ;;  %v7845_v60 = vrot.slane %v7813_v16, 1 }
 0x822   : > { %v7617_v12 = vpop.permute.xlu0 %7616  ;;  %v7687_v43 = vpop.permute.xlu1 %7686  ;;  %v7877_v9 = vmax.f32 %v7813_v16, %v7845_v60  ;;  %v9173_v16 = vld [vmem:[%s14538_s3 + $0x338] sm:$0xff] }
 0x823   : > { %v7782_v27 = vsel %vm5515_vm9, %v13767_v26, %v7617_v12 }
 0x824   : > { %v7798_v32 = vsel %vm5581_vm11, %v7782_v27, %v7681_v40  ;;  %v7950_v48 = vrot.slane %v7877_v9, 6  ;;  %v9176_v9 = vld [vmem:[%s14538_s3 + $0x350] sm:$0xff] }
 0x826   : > { %v7619_v17 = vpop.permute.xlu0 %7618  ;;  %v7689_v39 = vpop.permute.xlu1 %7688 }
 0x827   : > { %v7783_v30 = vsel %vm5515_vm9, %v13779_v23, %v7619_v17 }
 0x828   : > { %v7799_v15 = vsel %vm5581_vm11, %v7783_v30, %v7683_v38 }
 0x82a   : > { %v7741_v52 = vpop.permute.xlu0 %7740  ;;  %v7691_v57 = vpop.permute.xlu1 %7690 }
 0x82b   : > { %v7812_v4 = vsel %vm5647_vm13, %v7796_v62, %v7741_v52 }
 0x82c   : > { %v7844_v34 = vrot.slane %v7812_v4, 1 }
 0x82e   : > { %v7745_v29 = vpop.permute.xlu0 %7744  ;;  %v7623_v14 = vpop.permute.xlu1 %7622  ;;  %v7876_v40 = vmax.f32 %v7812_v4, %v7844_v34  ;;  %v9170_v34 = vld [vmem:[%s14538_s3 + $0x320] sm:$0xff] }
 0x82f   : > { %v7814_v1 = vsel %vm5647_vm13, %v7798_v32, %v7745_v29  ;;  %v7785_v7 = vsel %vm5515_vm9, %v13800_v18, %v7623_v14 }
 0x830   : > { %v7846_v53 = vrot.slane %v7814_v1, 1  ;;  %v7801_v59 = vsel %vm5581_vm11, %v7785_v7, %v7687_v43  ;;  %v7949_v45 = vrot.slane %v7876_v40, 7  ;;  %v9172_v7 = vld [vmem:[%s14538_s3 + $0x330] sm:$0xff] }
 0x832   : > { %v7685_v0 = vpop.permute.xlu0 %7684  ;;  %v7625_v10 = vpop.permute.xlu1 %7624  ;;  %v7878_v18 = vmax.f32 %v7814_v1, %v7846_v53  ;;  %v7951_v55 = vsel %vm5921_vm15, %v7950_v48, %v7949_v45  ;;  %v9168_v1 = vld [vmem:[%s14538_s3 + $0x310] sm:$0xff] }
 0x833   : > { %v9449_v60 = vpack.c.bf16 %v9168_v1, %v9166_v31 }
 0x834   : > { %v7952_v24 = vrot.slane %v7878_v18, 5  ;;  %v9453_v18 = vpack.c.bf16 %v9172_v7, %v9170_v34 }
 0x836   : > { %v7621_v5 = vpop.permute.xlu0 %7620  ;;  %v7627_v22 = vpop.permute.xlu1 %7626  ;;  %v7953_v52 = vsel %vm5924_vm0, %v7952_v24, %v7951_v55  ;;  %v9180_v24 = vld [vmem:[%s14538_s3 + $0x370] sm:$0xff] }
 0x837   : > { %v7784_v26 = vsel %vm5515_vm9, %v13815_v41, %v7621_v5  ;;  %v7786_v41 = vsel %vm5515_vm9, %v13808_v63, %v7625_v10  ;;  %v7787_v46 = vsel %vm5515_vm9, %v13819_v11, %v7627_v22  ;;  %vm15032_vm9 = vmmov %vm15025_vm1  ;;  %v9171_v5 = vld [vmem:[%s14538_s3 + $0x328] sm:$0xff] }
 0x838   : > { %v7800_v44 = vsel %vm5581_vm11, %v7784_v26, %v7685_v0  ;;  %v7802_v13 = vsel %vm5581_vm11, %v7786_v41, %v7689_v39  ;;  %v7803_v50 = vsel %vm5581_vm11, %v7787_v46, %v7691_v57 }
 0x83a   : > { %v7749_v3 = vpop.permute.xlu0 %7748  ;;  %v7751_v19 = vpop.permute.xlu1 %7750 }
 0x83b   : > { %v7816_v8 = vsel %vm5647_vm13, %v7800_v44, %v7749_v3  ;;  %v7817_v47 = vsel %vm5647_vm13, %v7801_v59, %v7751_v19  ;;  %v9175_v44 = vld [vmem:[%s14538_s3 + $0x348] sm:$0xff]  ;;  %v9177_v3 = vld [vmem:[%s14538_s3 + $0x358] sm:$0xff] }
 0x83c   : > { %v7848_v58 = vrot.slane %v7816_v8, 1  ;;  %v7849_v20 = vrot.slane %v7817_v47, 1 }
 0x83e   : > { %v7747_v35 = vpop.permute.xlu0 %7746  ;;  %v7753_v28 = vpop.permute.xlu1 %7752  ;;  %v7880_v33 = vmax.f32 %v7816_v8, %v7848_v58  ;;  %v7881_v21 = vmax.f32 %v7817_v47, %v7849_v20  ;;  %v9451_v8 = vpack.c.bf16 %v9173_v16, %v9171_v5  ;;  %v9455_v58 = vpack.c.bf16 %v9177_v3, %v9175_v44  ;;  %v9174_v20 = vld [vmem:[%s14538_s3 + $0x340] sm:$0xff]  ;;  %v9200_v16 = vld [vmem:[%s14538_s3 + $0x410] sm:$0xff]  ;;  %v9207_v44 = vld [vmem:[%s14538_s3 + $0x448] sm:$0xff] }
 0x83f   : > { %v7815_v23 = vsel %vm5647_vm13, %v7799_v15, %v7747_v35  ;;  %v7818_v63 = vsel %vm5647_vm13, %v7802_v13, %v7753_v28  ;;  %v9181_v13 = vld [vmem:[%s14538_s3 + $0x378] sm:$0xff]  ;;  %v9457_v46 = vpack.c.bf16 %v9176_v9, %v9174_v20  ;;  %v9198_v5 = vld [vmem:[%s14538_s3 + $0x400] sm:$0xff] }
 0x840   : > { %v7847_v6 = vrot.slane %v7815_v23, 1  ;;  %v7850_v61 = vrot.slane %v7818_v63, 1  ;;  %v7956_v17 = vrot.slane %v7880_v33, 7  ;;  %v7957_v11 = vrot.slane %v7881_v21, 6  ;;  %v9183_v33 = vld [vmem:[%s14538_s3 + $0x388] sm:$0xff]  ;;  %v9185_v21 = vld [vmem:[%s14538_s3 + $0x398] sm:$0xff] }
 0x841   : > { %v9463_v48 = vpack.c.bf16 %v9185_v21, %v9183_v33  ;;  %v9481_v34 = vpack.c.bf16 %v9200_v16, %v9198_v5  ;;  %v9209_v3 = vld [vmem:[%s14538_s3 + $0x458] sm:$0xff] }
 0x842   : > { %v7879_v54 = vmax.f32 %v7815_v23, %v7847_v6  ;;  %v7882_v38 = vmax.f32 %v7818_v63, %v7850_v61  ;;  %v7755_v51 = vpop.permute.xlu1 %7754  ;;  %v7958_v27 = vsel %vm5921_vm15, %v7957_v11, %v7956_v17  ;;  %vm8077_vm15 = vcmask 1042432   ;;  %v9179_v23 = vld [vmem:[%s14538_s3 + $0x368] sm:$0xff]  ;;  %v9178_v63 = vld [vmem:[%s14538_s3 + $0x360] sm:$0xff]  ;;  %v9188_v17 = vld [vmem:[%s14538_s3 + $0x3b0] sm:$0xff] }
 0x843   : > { %v7819_v43 = vsel %vm5647_vm13, %v7803_v50, %v7755_v51  ;;  %vm7975_vm13 = vcmask 1044737   ;;  %v9459_v6 = vpack.c.bf16 %v9181_v13, %v9179_v23  ;;  %v9461_v61 = vpack.c.bf16 %v9180_v24, %v9178_v63  ;;  %v9187_v50 = vld [vmem:[%s14538_s3 + $0x3a8] sm:$0xff]  ;;  %v9189_v51 = vld [vmem:[%s14538_s3 + $0x3b8] sm:$0xff]  ;;  %v9210_v13 = vld [vmem:[%s14538_s3 + $0x460] sm:$0xff] }
 0x844   : > { %v7954_v12 = vrot.slane %v7879_v54, 4  ;;  %v7851_v39 = vrot.slane %v7819_v43, 1  ;;  %v7959_v29 = vrot.slane %v7882_v38, 5  ;;  %v9182_v54 = vld [vmem:[%s14538_s3 + $0x380] sm:$0xff]  ;;  %v9184_v38 = vld [vmem:[%s14538_s3 + $0x390] sm:$0xff]  ;;  %v9191_v11 = vld [vmem:[%s14538_s3 + $0x3c8] sm:$0xff] }
 0x845   : > { %v9465_v55 = vpack.c.bf16 %v9184_v38, %v9182_v54 }
 0x846   : > { %v7955_v14 = vsel %vm15032_vm9, %v7954_v12, %v7953_v52  ;;  %v7883_v25 = vmax.f32 %v7819_v43, %v7851_v39  ;;  %v7960_v0 = vsel %vm5924_vm0, %v7959_v29, %v7958_v27  ;;  %vm8078_vm0 = vcmask 1046532   ;;  %v9186_v43 = vld [vmem:[%s14538_s3 + $0x3a0] sm:$0xff]  ;;  %v9193_v39 = vld [vmem:[%s14538_s3 + $0x3d8] sm:$0xff]  ;;  %v9195_v27 = vld [vmem:[%s14538_s3 + $0x3e8] sm:$0xff] }
 0x847   : > { %7967 = vrot.lane.b32.xlu0 %v7955_v14, %s9610_s30  ;;  %vm14284_vm7 = vmor %vm8077_vm15, %vm8078_vm0  ;;  %v9467_v12 = vpack.c.bf16 %v9189_v51, %v9187_v50  ;;  %v9469_v52 = vpack.c.bf16 %v9188_v17, %v9186_v43  ;;  %v9471_v29 = vpack.c.bf16 %v9193_v39, %v9191_v11  ;;  %v9190_v14 = vld [vmem:[%s14538_s3 + $0x3c0] sm:$0xff] }
 0x848   : > { %v7961_v57 = vrot.slane %v7883_v25, 4  ;;  %v9192_v25 = vld [vmem:[%s14538_s3 + $0x3d0] sm:$0xff] }
 0x84a   : > { %v7962_v56 = vsel %vm15025_vm1, %v7961_v57, %v7960_v0  ;;  %v9197_v57 = vld [vmem:[%s14538_s3 + $0x3f8] sm:$0xff]  ;;  %v9473_v0 = vpack.c.bf16 %v9192_v25, %v9190_v14 }
 0x84b   : > { %7969 = vrot.lane.b32.xlu1 %v7962_v56, %s9610_s30  ;;  %v9475_v56 = vpack.c.bf16 %v9197_v57, %v9195_v27 }
 0x87d   : > { %v7964_v10 = vpop.permute.xlu0 %7963 }
 0x87e   : > { %7976 = vst.msk [vmem:[#allocation4] sm:$0x1e] %vm7975_vm13, %v7964_v10 }
 0x87f   : > { %7978 = vst.msk [vmem:[#allocation4 + $0x8] sm:$0x1e] %vm7977_vm6, %v7964_v10  ;;  %v9194_v10 = vld [vmem:[%s14538_s3 + $0x3e0] sm:$0xff] }
 0x886   : > { %v9572_v4 = vld [vmem:[#allocation4] ss:$8 sps:$4 sm:$0xee]   ;;  %v9574_v32 = vld [vmem:[#allocation4 + $0x4] ss:$8 sps:$4 sm:$0x11]  }
 0x887   : > { %v9102_v26 = vrot.slane %v9572_v4, 9  ;;  %v8082_v22 = vrot.slane %v9574_v32, 5  ;;  %v9199_v4 = vld [vmem:[%s14538_s3 + $0x408] sm:$0xff]  ;;  %v9201_v32 = vld [vmem:[%s14538_s3 + $0x418] sm:$0xff] }
 0x888   : > { %v9479_v1 = vpack.c.bf16 %v9201_v32, %v9199_v4 }
 0x889   : > { %v8083_v15 = vsel %vm14284_vm7, %v9102_v26, %v8082_v22  ;;  %v9203_v26 = vld [vmem:[%s14538_s3 + $0x428] sm:$0xff]  ;;  %v9205_v22 = vld [vmem:[%s14538_s3 + $0x438] sm:$0xff] }
 0x88a   : > { %v9483_v7 = vpack.c.bf16 %v9205_v22, %v9203_v26 }
 0x88d   : > { %v7966_v62 = vpop.permute.xlu1 %7965 }
 0x88e   : > { %7979 = vst.msk [vmem:[#allocation4 + $0x10] sm:$0x1e] %vm7975_vm13, %v7966_v62 }
 0x88f   : > { %7980 = vst.msk [vmem:[#allocation4 + $0x18] sm:$0x1e] %vm7977_vm6, %v7966_v62  ;;  %v9196_v62 = vld [vmem:[%s14538_s3 + $0x3f0] sm:$0xff] }
 0x890   : > { %v9477_v31 = vpack.c.bf16 %v9196_v62, %v9194_v10 }
 0x895   : > { %v9571_v30 = vld [vmem:[#allocation4] ss:$16 sps:$4 sm:$0xff]  }
 0x896   : > { %v9570_v53 = vld [vmem:[#allocation4 + $0x8] ss:$16 sps:$4 sm:$0xff]   ;;  %v9577_v19 = vld [vmem:[#allocation4 + $0x14] ss:$8 sps:$4 sm:$0x11]  }
 0x897   : > { %9160 = vmatprep.mubr.msk.f32.mxu0 %vm5581_vm11, %v9570_v53  ;;  %v9575_v59 = vld [vmem:[#allocation4 + $0x10] ss:$8 sps:$4 sm:$0xee]   ;;  %v8086_v47 = vrot.slane %v9577_v19, 5  ;;  %v9202_v53 = vld [vmem:[%s14538_s3 + $0x420] sm:$0xff]  ;;  %v9487_v19 = vpack.c.bf16 %v9209_v3, %v9207_v44 }
 0x898   : > { %8307 = vmatmul.mubr.f32.vlgmr.msra.gmra.mrb[16].mxu0 %v9571_v30  ;;  %v9103_v41 = vrot.slane %v9575_v59, 9  ;;  %v9206_v59 = vld [vmem:[%s14538_s3 + $0x440] sm:$0xff]  ;;  %v9585_v20 = vld [vmem:[#allocation4 + $0x14] ss:$8 sps:$4 sm:$0x33]  }
 0x899   : > { %9450 = vmatpush1.bf16.msra.mxu0 %v9449_v60  ;;  %v9204_v60 = vld [vmem:[%s14538_s3 + $0x430] sm:$0xff] }
 0x89a   : > { %9452 = vmatprep.subr.bf16.mxu0 %v9451_v8  ;;  %v8087_v35 = vsel %vm14284_vm7, %v9103_v41, %v8086_v47  ;;  %v9485_v8 = vpack.c.bf16 %v9204_v60, %v9202_v53  ;;  %v9208_v41 = vld [vmem:[%s14538_s3 + $0x450] sm:$0xff]  ;;  %v9211_v47 = vld [vmem:[%s14538_s3 + $0x468] sm:$0xff] }
 0x89b   : > { %v8145_v28 = vcombine.low %v8083_v15, %v8087_v35  ;;  %v8146_v45 = vcombine.high %v8083_v15, %v8087_v35  ;;  %v9489_v15 = vpack.c.bf16 %v9208_v41, %v9206_v59  ;;  %v9580_v35 = vld [vmem:[#allocation4] ss:$8 sps:$4 sm:$0xcc]  }
 0x89c   : > { %v9162_v24 = vrot.slane %v9580_v35, 10 }
 0x89d   : > { %9454 = vmatpush1.bf16.msra.mxu0 %v9453_v18  ;;  %9154 = vmatprep.mubr.msk.f32.mxu1 %vm5581_vm11, %v8146_v45  ;;  %v9213_v18 = vld [vmem:[%s14538_s3 + $0x478] sm:$0xff]  ;;  %v9582_v45 = vld [vmem:[#allocation4 + $0x4] ss:$8 sps:$4 sm:$0x33]  }
 0x89e   : > { %9456 = vmatprep.subr.bf16.mxu0 %v9455_v58  ;;  %8220 = vmatmul.mubr.f32.vlgmr.msra.gmra.mrb[8].mxu1 %v8145_v28  ;;  %v9583_v58 = vld [vmem:[#allocation4 + $0x10] ss:$8 sps:$4 sm:$0xcc]   ;;  %v9491_v23 = vpack.c.bf16 %v9213_v18, %v9211_v47  ;;  %v8347_v21 = vrot.slane %v9582_v45, 6 }
 0x89f   : > { %v9212_v28 = vld [vmem:[%s14538_s3 + $0x470] sm:$0xff] }
 0x8a0   : > { %v9493_v63 = vpack.c.bf16 %v9212_v28, %v9210_v13  ;;  %v8348_v17 = vsel %vm14412_vm14, %v9162_v24, %v8347_v21 }
 0x8a1   : > { %9458 = vmatpush1.bf16.msra.mxu0 %v9457_v46  ;;  %v9163_v46 = vrot.slane %v9583_v58, 10 }
 0x8a2   : > { %9460 = vmatprep.subr.bf16.mxu0 %v9459_v6  ;;  %v8351_v6 = vrot.slane %v9585_v20, 6 }
 0x8a4   : > { %v8352_v54 = vsel %vm14412_vm14, %v9163_v46, %v8351_v6 }
 0x8a5   : > { %9462 = vmatpush1.bf16.msra.mxu0 %v9461_v61  ;;  %v8411_v11 = vcombine.high %v8348_v17, %v8352_v54  ;;  %v8410_v27 = vcombine.low %v8348_v17, %v8352_v54 }
 0x8a6   : > { %9464 = vmatprep.subr.bf16.mxu0 %v9463_v48 }
 0x8a9   : > { %9466 = vmatpush1.bf16.msra.mxu0 %v9465_v55 }
 0x8aa   : > { %9468 = vmatprep.subr.bf16.mxu0 %v9467_v12 }
 0x8ad   : > { %9470 = vmatpush1.bf16.msra.mxu0 %v9469_v52 }
 0x8ae   : > { %9472 = vmatprep.subr.bf16.mxu0 %v9471_v29 }
 0x8b1   : > { %9474 = vmatpush1.bf16.msra.mxu0 %v9473_v0 }
 0x8b2   : > { %9476 = vmatprep.subr.bf16.mxu0 %v9475_v56 }
 0x8b5   : > { %9478 = vmatpush1.bf16.msra.mxu0 %v9477_v31 }
 0x8b6   : > { %9480 = vmatprep.subr.bf16.mxu0 %v9479_v1 }
 0x8b9   : > { %v7968_v30 = vpop.permute.xlu0 %7967  ;;  %9482 = vmatpush1.bf16.msra.mxu0 %v9481_v34 }
 0x8ba   : > { %7981 = vst.msk [vmem:[#allocation4 + $0x20] sm:$0x1e] %vm7975_vm13, %v7968_v30  ;;  %9484 = vmatprep.subr.bf16.mxu0 %v9483_v7  ;;  %v8501_v7 = vld [vmem:[%s14541_s6] sm:$0x3] }
 0x8bb   : > { %7982 = vst.msk [vmem:[#allocation4 + $0x28] sm:$0x1e] %vm7977_vm6, %v7968_v30  ;;  %v8506_v53 = vrot.slane %v8501_v7, %v15026_v2  ;;  %v8510_v44 = vrot.slane %v8501_v7, %v15027_v42 }
 0x8bd   : > { %v7970_v9 = vpop.permute.xlu1 %7969  ;;  %9486 = vmatpush1.bf16.msra.mxu0 %v9485_v8 }
 0x8be   : > { %7983 = vst.msk [vmem:[#allocation4 + $0x30] sm:$0x1e] %vm7975_vm13, %v7970_v9  ;;  %9488 = vmatprep.subr.bf16.mxu0 %v9487_v19 }
 0x8bf   : > { %7984 = vst.msk [vmem:[#allocation4 + $0x38] sm:$0x1e] %vm7977_vm6, %v7970_v9 }
 0x8c1   : > { %9490 = vmatpush1.bf16.msra.mxu0 %v9489_v15 }
 0x8c2   : > { %v9586_v33 = vld [vmem:[#allocation4 + $0x20] ss:$8 sps:$4 sm:$0xee]   ;;  %9492 = vmatprep.subr.bf16.mxu0 %v9491_v23  ;;  %v9588_v61 = vld [vmem:[#allocation4 + $0x24] ss:$8 sps:$4 sm:$0x11]  }
 0x8c3   : > { %v9104_v38 = vrot.slane %v9586_v33, 9  ;;  %v8090_v50 = vrot.slane %v9588_v61, 5  ;;  %v9592_v51 = vld [vmem:[#allocation4 + $0x20] ss:$8 sps:$4 sm:$0xcc]  }
 0x8c4   : > { %v9594_v55 = vld [vmem:[#allocation4 + $0x24] ss:$8 sps:$4 sm:$0x33]   ;;  %v9164_v0 = vrot.slane %v9592_v51, 10 }
 0x8c5   : > { %9494 = vmatpush1.bf16.msra.mxu0 %v9493_v63  ;;  %v9579_v43 = vld [vmem:[#allocation4 + $0x20] ss:$16 sps:$4 sm:$0xff]   ;;  %v8355_v56 = vrot.slane %v9594_v55, 6  ;;  %v8091_v10 = vsel %vm14284_vm7, %v9104_v38, %v8090_v50 }
 0x8c6   : > { %v9578_v12 = vld [vmem:[#allocation4 + $0x28] ss:$16 sps:$4 sm:$0xff]   ;;  %v9591_v52 = vld [vmem:[#allocation4 + $0x34] ss:$8 sps:$4 sm:$0x11]  }
 0x8c7   : > { %9161 = vmatprep.mubr.msk.f32.mxu0 %vm5581_vm11, %v9578_v12  ;;  %v9589_v39 = vld [vmem:[#allocation4 + $0x30] ss:$8 sps:$4 sm:$0xee]   ;;  %v8094_v14 = vrot.slane %v9591_v52, 5  ;;  %v8356_v5 = vsel %vm14412_vm14, %v9164_v0, %v8355_v56 }
 0x8c8   : > { %8313 = vmatmul.mubr.f32.gmra.mrb[18].mxu0 %v9579_v43  ;;  %v9105_v29 = vrot.slane %v9589_v39, 9  ;;  %v9595_v25 = vld [vmem:[#allocation4 + $0x30] ss:$8 sps:$4 sm:$0xcc]  }
 0x8c9   : > { %9214 = vmatprep.mubr.msk.f32.mxu0 %vm5581_vm11, %v8411_v11  ;;  %v9597_v57 = vld [vmem:[#allocation4 + $0x34] ss:$8 sps:$4 sm:$0x33]   ;;  %v9165_v4 = vrot.slane %v9595_v25, 10 }
 0x8ca   : > { %v8095_v62 = vsel %vm14284_vm7, %v9105_v29, %v8094_v14  ;;  %v8359_v1 = vrot.slane %v9597_v57, 6 }
 0x8cb   : > { %v8148_v32 = vcombine.high %v8091_v10, %v8095_v62  ;;  %v8147_v31 = vcombine.low %v8091_v10, %v8095_v62 }
 0x8cc   : > { %8485 = vmatmul.mubr.f32.vlgmr.msra.gmra.mrb[16].mxu0 %v8410_v27  ;;  %v8360_v16 = vsel %vm14412_vm14, %v9165_v4, %v8359_v1 }
 0x8cd   : > { %9155 = vmatprep.mubr.msk.f32.mxu1 %vm5581_vm11, %v8148_v32  ;;  %v8413_v26 = vcombine.high %v8356_v5, %v8360_v16  ;;  %v8412_v22 = vcombine.low %v8356_v5, %v8360_v16 }
 0x8ce   : > { %8226 = vmatmul.mubr.f32.gmra.mrb[10].mxu1 %v8147_v31 }
 0x8cf   : > { %9215 = vmatprep.mubr.msk.f32.mxu0 %vm5581_vm11, %v8413_v26 }
 0x8d0   : > { %8491 = vmatmul.mubr.f32.gmra.mrb[18].mxu0 %v8412_v22 }
 0x971   : > { %v8221_v40 = vpop.f32.mrb[8].mxu1 }
 0x972   : > { %v8223_v34 = vpop.f32.mrb[9].mxu1 }
 0x99f   : > { %v8486_v60 = vpop.f32.mrb[16].mxu0 }
 0x9a0   : > { %v9495_v3 = vadd.f32 %v8486_v60, %v8221_v40  ;;  %v8488_v30 = vpop.f32.mrb[17].mxu0 }
 0x9a1   : > { %v9496_v8 = vadd.f32 %v8488_v30, %v8223_v34  ;;  %v8227_v19 = vpop.f32.mrb[10].mxu1 }
 0x9a2   : > { %v8513_v59 = vadd.f32 %v9495_v3, %v8506_v53  ;;  %v8229_v47 = vpop.f32.mrb[11].mxu1 }
 0x9a3   : > { %v8514_v41 = vadd.f32 %v9496_v8, %v8510_v44  ;;  %v8492_v20 = vpop.f32.mrb[18].mxu0 }
 0x9a4   : > { %v8517_v18 = vmax.f32 %v8513_v59, 0.0  ;;  %v9497_v35 = vadd.f32 %v8492_v20, %v8227_v19  ;;  %v8494_v23 = vpop.f32.mrb[19].mxu0 }
 0x9a5   : > { %v8518_v58 = vmax.f32 %v8514_v41, 0.0  ;;  %v9498_v13 = vadd.f32 %v8494_v23, %v8229_v47 }
 0x9a6   : > { %v8521_v9 = vcombine.high %v8517_v18, %v14664_v36  ;;  %v8528_v15 = vrot.slane %v8517_v18, %v15028_v37  ;;  %v8515_v45 = vadd.f32 %v9497_v35, %v8506_v53 }
 0x9a7   : > { %v8536_v2 = vcombine.high %v8518_v58, %v14664_v36  ;;  %v8543_v42 = vrot.slane %v8518_v58, %v15028_v37  ;;  %v8516_v24 = vadd.f32 %v9498_v13, %v8510_v44 }
 0x9a8   : > { %v8535_v28 = vrot.slane %v8521_v9, %v15028_v37  ;;  %v8519_v33 = vmax.f32 %v8515_v45, 0.0 }
 0x9a9   : > { %v8550_v46 = vrot.slane %v8536_v2, %v15028_v37  ;;  %v8551_v6 = vcombine.low %v8528_v15, %v8543_v42  ;;  %v8552_v63 = vcombine.high %v8528_v15, %v8543_v42  ;;  %v8520_v48 = vmax.f32 %v8516_v24, 0.0 }
 0x9aa   : > { %v8587_v38 = vcombine.high %v8519_v33, %v14664_v36  ;;  %v8594_v50 = vrot.slane %v8519_v33, %v15028_v37 }
 0x9ab   : > { %v8567_v21 = vcombine.low %v8535_v28, %v8550_v46  ;;  %v8568_v61 = vcombine.high %v8535_v28, %v8550_v46  ;;  %v8566_v54 = vrot.slane %v8552_v63, %v15029_v49  ;;  %v8602_v51 = vcombine.high %v8520_v48, %v14664_v36 }
 0x9ac   : > { %v8609_v55 = vrot.slane %v8520_v48, %v15028_v37  ;;  %v8559_v43 = vrot.slane %v8551_v6, %v15029_v49  ;;  %v8601_v17 = vrot.slane %v8587_v38, %v15028_v37 }
 0x9ad   : > { %8673 = vrot.lane.b32.xlu0 %v8566_v54, %s9608_s28  ;;  %v8584_v12 = vcombine.high %v8566_v54, %v14664_v36  ;;  %v8616_v11 = vrot.slane %v8602_v51, %v15028_v37  ;;  %v8582_v27 = vrot.slane %v8568_v61, %v15029_v49  ;;  %v8575_v37 = vrot.slane %v8567_v21, %v15029_v49 }
 0x9ae   : > { %v8617_v39 = vcombine.low %v8594_v50, %v8609_v55  ;;  %v8618_v52 = vcombine.high %v8594_v50, %v8609_v55  ;;  %v8583_v25 = vcombine.high %v8559_v43, %v14664_v36 }
 0x9af   : > { %8675 = vrot.lane.b32.xlu1 %v8584_v12, %s9608_s28  ;;  %v8633_v29 = vcombine.low %v8601_v17, %v8616_v11  ;;  %v8634_v14 = vcombine.high %v8601_v17, %v8616_v11  ;;  %v8586_v57 = vcombine.high %v8582_v27, %v14664_v36  ;;  %v8585_v0 = vcombine.high %v8575_v37, %v14664_v36 }
 0x9b0   : > { %v8632_v56 = vrot.slane %v8618_v52, %v15029_v49  ;;  %v8625_v62 = vrot.slane %v8617_v39, %v15029_v49 }
 0x9b1   : > { %8669 = vrot.lane.b32.xlu0 %v8559_v43, %s9608_s28  ;;  %v8648_v32 = vrot.slane %v8634_v14, %v15029_v49  ;;  %v14477_v1 = vrot.slane %v8633_v29, %v15029_v49 }
 0x9b2   : > { %v8650_v10 = vcombine.high %v8632_v56, %v14664_v36  ;;  %v8649_v4 = vcombine.high %v8625_v62, %v14664_v36 }
 0x9b3   : > { %8671 = vrot.lane.b32.xlu1 %v8583_v25, %s9608_s28  ;;  %v8652_v31 = vcombine.high %v8648_v32, %v14664_v36  ;;  %v8651_v5 = vcombine.high %v14477_v1, %v14664_v36 }
 0x9b5   : > { %8681 = vrot.lane.b32.xlu0 %v8582_v27, %s9608_s28 }
 0x9b7   : > { %8683 = vrot.lane.b32.xlu1 %v8586_v57, %s9608_s28 }
 0x9b9   : > { %8677 = vrot.lane.b32.xlu0 %v8575_v37, %s9608_s28 }
 0x9bb   : > { %8679 = vrot.lane.b32.xlu1 %v8585_v0, %s9608_s28 }
 0x9bd   : > { %8689 = vrot.lane.b32.xlu0 %v8632_v56, %s9608_s28 }
 0x9bf   : > { %8691 = vrot.lane.b32.xlu1 %v8650_v10, %s9608_s28 }
 0x9c1   : > { %8685 = vrot.lane.b32.xlu0 %v8625_v62, %s9608_s28 }
 0x9c3   : > { %8687 = vrot.lane.b32.xlu1 %v8649_v4, %s9608_s28 }
 0x9c5   : > { %8697 = vrot.lane.b32.xlu0 %v8648_v32, %s9608_s28 }
 0x9c7   : > { %8699 = vrot.lane.b32.xlu1 %v8652_v31, %s9608_s28 }
 0x9c9   : > { %8693 = vrot.lane.b32.xlu0 %v14477_v1, %s9608_s28 }
 0x9cb   : > { %8695 = vrot.lane.b32.xlu1 %v8651_v5, %s9608_s28 }
 0xa1f   : > { %v8674_v16 = vpop.permute.xlu0 %8673 }
 0xa20   : > { %v8728_v22 = vmax.f32 %v8566_v54, %v8674_v16 }
 0xa21   : > { %v8676_v26 = vpop.permute.xlu1 %8675 }
 0xa22   : > { %v8729_v40 = vmax.f32 %v8584_v12, %v8676_v26 }
 0xa23   : > { %v8670_v34 = vpop.permute.xlu0 %8669 }
 0xa24   : > { %v8730_v7 = vcombine.low %v8728_v22, %v8729_v40  ;;  %v8717_v44 = vmax.f32 %v8559_v43, %v8670_v34 }
 0xa25   : > { %v8672_v53 = vpop.permute.xlu1 %8671 }
 0xa26   : > { %v8737_v60 = vrot.slane %v8730_v7, %v15029_v49  ;;  %v8718_v3 = vmax.f32 %v8583_v25, %v8672_v53 }
 0xa27   : > { %v8682_v30 = vpop.permute.xlu0 %8681 }
 0xa28   : > { %v8738_v8 = vcombine.high %v8737_v60, %v14664_v36  ;;  %v8719_v59 = vcombine.low %v8717_v44, %v8718_v3  ;;  %v8750_v47 = vmax.f32 %v8582_v27, %v8682_v30 }
 0xa29   : > { %v8684_v19 = vpop.permute.xlu1 %8683 }
 0xa2a   : > { %v8726_v41 = vrot.slane %v8719_v59, %v15029_v49  ;;  %v8751_v18 = vmax.f32 %v8586_v57, %v8684_v19  ;;  %8815 = vrot.lane.b32.xlu0 %v8738_v8, %s9608_s28 }
 0xa2b   : > { %v8678_v58 = vpop.permute.xlu0 %8677 }
 0xa2c   : > { %v8727_v20 = vcombine.high %v8726_v41, %v14664_v36  ;;  %v8752_v9 = vcombine.low %v8750_v47, %v8751_v18  ;;  %v8739_v23 = vmax.f32 %v8575_v37, %v8678_v58 }
 0xa2d   : > { %v8680_v15 = vpop.permute.xlu1 %8679 }
 0xa2e   : > { %v8759_v35 = vrot.slane %v8752_v9, %v15029_v49  ;;  %v8740_v2 = vmax.f32 %v8585_v0, %v8680_v15  ;;  %8813 = vrot.lane.b32.xlu0 %v8727_v20, %s9608_s28 }
 0xa2f   : > { %v8690_v42 = vpop.permute.xlu0 %8689 }
 0xa30   : > { %v8760_v13 = vcombine.high %v8759_v35, %v14664_v36  ;;  %v8741_v28 = vcombine.low %v8739_v23, %v8740_v2  ;;  %v8772_v6 = vmax.f32 %v8632_v56, %v8690_v42 }
 0xa31   : > { %v8692_v45 = vpop.permute.xlu1 %8691 }
 0xa32   : > { %v8748_v46 = vrot.slane %v8741_v28, %v15029_v49  ;;  %v8773_v63 = vmax.f32 %v8650_v10, %v8692_v45  ;;  %8819 = vrot.lane.b32.xlu1 %v8760_v13, %s9608_s28 }
 0xa33   : > { %v8686_v24 = vpop.permute.xlu0 %8685 }
 0xa34   : > { %v8749_v33 = vcombine.high %v8748_v46, %v14664_v36  ;;  %v8774_v21 = vcombine.low %v8772_v6, %v8773_v63  ;;  %v8761_v54 = vmax.f32 %v8625_v62, %v8686_v24 }
 0xa35   : > { %v8688_v61 = vpop.permute.xlu1 %8687 }
 0xa36   : > { %v8781_v48 = vrot.slane %v8774_v21, %v15029_v49  ;;  %v8762_v38 = vmax.f32 %v8649_v4, %v8688_v61  ;;  %8817 = vrot.lane.b32.xlu0 %v8749_v33, %s9608_s28 }
 0xa37   : > { %v8698_v50 = vpop.permute.xlu0 %8697 }
 0xa38   : > { %v8782_v51 = vcombine.high %v8781_v48, %v14664_v36  ;;  %v8763_v55 = vcombine.low %v8761_v54, %v8762_v38  ;;  %v8794_v17 = vmax.f32 %v8648_v32, %v8698_v50 }
 0xa39   : > { %v8700_v12 = vpop.permute.xlu1 %8699 }
 0xa3a   : > { %v8770_v43 = vrot.slane %v8763_v55, %v15029_v49  ;;  %v8795_v11 = vmax.f32 %v8652_v31, %v8700_v12  ;;  %8823 = vrot.lane.b32.xlu1 %v8782_v51, %s9608_s28 }
 0xa3b   : > { %v8694_v39 = vpop.permute.xlu0 %8693 }
 0xa3c   : > { %v8771_v52 = vcombine.high %v8770_v43, %v14664_v36  ;;  %v8796_v29 = vcombine.low %v8794_v17, %v8795_v11  ;;  %v8783_v27 = vmax.f32 %v14477_v1, %v8694_v39 }
 0xa3d   : > { %v8696_v14 = vpop.permute.xlu1 %8695 }
 0xa3e   : > { %v8803_v25 = vrot.slane %v8796_v29, %v15029_v49  ;;  %v8784_v57 = vmax.f32 %v8651_v5, %v8696_v14  ;;  %8821 = vrot.lane.b32.xlu0 %v8771_v52, %s9608_s28 }
 0xa40   : > { %v8804_v37 = vcombine.high %v8803_v25, %v14664_v36  ;;  %v8785_v0 = vcombine.low %v8783_v27, %v8784_v57 }
 0xa42   : > { %v8792_v56 = vrot.slane %v8785_v0, %v15029_v49  ;;  %8827 = vrot.lane.b32.xlu1 %v8804_v37, %s9608_s28 }
 0xa44   : > { %v8793_v10 = vcombine.high %v8792_v56, %v14664_v36 }
 0xa46   : > { %8825 = vrot.lane.b32.xlu1 %v8793_v10, %s9608_s28 }
 0xa9c   : > { %v8816_v62 = vpop.permute.xlu0 %8815 }
 0xa9d   : > { %v8838_v4 = vsel %vm5581_vm11, %v8737_v60, %v8816_v62 }
 0xa9e   : > { %v8854_v32 = vrot.slane %v8838_v4, 1 }
 0xaa0   : > { %v8870_v31 = vmax.f32 %v8838_v4, %v8854_v32  ;;  %v8814_v1 = vpop.permute.xlu0 %8813 }
 0xaa1   : > { %v8837_v5 = vsel %vm5581_vm11, %v8726_v41, %v8814_v1 }
 0xaa2   : > { %v8853_v16 = vrot.slane %v8837_v5, 1  ;;  %v8885_v26 = vrot.slane %v8870_v31, 7 }
 0xaa4   : > { %v8869_v36 = vmax.f32 %v8837_v5, %v8853_v16  ;;  %v8820_v49 = vpop.permute.xlu1 %8819 }
 0xaa5   : > { %v8840_v22 = vsel %vm5581_vm11, %v8759_v35, %v8820_v49 }
 0xaa6   : > { %v8887_v40 = vsel %vm8886_vm2, %v8885_v26, %v8869_v36  ;;  %v8856_v34 = vrot.slane %v8840_v22, 1 }
 0xaa7   : > { %8898 = vst [vmem:[%s14516_s19] sm:$0x3] %v8887_v40 }
 0xaa8   : > { %v8872_v7 = vmax.f32 %v8840_v22, %v8856_v34  ;;  %v8818_v53 = vpop.permute.xlu0 %8817 }
 0xaa9   : > { %v8839_v60 = vsel %vm5581_vm11, %v8748_v46, %v8818_v53 }
 0xaaa   : > { %v8855_v44 = vrot.slane %v8839_v60, 1  ;;  %v8888_v3 = vrot.slane %v8872_v7, 7 }
 0xaac   : > { %v8871_v30 = vmax.f32 %v8839_v60, %v8855_v44  ;;  %v8824_v8 = vpop.permute.xlu1 %8823 }
 0xaad   : > { %v8842_v59 = vsel %vm5581_vm11, %v8781_v48, %v8824_v8 }
 0xaae   : > { %v8889_v19 = vsel %vm8886_vm2, %v8888_v3, %v8871_v30  ;;  %v8858_v41 = vrot.slane %v8842_v59, 1 }
 0xaaf   : > { %8899 = vst [vmem:[%s14516_s19 + $0x2] sm:$0x3] %v8889_v19 }
 0xab0   : > { %v8874_v47 = vmax.f32 %v8842_v59, %v8858_v41  ;;  %v8822_v18 = vpop.permute.xlu0 %8821 }
 0xab1   : > { %v8841_v58 = vsel %vm5581_vm11, %v8770_v43, %v8822_v18 }
 0xab2   : > { %v8857_v20 = vrot.slane %v8841_v58, 1  ;;  %v8890_v9 = vrot.slane %v8874_v47, 7 }
 0xab4   : > { %v8873_v15 = vmax.f32 %v8841_v58, %v8857_v20  ;;  %v8828_v35 = vpop.permute.xlu1 %8827 }
 0xab5   : > { %v8844_v23 = vsel %vm5581_vm11, %v8803_v25, %v8828_v35 }
 0xab6   : > { %v8891_v2 = vsel %vm8886_vm2, %v8890_v9, %v8873_v15  ;;  %v8860_v42 = vrot.slane %v8844_v23, 1 }
 0xab7   : > { %8900 = vst [vmem:[%s14516_s19 + $0x4] sm:$0x3] %v8891_v2 }
 0xab8   : > { %v8876_v13 = vmax.f32 %v8844_v23, %v8860_v42  ;;  %v8826_v28 = vpop.permute.xlu1 %8825 }
 0xab9   : > { %v8843_v45 = vsel %vm5581_vm11, %v8792_v56, %v8826_v28 }
 0xaba   : > { %v8859_v46 = vrot.slane %v8843_v45, 1  ;;  %v8892_v6 = vrot.slane %v8876_v13, 7 }
 0xabc   : > { %v8875_v63 = vmax.f32 %v8843_v45, %v8859_v46 }
 0xabe   : > { %v8893_v24 = vsel %vm8886_vm2, %v8892_v6, %v8875_v63 }
 0xabf   : > { %8901 = vst [vmem:[%s14516_s19 + $0x6] sm:$0x3] %v8893_v24 }
 0xac0 PF: > { %s17_s24 = sadd.s32 1, %s9604_s24  }
 0xac1   : > { %p14_p4 = scmp.ge.s32.totalorder %s17_s24, 4  }
 0xac3   :  { %16 = sbr.rel (!%p14_p4) target bundleno = 1 (0x1), region = 98 }

</bundles_post_ra>
